<compile_context>
chip_gen: v5e
topology: v5e:2x2
jax: 0.10.0
libtpu: 0.0.40
codegen_flags: <defaults>
</compile_context>

<pallas_src>
from functools import partial

import jax
import jax.numpy as jnp
from jax.experimental import pallas as pl
from jax.experimental.pallas import tpu as pltpu

MASK_RATE = 0.5
REMASK_RATE = 0.5
NUM_REMASK = 3
ALPHA_L = 2
NEG_SLOPE = 0.2
MOMENTUM = 0.996
NEG_INF = -1e30


# ----------------------------- small helpers ----------------------------------

def _round_up(x, m):
    return ((x + m - 1) // m) * m


def _fullspec(shape):
    nd = len(shape)
    return pl.BlockSpec(shape, lambda *_, nd=nd: (0,) * nd)


def _bf16_dot(a, b):
    # MXU matmul: bf16 operands, f32 accumulation.
    return jnp.dot(a.astype(jnp.bfloat16), b.astype(jnp.bfloat16),
                   preferred_element_type=jnp.float32)


def _l2norm(v):
    # F.normalize: v / max(||v||, eps), via EUP rsqrt + VPU multiply.
    ss = jnp.sum(v * v, axis=-1, keepdims=True)
    return v * jax.lax.rsqrt(jnp.maximum(ss, 1e-24))


def _edge_softmax_aggregate(wh_k, el_row, er_col, ee_k, adj, slope):
    """One dense GAT head. wh_k (N,F), el_row (1,N) src term, er_col (N,1) dst term,
    ee_k/adj (N,N).  Returns softmax(leaky(el+er+ee)) @ wh_k, shape (N,F)."""
    s = er_col + el_row + ee_k                        # s[dst, src], f32
    s = jnp.where(s > 0, s, slope * s)                # LeakyReLU
    s = jnp.where(adj > 0, s, NEG_INF)                # mask non-edges
    s = s - jnp.max(s, axis=-1, keepdims=True)
    p = jnp.exp(s)                                    # non-edges -> 0 (self-loops guaranteed)
    denom = jnp.maximum(jnp.sum(p, axis=-1, keepdims=True), 1e-12)
    alpha = p * pl.reciprocal(denom, approx=True)     # edge softmax (EUP reciprocal)
    return _bf16_dot(alpha, wh_k)


# ----------------------------- Pallas kernels ---------------------------------

def _encoders_kernel(x_ref, adj_ref, ee_ref, *rest, n_layers, heads, f_out, slope):
    """Fused multi-layer GAT for one branch (student or EMA, selected by grid)."""
    param_refs = rest[:-2]
    cat_ref, last_ref = rest[-2], rest[-1]
    adj = adj_ref[...]
    h = x_ref[...]
    layer_outs = []
    for l in range(n_layers):
        w, al, ar, b = (param_refs[4 * l + i][...] for i in range(4))
        wh = _bf16_dot(h, w[0])                                       # (N, heads*f_out)
        el_cols, er_cols, wh_heads = [], [], []
        for k in range(heads):
            whk = wh[:, k * f_out:(k + 1) * f_out]
            wh_heads.append(whk)
            el_cols.append(jnp.sum(whk * al[0, k:k + 1, :], axis=-1, keepdims=True))
            er_cols.append(jnp.sum(whk * ar[0, k:k + 1, :], axis=-1, keepdims=True))
        # one XLU transpose per layer for all heads' source terms
        el_t = jnp.transpose(jnp.concatenate(el_cols, axis=-1))       # (heads, N)
        head_outs = []
        for k in range(heads):
            ee_k = ee_ref[0, l * heads + k].astype(jnp.float32)       # precontracted edge term
            head_outs.append(_edge_softmax_aggregate(
                wh_heads[k], el_t[k:k + 1, :], er_cols[k], adj=adj, ee_k=ee_k, slope=slope))
        # lane-dense (N, hidden) layer slab: bias + ReLU on full width, stays local
        h = jnp.maximum(jnp.concatenate(head_outs, axis=-1) + b[0], 0.0)
        layer_outs.append(h)
    cat_ref[0] = jnp.concatenate(layer_outs, axis=-1).astype(cat_ref.dtype)
    last_ref[0] = layer_outs[-1].astype(last_ref.dtype)


def _recon_kernel(enc_ref, e2dw_ref, dtok_ref, rmask_ref,
                  wd_ref, ald_ref, ard_ref, bd_ref,
                  ee_ref, adj_ref, xt_ref, mmask_ref, o_ref,
                  *, slope, inv_num_mask, alpha_l, num_remask):
    n = xt_ref.shape[0]
    adj = adj_ref[...]
    ee = ee_ref[...].astype(jnp.float32)              # hoisted: shared by all remask rounds
    origin = _bf16_dot(enc_ref[0], e2dw_ref[...])     # encoder_to_decoder, (N, hidden)
    dtok = dtok_ref[...]
    # batch the three re-masked decoder input projections into one MXU matmul
    reps = [jnp.where(rmask_ref[:, t:t + 1] > 0, dtok, origin) for t in range(num_remask)]
    wh_all = _bf16_dot(jnp.concatenate(reps, axis=0), wd_ref[...])    # (3N, n_dim)
    al = ald_ref[...]
    ar = ard_ref[...]
    bd = bd_ref[...]
    xt = _l2norm(xt_ref[...])                         # normalized recon target (original x)
    mmask = mmask_ref[...]
    total = jnp.zeros((1, 1), jnp.float32)
    for t in range(num_remask):
        wh = wh_all[t * n:(t + 1) * n]
        el = jnp.transpose(jnp.sum(wh * al, axis=-1, keepdims=True))  # (1, N)
        er = jnp.sum(wh * ar, axis=-1, keepdims=True)                 # (N, 1)
        rec = _edge_softmax_aggregate(wh, el, er, ee, adj, slope) + bd   # 1 head, no act
        cos = jnp.sum(xt * _l2norm(rec), axis=-1, keepdims=True)
        d = 1.0 - cos
        lrow = d
        for _ in range(alpha_l - 1):
            lrow = lrow * d
        total = total + jnp.sum(lrow * mmask, axis=0, keepdims=True) * inv_num_mask
    o_ref[...] = total


def _latent_kernel(last_ref, kmask_ref,
                   pw1_ref, pb1_ref, pa_ref, pw2_ref, pb2_ref,
                   ew1_ref, eb1_ref, ea_ref, ew2_ref, eb2_ref,
                   qa_ref, qw_ref, qb_ref, o_ref, *, inv_num_keep):
    rep_s = last_ref[0]                               # student final-layer hidden (bf16)
    rep_t = last_ref[1]                               # EMA final-layer hidden (bf16)
    # projector (student)
    h = _bf16_dot(rep_s, pw1_ref[...]) + pb1_ref[...]
    a = pa_ref[...]
    h = jnp.where(h > 0, h, a * h)                    # PReLU
    zp = _bf16_dot(h, pw2_ref[...]) + pb2_ref[...]
    # predictor: PReLU -> Linear
    qa = qa_ref[...]
    zp = jnp.where(zp > 0, zp, qa * zp)
    zp = _bf16_dot(zp, qw_ref[...]) + qb_ref[...]
    # projector_ema (no_grad teacher branch)
    ht = _bf16_dot(rep_t, ew1_ref[...]) + eb1_ref[...]
    ea = ea_ref[...]
    ht = jnp.where(ht > 0, ht, ea * ht)
    zt = _bf16_dot(ht, ew2_ref[...]) + eb2_ref[...]
    # sce(alpha=1) over keep_nodes via mask (gather-free)
    cos = jnp.sum(_l2norm(zp) * _l2norm(zt), axis=-1, keepdims=True)
    o_ref[...] = jnp.sum((1.0 - cos) * kmask_ref[...], axis=0, keepdims=True) * inv_num_keep


def _edge_bce_kernel(pair_ref, y_ref, w_ref, w1_ref, b1_ref, w2t_ref, b2_ref, o_ref,
                     *, slope):
    @pl.when(pl.program_id(0) == 0)
    def _init():
        o_ref[...] = jnp.zeros_like(o_ref)
    h = _bf16_dot(pair_ref[...], w1_ref[...]) + b1_ref[...]
    h = jnp.where(h > 0, h, slope * h)                                # LeakyReLU
    # final 1-unit projection on the VPU (avoids an N=1 MXU matmul)
    z = jnp.sum(h * w2t_ref[...], axis=-1, keepdims=True) + b2_ref[...]   # logits (tile, 1)
    y = y_ref[...]
    # BCE from logits: softplus(z) - y*z (stable; fuses sigmoid + BCE)
    sp = jnp.maximum(z, 0.0) + jnp.log1p(jnp.exp(-jnp.abs(z)))
    # per-row weight carries both the 1/rows mean and the padded-row mask
    o_ref[...] += jnp.sum((sp - y * z) * w_ref[...], axis=0, keepdims=True)


# ----------------------------- kernel wrappers ---------------------------------

def run_encoders(x, adj, ee_enc, enc_params, ema_params, *, slope=NEG_SLOPE):
    n, n_dim = x.shape
    n_layers = len(enc_params)
    heads, f_out = enc_params[0]["attn_l"].shape
    hidden = heads * f_out
    cat_dim = n_layers * hidden

    args = [x, adj, ee_enc]
    in_specs = [pl.BlockSpec((n, n_dim), lambda b: (0, 0)),
                pl.BlockSpec((n, n), lambda b: (0, 0)),
                pl.BlockSpec((1, n_layers * heads, n, n), lambda b: (b, 0, 0, 0))]
    for l in range(n_layers):
        for name in ("W", "attn_l", "attn_r", "bias"):
            stk = jnp.stack([enc_params[l][name], ema_params[l][name]], axis=0)   # (2, ...)
            args.append(stk)
            in_specs.append(pl.BlockSpec((1,) + stk.shape[1:], lambda b: (b, 0, 0)))

    kern = partial(_encoders_kernel, n_layers=n_layers, heads=heads,
                   f_out=f_out, slope=float(slope))
    return pl.pallas_call(
        kern,
        out_shape=(jax.ShapeDtypeStruct((2, n, cat_dim), jnp.bfloat16),
                   jax.ShapeDtypeStruct((2, n, hidden), jnp.bfloat16)),
        grid=(2,),                                     # student / EMA branch (megacore)
        in_specs=in_specs,
        out_specs=(pl.BlockSpec((1, n, cat_dim), lambda b: (b, 0, 0)),
                   pl.BlockSpec((1, n, hidden), lambda b: (b, 0, 0))),
        compiler_params=pltpu.CompilerParams(dimension_semantics=("parallel",)),
    )(*args)


def run_latent(enc_last_both, keep_f, proj, proj_ema, pred, *, num_keep):
    args = (enc_last_both, keep_f,
            proj["W1"], proj["b1"], proj["a"], proj["W2"], proj["b2"],
            proj_ema["W1"], proj_ema["b1"], proj_ema["a"], proj_ema["W2"], proj_ema["b2"],
            pred["a"], pred["W"], pred["b"])
    out = pl.pallas_call(
        partial(_latent_kernel, inv_num_keep=1.0 / num_keep),
        out_shape=jax.ShapeDtypeStruct((1, 1), jnp.float32),
        grid=(1,),
        in_specs=[_fullspec(a.shape) for a in args],
        out_specs=_fullspec((1, 1)),
    )(*args)
    return out[0, 0]


def run_recon(enc_cat_both, rmask, x_target, mask_f, adj, ee_dec, params, *, num_mask):
    _, n, cat_dim = enc_cat_both.shape
    dec = params["decoder"][0]
    args = (enc_cat_both, params["enc_to_dec_W"], params["dec_mask_token"], rmask,
            dec["W"], dec["attn_l"], dec["attn_r"], dec["bias"],
            ee_dec, adj, x_target, mask_f)
    in_specs = ([pl.BlockSpec((1, n, cat_dim), lambda *_: (0, 0, 0))]   # student branch only
                + [_fullspec(a.shape) for a in args[1:]])
    out = pl.pallas_call(
        partial(_recon_kernel, slope=NEG_SLOPE, inv_num_mask=1.0 / num_mask,
                alpha_l=ALPHA_L, num_remask=NUM_REMASK),
        out_shape=jax.ShapeDtypeStruct((1, 1), jnp.float32),
        grid=(1,),
        in_specs=in_specs,
        out_specs=_fullspec((1, 1)),
    )(*args)
    return out[0, 0]


def run_edge_bce(pair, y, fc, *, tile=512):
    rows, feat = pair.shape
    tile = min(tile, _round_up(rows, 8))
    rows_p = _round_up(rows, tile)
    if rows_p != rows:                                 # pad; padded rows get zero weight
        pad = rows_p - rows
        pair = jnp.concatenate([pair, jnp.zeros((pad, feat), pair.dtype)], axis=0)
        y = jnp.concatenate([y, jnp.zeros((pad, 1), y.dtype)], axis=0)
    w = jnp.concatenate([jnp.full((rows, 1), 1.0 / rows, jnp.float32),
                         jnp.zeros((rows_p - rows, 1), jnp.float32)], axis=0)
    hidden = fc["W1"].shape[1]
    w2t = fc["W2"].reshape(1, hidden)
    # TODO(synk): on v7x split into grid=(2, rows_p//(2*tile)) with a leading
    # "parallel" axis and per-core partial sums to use both TensorCores.
    out = pl.pallas_call(
        partial(_edge_bce_kernel, slope=NEG_SLOPE),
        out_shape=jax.ShapeDtypeStruct((1, 1), jnp.float32),
        grid=(rows_p // tile,),
        in_specs=[pl.BlockSpec((tile, feat), lambda i: (i, 0)),
                  pl.BlockSpec((tile, 1), lambda i: (i, 0)),
                  pl.BlockSpec((tile, 1), lambda i: (i, 0)),
                  pl.BlockSpec(fc["W1"].shape, lambda i: (0, 0)),
                  pl.BlockSpec(fc["b1"].shape, lambda i: (0, 0)),
                  pl.BlockSpec((1, hidden), lambda i: (0, 0)),
                  pl.BlockSpec(fc["b2"].shape, lambda i: (0, 0))],
        out_specs=pl.BlockSpec((1, 1), lambda i: (0, 0)),
        compiler_params=pltpu.CompilerParams(dimension_semantics=("arbitrary",)),
    )(pair, y, w, fc["W1"], fc["b1"], w2t, fc["b2"])
    return out[0, 0]


# ----------------------------- model glue (plain JAX) --------------------------

def gmae_forward(params, x, adj, edge_dense, edge_src, edge_dst, key):
    n, _ = x.shape
    n_layers = len(params["encoder"])
    heads, f_out = params["encoder"][0]["attn_l"].shape
    keys = jax.random.split(key, 7)

    # torch no_grad semantics for the EMA teacher branches
    enc_ema = jax.lax.stop_gradient(params["encoder_ema"])
    proj_ema = jax.lax.stop_gradient(params["projector_ema"])

    # --- encoding_mask_noise ---
    perm = jax.random.permutation(keys[0], n)
    num_mask = int(MASK_RATE * n)
    mask_nodes = perm[:num_mask]
    mask_f = jnp.zeros((n,), jnp.float32).at[mask_nodes].set(1.0)[:, None]   # (N,1)
    keep_f = 1.0 - mask_f
    pre_use_x = jnp.where(mask_f > 0, params["enc_mask_token"], x)

    # --- edge-feature attention terms: contract e_dim against attn_e in the wrapper,
    #     producing lane-dense (N, N) terms (never ship the (N,N,e_dim=8) block). ---
    adj_bf = adj.astype(jnp.bfloat16)
    ae = jnp.stack(
        [jnp.stack([params["encoder"][l]["attn_e"] for l in range(n_layers)], axis=0),
         jnp.stack([enc_ema[l]["attn_e"] for l in range(n_layers)], axis=0)],
        axis=0)                                                          # (2, L, E, H)
    ee_enc = jnp.einsum("dse,bleh->blhds", edge_dense, ae)
    ee_enc = ee_enc.reshape(2, n_layers * heads, n, n).astype(jnp.bfloat16)
    ee_dec = jnp.einsum("dse,e->ds", edge_dense,
                        params["decoder"][0]["attn_e"][:, 0]).astype(jnp.bfloat16)

    # --- student + EMA encoders: one fused pallas_call, grid=(2,) parallel ---
    # (encoder activation modeled as ReLU on every layer; encoding=True in the spec)
    enc_cat_both, enc_last_both = run_encoders(pre_use_x, adj_bf, ee_enc,
                                               params["encoder"], enc_ema)

    # --- latent loss: projector / projector_ema / predictor / sce(alpha=1) fused ---
    loss_latent = run_latent(enc_last_both, keep_f, params["projector"], proj_ema,
                             params["predictor"], num_keep=n - num_mask)

    # --- reconstruction loss: enc2dec + 3 random-remask decoder passes + sce(alpha=2)
    num_remask_nodes = int(REMASK_RATE * n)
    rcols = []
    for t in range(NUM_REMASK):
        rp = jax.random.permutation(keys[1 + t], n)
        rcols.append(jnp.zeros((n,), jnp.float32).at[rp[:num_remask_nodes]].set(1.0))
    rmask = jnp.stack(rcols, axis=1)                                     # (N, NUM_REMASK)
    # recon target is the ORIGINAL node features at masked nodes (reference GMAE
    # semantics; targeting pre_use_x would compare against the zero mask token).
    loss_rec = run_recon(enc_cat_both, rmask, x, mask_f, adj_bf, ee_dec, params,
                         num_mask=num_mask)

    # --- edge reconstruction loss ---
    threshold = min(10000, n)
    pos_idx = jax.random.choice(keys[4], edge_src.shape[0], (threshold,), replace=False)
    # TODO(synk): dgl.sampling.global_uniform_negative_sampling rejects existing
    # edges; negatives here are plain uniform (src, dst) pairs.
    neg_src = jax.random.randint(keys[5], (threshold,), 0, n)
    neg_dst = jax.random.randint(keys[6], (threshold,), 0, n)
    all_src = jnp.concatenate([edge_src[pos_idx], neg_src])
    all_dst = jnp.concatenate([edge_dst[pos_idx], neg_dst])
    enc_cat = enc_cat_both[0]
    # TODO(synk): row gathers stay in XLA; an in-kernel scalar-prefetch gather is
    # not worthwhile at 2*threshold rows this small.
    pair = jnp.concatenate([jnp.take(enc_cat, all_src, axis=0),
                            jnp.take(enc_cat, all_dst, axis=0)], axis=-1)
    y = jnp.concatenate([jnp.ones((threshold, 1), jnp.float32),
                         jnp.zeros((threshold, 1), jnp.float32)], axis=0)
    loss_edge = run_edge_bce(pair, y, params["edge_fc"])

    return loss_latent + loss_rec + loss_edge


def ema_update(student, teacher, m=MOMENTUM):
    # torch does an in-place parameter update; here it is a pure function (unused by loss)
    return jax.tree_util.tree_map(lambda q, k: m * k + (1.0 - m) * q, student, teacher)


# ----------------------------- parameter init ----------------------------------

def xavier_uniform(key, shape, gain=1.0):
    fan_in, fan_out = shape[0], shape[-1]
    limit = gain * (6.0 / (fan_in + fan_out)) ** 0.5
    return jax.random.uniform(key, shape, jnp.float32, -limit, limit)


def init_gat_layer(key, f_in, f_out, heads, e_dim):
    ks = jax.random.split(key, 4)
    return {
        "W": xavier_uniform(ks[0], (f_in, heads * f_out)),
        "attn_l": xavier_uniform(ks[1], (heads, f_out)),
        "attn_r": xavier_uniform(ks[2], (heads, f_out)),
        "attn_e": xavier_uniform(ks[3], (e_dim, heads)),
        "bias": jnp.zeros((1, heads * f_out), jnp.float32),
    }


def init_params(key, n_dim, e_dim, hidden_dim, n_layers, n_heads):
    enc_hidden = hidden_dim // n_heads
    ks = jax.random.split(key, 16)
    enc = []
    f_in = n_dim
    for l in range(n_layers):
        enc.append(init_gat_layer(ks[l], f_in, enc_hidden, n_heads, e_dim))
        f_in = enc_hidden * n_heads
    dec = [init_gat_layer(ks[4], hidden_dim, n_dim, 1, e_dim)]
    dim = 256
    params = {
        "encoder": enc,
        "encoder_ema": jax.tree_util.tree_map(lambda a: a, enc),   # load_state_dict copy
        "decoder": dec,
        "enc_to_dec_W": xavier_uniform(ks[5], (hidden_dim * n_layers, hidden_dim)),
        "enc_mask_token": jnp.zeros((1, n_dim), jnp.float32),
        "dec_mask_token": jnp.zeros((1, hidden_dim), jnp.float32),
        "projector": {
            "W1": xavier_uniform(ks[6], (hidden_dim, dim)),
            "b1": jnp.zeros((1, dim), jnp.float32),
            "a": jnp.full((1, 1), 0.25, jnp.float32),
            "W2": xavier_uniform(ks[7], (dim, hidden_dim)),
            "b2": jnp.zeros((1, hidden_dim), jnp.float32),
        },
        "predictor": {
            "a": jnp.full((1, 1), 0.25, jnp.float32),
            "W": xavier_uniform(ks[8], (hidden_dim, hidden_dim)),
            "b": jnp.zeros((1, hidden_dim), jnp.float32),
        },
        "edge_fc": {
            "W1": xavier_uniform(ks[9], (hidden_dim * n_layers * 2, hidden_dim)),
            "b1": jnp.zeros((1, hidden_dim), jnp.float32),
            "W2": xavier_uniform(ks[10], (hidden_dim, 1)),
            "b2": jnp.zeros((1, 1), jnp.float32),
        },
    }
    params["projector_ema"] = jax.tree_util.tree_map(lambda a: a, params["projector"])
    return params


# ----------------------------- main ---------------------------------------------

if __name__ == "__main__":
    N, N_DIM, E_DIM, HIDDEN, N_LAYERS, N_HEADS = 64, 16, 8, 32, 2, 4
    NUM_EDGES = 256
    root = jax.random.PRNGKey(0)
    kp, kx, ks_, kd, ke, kf = jax.random.split(root, 6)

    params = init_params(kp, N_DIM, E_DIM, HIDDEN, N_LAYERS, N_HEADS)

    x = jax.random.normal(kx, (N, N_DIM), jnp.float32)
    edge_src = jax.random.randint(ks_, (NUM_EDGES,), 0, N)
    edge_dst = jax.random.randint(kd, (NUM_EDGES,), 0, N)
    edge_attr = jax.random.normal(ke, (NUM_EDGES, E_DIM), jnp.float32)

    # dense graph representation; self-loops added so every node has an in-neighbor
    # (the in-kernel softmax relies on each row having at least one edge)
    adj = jnp.zeros((N, N), jnp.float32).at[edge_dst, edge_src].set(1.0)
    adj = jnp.maximum(adj, jnp.eye(N, dtype=jnp.float32))
    edge_dense = jnp.zeros((N, N, E_DIM), jnp.float32).at[edge_dst, edge_src].set(edge_attr)

    fwd = jax.jit(gmae_forward)
    loss = jax.block_until_ready(fwd(params, x, adj, edge_dense, edge_src, edge_dst, kf))

    # EMA teacher update (side effect in torch; functional and unused here)
    _ = ema_update(params["encoder"], params["encoder_ema"])
    _ = ema_update(params["projector"], params["projector_ema"])

    assert bool(jnp.isfinite(loss)), "loss is not finite"
    print("KERNEL_OK")
</pallas_src>

<mosaic_0001>
module attributes {stable_mosaic.version = 11 : i64} {
  func.func @_latent_kernel(%arg0: i32, %arg1: memref<2x64x32xbf16, #tpu.memory_space<vmem>>, %arg2: memref<64x1xf32, #tpu.memory_space<vmem>>, %arg3: memref<32x256xf32, #tpu.memory_space<vmem>>, %arg4: memref<1x256xf32, #tpu.memory_space<vmem>>, %arg5: memref<1x1xf32, #tpu.memory_space<vmem>>, %arg6: memref<256x32xf32, #tpu.memory_space<vmem>>, %arg7: memref<1x32xf32, #tpu.memory_space<vmem>>, %arg8: memref<32x256xf32, #tpu.memory_space<vmem>>, %arg9: memref<1x256xf32, #tpu.memory_space<vmem>>, %arg10: memref<1x1xf32, #tpu.memory_space<vmem>>, %arg11: memref<256x32xf32, #tpu.memory_space<vmem>>, %arg12: memref<1x32xf32, #tpu.memory_space<vmem>>, %arg13: memref<1x1xf32, #tpu.memory_space<vmem>>, %arg14: memref<32x32xf32, #tpu.memory_space<vmem>>, %arg15: memref<1x32xf32, #tpu.memory_space<vmem>>, %arg16: memref<1x1xf32, #tpu.memory_space<vmem>>) attributes {dimension_semantics = [#tpu.dimension_semantics<arbitrary>], iteration_bounds = array<i64: 1>, scalar_prefetch = 0 : i64, scratch_operands = 0 : i64, tpu.core_type = #tpu.core_type<tc>, window_params = [{pipeline_mode = #tpu.pipeline_mode<synchronous>, transform_indices = @transform_0, window_bounds = array<i64: 2, 64, 32>}, {pipeline_mode = #tpu.pipeline_mode<synchronous>, transform_indices = @transform_1, window_bounds = array<i64: 64, 1>}, {pipeline_mode = #tpu.pipeline_mode<synchronous>, transform_indices = @transform_2, window_bounds = array<i64: 32, 256>}, {pipeline_mode = #tpu.pipeline_mode<synchronous>, transform_indices = @transform_3, window_bounds = array<i64: 1, 256>}, {pipeline_mode = #tpu.pipeline_mode<synchronous>, transform_indices = @transform_4, window_bounds = array<i64: 1, 1>}, {pipeline_mode = #tpu.pipeline_mode<synchronous>, transform_indices = @transform_5, window_bounds = array<i64: 256, 32>}, {pipeline_mode = #tpu.pipeline_mode<synchronous>, transform_indices = @transform_6, window_bounds = array<i64: 1, 32>}, {pipeline_mode = #tpu.pipeline_mode<synchronous>, transform_indices = @transform_7, window_bounds = array<i64: 32, 256>}, {pipeline_mode = #tpu.pipeline_mode<synchronous>, transform_indices = @transform_8, window_bounds = array<i64: 1, 256>}, {pipeline_mode = #tpu.pipeline_mode<synchronous>, transform_indices = @transform_9, window_bounds = array<i64: 1, 1>}, {pipeline_mode = #tpu.pipeline_mode<synchronous>, transform_indices = @transform_10, window_bounds = array<i64: 256, 32>}, {pipeline_mode = #tpu.pipeline_mode<synchronous>, transform_indices = @transform_11, window_bounds = array<i64: 1, 32>}, {pipeline_mode = #tpu.pipeline_mode<synchronous>, transform_indices = @transform_12, window_bounds = array<i64: 1, 1>}, {pipeline_mode = #tpu.pipeline_mode<synchronous>, transform_indices = @transform_13, window_bounds = array<i64: 32, 32>}, {pipeline_mode = #tpu.pipeline_mode<synchronous>, transform_indices = @transform_14, window_bounds = array<i64: 1, 32>}, {pipeline_mode = #tpu.pipeline_mode<synchronous>, transform_indices = @transform_15, window_bounds = array<i64: 1, 1>}]} {
    %c0 = arith.constant 0 : index
    %c0_0 = arith.constant 0 : index
    %c0_1 = arith.constant 0 : index
    %0 = vector.load %arg1[%c0, %c0_0, %c0_1] : memref<2x64x32xbf16, #tpu.memory_space<vmem>>, vector<1x64x32xbf16>
    %1 = vector.shape_cast %0 : vector<1x64x32xbf16> to vector<64x32xbf16>
    %c1 = arith.constant 1 : index
    %c0_2 = arith.constant 0 : index
    %c0_3 = arith.constant 0 : index
    %2 = vector.load %arg1[%c1, %c0_2, %c0_3] : memref<2x64x32xbf16, #tpu.memory_space<vmem>>, vector<1x64x32xbf16>
    %3 = vector.shape_cast %2 : vector<1x64x32xbf16> to vector<64x32xbf16>
    %c0_4 = arith.constant 0 : index
    %c0_5 = arith.constant 0 : index
    %4 = vector.load %arg3[%c0_4, %c0_5] : memref<32x256xf32, #tpu.memory_space<vmem>>, vector<32x256xf32>
    %5 = arith.truncf %4 : vector<32x256xf32> to vector<32x256xbf16>
    %cst = arith.constant dense<0.000000e+00> : vector<64x256xf32>
    %6 = tpu.matmul %1, %5, %cst {dimension_numbers = #tpu.dot_dimension_numbers<[1], [0], [0], [1], [0, 0, 1, 1], [], []>} : vector<64x32xbf16>, vector<32x256xbf16>, vector<64x256xf32> -> vector<64x256xf32>
    %c0_6 = arith.constant 0 : index
    %c0_7 = arith.constant 0 : index
    %7 = vector.load %arg4[%c0_6, %c0_7] : memref<1x256xf32, #tpu.memory_space<vmem>>, vector<1x256xf32>
    %8 = vector.broadcast %7 : vector<1x256xf32> to vector<64x256xf32>
    %9 = arith.addf %6, %8 : vector<64x256xf32>
    %c0_8 = arith.constant 0 : index
    %c0_9 = arith.constant 0 : index
    %10 = vector.load %arg5[%c0_8, %c0_9] : memref<1x1xf32, #tpu.memory_space<vmem>>, vector<1x1xf32>
    %cst_10 = arith.constant 0.000000e+00 : f32
    %11 = vector.broadcast %cst_10 : f32 to vector<64x256xf32>
    %12 = arith.cmpf ogt, %9, %11 : vector<64x256xf32>
    %13 = vector.broadcast %10 : vector<1x1xf32> to vector<64x256xf32>
    %14 = arith.mulf %13, %9 : vector<64x256xf32>
    %15 = arith.select %12, %9, %14 : vector<64x256xi1>, vector<64x256xf32>
    %c0_11 = arith.constant 0 : index
    %c0_12 = arith.constant 0 : index
    %16 = vector.load %arg6[%c0_11, %c0_12] : memref<256x32xf32, #tpu.memory_space<vmem>>, vector<256x32xf32>
    %17 = arith.truncf %15 : vector<64x256xf32> to vector<64x256xbf16>
    %18 = arith.truncf %16 : vector<256x32xf32> to vector<256x32xbf16>
    %cst_13 = arith.constant dense<0.000000e+00> : vector<64x32xf32>
    %19 = tpu.matmul %17, %18, %cst_13 {dimension_numbers = #tpu.dot_dimension_numbers<[1], [0], [0], [1], [0, 0, 1, 1], [], []>} : vector<64x256xbf16>, vector<256x32xbf16>, vector<64x32xf32> -> vector<64x32xf32>
    %c0_14 = arith.constant 0 : index
    %c0_15 = arith.constant 0 : index
    %20 = vector.load %arg7[%c0_14, %c0_15] : memref<1x32xf32, #tpu.memory_space<vmem>>, vector<1x32xf32>
    %21 = vector.broadcast %20 : vector<1x32xf32> to vector<64x32xf32>
    %22 = arith.addf %19, %21 : vector<64x32xf32>
    %c0_16 = arith.constant 0 : index
    %c0_17 = arith.constant 0 : index
    %23 = vector.load %arg13[%c0_16, %c0_17] : memref<1x1xf32, #tpu.memory_space<vmem>>, vector<1x1xf32>
    %cst_18 = arith.constant 0.000000e+00 : f32
    %24 = vector.broadcast %cst_18 : f32 to vector<64x32xf32>
    %25 = arith.cmpf ogt, %22, %24 : vector<64x32xf32>
    %26 = vector.broadcast %23 : vector<1x1xf32> to vector<64x32xf32>
    %27 = arith.mulf %26, %22 : vector<64x32xf32>
    %28 = arith.select %25, %22, %27 : vector<64x32xi1>, vector<64x32xf32>
    %c0_19 = arith.constant 0 : index
    %c0_20 = arith.constant 0 : index
    %29 = vector.load %arg14[%c0_19, %c0_20] : memref<32x32xf32, #tpu.memory_space<vmem>>, vector<32x32xf32>
    %30 = arith.truncf %28 : vector<64x32xf32> to vector<64x32xbf16>
    %31 = arith.truncf %29 : vector<32x32xf32> to vector<32x32xbf16>
    %cst_21 = arith.constant dense<0.000000e+00> : vector<64x32xf32>
    %32 = tpu.matmul %30, %31, %cst_21 {dimension_numbers = #tpu.dot_dimension_numbers<[1], [0], [0], [1], [0, 0, 1, 1], [], []>} : vector<64x32xbf16>, vector<32x32xbf16>, vector<64x32xf32> -> vector<64x32xf32>
    %c0_22 = arith.constant 0 : index
    %c0_23 = arith.constant 0 : index
    %33 = vector.load %arg15[%c0_22, %c0_23] : memref<1x32xf32, #tpu.memory_space<vmem>>, vector<1x32xf32>
    %34 = vector.broadcast %33 : vector<1x32xf32> to vector<64x32xf32>
    %35 = arith.addf %32, %34 : vector<64x32xf32>
    %c0_24 = arith.constant 0 : index
    %c0_25 = arith.constant 0 : index
    %36 = vector.load %arg8[%c0_24, %c0_25] : memref<32x256xf32, #tpu.memory_space<vmem>>, vector<32x256xf32>
    %37 = arith.truncf %36 : vector<32x256xf32> to vector<32x256xbf16>
    %cst_26 = arith.constant dense<0.000000e+00> : vector<64x256xf32>
    %38 = tpu.matmul %3, %37, %cst_26 {dimension_numbers = #tpu.dot_dimension_numbers<[1], [0], [0], [1], [0, 0, 1, 1], [], []>} : vector<64x32xbf16>, vector<32x256xbf16>, vector<64x256xf32> -> vector<64x256xf32>
    %c0_27 = arith.constant 0 : index
    %c0_28 = arith.constant 0 : index
    %39 = vector.load %arg9[%c0_27, %c0_28] : memref<1x256xf32, #tpu.memory_space<vmem>>, vector<1x256xf32>
    %40 = vector.broadcast %39 : vector<1x256xf32> to vector<64x256xf32>
    %41 = arith.addf %38, %40 : vector<64x256xf32>
    %c0_29 = arith.constant 0 : index
    %c0_30 = arith.constant 0 : index
    %42 = vector.load %arg10[%c0_29, %c0_30] : memref<1x1xf32, #tpu.memory_space<vmem>>, vector<1x1xf32>
    %cst_31 = arith.constant 0.000000e+00 : f32
    %43 = vector.broadcast %cst_31 : f32 to vector<64x256xf32>
    %44 = arith.cmpf ogt, %41, %43 : vector<64x256xf32>
    %45 = vector.broadcast %42 : vector<1x1xf32> to vector<64x256xf32>
    %46 = arith.mulf %45, %41 : vector<64x256xf32>
    %47 = arith.select %44, %41, %46 : vector<64x256xi1>, vector<64x256xf32>
    %c0_32 = arith.constant 0 : index
    %c0_33 = arith.constant 0 : index
    %48 = vector.load %arg11[%c0_32, %c0_33] : memref<256x32xf32, #tpu.memory_space<vmem>>, vector<256x32xf32>
    %49 = arith.truncf %47 : vector<64x256xf32> to vector<64x256xbf16>
    %50 = arith.truncf %48 : vector<256x32xf32> to vector<256x32xbf16>
    %cst_34 = arith.constant dense<0.000000e+00> : vector<64x32xf32>
    %51 = tpu.matmul %49, %50, %cst_34 {dimension_numbers = #tpu.dot_dimension_numbers<[1], [0], [0], [1], [0, 0, 1, 1], [], []>} : vector<64x256xbf16>, vector<256x32xbf16>, vector<64x32xf32> -> vector<64x32xf32>
    %c0_35 = arith.constant 0 : index
    %c0_36 = arith.constant 0 : index
    %52 = vector.load %arg12[%c0_35, %c0_36] : memref<1x32xf32, #tpu.memory_space<vmem>>, vector<1x32xf32>
    %53 = vector.broadcast %52 : vector<1x32xf32> to vector<64x32xf32>
    %54 = arith.addf %51, %53 : vector<64x32xf32>
    %55 = arith.mulf %35, %35 : vector<64x32xf32>
    %cst_37 = arith.constant dense<0.000000e+00> : vector<64xf32>
    %56 = vector.multi_reduction <add>, %55, %cst_37 [1] : vector<64x32xf32> to vector<64xf32>
    %57 = vector.shape_cast %56 : vector<64xf32> to vector<64x1xf32>
    %cst_38 = arith.constant 1.000000e-24 : f32
    %58 = vector.broadcast %cst_38 : f32 to vector<64x1xf32>
    %59 = arith.maximumf %57, %58 : vector<64x1xf32>
    %60 = math.rsqrt %59 : vector<64x1xf32>
    %61 = vector.broadcast %60 : vector<64x1xf32> to vector<64x32xf32>
    %62 = arith.mulf %35, %61 : vector<64x32xf32>
    %63 = arith.mulf %54, %54 : vector<64x32xf32>
    %cst_39 = arith.constant dense<0.000000e+00> : vector<64xf32>
    %64 = vector.multi_reduction <add>, %63, %cst_39 [1] : vector<64x32xf32> to vector<64xf32>
    %65 = vector.shape_cast %64 : vector<64xf32> to vector<64x1xf32>
    %cst_40 = arith.constant 1.000000e-24 : f32
    %66 = vector.broadcast %cst_40 : f32 to vector<64x1xf32>
    %67 = arith.maximumf %65, %66 : vector<64x1xf32>
    %68 = math.rsqrt %67 : vector<64x1xf32>
    %69 = vector.broadcast %68 : vector<64x1xf32> to vector<64x32xf32>
    %70 = arith.mulf %54, %69 : vector<64x32xf32>
    %71 = arith.mulf %62, %70 : vector<64x32xf32>
    %cst_41 = arith.constant dense<0.000000e+00> : vector<64xf32>
    %72 = vector.multi_reduction <add>, %71, %cst_41 [1] : vector<64x32xf32> to vector<64xf32>
    %73 = vector.shape_cast %72 : vector<64xf32> to vector<64x1xf32>
    %cst_42 = arith.constant 1.000000e+00 : f32
    %74 = vector.broadcast %cst_42 : f32 to vector<64x1xf32>
    %75 = arith.subf %74, %73 : vector<64x1xf32>
    %c0_43 = arith.constant 0 : index
    %c0_44 = arith.constant 0 : index
    %76 = vector.load %arg2[%c0_43, %c0_44] : memref<64x1xf32, #tpu.memory_space<vmem>>, vector<64x1xf32>
    %77 = arith.mulf %75, %76 : vector<64x1xf32>
    %cst_45 = arith.constant dense<0.000000e+00> : vector<1xf32>
    %78 = vector.multi_reduction <add>, %77, %cst_45 [0] : vector<64x1xf32> to vector<1xf32>
    %79 = vector.shape_cast %78 : vector<1xf32> to vector<1x1xf32>
    %cst_46 = arith.constant 3.125000e-02 : f32
    %80 = vector.broadcast %cst_46 : f32 to vector<1x1xf32>
    %81 = arith.mulf %79, %80 : vector<1x1xf32>
    %c0_47 = arith.constant 0 : index
    %c0_48 = arith.constant 0 : index
    %82 = vector.load %arg16[%c0_47, %c0_48] : memref<1x1xf32, #tpu.memory_space<vmem>>, vector<1x1xf32>
    tpu.vector_store %arg16[%c0_47, %c0_48], %81 {strides = array<i32>} : memref<1x1xf32, #tpu.memory_space<vmem>>, vector<1x1xf32>,
    return
  }
  func.func @transform_0(%arg0: i32) -> (i32, i32, i32) {
    %c0_i32 = arith.constant 0 : i32
    %c0_i32_0 = arith.constant 0 : i32
    %c0_i32_1 = arith.constant 0 : i32
    %c0_i32_2 = arith.constant 0 : i32
    return %c0_i32, %c0_i32_0, %c0_i32_1 : i32, i32, i32
  }
  func.func @transform_1(%arg0: i32) -> (i32, i32) {
    %c0_i32 = arith.constant 0 : i32
    %c0_i32_0 = arith.constant 0 : i32
    %c0_i32_1 = arith.constant 0 : i32
    return %c0_i32, %c0_i32_0 : i32, i32
  }
  func.func @transform_2(%arg0: i32) -> (i32, i32) {
    %c0_i32 = arith.constant 0 : i32
    %c0_i32_0 = arith.constant 0 : i32
    %c0_i32_1 = arith.constant 0 : i32
    return %c0_i32, %c0_i32_0 : i32, i32
  }
  func.func @transform_3(%arg0: i32) -> (i32, i32) {
    %c0_i32 = arith.constant 0 : i32
    %c0_i32_0 = arith.constant 0 : i32
    %c0_i32_1 = arith.constant 0 : i32
    return %c0_i32, %c0_i32_0 : i32, i32
  }
  func.func @transform_4(%arg0: i32) -> (i32, i32) {
    %c0_i32 = arith.constant 0 : i32
    %c0_i32_0 = arith.constant 0 : i32
    %c0_i32_1 = arith.constant 0 : i32
    return %c0_i32, %c0_i32_0 : i32, i32
  }
  func.func @transform_5(%arg0: i32) -> (i32, i32) {
    %c0_i32 = arith.constant 0 : i32
    %c0_i32_0 = arith.constant 0 : i32
    %c0_i32_1 = arith.constant 0 : i32
    return %c0_i32, %c0_i32_0 : i32, i32
  }
  func.func @transform_6(%arg0: i32) -> (i32, i32) {
    %c0_i32 = arith.constant 0 : i32
    %c0_i32_0 = arith.constant 0 : i32
    %c0_i32_1 = arith.constant 0 : i32
    return %c0_i32, %c0_i32_0 : i32, i32
  }
  func.func @transform_7(%arg0: i32) -> (i32, i32) {
    %c0_i32 = arith.constant 0 : i32
    %c0_i32_0 = arith.constant 0 : i32
    %c0_i32_1 = arith.constant 0 : i32
    return %c0_i32, %c0_i32_0 : i32, i32
  }
  func.func @transform_8(%arg0: i32) -> (i32, i32) {
    %c0_i32 = arith.constant 0 : i32
    %c0_i32_0 = arith.constant 0 : i32
    %c0_i32_1 = arith.constant 0 : i32
    return %c0_i32, %c0_i32_0 : i32, i32
  }
  func.func @transform_9(%arg0: i32) -> (i32, i32) {
    %c0_i32 = arith.constant 0 : i32
    %c0_i32_0 = arith.constant 0 : i32
    %c0_i32_1 = arith.constant 0 : i32
    return %c0_i32, %c0_i32_0 : i32, i32
  }
  func.func @transform_10(%arg0: i32) -> (i32, i32) {
    %c0_i32 = arith.constant 0 : i32
    %c0_i32_0 = arith.constant 0 : i32
    %c0_i32_1 = arith.constant 0 : i32
    return %c0_i32, %c0_i32_0 : i32, i32
  }
  func.func @transform_11(%arg0: i32) -> (i32, i32) {
    %c0_i32 = arith.constant 0 : i32
    %c0_i32_0 = arith.constant 0 : i32
    %c0_i32_1 = arith.constant 0 : i32
    return %c0_i32, %c0_i32_0 : i32, i32
  }
  func.func @transform_12(%arg0: i32) -> (i32, i32) {
    %c0_i32 = arith.constant 0 : i32
    %c0_i32_0 = arith.constant 0 : i32
    %c0_i32_1 = arith.constant 0 : i32
    return %c0_i32, %c0_i32_0 : i32, i32
  }
  func.func @transform_13(%arg0: i32) -> (i32, i32) {
    %c0_i32 = arith.constant 0 : i32
    %c0_i32_0 = arith.constant 0 : i32
    %c0_i32_1 = arith.constant 0 : i32
    return %c0_i32, %c0_i32_0 : i32, i32
  }
  func.func @transform_14(%arg0: i32) -> (i32, i32) {
    %c0_i32 = arith.constant 0 : i32
    %c0_i32_0 = arith.constant 0 : i32
    %c0_i32_1 = arith.constant 0 : i32
    return %c0_i32, %c0_i32_0 : i32, i32
  }
  func.func @transform_15(%arg0: i32) -> (i32, i32) {
    %c0_i32 = arith.constant 0 : i32
    %c0_i32_0 = arith.constant 0 : i32
    %c0_i32_1 = arith.constant 0 : i32
    return %c0_i32, %c0_i32_0 : i32, i32
  }
}

module attributes {stable_mosaic.version = 11 : i64} {
  func.func @_encoders_kernel(%arg0: i32, %arg1: memref<64x16xf32, #tpu.memory_space<vmem>>, %arg2: memref<64x64xbf16, #tpu.memory_space<vmem>>, %arg3: memref<1x8x64x64xbf16, #tpu.memory_space<vmem>>, %arg4: memref<1x16x32xf32, #tpu.memory_space<vmem>>, %arg5: memref<1x4x8xf32, #tpu.memory_space<vmem>>, %arg6: memref<1x4x8xf32, #tpu.memory_space<vmem>>, %arg7: memref<1x1x32xf32, #tpu.memory_space<vmem>>, %arg8: memref<1x32x32xf32, #tpu.memory_space<vmem>>, %arg9: memref<1x4x8xf32, #tpu.memory_space<vmem>>, %arg10: memref<1x4x8xf32, #tpu.memory_space<vmem>>, %arg11: memref<1x1x32xf32, #tpu.memory_space<vmem>>, %arg12: memref<1x64x64xbf16, #tpu.memory_space<vmem>>, %arg13: memref<1x64x32xbf16, #tpu.memory_space<vmem>>) attributes {dimension_semantics = [#tpu.dimension_semantics<parallel>], iteration_bounds = array<i64: 2>, scalar_prefetch = 0 : i64, scratch_operands = 0 : i64, tpu.core_type = #tpu.core_type<tc>, window_params = [{pipeline_mode = #tpu.pipeline_mode<synchronous>, transform_indices = @transform_0, window_bounds = array<i64: 64, 16>}, {pipeline_mode = #tpu.pipeline_mode<synchronous>, transform_indices = @transform_1, window_bounds = array<i64: 64, 64>}, {transform_indices = @transform_2, window_bounds = array<i64: 1, 8, 64, 64>}, {transform_indices = @transform_3, window_bounds = array<i64: 1, 16, 32>}, {transform_indices = @transform_4, window_bounds = array<i64: 1, 4, 8>}, {transform_indices = @transform_5, window_bounds = array<i64: 1, 4, 8>}, {transform_indices = @transform_6, window_bounds = array<i64: 1, 1, 32>}, {transform_indices = @transform_7, window_bounds = array<i64: 1, 32, 32>}, {transform_indices = @transform_8, window_bounds = array<i64: 1, 4, 8>}, {transform_indices = @transform_9, window_bounds = array<i64: 1, 4, 8>}, {transform_indices = @transform_10, window_bounds = array<i64: 1, 1, 32>}, {transform_indices = @transform_11, window_bounds = array<i64: 1, 64, 64>}, {transform_indices = @transform_12, window_bounds = array<i64: 1, 64, 32>}]} {
    %c0 = arith.constant 0 : index
    %c0_0 = arith.constant 0 : index
    %0 = vector.load %arg2[%c0, %c0_0] : memref<64x64xbf16, #tpu.memory_space<vmem>>, vector<64x64xbf16>
    %c0_1 = arith.constant 0 : index
    %c0_2 = arith.constant 0 : index
    %1 = vector.load %arg1[%c0_1, %c0_2] : memref<64x16xf32, #tpu.memory_space<vmem>>, vector<64x16xf32>
    %c0_3 = arith.constant 0 : index
    %c0_4 = arith.constant 0 : index
    %c0_5 = arith.constant 0 : index
    %2 = vector.load %arg4[%c0_3, %c0_4, %c0_5] : memref<1x16x32xf32, #tpu.memory_space<vmem>>, vector<1x16x32xf32>
    %c0_6 = arith.constant 0 : index
    %c0_7 = arith.constant 0 : index
    %c0_8 = arith.constant 0 : index
    %3 = vector.load %arg5[%c0_6, %c0_7, %c0_8] : memref<1x4x8xf32, #tpu.memory_space<vmem>>, vector<1x4x8xf32>
    %c0_9 = arith.constant 0 : index
    %c0_10 = arith.constant 0 : index
    %c0_11 = arith.constant 0 : index
    %4 = vector.load %arg6[%c0_9, %c0_10, %c0_11] : memref<1x4x8xf32, #tpu.memory_space<vmem>>, vector<1x4x8xf32>
    %c0_12 = arith.constant 0 : index
    %c0_13 = arith.constant 0 : index
    %c0_14 = arith.constant 0 : index
    %5 = vector.load %arg7[%c0_12, %c0_13, %c0_14] : memref<1x1x32xf32, #tpu.memory_space<vmem>>, vector<1x1x32xf32>
    %6 = vector.shape_cast %2 : vector<1x16x32xf32> to vector<16x32xf32>
    %7 = arith.truncf %1 : vector<64x16xf32> to vector<64x16xbf16>
    %8 = arith.truncf %6 : vector<16x32xf32> to vector<16x32xbf16>
    %cst = arith.constant dense<0.000000e+00> : vector<64x32xf32>
    %9 = tpu.matmul %7, %8, %cst {dimension_numbers = #tpu.dot_dimension_numbers<[1], [0], [0], [1], [0, 0, 1, 1], [], []>} : vector<64x16xbf16>, vector<16x32xbf16>, vector<64x32xf32> -> vector<64x32xf32>
    %10 = vector.extract_strided_slice %9 {offsets = [0, 0], sizes = [64, 8], strides = [1, 1]} : vector<64x32xf32> to vector<64x8xf32>
    %11 = vector.extract_strided_slice %3 {offsets = [0, 0, 0], sizes = [1, 1, 8], strides = [1, 1, 1]} : vector<1x4x8xf32> to vector<1x1x8xf32>
    %12 = vector.shape_cast %11 : vector<1x1x8xf32> to vector<1x8xf32>
    %13 = vector.broadcast %12 : vector<1x8xf32> to vector<64x8xf32>
    %14 = arith.mulf %10, %13 : vector<64x8xf32>
    %cst_15 = arith.constant dense<0.000000e+00> : vector<64xf32>
    %15 = vector.multi_reduction <add>, %14, %cst_15 [1] : vector<64x8xf32> to vector<64xf32>
    %16 = vector.shape_cast %15 : vector<64xf32> to vector<64x1xf32>
    %17 = vector.extract_strided_slice %4 {offsets = [0, 0, 0], sizes = [1, 1, 8], strides = [1, 1, 1]} : vector<1x4x8xf32> to vector<1x1x8xf32>
    %18 = vector.shape_cast %17 : vector<1x1x8xf32> to vector<1x8xf32>
    %19 = vector.broadcast %18 : vector<1x8xf32> to vector<64x8xf32>
    %20 = arith.mulf %10, %19 : vector<64x8xf32>
    %cst_16 = arith.constant dense<0.000000e+00> : vector<64xf32>
    %21 = vector.multi_reduction <add>, %20, %cst_16 [1] : vector<64x8xf32> to vector<64xf32>
    %22 = vector.shape_cast %21 : vector<64xf32> to vector<64x1xf32>
    %23 = vector.extract_strided_slice %9 {offsets = [0, 8], sizes = [64, 8], strides = [1, 1]} : vector<64x32xf32> to vector<64x8xf32>
    %24 = vector.extract_strided_slice %3 {offsets = [0, 1, 0], sizes = [1, 1, 8], strides = [1, 1, 1]} : vector<1x4x8xf32> to vector<1x1x8xf32>
    %25 = vector.shape_cast %24 : vector<1x1x8xf32> to vector<1x8xf32>
    %26 = vector.broadcast %25 : vector<1x8xf32> to vector<64x8xf32>
    %27 = arith.mulf %23, %26 : vector<64x8xf32>
    %cst_17 = arith.constant dense<0.000000e+00> : vector<64xf32>
    %28 = vector.multi_reduction <add>, %27, %cst_17 [1] : vector<64x8xf32> to vector<64xf32>
    %29 = vector.shape_cast %28 : vector<64xf32> to vector<64x1xf32>
    %30 = vector.extract_strided_slice %4 {offsets = [0, 1, 0], sizes = [1, 1, 8], strides = [1, 1, 1]} : vector<1x4x8xf32> to vector<1x1x8xf32>
    %31 = vector.shape_cast %30 : vector<1x1x8xf32> to vector<1x8xf32>
    %32 = vector.broadcast %31 : vector<1x8xf32> to vector<64x8xf32>
    %33 = arith.mulf %23, %32 : vector<64x8xf32>
    %cst_18 = arith.constant dense<0.000000e+00> : vector<64xf32>
    %34 = vector.multi_reduction <add>, %33, %cst_18 [1] : vector<64x8xf32> to vector<64xf32>
    %35 = vector.shape_cast %34 : vector<64xf32> to vector<64x1xf32>
    %36 = vector.extract_strided_slice %9 {offsets = [0, 16], sizes = [64, 8], strides = [1, 1]} : vector<64x32xf32> to vector<64x8xf32>
    %37 = vector.extract_strided_slice %3 {offsets = [0, 2, 0], sizes = [1, 1, 8], strides = [1, 1, 1]} : vector<1x4x8xf32> to vector<1x1x8xf32>
    %38 = vector.shape_cast %37 : vector<1x1x8xf32> to vector<1x8xf32>
    %39 = vector.broadcast %38 : vector<1x8xf32> to vector<64x8xf32>
    %40 = arith.mulf %36, %39 : vector<64x8xf32>
    %cst_19 = arith.constant dense<0.000000e+00> : vector<64xf32>
    %41 = vector.multi_reduction <add>, %40, %cst_19 [1] : vector<64x8xf32> to vector<64xf32>
    %42 = vector.shape_cast %41 : vector<64xf32> to vector<64x1xf32>
    %43 = vector.extract_strided_slice %4 {offsets = [0, 2, 0], sizes = [1, 1, 8], strides = [1, 1, 1]} : vector<1x4x8xf32> to vector<1x1x8xf32>
    %44 = vector.shape_cast %43 : vector<1x1x8xf32> to vector<1x8xf32>
    %45 = vector.broadcast %44 : vector<1x8xf32> to vector<64x8xf32>
    %46 = arith.mulf %36, %45 : vector<64x8xf32>
    %cst_20 = arith.constant dense<0.000000e+00> : vector<64xf32>
    %47 = vector.multi_reduction <add>, %46, %cst_20 [1] : vector<64x8xf32> to vector<64xf32>
    %48 = vector.shape_cast %47 : vector<64xf32> to vector<64x1xf32>
    %49 = vector.extract_strided_slice %9 {offsets = [0, 24], sizes = [64, 8], strides = [1, 1]} : vector<64x32xf32> to vector<64x8xf32>
    %50 = vector.extract_strided_slice %3 {offsets = [0, 3, 0], sizes = [1, 1, 8], strides = [1, 1, 1]} : vector<1x4x8xf32> to vector<1x1x8xf32>
    %51 = vector.shape_cast %50 : vector<1x1x8xf32> to vector<1x8xf32>
    %52 = vector.broadcast %51 : vector<1x8xf32> to vector<64x8xf32>
    %53 = arith.mulf %49, %52 : vector<64x8xf32>
    %cst_21 = arith.constant dense<0.000000e+00> : vector<64xf32>
    %54 = vector.multi_reduction <add>, %53, %cst_21 [1] : vector<64x8xf32> to vector<64xf32>
    %55 = vector.shape_cast %54 : vector<64xf32> to vector<64x1xf32>
    %56 = vector.extract_strided_slice %4 {offsets = [0, 3, 0], sizes = [1, 1, 8], strides = [1, 1, 1]} : vector<1x4x8xf32> to vector<1x1x8xf32>
    %57 = vector.shape_cast %56 : vector<1x1x8xf32> to vector<1x8xf32>
    %58 = vector.broadcast %57 : vector<1x8xf32> to vector<64x8xf32>
    %59 = arith.mulf %49, %58 : vector<64x8xf32>
    %cst_22 = arith.constant dense<0.000000e+00> : vector<64xf32>
    %60 = vector.multi_reduction <add>, %59, %cst_22 [1] : vector<64x8xf32> to vector<64xf32>
    %61 = vector.shape_cast %60 : vector<64xf32> to vector<64x1xf32>
    %62 = tpu.concatenate %16, %29, %42, %55 in 1 : vector<64x1xf32>, vector<64x1xf32>, vector<64x1xf32>, vector<64x1xf32> -> vector<64x4xf32>
    %63 = tpu.transpose %62, [1, 0] : vector<64x4xf32> -> vector<4x64xf32>
    %c0_23 = arith.constant 0 : index
    %c0_24 = arith.constant 0 : index
    %c0_25 = arith.constant 0 : index
    %c0_26 = arith.constant 0 : index
    %64 = vector.load %arg3[%c0_23, %c0_24, %c0_25, %c0_26] : memref<1x8x64x64xbf16, #tpu.memory_space<vmem>>, vector<1x1x64x64xbf16>
    %65 = vector.shape_cast %64 : vector<1x1x64x64xbf16> to vector<64x64xbf16>
    %66 = arith.extf %65 : vector<64x64xbf16> to vector<64x64xf32>
    %67 = vector.extract_strided_slice %63 {offsets = [0, 0], sizes = [1, 64], strides = [1, 1]} : vector<4x64xf32> to vector<1x64xf32>
    %68 = vector.broadcast %22 : vector<64x1xf32> to vector<64x64xf32>
    %69 = vector.broadcast %67 : vector<1x64xf32> to vector<64x64xf32>
    %70 = arith.addf %68, %69 : vector<64x64xf32>
    %71 = arith.addf %70, %66 : vector<64x64xf32>
    %cst_27 = arith.constant 0.000000e+00 : f32
    %72 = vector.broadcast %cst_27 : f32 to vector<64x64xf32>
    %73 = arith.cmpf ogt, %71, %72 : vector<64x64xf32>
    %cst_28 = arith.constant 2.000000e-01 : f32
    %74 = vector.broadcast %cst_28 : f32 to vector<64x64xf32>
    %75 = arith.mulf %74, %71 : vector<64x64xf32>
    %76 = arith.select %73, %71, %75 : vector<64x64xi1>, vector<64x64xf32>
    %cst_29 = arith.constant 0.000000e+00 : bf16
    %77 = vector.broadcast %cst_29 : bf16 to vector<64x64xbf16>
    %78 = arith.cmpf ogt, %0, %77 : vector<64x64xbf16>
    %cst_30 = arith.constant -1.000000e+30 : f32
    %79 = vector.broadcast %cst_30 : f32 to vector<64x64xf32>
    %80 = arith.select %78, %76, %79 : vector<64x64xi1>, vector<64x64xf32>
    %cst_31 = arith.constant dense<0xFF800000> : vector<64xf32>
    %81 = vector.multi_reduction <maximumf>, %80, %cst_31 [1] : vector<64x64xf32> to vector<64xf32>
    %82 = vector.shape_cast %81 : vector<64xf32> to vector<64x1xf32>
    %83 = vector.broadcast %82 : vector<64x1xf32> to vector<64x64xf32>
    %84 = arith.subf %80, %83 : vector<64x64xf32>
    %85 = math.exp %84 : vector<64x64xf32>
    %cst_32 = arith.constant dense<0.000000e+00> : vector<64xf32>
    %86 = vector.multi_reduction <add>, %85, %cst_32 [1] : vector<64x64xf32> to vector<64xf32>
    %87 = vector.shape_cast %86 : vector<64xf32> to vector<64x1xf32>
    %cst_33 = arith.constant 9.99999996E-13 : f32
    %88 = vector.broadcast %cst_33 : f32 to vector<64x1xf32>
    %89 = arith.maximumf %87, %88 : vector<64x1xf32>
    %90 = tpu.reciprocal %89 {approx = true} : vector<64x1xf32> -> vector<64x1xf32>
    %91 = vector.broadcast %90 : vector<64x1xf32> to vector<64x64xf32>
    %92 = arith.mulf %85, %91 : vector<64x64xf32>
    %93 = arith.truncf %92 : vector<64x64xf32> to vector<64x64xbf16>
    %94 = arith.truncf %10 : vector<64x8xf32> to vector<64x8xbf16>
    %cst_34 = arith.constant dense<0.000000e+00> : vector<64x8xf32>
    %95 = tpu.matmul %93, %94, %cst_34 {dimension_numbers = #tpu.dot_dimension_numbers<[1], [0], [0], [1], [0, 0, 1, 1], [], []>} : vector<64x64xbf16>, vector<64x8xbf16>, vector<64x8xf32> -> vector<64x8xf32>
    %c0_35 = arith.constant 0 : index
    %c1 = arith.constant 1 : index
    %c0_36 = arith.constant 0 : index
    %c0_37 = arith.constant 0 : index
    %96 = vector.load %arg3[%c0_35, %c1, %c0_36, %c0_37] : memref<1x8x64x64xbf16, #tpu.memory_space<vmem>>, vector<1x1x64x64xbf16>
    %97 = vector.shape_cast %96 : vector<1x1x64x64xbf16> to vector<64x64xbf16>
    %98 = arith.extf %97 : vector<64x64xbf16> to vector<64x64xf32>
    %99 = vector.extract_strided_slice %63 {offsets = [1, 0], sizes = [1, 64], strides = [1, 1]} : vector<4x64xf32> to vector<1x64xf32>
    %100 = vector.broadcast %35 : vector<64x1xf32> to vector<64x64xf32>
    %101 = vector.broadcast %99 : vector<1x64xf32> to vector<64x64xf32>
    %102 = arith.addf %100, %101 : vector<64x64xf32>
    %103 = arith.addf %102, %98 : vector<64x64xf32>
    %cst_38 = arith.constant 0.000000e+00 : f32
    %104 = vector.broadcast %cst_38 : f32 to vector<64x64xf32>
    %105 = arith.cmpf ogt, %103, %104 : vector<64x64xf32>
    %cst_39 = arith.constant 2.000000e-01 : f32
    %106 = vector.broadcast %cst_39 : f32 to vector<64x64xf32>
    %107 = arith.mulf %106, %103 : vector<64x64xf32>
    %108 = arith.select %105, %103, %107 : vector<64x64xi1>, vector<64x64xf32>
    %cst_40 = arith.constant 0.000000e+00 : bf16
    %109 = vector.broadcast %cst_40 : bf16 to vector<64x64xbf16>
    %110 = arith.cmpf ogt, %0, %109 : vector<64x64xbf16>
    %cst_41 = arith.constant -1.000000e+30 : f32
    %111 = vector.broadcast %cst_41 : f32 to vector<64x64xf32>
    %112 = arith.select %110, %108, %111 : vector<64x64xi1>, vector<64x64xf32>
    %cst_42 = arith.constant dense<0xFF800000> : vector<64xf32>
    %113 = vector.multi_reduction <maximumf>, %112, %cst_42 [1] : vector<64x64xf32> to vector<64xf32>
    %114 = vector.shape_cast %113 : vector<64xf32> to vector<64x1xf32>
    %115 = vector.broadcast %114 : vector<64x1xf32> to vector<64x64xf32>
    %116 = arith.subf %112, %115 : vector<64x64xf32>
    %117 = math.exp %116 : vector<64x64xf32>
    %cst_43 = arith.constant dense<0.000000e+00> : vector<64xf32>
    %118 = vector.multi_reduction <add>, %117, %cst_43 [1] : vector<64x64xf32> to vector<64xf32>
    %119 = vector.shape_cast %118 : vector<64xf32> to vector<64x1xf32>
    %cst_44 = arith.constant 9.99999996E-13 : f32
    %120 = vector.broadcast %cst_44 : f32 to vector<64x1xf32>
    %121 = arith.maximumf %119, %120 : vector<64x1xf32>
    %122 = tpu.reciprocal %121 {approx = true} : vector<64x1xf32> -> vector<64x1xf32>
    %123 = vector.broadcast %122 : vector<64x1xf32> to vector<64x64xf32>
    %124 = arith.mulf %117, %123 : vector<64x64xf32>
    %125 = arith.truncf %124 : vector<64x64xf32> to vector<64x64xbf16>
    %126 = arith.truncf %23 : vector<64x8xf32> to vector<64x8xbf16>
    %cst_45 = arith.constant dense<0.000000e+00> : vector<64x8xf32>
    %127 = tpu.matmul %125, %126, %cst_45 {dimension_numbers = #tpu.dot_dimension_numbers<[1], [0], [0], [1], [0, 0, 1, 1], [], []>} : vector<64x64xbf16>, vector<64x8xbf16>, vector<64x8xf32> -> vector<64x8xf32>
    %c0_46 = arith.constant 0 : index
    %c2 = arith.constant 2 : index
    %c0_47 = arith.constant 0 : index
    %c0_48 = arith.constant 0 : index
    %128 = vector.load %arg3[%c0_46, %c2, %c0_47, %c0_48] : memref<1x8x64x64xbf16, #tpu.memory_space<vmem>>, vector<1x1x64x64xbf16>
    %129 = vector.shape_cast %128 : vector<1x1x64x64xbf16> to vector<64x64xbf16>
    %130 = arith.extf %129 : vector<64x64xbf16> to vector<64x64xf32>
    %131 = vector.extract_strided_slice %63 {offsets = [2, 0], sizes = [1, 64], strides = [1, 1]} : vector<4x64xf32> to vector<1x64xf32>
    %132 = vector.broadcast %48 : vector<64x1xf32> to vector<64x64xf32>
    %133 = vector.broadcast %131 : vector<1x64xf32> to vector<64x64xf32>
    %134 = arith.addf %132, %133 : vector<64x64xf32>
    %135 = arith.addf %134, %130 : vector<64x64xf32>
    %cst_49 = arith.constant 0.000000e+00 : f32
    %136 = vector.broadcast %cst_49 : f32 to vector<64x64xf32>
    %137 = arith.cmpf ogt, %135, %136 : vector<64x64xf32>
    %cst_50 = arith.constant 2.000000e-01 : f32
    %138 = vector.broadcast %cst_50 : f32 to vector<64x64xf32>
    %139 = arith.mulf %138, %135 : vector<64x64xf32>
    %140 = arith.select %137, %135, %139 : vector<64x64xi1>, vector<64x64xf32>
    %cst_51 = arith.constant 0.000000e+00 : bf16
    %141 = vector.broadcast %cst_51 : bf16 to vector<64x64xbf16>
    %142 = arith.cmpf ogt, %0, %141 : vector<64x64xbf16>
    %cst_52 = arith.constant -1.000000e+30 : f32
    %143 = vector.broadcast %cst_52 : f32 to vector<64x64xf32>
    %144 = arith.select %142, %140, %143 : vector<64x64xi1>, vector<64x64xf32>
    %cst_53 = arith.constant dense<0xFF800000> : vector<64xf32>
    %145 = vector.multi_reduction <maximumf>, %144, %cst_53 [1] : vector<64x64xf32> to vector<64xf32>
    %146 = vector.shape_cast %145 : vector<64xf32> to vector<64x1xf32>
    %147 = vector.broadcast %146 : vector<64x1xf32> to vector<64x64xf32>
    %148 = arith.subf %144, %147 : vector<64x64xf32>
    %149 = math.exp %148 : vector<64x64xf32>
    %cst_54 = arith.constant dense<0.000000e+00> : vector<64xf32>
    %150 = vector.multi_reduction <add>, %149, %cst_54 [1] : vector<64x64xf32> to vector<64xf32>
    %151 = vector.shape_cast %150 : vector<64xf32> to vector<64x1xf32>
    %cst_55 = arith.constant 9.99999996E-13 : f32
    %152 = vector.broadcast %cst_55 : f32 to vector<64x1xf32>
    %153 = arith.maximumf %151, %152 : vector<64x1xf32>
    %154 = tpu.reciprocal %153 {approx = true} : vector<64x1xf32> -> vector<64x1xf32>
    %155 = vector.broadcast %154 : vector<64x1xf32> to vector<64x64xf32>
    %156 = arith.mulf %149, %155 : vector<64x64xf32>
    %157 = arith.truncf %156 : vector<64x64xf32> to vector<64x64xbf16>
    %158 = arith.truncf %36 : vector<64x8xf32> to vector<64x8xbf16>
    %cst_56 = arith.constant dense<0.000000e+00> : vector<64x8xf32>
    %159 = tpu.matmul %157, %158, %cst_56 {dimension_numbers = #tpu.dot_dimension_numbers<[1], [0], [0], [1], [0, 0, 1, 1], [], []>} : vector<64x64xbf16>, vector<64x8xbf16>, vector<64x8xf32> -> vector<64x8xf32>
    %c0_57 = arith.constant 0 : index
    %c3 = arith.constant 3 : index
    %c0_58 = arith.constant 0 : index
    %c0_59 = arith.constant 0 : index
    %160 = vector.load %arg3[%c0_57, %c3, %c0_58, %c0_59] : memref<1x8x64x64xbf16, #tpu.memory_space<vmem>>, vector<1x1x64x64xbf16>
    %161 = vector.shape_cast %160 : vector<1x1x64x64xbf16> to vector<64x64xbf16>
    %162 = arith.extf %161 : vector<64x64xbf16> to vector<64x64xf32>
    %163 = vector.extract_strided_slice %63 {offsets = [3, 0], sizes = [1, 64], strides = [1, 1]} : vector<4x64xf32> to vector<1x64xf32>
    %164 = vector.broadcast %61 : vector<64x1xf32> to vector<64x64xf32>
    %165 = vector.broadcast %163 : vector<1x64xf32> to vector<64x64xf32>
    %166 = arith.addf %164, %165 : vector<64x64xf32>
    %167 = arith.addf %166, %162 : vector<64x64xf32>
    %cst_60 = arith.constant 0.000000e+00 : f32
    %168 = vector.broadcast %cst_60 : f32 to vector<64x64xf32>
    %169 = arith.cmpf ogt, %167, %168 : vector<64x64xf32>
    %cst_61 = arith.constant 2.000000e-01 : f32
    %170 = vector.broadcast %cst_61 : f32 to vector<64x64xf32>
    %171 = arith.mulf %170, %167 : vector<64x64xf32>
    %172 = arith.select %169, %167, %171 : vector<64x64xi1>, vector<64x64xf32>
    %cst_62 = arith.constant 0.000000e+00 : bf16
    %173 = vector.broadcast %cst_62 : bf16 to vector<64x64xbf16>
    %174 = arith.cmpf ogt, %0, %173 : vector<64x64xbf16>
    %cst_63 = arith.constant -1.000000e+30 : f32
    %175 = vector.broadcast %cst_63 : f32 to vector<64x64xf32>
    %176 = arith.select %174, %172, %175 : vector<64x64xi1>, vector<64x64xf32>
    %cst_64 = arith.constant dense<0xFF800000> : vector<64xf32>
    %177 = vector.multi_reduction <maximumf>, %176, %cst_64 [1] : vector<64x64xf32> to vector<64xf32>
    %178 = vector.shape_cast %177 : vector<64xf32> to vector<64x1xf32>
    %179 = vector.broadcast %178 : vector<64x1xf32> to vector<64x64xf32>
    %180 = arith.subf %176, %179 : vector<64x64xf32>
    %181 = math.exp %180 : vector<64x64xf32>
    %cst_65 = arith.constant dense<0.000000e+00> : vector<64xf32>
    %182 = vector.multi_reduction <add>, %181, %cst_65 [1] : vector<64x64xf32> to vector<64xf32>
    %183 = vector.shape_cast %182 : vector<64xf32> to vector<64x1xf32>
    %cst_66 = arith.constant 9.99999996E-13 : f32
    %184 = vector.broadcast %cst_66 : f32 to vector<64x1xf32>
    %185 = arith.maximumf %183, %184 : vector<64x1xf32>
    %186 = tpu.reciprocal %185 {approx = true} : vector<64x1xf32> -> vector<64x1xf32>
    %187 = vector.broadcast %186 : vector<64x1xf32> to vector<64x64xf32>
    %188 = arith.mulf %181, %187 : vector<64x64xf32>
    %189 = arith.truncf %188 : vector<64x64xf32> to vector<64x64xbf16>
    %190 = arith.truncf %49 : vector<64x8xf32> to vector<64x8xbf16>
    %cst_67 = arith.constant dense<0.000000e+00> : vector<64x8xf32>
    %191 = tpu.matmul %189, %190, %cst_67 {dimension_numbers = #tpu.dot_dimension_numbers<[1], [0], [0], [1], [0, 0, 1, 1], [], []>} : vector<64x64xbf16>, vector<64x8xbf16>, vector<64x8xf32> -> vector<64x8xf32>
    %192 = tpu.concatenate %95, %127, %159, %191 in 1 : vector<64x8xf32>, vector<64x8xf32>, vector<64x8xf32>, vector<64x8xf32> -> vector<64x32xf32>
    %193 = vector.shape_cast %5 : vector<1x1x32xf32> to vector<1x32xf32>
    %194 = vector.broadcast %193 : vector<1x32xf32> to vector<64x32xf32>
    %195 = arith.addf %192, %194 : vector<64x32xf32>
    %cst_68 = arith.constant 0.000000e+00 : f32
    %196 = vector.broadcast %cst_68 : f32 to vector<64x32xf32>
    %197 = arith.maximumf %195, %196 : vector<64x32xf32>
    %c0_69 = arith.constant 0 : index
    %c0_70 = arith.constant 0 : index
    %c0_71 = arith.constant 0 : index
    %198 = vector.load %arg8[%c0_69, %c0_70, %c0_71] : memref<1x32x32xf32, #tpu.memory_space<vmem>>, vector<1x32x32xf32>
    %c0_72 = arith.constant 0 : index
    %c0_73 = arith.constant 0 : index
    %c0_74 = arith.constant 0 : index
    %199 = vector.load %arg9[%c0_72, %c0_73, %c0_74] : memref<1x4x8xf32, #tpu.memory_space<vmem>>, vector<1x4x8xf32>
    %c0_75 = arith.constant 0 : index
    %c0_76 = arith.constant 0 : index
    %c0_77 = arith.constant 0 : index
    %200 = vector.load %arg10[%c0_75, %c0_76, %c0_77] : memref<1x4x8xf32, #tpu.memory_space<vmem>>, vector<1x4x8xf32>
    %c0_78 = arith.constant 0 : index
    %c0_79 = arith.constant 0 : index
    %c0_80 = arith.constant 0 : index
    %201 = vector.load %arg11[%c0_78, %c0_79, %c0_80] : memref<1x1x32xf32, #tpu.memory_space<vmem>>, vector<1x1x32xf32>
    %202 = vector.shape_cast %198 : vector<1x32x32xf32> to vector<32x32xf32>
    %203 = arith.truncf %197 : vector<64x32xf32> to vector<64x32xbf16>
    %204 = arith.truncf %202 : vector<32x32xf32> to vector<32x32xbf16>
    %cst_81 = arith.constant dense<0.000000e+00> : vector<64x32xf32>
    %205 = tpu.matmul %203, %204, %cst_81 {dimension_numbers = #tpu.dot_dimension_numbers<[1], [0], [0], [1], [0, 0, 1, 1], [], []>} : vector<64x32xbf16>, vector<32x32xbf16>, vector<64x32xf32> -> vector<64x32xf32>
    %206 = vector.extract_strided_slice %205 {offsets = [0, 0], sizes = [64, 8], strides = [1, 1]} : vector<64x32xf32> to vector<64x8xf32>
    %207 = vector.extract_strided_slice %199 {offsets = [0, 0, 0], sizes = [1, 1, 8], strides = [1, 1, 1]} : vector<1x4x8xf32> to vector<1x1x8xf32>
    %208 = vector.shape_cast %207 : vector<1x1x8xf32> to vector<1x8xf32>
    %209 = vector.broadcast %208 : vector<1x8xf32> to vector<64x8xf32>
    %210 = arith.mulf %206, %209 : vector<64x8xf32>
    %cst_82 = arith.constant dense<0.000000e+00> : vector<64xf32>
    %211 = vector.multi_reduction <add>, %210, %cst_82 [1] : vector<64x8xf32> to vector<64xf32>
    %212 = vector.shape_cast %211 : vector<64xf32> to vector<64x1xf32>
    %213 = vector.extract_strided_slice %200 {offsets = [0, 0, 0], sizes = [1, 1, 8], strides = [1, 1, 1]} : vector<1x4x8xf32> to vector<1x1x8xf32>
    %214 = vector.shape_cast %213 : vector<1x1x8xf32> to vector<1x8xf32>
    %215 = vector.broadcast %214 : vector<1x8xf32> to vector<64x8xf32>
    %216 = arith.mulf %206, %215 : vector<64x8xf32>
    %cst_83 = arith.constant dense<0.000000e+00> : vector<64xf32>
    %217 = vector.multi_reduction <add>, %216, %cst_83 [1] : vector<64x8xf32> to vector<64xf32>
    %218 = vector.shape_cast %217 : vector<64xf32> to vector<64x1xf32>
    %219 = vector.extract_strided_slice %205 {offsets = [0, 8], sizes = [64, 8], strides = [1, 1]} : vector<64x32xf32> to vector<64x8xf32>
    %220 = vector.extract_strided_slice %199 {offsets = [0, 1, 0], sizes = [1, 1, 8], strides = [1, 1, 1]} : vector<1x4x8xf32> to vector<1x1x8xf32>
    %221 = vector.shape_cast %220 : vector<1x1x8xf32> to vector<1x8xf32>
    %222 = vector.broadcast %221 : vector<1x8xf32> to vector<64x8xf32>
    %223 = arith.mulf %219, %222 : vector<64x8xf32>
    %cst_84 = arith.constant dense<0.000000e+00> : vector<64xf32>
    %224 = vector.multi_reduction <add>, %223, %cst_84 [1] : vector<64x8xf32> to vector<64xf32>
    %225 = vector.shape_cast %224 : vector<64xf32> to vector<64x1xf32>
    %226 = vector.extract_strided_slice %200 {offsets = [0, 1, 0], sizes = [1, 1, 8], strides = [1, 1, 1]} : vector<1x4x8xf32> to vector<1x1x8xf32>
    %227 = vector.shape_cast %226 : vector<1x1x8xf32> to vector<1x8xf32>
    %228 = vector.broadcast %227 : vector<1x8xf32> to vector<64x8xf32>
    %229 = arith.mulf %219, %228 : vector<64x8xf32>
    %cst_85 = arith.constant dense<0.000000e+00> : vector<64xf32>
    %230 = vector.multi_reduction <add>, %229, %cst_85 [1] : vector<64x8xf32> to vector<64xf32>
    %231 = vector.shape_cast %230 : vector<64xf32> to vector<64x1xf32>
    %232 = vector.extract_strided_slice %205 {offsets = [0, 16], sizes = [64, 8], strides = [1, 1]} : vector<64x32xf32> to vector<64x8xf32>
    %233 = vector.extract_strided_slice %199 {offsets = [0, 2, 0], sizes = [1, 1, 8], strides = [1, 1, 1]} : vector<1x4x8xf32> to vector<1x1x8xf32>
    %234 = vector.shape_cast %233 : vector<1x1x8xf32> to vector<1x8xf32>
    %235 = vector.broadcast %234 : vector<1x8xf32> to vector<64x8xf32>
    %236 = arith.mulf %232, %235 : vector<64x8xf32>
    %cst_86 = arith.constant dense<0.000000e+00> : vector<64xf32>
    %237 = vector.multi_reduction <add>, %236, %cst_86 [1] : vector<64x8xf32> to vector<64xf32>
    %238 = vector.shape_cast %237 : vector<64xf32> to vector<64x1xf32>
    %239 = vector.extract_strided_slice %200 {offsets = [0, 2, 0], sizes = [1, 1, 8], strides = [1, 1, 1]} : vector<1x4x8xf32> to vector<1x1x8xf32>
    %240 = vector.shape_cast %239 : vector<1x1x8xf32> to vector<1x8xf32>
    %241 = vector.broadcast %240 : vector<1x8xf32> to vector<64x8xf32>
    %242 = arith.mulf %232, %241 : vector<64x8xf32>
    %cst_87 = arith.constant dense<0.000000e+00> : vector<64xf32>
    %243 = vector.multi_reduction <add>, %242, %cst_87 [1] : vector<64x8xf32> to vector<64xf32>
    %244 = vector.shape_cast %243 : vector<64xf32> to vector<64x1xf32>
    %245 = vector.extract_strided_slice %205 {offsets = [0, 24], sizes = [64, 8], strides = [1, 1]} : vector<64x32xf32> to vector<64x8xf32>
    %246 = vector.extract_strided_slice %199 {offsets = [0, 3, 0], sizes = [1, 1, 8], strides = [1, 1, 1]} : vector<1x4x8xf32> to vector<1x1x8xf32>
    %247 = vector.shape_cast %246 : vector<1x1x8xf32> to vector<1x8xf32>
    %248 = vector.broadcast %247 : vector<1x8xf32> to vector<64x8xf32>
    %249 = arith.mulf %245, %248 : vector<64x8xf32>
    %cst_88 = arith.constant dense<0.000000e+00> : vector<64xf32>
    %250 = vector.multi_reduction <add>, %249, %cst_88 [1] : vector<64x8xf32> to vector<64xf32>
    %251 = vector.shape_cast %250 : vector<64xf32> to vector<64x1xf32>
    %252 = vector.extract_strided_slice %200 {offsets = [0, 3, 0], sizes = [1, 1, 8], strides = [1, 1, 1]} : vector<1x4x8xf32> to vector<1x1x8xf32>
    %253 = vector.shape_cast %252 : vector<1x1x8xf32> to vector<1x8xf32>
    %254 = vector.broadcast %253 : vector<1x8xf32> to vector<64x8xf32>
    %255 = arith.mulf %245, %254 : vector<64x8xf32>
    %cst_89 = arith.constant dense<0.000000e+00> : vector<64xf32>
    %256 = vector.multi_reduction <add>, %255, %cst_89 [1] : vector<64x8xf32> to vector<64xf32>
    %257 = vector.shape_cast %256 : vector<64xf32> to vector<64x1xf32>
    %258 = tpu.concatenate %212, %225, %238, %251 in 1 : vector<64x1xf32>, vector<64x1xf32>, vector<64x1xf32>, vector<64x1xf32> -> vector<64x4xf32>
    %259 = tpu.transpose %258, [1, 0] : vector<64x4xf32> -> vector<4x64xf32>
    %c0_90 = arith.constant 0 : index
    %c4 = arith.constant 4 : index
    %c0_91 = arith.constant 0 : index
    %c0_92 = arith.constant 0 : index
    %260 = vector.load %arg3[%c0_90, %c4, %c0_91, %c0_92] : memref<1x8x64x64xbf16, #tpu.memory_space<vmem>>, vector<1x1x64x64xbf16>
    %261 = vector.shape_cast %260 : vector<1x1x64x64xbf16> to vector<64x64xbf16>
    %262 = arith.extf %261 : vector<64x64xbf16> to vector<64x64xf32>
    %263 = vector.extract_strided_slice %259 {offsets = [0, 0], sizes = [1, 64], strides = [1, 1]} : vector<4x64xf32> to vector<1x64xf32>
    %264 = vector.broadcast %218 : vector<64x1xf32> to vector<64x64xf32>
    %265 = vector.broadcast %263 : vector<1x64xf32> to vector<64x64xf32>
    %266 = arith.addf %264, %265 : vector<64x64xf32>
    %267 = arith.addf %266, %262 : vector<64x64xf32>
    %cst_93 = arith.constant 0.000000e+00 : f32
    %268 = vector.broadcast %cst_93 : f32 to vector<64x64xf32>
    %269 = arith.cmpf ogt, %267, %268 : vector<64x64xf32>
    %cst_94 = arith.constant 2.000000e-01 : f32
    %270 = vector.broadcast %cst_94 : f32 to vector<64x64xf32>
    %271 = arith.mulf %270, %267 : vector<64x64xf32>
    %272 = arith.select %269, %267, %271 : vector<64x64xi1>, vector<64x64xf32>
    %cst_95 = arith.constant 0.000000e+00 : bf16
    %273 = vector.broadcast %cst_95 : bf16 to vector<64x64xbf16>
    %274 = arith.cmpf ogt, %0, %273 : vector<64x64xbf16>
    %cst_96 = arith.constant -1.000000e+30 : f32
    %275 = vector.broadcast %cst_96 : f32 to vector<64x64xf32>
    %276 = arith.select %274, %272, %275 : vector<64x64xi1>, vector<64x64xf32>
    %cst_97 = arith.constant dense<0xFF800000> : vector<64xf32>
    %277 = vector.multi_reduction <maximumf>, %276, %cst_97 [1] : vector<64x64xf32> to vector<64xf32>
    %278 = vector.shape_cast %277 : vector<64xf32> to vector<64x1xf32>
    %279 = vector.broadcast %278 : vector<64x1xf32> to vector<64x64xf32>
    %280 = arith.subf %276, %279 : vector<64x64xf32>
    %281 = math.exp %280 : vector<64x64xf32>
    %cst_98 = arith.constant dense<0.000000e+00> : vector<64xf32>
    %282 = vector.multi_reduction <add>, %281, %cst_98 [1] : vector<64x64xf32> to vector<64xf32>
    %283 = vector.shape_cast %282 : vector<64xf32> to vector<64x1xf32>
    %cst_99 = arith.constant 9.99999996E-13 : f32
    %284 = vector.broadcast %cst_99 : f32 to vector<64x1xf32>
    %285 = arith.maximumf %283, %284 : vector<64x1xf32>
    %286 = tpu.reciprocal %285 {approx = true} : vector<64x1xf32> -> vector<64x1xf32>
    %287 = vector.broadcast %286 : vector<64x1xf32> to vector<64x64xf32>
    %288 = arith.mulf %281, %287 : vector<64x64xf32>
    %289 = arith.truncf %288 : vector<64x64xf32> to vector<64x64xbf16>
    %290 = arith.truncf %206 : vector<64x8xf32> to vector<64x8xbf16>
    %cst_100 = arith.constant dense<0.000000e+00> : vector<64x8xf32>
    %291 = tpu.matmul %289, %290, %cst_100 {dimension_numbers = #tpu.dot_dimension_numbers<[1], [0], [0], [1], [0, 0, 1, 1], [], []>} : vector<64x64xbf16>, vector<64x8xbf16>, vector<64x8xf32> -> vector<64x8xf32>
    %c0_101 = arith.constant 0 : index
    %c5 = arith.constant 5 : index
    %c0_102 = arith.constant 0 : index
    %c0_103 = arith.constant 0 : index
    %292 = vector.load %arg3[%c0_101, %c5, %c0_102, %c0_103] : memref<1x8x64x64xbf16, #tpu.memory_space<vmem>>, vector<1x1x64x64xbf16>
    %293 = vector.shape_cast %292 : vector<1x1x64x64xbf16> to vector<64x64xbf16>
    %294 = arith.extf %293 : vector<64x64xbf16> to vector<64x64xf32>
    %295 = vector.extract_strided_slice %259 {offsets = [1, 0], sizes = [1, 64], strides = [1, 1]} : vector<4x64xf32> to vector<1x64xf32>
    %296 = vector.broadcast %231 : vector<64x1xf32> to vector<64x64xf32>
    %297 = vector.broadcast %295 : vector<1x64xf32> to vector<64x64xf32>
    %298 = arith.addf %296, %297 : vector<64x64xf32>
    %299 = arith.addf %298, %294 : vector<64x64xf32>
    %cst_104 = arith.constant 0.000000e+00 : f32
    %300 = vector.broadcast %cst_104 : f32 to vector<64x64xf32>
    %301 = arith.cmpf ogt, %299, %300 : vector<64x64xf32>
    %cst_105 = arith.constant 2.000000e-01 : f32
    %302 = vector.broadcast %cst_105 : f32 to vector<64x64xf32>
    %303 = arith.mulf %302, %299 : vector<64x64xf32>
    %304 = arith.select %301, %299, %303 : vector<64x64xi1>, vector<64x64xf32>
    %cst_106 = arith.constant 0.000000e+00 : bf16
    %305 = vector.broadcast %cst_106 : bf16 to vector<64x64xbf16>
    %306 = arith.cmpf ogt, %0, %305 : vector<64x64xbf16>
    %cst_107 = arith.constant -1.000000e+30 : f32
    %307 = vector.broadcast %cst_107 : f32 to vector<64x64xf32>
    %308 = arith.select %306, %304, %307 : vector<64x64xi1>, vector<64x64xf32>
    %cst_108 = arith.constant dense<0xFF800000> : vector<64xf32>
    %309 = vector.multi_reduction <maximumf>, %308, %cst_108 [1] : vector<64x64xf32> to vector<64xf32>
    %310 = vector.shape_cast %309 : vector<64xf32> to vector<64x1xf32>
    %311 = vector.broadcast %310 : vector<64x1xf32> to vector<64x64xf32>
    %312 = arith.subf %308, %311 : vector<64x64xf32>
    %313 = math.exp %312 : vector<64x64xf32>
    %cst_109 = arith.constant dense<0.000000e+00> : vector<64xf32>
    %314 = vector.multi_reduction <add>, %313, %cst_109 [1] : vector<64x64xf32> to vector<64xf32>
    %315 = vector.shape_cast %314 : vector<64xf32> to vector<64x1xf32>
    %cst_110 = arith.constant 9.99999996E-13 : f32
    %316 = vector.broadcast %cst_110 : f32 to vector<64x1xf32>
    %317 = arith.maximumf %315, %316 : vector<64x1xf32>
    %318 = tpu.reciprocal %317 {approx = true} : vector<64x1xf32> -> vector<64x1xf32>
    %319 = vector.broadcast %318 : vector<64x1xf32> to vector<64x64xf32>
    %320 = arith.mulf %313, %319 : vector<64x64xf32>
    %321 = arith.truncf %320 : vector<64x64xf32> to vector<64x64xbf16>
    %322 = arith.truncf %219 : vector<64x8xf32> to vector<64x8xbf16>
    %cst_111 = arith.constant dense<0.000000e+00> : vector<64x8xf32>
    %323 = tpu.matmul %321, %322, %cst_111 {dimension_numbers = #tpu.dot_dimension_numbers<[1], [0], [0], [1], [0, 0, 1, 1], [], []>} : vector<64x64xbf16>, vector<64x8xbf16>, vector<64x8xf32> -> vector<64x8xf32>
    %c0_112 = arith.constant 0 : index
    %c6 = arith.constant 6 : index
    %c0_113 = arith.constant 0 : index
    %c0_114 = arith.constant 0 : index
    %324 = vector.load %arg3[%c0_112, %c6, %c0_113, %c0_114] : memref<1x8x64x64xbf16, #tpu.memory_space<vmem>>, vector<1x1x64x64xbf16>
    %325 = vector.shape_cast %324 : vector<1x1x64x64xbf16> to vector<64x64xbf16>
    %326 = arith.extf %325 : vector<64x64xbf16> to vector<64x64xf32>
    %327 = vector.extract_strided_slice %259 {offsets = [2, 0], sizes = [1, 64], strides = [1, 1]} : vector<4x64xf32> to vector<1x64xf32>
    %328 = vector.broadcast %244 : vector<64x1xf32> to vector<64x64xf32>
    %329 = vector.broadcast %327 : vector<1x64xf32> to vector<64x64xf32>
    %330 = arith.addf %328, %329 : vector<64x64xf32>
    %331 = arith.addf %330, %326 : vector<64x64xf32>
    %cst_115 = arith.constant 0.000000e+00 : f32
    %332 = vector.broadcast %cst_115 : f32 to vector<64x64xf32>
    %333 = arith.cmpf ogt, %331, %332 : vector<64x64xf32>
    %cst_116 = arith.constant 2.000000e-01 : f32
    %334 = vector.broadcast %cst_116 : f32 to vector<64x64xf32>
    %335 = arith.mulf %334, %331 : vector<64x64xf32>
    %336 = arith.select %333, %331, %335 : vector<64x64xi1>, vector<64x64xf32>
    %cst_117 = arith.constant 0.000000e+00 : bf16
    %337 = vector.broadcast %cst_117 : bf16 to vector<64x64xbf16>
    %338 = arith.cmpf ogt, %0, %337 : vector<64x64xbf16>
    %cst_118 = arith.constant -1.000000e+30 : f32
    %339 = vector.broadcast %cst_118 : f32 to vector<64x64xf32>
    %340 = arith.select %338, %336, %339 : vector<64x64xi1>, vector<64x64xf32>
    %cst_119 = arith.constant dense<0xFF800000> : vector<64xf32>
    %341 = vector.multi_reduction <maximumf>, %340, %cst_119 [1] : vector<64x64xf32> to vector<64xf32>
    %342 = vector.shape_cast %341 : vector<64xf32> to vector<64x1xf32>
    %343 = vector.broadcast %342 : vector<64x1xf32> to vector<64x64xf32>
    %344 = arith.subf %340, %343 : vector<64x64xf32>
    %345 = math.exp %344 : vector<64x64xf32>
    %cst_120 = arith.constant dense<0.000000e+00> : vector<64xf32>
    %346 = vector.multi_reduction <add>, %345, %cst_120 [1] : vector<64x64xf32> to vector<64xf32>
    %347 = vector.shape_cast %346 : vector<64xf32> to vector<64x1xf32>
    %cst_121 = arith.constant 9.99999996E-13 : f32
    %348 = vector.broadcast %cst_121 : f32 to vector<64x1xf32>
    %349 = arith.maximumf %347, %348 : vector<64x1xf32>
    %350 = tpu.reciprocal %349 {approx = true} : vector<64x1xf32> -> vector<64x1xf32>
    %351 = vector.broadcast %350 : vector<64x1xf32> to vector<64x64xf32>
    %352 = arith.mulf %345, %351 : vector<64x64xf32>
    %353 = arith.truncf %352 : vector<64x64xf32> to vector<64x64xbf16>
    %354 = arith.truncf %232 : vector<64x8xf32> to vector<64x8xbf16>
    %cst_122 = arith.constant dense<0.000000e+00> : vector<64x8xf32>
    %355 = tpu.matmul %353, %354, %cst_122 {dimension_numbers = #tpu.dot_dimension_numbers<[1], [0], [0], [1], [0, 0, 1, 1], [], []>} : vector<64x64xbf16>, vector<64x8xbf16>, vector<64x8xf32> -> vector<64x8xf32>
    %c0_123 = arith.constant 0 : index
    %c7 = arith.constant 7 : index
    %c0_124 = arith.constant 0 : index
    %c0_125 = arith.constant 0 : index
    %356 = vector.load %arg3[%c0_123, %c7, %c0_124, %c0_125] : memref<1x8x64x64xbf16, #tpu.memory_space<vmem>>, vector<1x1x64x64xbf16>
    %357 = vector.shape_cast %356 : vector<1x1x64x64xbf16> to vector<64x64xbf16>
    %358 = arith.extf %357 : vector<64x64xbf16> to vector<64x64xf32>
    %359 = vector.extract_strided_slice %259 {offsets = [3, 0], sizes = [1, 64], strides = [1, 1]} : vector<4x64xf32> to vector<1x64xf32>
    %360 = vector.broadcast %257 : vector<64x1xf32> to vector<64x64xf32>
    %361 = vector.broadcast %359 : vector<1x64xf32> to vector<64x64xf32>
    %362 = arith.addf %360, %361 : vector<64x64xf32>
    %363 = arith.addf %362, %358 : vector<64x64xf32>
    %cst_126 = arith.constant 0.000000e+00 : f32
    %364 = vector.broadcast %cst_126 : f32 to vector<64x64xf32>
    %365 = arith.cmpf ogt, %363, %364 : vector<64x64xf32>
    %cst_127 = arith.constant 2.000000e-01 : f32
    %366 = vector.broadcast %cst_127 : f32 to vector<64x64xf32>
    %367 = arith.mulf %366, %363 : vector<64x64xf32>
    %368 = arith.select %365, %363, %367 : vector<64x64xi1>, vector<64x64xf32>
    %cst_128 = arith.constant 0.000000e+00 : bf16
    %369 = vector.broadcast %cst_128 : bf16 to vector<64x64xbf16>
    %370 = arith.cmpf ogt, %0, %369 : vector<64x64xbf16>
    %cst_129 = arith.constant -1.000000e+30 : f32
    %371 = vector.broadcast %cst_129 : f32 to vector<64x64xf32>
    %372 = arith.select %370, %368, %371 : vector<64x64xi1>, vector<64x64xf32>
    %cst_130 = arith.constant dense<0xFF800000> : vector<64xf32>
    %373 = vector.multi_reduction <maximumf>, %372, %cst_130 [1] : vector<64x64xf32> to vector<64xf32>
    %374 = vector.shape_cast %373 : vector<64xf32> to vector<64x1xf32>
    %375 = vector.broadcast %374 : vector<64x1xf32> to vector<64x64xf32>
    %376 = arith.subf %372, %375 : vector<64x64xf32>
    %377 = math.exp %376 : vector<64x64xf32>
    %cst_131 = arith.constant dense<0.000000e+00> : vector<64xf32>
    %378 = vector.multi_reduction <add>, %377, %cst_131 [1] : vector<64x64xf32> to vector<64xf32>
    %379 = vector.shape_cast %378 : vector<64xf32> to vector<64x1xf32>
    %cst_132 = arith.constant 9.99999996E-13 : f32
    %380 = vector.broadcast %cst_132 : f32 to vector<64x1xf32>
    %381 = arith.maximumf %379, %380 : vector<64x1xf32>
    %382 = tpu.reciprocal %381 {approx = true} : vector<64x1xf32> -> vector<64x1xf32>
    %383 = vector.broadcast %382 : vector<64x1xf32> to vector<64x64xf32>
    %384 = arith.mulf %377, %383 : vector<64x64xf32>
    %385 = arith.truncf %384 : vector<64x64xf32> to vector<64x64xbf16>
    %386 = arith.truncf %245 : vector<64x8xf32> to vector<64x8xbf16>
    %cst_133 = arith.constant dense<0.000000e+00> : vector<64x8xf32>
    %387 = tpu.matmul %385, %386, %cst_133 {dimension_numbers = #tpu.dot_dimension_numbers<[1], [0], [0], [1], [0, 0, 1, 1], [], []>} : vector<64x64xbf16>, vector<64x8xbf16>, vector<64x8xf32> -> vector<64x8xf32>
    %388 = tpu.concatenate %291, %323, %355, %387 in 1 : vector<64x8xf32>, vector<64x8xf32>, vector<64x8xf32>, vector<64x8xf32> -> vector<64x32xf32>
    %389 = vector.shape_cast %201 : vector<1x1x32xf32> to vector<1x32xf32>
    %390 = vector.broadcast %389 : vector<1x32xf32> to vector<64x32xf32>
    %391 = arith.addf %388, %390 : vector<64x32xf32>
    %cst_134 = arith.constant 0.000000e+00 : f32
    %392 = vector.broadcast %cst_134 : f32 to vector<64x32xf32>
    %393 = arith.maximumf %391, %392 : vector<64x32xf32>
    %394 = tpu.concatenate %197, %393 in 1 : vector<64x32xf32>, vector<64x32xf32> -> vector<64x64xf32>
    %395 = arith.truncf %394 : vector<64x64xf32> to vector<64x64xbf16>
    %c0_135 = arith.constant 0 : index
    %c0_136 = arith.constant 0 : index
    %c0_137 = arith.constant 0 : index
    %396 = vector.load %arg12[%c0_135, %c0_136, %c0_137] : memref<1x64x64xbf16, #tpu.memory_space<vmem>>, vector<1x64x64xbf16>
    %397 = vector.shape_cast %396 : vector<1x64x64xbf16> to vector<64x64xbf16>
    %398 = vector.shape_cast %395 : vector<64x64xbf16> to vector<1x64x64xbf16>
    tpu.vector_store %arg12[%c0_135, %c0_136, %c0_137], %398 {strides = array<i32>} : memref<1x64x64xbf16, #tpu.memory_space<vmem>>, vector<1x64x64xbf16>,
    %399 = arith.truncf %393 : vector<64x32xf32> to vector<64x32xbf16>
    %c0_138 = arith.constant 0 : index
    %c0_139 = arith.constant 0 : index
    %c0_140 = arith.constant 0 : index
    %400 = vector.load %arg13[%c0_138, %c0_139, %c0_140] : memref<1x64x32xbf16, #tpu.memory_space<vmem>>, vector<1x64x32xbf16>
    %401 = vector.shape_cast %400 : vector<1x64x32xbf16> to vector<64x32xbf16>
    %402 = vector.shape_cast %399 : vector<64x32xbf16> to vector<1x64x32xbf16>
    tpu.vector_store %arg13[%c0_138, %c0_139, %c0_140], %402 {strides = array<i32>} : memref<1x64x32xbf16, #tpu.memory_space<vmem>>, vector<1x64x32xbf16>,
    return
  }
  func.func @transform_0(%arg0: i32) -> (i32, i32) {
    %c0_i32 = arith.constant 0 : i32
    %c0_i32_0 = arith.constant 0 : i32
    %c0_i32_1 = arith.constant 0 : i32
    return %c0_i32, %c0_i32_0 : i32, i32
  }
  func.func @transform_1(%arg0: i32) -> (i32, i32) {
    %c0_i32 = arith.constant 0 : i32
    %c0_i32_0 = arith.constant 0 : i32
    %c0_i32_1 = arith.constant 0 : i32
    return %c0_i32, %c0_i32_0 : i32, i32
  }
  func.func @transform_2(%arg0: i32) -> (i32, i32, i32, i32) {
    %c0_i32 = arith.constant 0 : i32
    %c0_i32_0 = arith.constant 0 : i32
    %c0_i32_1 = arith.constant 0 : i32
    %c0_i32_2 = arith.constant 0 : i32
    return %arg0, %c0_i32, %c0_i32_0, %c0_i32_1 : i32, i32, i32, i32
  }
  func.func @transform_3(%arg0: i32) -> (i32, i32, i32) {
    %c0_i32 = arith.constant 0 : i32
    %c0_i32_0 = arith.constant 0 : i32
    %c0_i32_1 = arith.constant 0 : i32
    return %arg0, %c0_i32, %c0_i32_0 : i32, i32, i32
  }
  func.func @transform_4(%arg0: i32) -> (i32, i32, i32) {
    %c0_i32 = arith.constant 0 : i32
    %c0_i32_0 = arith.constant 0 : i32
    %c0_i32_1 = arith.constant 0 : i32
    return %arg0, %c0_i32, %c0_i32_0 : i32, i32, i32
  }
  func.func @transform_5(%arg0: i32) -> (i32, i32, i32) {
    %c0_i32 = arith.constant 0 : i32
    %c0_i32_0 = arith.constant 0 : i32
    %c0_i32_1 = arith.constant 0 : i32
    return %arg0, %c0_i32, %c0_i32_0 : i32, i32, i32
  }
  func.func @transform_6(%arg0: i32) -> (i32, i32, i32) {
    %c0_i32 = arith.constant 0 : i32
    %c0_i32_0 = arith.constant 0 : i32
    %c0_i32_1 = arith.constant 0 : i32
    return %arg0, %c0_i32, %c0_i32_0 : i32, i32, i32
  }
  func.func @transform_7(%arg0: i32) -> (i32, i32, i32) {
    %c0_i32 = arith.constant 0 : i32
    %c0_i32_0 = arith.constant 0 : i32
    %c0_i32_1 = arith.constant 0 : i32
    return %arg0, %c0_i32, %c0_i32_0 : i32, i32, i32
  }
  func.func @transform_8(%arg0: i32) -> (i32, i32, i32) {
    %c0_i32 = arith.constant 0 : i32
    %c0_i32_0 = arith.constant 0 : i32
    %c0_i32_1 = arith.constant 0 : i32
    return %arg0, %c0_i32, %c0_i32_0 : i32, i32, i32
  }
  func.func @transform_9(%arg0: i32) -> (i32, i32, i32) {
    %c0_i32 = arith.constant 0 : i32
    %c0_i32_0 = arith.constant 0 : i32
    %c0_i32_1 = arith.constant 0 : i32
    return %arg0, %c0_i32, %c0_i32_0 : i32, i32, i32
  }
  func.func @transform_10(%arg0: i32) -> (i32, i32, i32) {
    %c0_i32 = arith.constant 0 : i32
    %c0_i32_0 = arith.constant 0 : i32
    %c0_i32_1 = arith.constant 0 : i32
    return %arg0, %c0_i32, %c0_i32_0 : i32, i32, i32
  }
  func.func @transform_11(%arg0: i32) -> (i32, i32, i32) {
    %c0_i32 = arith.constant 0 : i32
    %c0_i32_0 = arith.constant 0 : i32
    %c0_i32_1 = arith.constant 0 : i32
    return %arg0, %c0_i32, %c0_i32_0 : i32, i32, i32
  }
  func.func @transform_12(%arg0: i32) -> (i32, i32, i32) {
    %c0_i32 = arith.constant 0 : i32
    %c0_i32_0 = arith.constant 0 : i32
    %c0_i32_1 = arith.constant 0 : i32
    return %arg0, %c0_i32, %c0_i32_0 : i32, i32, i32
  }
}

module attributes {stable_mosaic.version = 11 : i64} {
  func.func @_recon_kernel(%arg0: i32, %arg1: memref<1x64x64xbf16, #tpu.memory_space<vmem>>, %arg2: memref<64x32xf32, #tpu.memory_space<vmem>>, %arg3: memref<1x32xf32, #tpu.memory_space<vmem>>, %arg4: memref<64x3xf32, #tpu.memory_space<vmem>>, %arg5: memref<32x16xf32, #tpu.memory_space<vmem>>, %arg6: memref<1x16xf32, #tpu.memory_space<vmem>>, %arg7: memref<1x16xf32, #tpu.memory_space<vmem>>, %arg8: memref<1x16xf32, #tpu.memory_space<vmem>>, %arg9: memref<64x64xbf16, #tpu.memory_space<vmem>>, %arg10: memref<64x64xbf16, #tpu.memory_space<vmem>>, %arg11: memref<64x16xf32, #tpu.memory_space<vmem>>, %arg12: memref<64x1xf32, #tpu.memory_space<vmem>>, %arg13: memref<1x1xf32, #tpu.memory_space<vmem>>) attributes {dimension_semantics = [#tpu.dimension_semantics<arbitrary>], iteration_bounds = array<i64: 1>, scalar_prefetch = 0 : i64, scratch_operands = 0 : i64, tpu.core_type = #tpu.core_type<tc>, window_params = [{transform_indices = @transform_0, window_bounds = array<i64: 1, 64, 64>}, {pipeline_mode = #tpu.pipeline_mode<synchronous>, transform_indices = @transform_1, window_bounds = array<i64: 64, 32>}, {pipeline_mode = #tpu.pipeline_mode<synchronous>, transform_indices = @transform_2, window_bounds = array<i64: 1, 32>}, {pipeline_mode = #tpu.pipeline_mode<synchronous>, transform_indices = @transform_3, window_bounds = array<i64: 64, 3>}, {pipeline_mode = #tpu.pipeline_mode<synchronous>, transform_indices = @transform_4, window_bounds = array<i64: 32, 16>}, {pipeline_mode = #tpu.pipeline_mode<synchronous>, transform_indices = @transform_5, window_bounds = array<i64: 1, 16>}, {pipeline_mode = #tpu.pipeline_mode<synchronous>, transform_indices = @transform_6, window_bounds = array<i64: 1, 16>}, {pipeline_mode = #tpu.pipeline_mode<synchronous>, transform_indices = @transform_7, window_bounds = array<i64: 1, 16>}, {pipeline_mode = #tpu.pipeline_mode<synchronous>, transform_indices = @transform_8, window_bounds = array<i64: 64, 64>}, {pipeline_mode = #tpu.pipeline_mode<synchronous>, transform_indices = @transform_9, window_bounds = array<i64: 64, 64>}, {pipeline_mode = #tpu.pipeline_mode<synchronous>, transform_indices = @transform_10, window_bounds = array<i64: 64, 16>}, {pipeline_mode = #tpu.pipeline_mode<synchronous>, transform_indices = @transform_11, window_bounds = array<i64: 64, 1>}, {pipeline_mode = #tpu.pipeline_mode<synchronous>, transform_indices = @transform_12, window_bounds = array<i64: 1, 1>}]} {
    %c0 = arith.constant 0 : index
    %c0_0 = arith.constant 0 : index
    %0 = vector.load %arg10[%c0, %c0_0] : memref<64x64xbf16, #tpu.memory_space<vmem>>, vector<64x64xbf16>
    %c0_1 = arith.constant 0 : index
    %c0_2 = arith.constant 0 : index
    %1 = vector.load %arg9[%c0_1, %c0_2] : memref<64x64xbf16, #tpu.memory_space<vmem>>, vector<64x64xbf16>
    %2 = arith.extf %1 : vector<64x64xbf16> to vector<64x64xf32>
    %c0_3 = arith.constant 0 : index
    %c0_4 = arith.constant 0 : index
    %c0_5 = arith.constant 0 : index
    %3 = vector.load %arg1[%c0_3, %c0_4, %c0_5] : memref<1x64x64xbf16, #tpu.memory_space<vmem>>, vector<1x64x64xbf16>
    %4 = vector.shape_cast %3 : vector<1x64x64xbf16> to vector<64x64xbf16>
    %c0_6 = arith.constant 0 : index
    %c0_7 = arith.constant 0 : index
    %5 = vector.load %arg2[%c0_6, %c0_7] : memref<64x32xf32, #tpu.memory_space<vmem>>, vector<64x32xf32>
    %6 = arith.truncf %5 : vector<64x32xf32> to vector<64x32xbf16>
    %cst = arith.constant dense<0.000000e+00> : vector<64x32xf32>
    %7 = tpu.matmul %4, %6, %cst {dimension_numbers = #tpu.dot_dimension_numbers<[1], [0], [0], [1], [0, 0, 1, 1], [], []>} : vector<64x64xbf16>, vector<64x32xbf16>, vector<64x32xf32> -> vector<64x32xf32>
    %c0_8 = arith.constant 0 : index
    %c0_9 = arith.constant 0 : index
    %8 = vector.load %arg3[%c0_8, %c0_9] : memref<1x32xf32, #tpu.memory_space<vmem>>, vector<1x32xf32>
    %c0_10 = arith.constant 0 : index
    %c0_11 = arith.constant 0 : index
    %9 = vector.load %arg4[%c0_10, %c0_11] : memref<64x3xf32, #tpu.memory_space<vmem>>, vector<64x1xf32>
    %cst_12 = arith.constant 0.000000e+00 : f32
    %10 = vector.broadcast %cst_12 : f32 to vector<64x1xf32>
    %11 = arith.cmpf ogt, %9, %10 : vector<64x1xf32>
    %12 = vector.shape_cast %11 : vector<64x1xi1> to vector<64x1xi1>
    %13 = vector.broadcast %12 : vector<64x1xi1> to vector<64x32xi1>
    %14 = vector.shape_cast %8 : vector<1x32xf32> to vector<1x32xf32>
    %15 = vector.broadcast %14 : vector<1x32xf32> to vector<64x32xf32>
    %16 = arith.select %13, %15, %7 : vector<64x32xi1>, vector<64x32xf32>
    %c0_13 = arith.constant 0 : index
    %c1 = arith.constant 1 : index
    %17 = vector.load %arg4[%c0_13, %c1] : memref<64x3xf32, #tpu.memory_space<vmem>>, vector<64x1xf32>
    %cst_14 = arith.constant 0.000000e+00 : f32
    %18 = vector.broadcast %cst_14 : f32 to vector<64x1xf32>
    %19 = arith.cmpf ogt, %17, %18 : vector<64x1xf32>
    %20 = vector.shape_cast %19 : vector<64x1xi1> to vector<64x1xi1>
    %21 = vector.broadcast %20 : vector<64x1xi1> to vector<64x32xi1>
    %22 = vector.shape_cast %8 : vector<1x32xf32> to vector<1x32xf32>
    %23 = vector.broadcast %22 : vector<1x32xf32> to vector<64x32xf32>
    %24 = arith.select %21, %23, %7 : vector<64x32xi1>, vector<64x32xf32>
    %c0_15 = arith.constant 0 : index
    %c2 = arith.constant 2 : index
    %25 = vector.load %arg4[%c0_15, %c2] : memref<64x3xf32, #tpu.memory_space<vmem>>, vector<64x1xf32>
    %cst_16 = arith.constant 0.000000e+00 : f32
    %26 = vector.broadcast %cst_16 : f32 to vector<64x1xf32>
    %27 = arith.cmpf ogt, %25, %26 : vector<64x1xf32>
    %28 = vector.shape_cast %27 : vector<64x1xi1> to vector<64x1xi1>
    %29 = vector.broadcast %28 : vector<64x1xi1> to vector<64x32xi1>
    %30 = vector.shape_cast %8 : vector<1x32xf32> to vector<1x32xf32>
    %31 = vector.broadcast %30 : vector<1x32xf32> to vector<64x32xf32>
    %32 = arith.select %29, %31, %7 : vector<64x32xi1>, vector<64x32xf32>
    %33 = tpu.concatenate %16, %24, %32 in 0 : vector<64x32xf32>, vector<64x32xf32>, vector<64x32xf32> -> vector<192x32xf32>
    %c0_17 = arith.constant 0 : index
    %c0_18 = arith.constant 0 : index
    %34 = vector.load %arg5[%c0_17, %c0_18] : memref<32x16xf32, #tpu.memory_space<vmem>>, vector<32x16xf32>
    %35 = arith.truncf %33 : vector<192x32xf32> to vector<192x32xbf16>
    %36 = arith.truncf %34 : vector<32x16xf32> to vector<32x16xbf16>
    %cst_19 = arith.constant dense<0.000000e+00> : vector<192x16xf32>
    %37 = tpu.matmul %35, %36, %cst_19 {dimension_numbers = #tpu.dot_dimension_numbers<[1], [0], [0], [1], [0, 0, 1, 1], [], []>} : vector<192x32xbf16>, vector<32x16xbf16>, vector<192x16xf32> -> vector<192x16xf32>
    %c0_20 = arith.constant 0 : index
    %c0_21 = arith.constant 0 : index
    %38 = vector.load %arg6[%c0_20, %c0_21] : memref<1x16xf32, #tpu.memory_space<vmem>>, vector<1x16xf32>
    %c0_22 = arith.constant 0 : index
    %c0_23 = arith.constant 0 : index
    %39 = vector.load %arg7[%c0_22, %c0_23] : memref<1x16xf32, #tpu.memory_space<vmem>>, vector<1x16xf32>
    %c0_24 = arith.constant 0 : index
    %c0_25 = arith.constant 0 : index
    %40 = vector.load %arg8[%c0_24, %c0_25] : memref<1x16xf32, #tpu.memory_space<vmem>>, vector<1x16xf32>
    %c0_26 = arith.constant 0 : index
    %c0_27 = arith.constant 0 : index
    %41 = vector.load %arg11[%c0_26, %c0_27] : memref<64x16xf32, #tpu.memory_space<vmem>>, vector<64x16xf32>
    %42 = arith.mulf %41, %41 : vector<64x16xf32>
    %cst_28 = arith.constant dense<0.000000e+00> : vector<64xf32>
    %43 = vector.multi_reduction <add>, %42, %cst_28 [1] : vector<64x16xf32> to vector<64xf32>
    %44 = vector.shape_cast %43 : vector<64xf32> to vector<64x1xf32>
    %cst_29 = arith.constant 1.000000e-24 : f32
    %45 = vector.broadcast %cst_29 : f32 to vector<64x1xf32>
    %46 = arith.maximumf %44, %45 : vector<64x1xf32>
    %47 = math.rsqrt %46 : vector<64x1xf32>
    %48 = vector.broadcast %47 : vector<64x1xf32> to vector<64x16xf32>
    %49 = arith.mulf %41, %48 : vector<64x16xf32>
    %c0_30 = arith.constant 0 : index
    %c0_31 = arith.constant 0 : index
    %50 = vector.load %arg12[%c0_30, %c0_31] : memref<64x1xf32, #tpu.memory_space<vmem>>, vector<64x1xf32>
    %cst_32 = arith.constant 0.000000e+00 : f32
    %51 = vector.broadcast %cst_32 : f32 to vector<1x1xf32>
    %52 = vector.extract_strided_slice %37 {offsets = [0, 0], sizes = [64, 16], strides = [1, 1]} : vector<192x16xf32> to vector<64x16xf32>
    %53 = vector.broadcast %38 : vector<1x16xf32> to vector<64x16xf32>
    %54 = arith.mulf %52, %53 : vector<64x16xf32>
    %cst_33 = arith.constant dense<0.000000e+00> : vector<64xf32>
    %55 = vector.multi_reduction <add>, %54, %cst_33 [1] : vector<64x16xf32> to vector<64xf32>
    %56 = vector.shape_cast %55 : vector<64xf32> to vector<64x1xf32>
    %57 = tpu.transpose %56, [1, 0] : vector<64x1xf32> -> vector<1x64xf32>
    %58 = vector.broadcast %39 : vector<1x16xf32> to vector<64x16xf32>
    %59 = arith.mulf %52, %58 : vector<64x16xf32>
    %cst_34 = arith.constant dense<0.000000e+00> : vector<64xf32>
    %60 = vector.multi_reduction <add>, %59, %cst_34 [1] : vector<64x16xf32> to vector<64xf32>
    %61 = vector.shape_cast %60 : vector<64xf32> to vector<64x1xf32>
    %62 = vector.broadcast %61 : vector<64x1xf32> to vector<64x64xf32>
    %63 = vector.broadcast %57 : vector<1x64xf32> to vector<64x64xf32>
    %64 = arith.addf %62, %63 : vector<64x64xf32>
    %65 = arith.addf %64, %2 : vector<64x64xf32>
    %cst_35 = arith.constant 0.000000e+00 : f32
    %66 = vector.broadcast %cst_35 : f32 to vector<64x64xf32>
    %67 = arith.cmpf ogt, %65, %66 : vector<64x64xf32>
    %cst_36 = arith.constant 2.000000e-01 : f32
    %68 = vector.broadcast %cst_36 : f32 to vector<64x64xf32>
    %69 = arith.mulf %68, %65 : vector<64x64xf32>
    %70 = arith.select %67, %65, %69 : vector<64x64xi1>, vector<64x64xf32>
    %cst_37 = arith.constant 0.000000e+00 : bf16
    %71 = vector.broadcast %cst_37 : bf16 to vector<64x64xbf16>
    %72 = arith.cmpf ogt, %0, %71 : vector<64x64xbf16>
    %cst_38 = arith.constant -1.000000e+30 : f32
    %73 = vector.broadcast %cst_38 : f32 to vector<64x64xf32>
    %74 = arith.select %72, %70, %73 : vector<64x64xi1>, vector<64x64xf32>
    %cst_39 = arith.constant dense<0xFF800000> : vector<64xf32>
    %75 = vector.multi_reduction <maximumf>, %74, %cst_39 [1] : vector<64x64xf32> to vector<64xf32>
    %76 = vector.shape_cast %75 : vector<64xf32> to vector<64x1xf32>
    %77 = vector.broadcast %76 : vector<64x1xf32> to vector<64x64xf32>
    %78 = arith.subf %74, %77 : vector<64x64xf32>
    %79 = math.exp %78 : vector<64x64xf32>
    %cst_40 = arith.constant dense<0.000000e+00> : vector<64xf32>
    %80 = vector.multi_reduction <add>, %79, %cst_40 [1] : vector<64x64xf32> to vector<64xf32>
    %81 = vector.shape_cast %80 : vector<64xf32> to vector<64x1xf32>
    %cst_41 = arith.constant 9.99999996E-13 : f32
    %82 = vector.broadcast %cst_41 : f32 to vector<64x1xf32>
    %83 = arith.maximumf %81, %82 : vector<64x1xf32>
    %84 = tpu.reciprocal %83 {approx = true} : vector<64x1xf32> -> vector<64x1xf32>
    %85 = vector.broadcast %84 : vector<64x1xf32> to vector<64x64xf32>
    %86 = arith.mulf %79, %85 : vector<64x64xf32>
    %87 = arith.truncf %86 : vector<64x64xf32> to vector<64x64xbf16>
    %88 = arith.truncf %52 : vector<64x16xf32> to vector<64x16xbf16>
    %cst_42 = arith.constant dense<0.000000e+00> : vector<64x16xf32>
    %89 = tpu.matmul %87, %88, %cst_42 {dimension_numbers = #tpu.dot_dimension_numbers<[1], [0], [0], [1], [0, 0, 1, 1], [], []>} : vector<64x64xbf16>, vector<64x16xbf16>, vector<64x16xf32> -> vector<64x16xf32>
    %90 = vector.broadcast %40 : vector<1x16xf32> to vector<64x16xf32>
    %91 = arith.addf %89, %90 : vector<64x16xf32>
    %92 = arith.mulf %91, %91 : vector<64x16xf32>
    %cst_43 = arith.constant dense<0.000000e+00> : vector<64xf32>
    %93 = vector.multi_reduction <add>, %92, %cst_43 [1] : vector<64x16xf32> to vector<64xf32>
    %94 = vector.shape_cast %93 : vector<64xf32> to vector<64x1xf32>
    %cst_44 = arith.constant 1.000000e-24 : f32
    %95 = vector.broadcast %cst_44 : f32 to vector<64x1xf32>
    %96 = arith.maximumf %94, %95 : vector<64x1xf32>
    %97 = math.rsqrt %96 : vector<64x1xf32>
    %98 = vector.broadcast %97 : vector<64x1xf32> to vector<64x16xf32>
    %99 = arith.mulf %91, %98 : vector<64x16xf32>
    %100 = arith.mulf %49, %99 : vector<64x16xf32>
    %cst_45 = arith.constant dense<0.000000e+00> : vector<64xf32>
    %101 = vector.multi_reduction <add>, %100, %cst_45 [1] : vector<64x16xf32> to vector<64xf32>
    %102 = vector.shape_cast %101 : vector<64xf32> to vector<64x1xf32>
    %cst_46 = arith.constant 1.000000e+00 : f32
    %103 = vector.broadcast %cst_46 : f32 to vector<64x1xf32>
    %104 = arith.subf %103, %102 : vector<64x1xf32>
    %105 = arith.mulf %104, %104 : vector<64x1xf32>
    %106 = arith.mulf %105, %50 : vector<64x1xf32>
    %cst_47 = arith.constant dense<0.000000e+00> : vector<1xf32>
    %107 = vector.multi_reduction <add>, %106, %cst_47 [0] : vector<64x1xf32> to vector<1xf32>
    %108 = vector.shape_cast %107 : vector<1xf32> to vector<1x1xf32>
    %cst_48 = arith.constant 3.125000e-02 : f32
    %109 = vector.broadcast %cst_48 : f32 to vector<1x1xf32>
    %110 = arith.mulf %108, %109 : vector<1x1xf32>
    %111 = arith.addf %51, %110 : vector<1x1xf32>
    %112 = vector.extract_strided_slice %37 {offsets = [64, 0], sizes = [64, 16], strides = [1, 1]} : vector<192x16xf32> to vector<64x16xf32>
    %113 = vector.broadcast %38 : vector<1x16xf32> to vector<64x16xf32>
    %114 = arith.mulf %112, %113 : vector<64x16xf32>
    %cst_49 = arith.constant dense<0.000000e+00> : vector<64xf32>
    %115 = vector.multi_reduction <add>, %114, %cst_49 [1] : vector<64x16xf32> to vector<64xf32>
    %116 = vector.shape_cast %115 : vector<64xf32> to vector<64x1xf32>
    %117 = tpu.transpose %116, [1, 0] : vector<64x1xf32> -> vector<1x64xf32>
    %118 = vector.broadcast %39 : vector<1x16xf32> to vector<64x16xf32>
    %119 = arith.mulf %112, %118 : vector<64x16xf32>
    %cst_50 = arith.constant dense<0.000000e+00> : vector<64xf32>
    %120 = vector.multi_reduction <add>, %119, %cst_50 [1] : vector<64x16xf32> to vector<64xf32>
    %121 = vector.shape_cast %120 : vector<64xf32> to vector<64x1xf32>
    %122 = vector.broadcast %121 : vector<64x1xf32> to vector<64x64xf32>
    %123 = vector.broadcast %117 : vector<1x64xf32> to vector<64x64xf32>
    %124 = arith.addf %122, %123 : vector<64x64xf32>
    %125 = arith.addf %124, %2 : vector<64x64xf32>
    %cst_51 = arith.constant 0.000000e+00 : f32
    %126 = vector.broadcast %cst_51 : f32 to vector<64x64xf32>
    %127 = arith.cmpf ogt, %125, %126 : vector<64x64xf32>
    %cst_52 = arith.constant 2.000000e-01 : f32
    %128 = vector.broadcast %cst_52 : f32 to vector<64x64xf32>
    %129 = arith.mulf %128, %125 : vector<64x64xf32>
    %130 = arith.select %127, %125, %129 : vector<64x64xi1>, vector<64x64xf32>
    %cst_53 = arith.constant 0.000000e+00 : bf16
    %131 = vector.broadcast %cst_53 : bf16 to vector<64x64xbf16>
    %132 = arith.cmpf ogt, %0, %131 : vector<64x64xbf16>
    %cst_54 = arith.constant -1.000000e+30 : f32
    %133 = vector.broadcast %cst_54 : f32 to vector<64x64xf32>
    %134 = arith.select %132, %130, %133 : vector<64x64xi1>, vector<64x64xf32>
    %cst_55 = arith.constant dense<0xFF800000> : vector<64xf32>
    %135 = vector.multi_reduction <maximumf>, %134, %cst_55 [1] : vector<64x64xf32> to vector<64xf32>
    %136 = vector.shape_cast %135 : vector<64xf32> to vector<64x1xf32>
    %137 = vector.broadcast %136 : vector<64x1xf32> to vector<64x64xf32>
    %138 = arith.subf %134, %137 : vector<64x64xf32>
    %139 = math.exp %138 : vector<64x64xf32>
    %cst_56 = arith.constant dense<0.000000e+00> : vector<64xf32>
    %140 = vector.multi_reduction <add>, %139, %cst_56 [1] : vector<64x64xf32> to vector<64xf32>
    %141 = vector.shape_cast %140 : vector<64xf32> to vector<64x1xf32>
    %cst_57 = arith.constant 9.99999996E-13 : f32
    %142 = vector.broadcast %cst_57 : f32 to vector<64x1xf32>
    %143 = arith.maximumf %141, %142 : vector<64x1xf32>
    %144 = tpu.reciprocal %143 {approx = true} : vector<64x1xf32> -> vector<64x1xf32>
    %145 = vector.broadcast %144 : vector<64x1xf32> to vector<64x64xf32>
    %146 = arith.mulf %139, %145 : vector<64x64xf32>
    %147 = arith.truncf %146 : vector<64x64xf32> to vector<64x64xbf16>
    %148 = arith.truncf %112 : vector<64x16xf32> to vector<64x16xbf16>
    %cst_58 = arith.constant dense<0.000000e+00> : vector<64x16xf32>
    %149 = tpu.matmul %147, %148, %cst_58 {dimension_numbers = #tpu.dot_dimension_numbers<[1], [0], [0], [1], [0, 0, 1, 1], [], []>} : vector<64x64xbf16>, vector<64x16xbf16>, vector<64x16xf32> -> vector<64x16xf32>
    %150 = vector.broadcast %40 : vector<1x16xf32> to vector<64x16xf32>
    %151 = arith.addf %149, %150 : vector<64x16xf32>
    %152 = arith.mulf %151, %151 : vector<64x16xf32>
    %cst_59 = arith.constant dense<0.000000e+00> : vector<64xf32>
    %153 = vector.multi_reduction <add>, %152, %cst_59 [1] : vector<64x16xf32> to vector<64xf32>
    %154 = vector.shape_cast %153 : vector<64xf32> to vector<64x1xf32>
    %cst_60 = arith.constant 1.000000e-24 : f32
    %155 = vector.broadcast %cst_60 : f32 to vector<64x1xf32>
    %156 = arith.maximumf %154, %155 : vector<64x1xf32>
    %157 = math.rsqrt %156 : vector<64x1xf32>
    %158 = vector.broadcast %157 : vector<64x1xf32> to vector<64x16xf32>
    %159 = arith.mulf %151, %158 : vector<64x16xf32>
    %160 = arith.mulf %49, %159 : vector<64x16xf32>
    %cst_61 = arith.constant dense<0.000000e+00> : vector<64xf32>
    %161 = vector.multi_reduction <add>, %160, %cst_61 [1] : vector<64x16xf32> to vector<64xf32>
    %162 = vector.shape_cast %161 : vector<64xf32> to vector<64x1xf32>
    %cst_62 = arith.constant 1.000000e+00 : f32
    %163 = vector.broadcast %cst_62 : f32 to vector<64x1xf32>
    %164 = arith.subf %163, %162 : vector<64x1xf32>
    %165 = arith.mulf %164, %164 : vector<64x1xf32>
    %166 = arith.mulf %165, %50 : vector<64x1xf32>
    %cst_63 = arith.constant dense<0.000000e+00> : vector<1xf32>
    %167 = vector.multi_reduction <add>, %166, %cst_63 [0] : vector<64x1xf32> to vector<1xf32>
    %168 = vector.shape_cast %167 : vector<1xf32> to vector<1x1xf32>
    %cst_64 = arith.constant 3.125000e-02 : f32
    %169 = vector.broadcast %cst_64 : f32 to vector<1x1xf32>
    %170 = arith.mulf %168, %169 : vector<1x1xf32>
    %171 = arith.addf %111, %170 : vector<1x1xf32>
    %172 = vector.extract_strided_slice %37 {offsets = [128, 0], sizes = [64, 16], strides = [1, 1]} : vector<192x16xf32> to vector<64x16xf32>
    %173 = vector.broadcast %38 : vector<1x16xf32> to vector<64x16xf32>
    %174 = arith.mulf %172, %173 : vector<64x16xf32>
    %cst_65 = arith.constant dense<0.000000e+00> : vector<64xf32>
    %175 = vector.multi_reduction <add>, %174, %cst_65 [1] : vector<64x16xf32> to vector<64xf32>
    %176 = vector.shape_cast %175 : vector<64xf32> to vector<64x1xf32>
    %177 = tpu.transpose %176, [1, 0] : vector<64x1xf32> -> vector<1x64xf32>
    %178 = vector.broadcast %39 : vector<1x16xf32> to vector<64x16xf32>
    %179 = arith.mulf %172, %178 : vector<64x16xf32>
    %cst_66 = arith.constant dense<0.000000e+00> : vector<64xf32>
    %180 = vector.multi_reduction <add>, %179, %cst_66 [1] : vector<64x16xf32> to vector<64xf32>
    %181 = vector.shape_cast %180 : vector<64xf32> to vector<64x1xf32>
    %182 = vector.broadcast %181 : vector<64x1xf32> to vector<64x64xf32>
    %183 = vector.broadcast %177 : vector<1x64xf32> to vector<64x64xf32>
    %184 = arith.addf %182, %183 : vector<64x64xf32>
    %185 = arith.addf %184, %2 : vector<64x64xf32>
    %cst_67 = arith.constant 0.000000e+00 : f32
    %186 = vector.broadcast %cst_67 : f32 to vector<64x64xf32>
    %187 = arith.cmpf ogt, %185, %186 : vector<64x64xf32>
    %cst_68 = arith.constant 2.000000e-01 : f32
    %188 = vector.broadcast %cst_68 : f32 to vector<64x64xf32>
    %189 = arith.mulf %188, %185 : vector<64x64xf32>
    %190 = arith.select %187, %185, %189 : vector<64x64xi1>, vector<64x64xf32>
    %cst_69 = arith.constant 0.000000e+00 : bf16
    %191 = vector.broadcast %cst_69 : bf16 to vector<64x64xbf16>
    %192 = arith.cmpf ogt, %0, %191 : vector<64x64xbf16>
    %cst_70 = arith.constant -1.000000e+30 : f32
    %193 = vector.broadcast %cst_70 : f32 to vector<64x64xf32>
    %194 = arith.select %192, %190, %193 : vector<64x64xi1>, vector<64x64xf32>
    %cst_71 = arith.constant dense<0xFF800000> : vector<64xf32>
    %195 = vector.multi_reduction <maximumf>, %194, %cst_71 [1] : vector<64x64xf32> to vector<64xf32>
    %196 = vector.shape_cast %195 : vector<64xf32> to vector<64x1xf32>
    %197 = vector.broadcast %196 : vector<64x1xf32> to vector<64x64xf32>
    %198 = arith.subf %194, %197 : vector<64x64xf32>
    %199 = math.exp %198 : vector<64x64xf32>
    %cst_72 = arith.constant dense<0.000000e+00> : vector<64xf32>
    %200 = vector.multi_reduction <add>, %199, %cst_72 [1] : vector<64x64xf32> to vector<64xf32>
    %201 = vector.shape_cast %200 : vector<64xf32> to vector<64x1xf32>
    %cst_73 = arith.constant 9.99999996E-13 : f32
    %202 = vector.broadcast %cst_73 : f32 to vector<64x1xf32>
    %203 = arith.maximumf %201, %202 : vector<64x1xf32>
    %204 = tpu.reciprocal %203 {approx = true} : vector<64x1xf32> -> vector<64x1xf32>
    %205 = vector.broadcast %204 : vector<64x1xf32> to vector<64x64xf32>
    %206 = arith.mulf %199, %205 : vector<64x64xf32>
    %207 = arith.truncf %206 : vector<64x64xf32> to vector<64x64xbf16>
    %208 = arith.truncf %172 : vector<64x16xf32> to vector<64x16xbf16>
    %cst_74 = arith.constant dense<0.000000e+00> : vector<64x16xf32>
    %209 = tpu.matmul %207, %208, %cst_74 {dimension_numbers = #tpu.dot_dimension_numbers<[1], [0], [0], [1], [0, 0, 1, 1], [], []>} : vector<64x64xbf16>, vector<64x16xbf16>, vector<64x16xf32> -> vector<64x16xf32>
    %210 = vector.broadcast %40 : vector<1x16xf32> to vector<64x16xf32>
    %211 = arith.addf %209, %210 : vector<64x16xf32>
    %212 = arith.mulf %211, %211 : vector<64x16xf32>
    %cst_75 = arith.constant dense<0.000000e+00> : vector<64xf32>
    %213 = vector.multi_reduction <add>, %212, %cst_75 [1] : vector<64x16xf32> to vector<64xf32>
    %214 = vector.shape_cast %213 : vector<64xf32> to vector<64x1xf32>
    %cst_76 = arith.constant 1.000000e-24 : f32
    %215 = vector.broadcast %cst_76 : f32 to vector<64x1xf32>
    %216 = arith.maximumf %214, %215 : vector<64x1xf32>
    %217 = math.rsqrt %216 : vector<64x1xf32>
    %218 = vector.broadcast %217 : vector<64x1xf32> to vector<64x16xf32>
    %219 = arith.mulf %211, %218 : vector<64x16xf32>
    %220 = arith.mulf %49, %219 : vector<64x16xf32>
    %cst_77 = arith.constant dense<0.000000e+00> : vector<64xf32>
    %221 = vector.multi_reduction <add>, %220, %cst_77 [1] : vector<64x16xf32> to vector<64xf32>
    %222 = vector.shape_cast %221 : vector<64xf32> to vector<64x1xf32>
    %cst_78 = arith.constant 1.000000e+00 : f32
    %223 = vector.broadcast %cst_78 : f32 to vector<64x1xf32>
    %224 = arith.subf %223, %222 : vector<64x1xf32>
    %225 = arith.mulf %224, %224 : vector<64x1xf32>
    %226 = arith.mulf %225, %50 : vector<64x1xf32>
    %cst_79 = arith.constant dense<0.000000e+00> : vector<1xf32>
    %227 = vector.multi_reduction <add>, %226, %cst_79 [0] : vector<64x1xf32> to vector<1xf32>
    %228 = vector.shape_cast %227 : vector<1xf32> to vector<1x1xf32>
    %cst_80 = arith.constant 3.125000e-02 : f32
    %229 = vector.broadcast %cst_80 : f32 to vector<1x1xf32>
    %230 = arith.mulf %228, %229 : vector<1x1xf32>
    %231 = arith.addf %171, %230 : vector<1x1xf32>
    %c0_81 = arith.constant 0 : index
    %c0_82 = arith.constant 0 : index
    %232 = vector.load %arg13[%c0_81, %c0_82] : memref<1x1xf32, #tpu.memory_space<vmem>>, vector<1x1xf32>
    tpu.vector_store %arg13[%c0_81, %c0_82], %231 {strides = array<i32>} : memref<1x1xf32, #tpu.memory_space<vmem>>, vector<1x1xf32>,
    return
  }
  func.func @transform_0(%arg0: i32) -> (i32, i32, i32) {
    %c0_i32 = arith.constant 0 : i32
    %c0_i32_0 = arith.constant 0 : i32
    %c0_i32_1 = arith.constant 0 : i32
    %c0_i32_2 = arith.constant 0 : i32
    return %c0_i32, %c0_i32_0, %c0_i32_1 : i32, i32, i32
  }
  func.func @transform_1(%arg0: i32) -> (i32, i32) {
    %c0_i32 = arith.constant 0 : i32
    %c0_i32_0 = arith.constant 0 : i32
    %c0_i32_1 = arith.constant 0 : i32
    return %c0_i32, %c0_i32_0 : i32, i32
  }
  func.func @transform_2(%arg0: i32) -> (i32, i32) {
    %c0_i32 = arith.constant 0 : i32
    %c0_i32_0 = arith.constant 0 : i32
    %c0_i32_1 = arith.constant 0 : i32
    return %c0_i32, %c0_i32_0 : i32, i32
  }
  func.func @transform_3(%arg0: i32) -> (i32, i32) {
    %c0_i32 = arith.constant 0 : i32
    %c0_i32_0 = arith.constant 0 : i32
    %c0_i32_1 = arith.constant 0 : i32
    return %c0_i32, %c0_i32_0 : i32, i32
  }
  func.func @transform_4(%arg0: i32) -> (i32, i32) {
    %c0_i32 = arith.constant 0 : i32
    %c0_i32_0 = arith.constant 0 : i32
    %c0_i32_1 = arith.constant 0 : i32
    return %c0_i32, %c0_i32_0 : i32, i32
  }
  func.func @transform_5(%arg0: i32) -> (i32, i32) {
    %c0_i32 = arith.constant 0 : i32
    %c0_i32_0 = arith.constant 0 : i32
    %c0_i32_1 = arith.constant 0 : i32
    return %c0_i32, %c0_i32_0 : i32, i32
  }
  func.func @transform_6(%arg0: i32) -> (i32, i32) {
    %c0_i32 = arith.constant 0 : i32
    %c0_i32_0 = arith.constant 0 : i32
    %c0_i32_1 = arith.constant 0 : i32
    return %c0_i32, %c0_i32_0 : i32, i32
  }
  func.func @transform_7(%arg0: i32) -> (i32, i32) {
    %c0_i32 = arith.constant 0 : i32
    %c0_i32_0 = arith.constant 0 : i32
    %c0_i32_1 = arith.constant 0 : i32
    return %c0_i32, %c0_i32_0 : i32, i32
  }
  func.func @transform_8(%arg0: i32) -> (i32, i32) {
    %c0_i32 = arith.constant 0 : i32
    %c0_i32_0 = arith.constant 0 : i32
    %c0_i32_1 = arith.constant 0 : i32
    return %c0_i32, %c0_i32_0 : i32, i32
  }
  func.func @transform_9(%arg0: i32) -> (i32, i32) {
    %c0_i32 = arith.constant 0 : i32
    %c0_i32_0 = arith.constant 0 : i32
    %c0_i32_1 = arith.constant 0 : i32
    return %c0_i32, %c0_i32_0 : i32, i32
  }
  func.func @transform_10(%arg0: i32) -> (i32, i32) {
    %c0_i32 = arith.constant 0 : i32
    %c0_i32_0 = arith.constant 0 : i32
    %c0_i32_1 = arith.constant 0 : i32
    return %c0_i32, %c0_i32_0 : i32, i32
  }
  func.func @transform_11(%arg0: i32) -> (i32, i32) {
    %c0_i32 = arith.constant 0 : i32
    %c0_i32_0 = arith.constant 0 : i32
    %c0_i32_1 = arith.constant 0 : i32
    return %c0_i32, %c0_i32_0 : i32, i32
  }
  func.func @transform_12(%arg0: i32) -> (i32, i32) {
    %c0_i32 = arith.constant 0 : i32
    %c0_i32_0 = arith.constant 0 : i32
    %c0_i32_1 = arith.constant 0 : i32
    return %c0_i32, %c0_i32_0 : i32, i32
  }
}

module attributes {stable_mosaic.version = 11 : i64} {
  func.func @_edge_bce_kernel(%arg0: i32, %arg1: memref<128x128xbf16, #tpu.memory_space<vmem>>, %arg2: memref<128x1xf32, #tpu.memory_space<vmem>>, %arg3: memref<128x1xf32, #tpu.memory_space<vmem>>, %arg4: memref<128x32xf32, #tpu.memory_space<vmem>>, %arg5: memref<1x32xf32, #tpu.memory_space<vmem>>, %arg6: memref<1x32xf32, #tpu.memory_space<vmem>>, %arg7: memref<1x1xf32, #tpu.memory_space<vmem>>, %arg8: memref<1x1xf32, #tpu.memory_space<vmem>>) attributes {dimension_semantics = [#tpu.dimension_semantics<arbitrary>], iteration_bounds = array<i64: 1>, scalar_prefetch = 0 : i64, scratch_operands = 0 : i64, tpu.core_type = #tpu.core_type<tc>, window_params = [{transform_indices = @transform_0, window_bounds = array<i64: 128, 128>}, {transform_indices = @transform_1, window_bounds = array<i64: 128, 1>}, {transform_indices = @transform_2, window_bounds = array<i64: 128, 1>}, {pipeline_mode = #tpu.pipeline_mode<synchronous>, transform_indices = @transform_3, window_bounds = array<i64: 128, 32>}, {pipeline_mode = #tpu.pipeline_mode<synchronous>, transform_indices = @transform_4, window_bounds = array<i64: 1, 32>}, {pipeline_mode = #tpu.pipeline_mode<synchronous>, transform_indices = @transform_5, window_bounds = array<i64: 1, 32>}, {pipeline_mode = #tpu.pipeline_mode<synchronous>, transform_indices = @transform_6, window_bounds = array<i64: 1, 1>}, {pipeline_mode = #tpu.pipeline_mode<synchronous>, transform_indices = @transform_7, window_bounds = array<i64: 1, 1>}]} {
    %c0_i32 = arith.constant 0 : i32
    %0 = arith.cmpi eq, %arg0, %c0_i32 : i32
    %1 = arith.extui %0 : i1 to i32
    %c0_i32_0 = arith.constant 0 : i32
    %2 = arith.cmpi ne, %1, %c0_i32_0 : i32
    scf.if %2 {
      %cst_24 = arith.constant 0.000000e+00 : f32
      %41 = vector.broadcast %cst_24 : f32 to vector<1x1xf32>
      %c0_25 = arith.constant 0 : index
      %c0_26 = arith.constant 0 : index
      %42 = vector.load %arg8[%c0_25, %c0_26] : memref<1x1xf32, #tpu.memory_space<vmem>>, vector<1x1xf32>
      tpu.vector_store %arg8[%c0_25, %c0_26], %41 {strides = array<i32>} : memref<1x1xf32, #tpu.memory_space<vmem>>, vector<1x1xf32>,
    } else {
    }
    %c0 = arith.constant 0 : index
    %c0_1 = arith.constant 0 : index
    %3 = vector.load %arg1[%c0, %c0_1] : memref<128x128xbf16, #tpu.memory_space<vmem>>, vector<128x128xbf16>
    %c0_2 = arith.constant 0 : index
    %c0_3 = arith.constant 0 : index
    %4 = vector.load %arg4[%c0_2, %c0_3] : memref<128x32xf32, #tpu.memory_space<vmem>>, vector<128x32xf32>
    %5 = arith.truncf %4 : vector<128x32xf32> to vector<128x32xbf16>
    %cst = arith.constant dense<0.000000e+00> : vector<128x32xf32>
    %6 = tpu.matmul %3, %5, %cst {dimension_numbers = #tpu.dot_dimension_numbers<[1], [0], [0], [1], [0, 0, 1, 1], [], []>} : vector<128x128xbf16>, vector<128x32xbf16>, vector<128x32xf32> -> vector<128x32xf32>
    %c0_4 = arith.constant 0 : index
    %c0_5 = arith.constant 0 : index
    %7 = vector.load %arg5[%c0_4, %c0_5] : memref<1x32xf32, #tpu.memory_space<vmem>>, vector<1x32xf32>
    %8 = vector.broadcast %7 : vector<1x32xf32> to vector<128x32xf32>
    %9 = arith.addf %6, %8 : vector<128x32xf32>
    %cst_6 = arith.constant 0.000000e+00 : f32
    %10 = vector.broadcast %cst_6 : f32 to vector<128x32xf32>
    %11 = arith.cmpf ogt, %9, %10 : vector<128x32xf32>
    %cst_7 = arith.constant 2.000000e-01 : f32
    %12 = vector.broadcast %cst_7 : f32 to vector<128x32xf32>
    %13 = arith.mulf %12, %9 : vector<128x32xf32>
    %14 = arith.select %11, %9, %13 : vector<128x32xi1>, vector<128x32xf32>
    %c0_8 = arith.constant 0 : index
    %c0_9 = arith.constant 0 : index
    %15 = vector.load %arg6[%c0_8, %c0_9] : memref<1x32xf32, #tpu.memory_space<vmem>>, vector<1x32xf32>
    %16 = vector.broadcast %15 : vector<1x32xf32> to vector<128x32xf32>
    %17 = arith.mulf %14, %16 : vector<128x32xf32>
    %cst_10 = arith.constant dense<0.000000e+00> : vector<128xf32>
    %18 = vector.multi_reduction <add>, %17, %cst_10 [1] : vector<128x32xf32> to vector<128xf32>
    %19 = vector.shape_cast %18 : vector<128xf32> to vector<128x1xf32>
    %c0_11 = arith.constant 0 : index
    %c0_12 = arith.constant 0 : index
    %20 = vector.load %arg7[%c0_11, %c0_12] : memref<1x1xf32, #tpu.memory_space<vmem>>, vector<1x1xf32>
    %21 = vector.broadcast %20 : vector<1x1xf32> to vector<128x1xf32>
    %22 = arith.addf %19, %21 : vector<128x1xf32>
    %c0_13 = arith.constant 0 : index
    %c0_14 = arith.constant 0 : index
    %23 = vector.load %arg2[%c0_13, %c0_14] : memref<128x1xf32, #tpu.memory_space<vmem>>, vector<128x1xf32>
    %cst_15 = arith.constant 0.000000e+00 : f32
    %24 = vector.broadcast %cst_15 : f32 to vector<128x1xf32>
    %25 = arith.maximumf %22, %24 : vector<128x1xf32>
    %26 = math.absf %22 : vector<128x1xf32>
    %cst_16 = arith.constant 0.000000e+00 : f32
    %27 = vector.broadcast %cst_16 : f32 to vector<128x1xf32>
    %28 = arith.subf %27, %26 : vector<128x1xf32>
    %29 = math.exp %28 : vector<128x1xf32>
    %30 = math.log1p %29 : vector<128x1xf32>
    %31 = arith.addf %25, %30 : vector<128x1xf32>
    %c0_17 = arith.constant 0 : index
    %c0_18 = arith.constant 0 : index
    %32 = vector.load %arg8[%c0_17, %c0_18] : memref<1x1xf32, #tpu.memory_space<vmem>>, vector<1x1xf32>
    %33 = arith.mulf %23, %22 : vector<128x1xf32>
    %34 = arith.subf %31, %33 : vector<128x1xf32>
    %c0_19 = arith.constant 0 : index
    %c0_20 = arith.constant 0 : index
    %35 = vector.load %arg3[%c0_19, %c0_20] : memref<128x1xf32, #tpu.memory_space<vmem>>, vector<128x1xf32>
    %36 = arith.mulf %34, %35 : vector<128x1xf32>
    %cst_21 = arith.constant dense<0.000000e+00> : vector<1xf32>
    %37 = vector.multi_reduction <add>, %36, %cst_21 [0] : vector<128x1xf32> to vector<1xf32>
    %38 = vector.shape_cast %37 : vector<1xf32> to vector<1x1xf32>
    %39 = arith.addf %32, %38 : vector<1x1xf32>
    %c0_22 = arith.constant 0 : index
    %c0_23 = arith.constant 0 : index
    %40 = vector.load %arg8[%c0_22, %c0_23] : memref<1x1xf32, #tpu.memory_space<vmem>>, vector<1x1xf32>
    tpu.vector_store %arg8[%c0_22, %c0_23], %39 {strides = array<i32>} : memref<1x1xf32, #tpu.memory_space<vmem>>, vector<1x1xf32>,
    return
  }
  func.func @transform_0(%arg0: i32) -> (i32, i32) {
    %c0_i32 = arith.constant 0 : i32
    %c0_i32_0 = arith.constant 0 : i32
    return %arg0, %c0_i32 : i32, i32
  }
  func.func @transform_1(%arg0: i32) -> (i32, i32) {
    %c0_i32 = arith.constant 0 : i32
    %c0_i32_0 = arith.constant 0 : i32
    return %arg0, %c0_i32 : i32, i32
  }
  func.func @transform_2(%arg0: i32) -> (i32, i32) {
    %c0_i32 = arith.constant 0 : i32
    %c0_i32_0 = arith.constant 0 : i32
    return %arg0, %c0_i32 : i32, i32
  }
  func.func @transform_3(%arg0: i32) -> (i32, i32) {
    %c0_i32 = arith.constant 0 : i32
    %c0_i32_0 = arith.constant 0 : i32
    %c0_i32_1 = arith.constant 0 : i32
    return %c0_i32, %c0_i32_0 : i32, i32
  }
  func.func @transform_4(%arg0: i32) -> (i32, i32) {
    %c0_i32 = arith.constant 0 : i32
    %c0_i32_0 = arith.constant 0 : i32
    %c0_i32_1 = arith.constant 0 : i32
    return %c0_i32, %c0_i32_0 : i32, i32
  }
  func.func @transform_5(%arg0: i32) -> (i32, i32) {
    %c0_i32 = arith.constant 0 : i32
    %c0_i32_0 = arith.constant 0 : i32
    %c0_i32_1 = arith.constant 0 : i32
    return %c0_i32, %c0_i32_0 : i32, i32
  }
  func.func @transform_6(%arg0: i32) -> (i32, i32) {
    %c0_i32 = arith.constant 0 : i32
    %c0_i32_0 = arith.constant 0 : i32
    %c0_i32_1 = arith.constant 0 : i32
    return %c0_i32, %c0_i32_0 : i32, i32
  }
  func.func @transform_7(%arg0: i32) -> (i32, i32) {
    %c0_i32 = arith.constant 0 : i32
    %c0_i32_0 = arith.constant 0 : i32
    %c0_i32_1 = arith.constant 0 : i32
    return %c0_i32, %c0_i32_0 : i32, i32
  }
}

</mosaic_0001>

<bundles_post_ra>
// kernel: gmae_forward.7
= control target key start
LH: loop header
LB: loop body
LE: loop exit
PB: predicated region body
PF: predicated region fallthrough
CT: control target
= control target key end

     0   :  { %s2001_s0 = inlined_call_operand.vmem [shape: bf16[2,64,32], index: 0, kind: input, shape index: {}]   ;;  %s2002_s1 = inlined_call_operand.vmem [shape: f32[64,1], index: 1, kind: input, shape index: {}]   ;;  %s2003_s2 = inlined_call_operand.vmem [shape: f32[32,256], index: 2, kind: input, shape index: {}]   ;;  %s2004_s3 = inlined_call_operand.vmem [shape: f32[1,256], index: 3, kind: input, shape index: {}]   ;;  %s2005_s4 = inlined_call_operand.<no memory space> [shape: f32[1,1], index: 4, kind: input, shape index: {}]   ;;  %s2006_s5 = inlined_call_operand.vmem [shape: f32[256,32], index: 5, kind: input, shape index: {}]   ;;  %s2007_s6 = inlined_call_operand.vmem [shape: f32[1,32], index: 6, kind: input, shape index: {}]   ;;  %s2008_s7 = inlined_call_operand.vmem [shape: f32[32,256], index: 7, kind: input, shape index: {}]   ;;  %s2009_s8 = inlined_call_operand.vmem [shape: f32[1,256], index: 8, kind: input, shape index: {}]   ;;  %s2010_s10 = inlined_call_operand.vmem [shape: f32[256,32], index: 10, kind: input, shape index: {}]   ;;  %s2011_s11 = inlined_call_operand.vmem [shape: f32[1,32], index: 11, kind: input, shape index: {}]   ;;  %s2012_s13 = inlined_call_operand.vmem [shape: f32[32,32], index: 13, kind: input, shape index: {}]   ;;  %s2013_s14 = inlined_call_operand.vmem [shape: f32[1,32], index: 14, kind: input, shape index: {}]   ;;  %s2014_s15 = inlined_call_operand.hbm [shape: f32[1,1], index: 15, kind: output, shape index: {}]   ;;  %s2015_s9 = inlined_call_operand.<no memory space> [shape: f32[1,1], index: 9, kind: input, shape index: {}]   ;;  %s2016_s12 = inlined_call_operand.<no memory space> [shape: f32[1,1], index: 12, kind: input, shape index: {}]  }
   0x1   :  { %v20_v0 = vstv %s2005_s4  ;;  %v22_v1 = vstv %s2015_s9  ;;  %v24_v2 = vstv %s2016_s12 }
   0x2   :  { %21 = vst [vmem:[#allocation2] sm:$0x1] %v20_v0 }
   0x3   :  { %23 = vst [vmem:[#allocation3] sm:$0x1] %v22_v1 }
   0x4   :  { %25 = vst [vmem:[#allocation4] sm:$0x1] %v24_v2 }
   0x5   :  { %v79_v3 = vld [vmem:[%s2003_s2 + $0x20] sm:$0xff]  ;;  %v81_v4 = vld [vmem:[%s2003_s2 + $0x30] sm:$0xff]  ;;  %v1215_v8 = vmov 0   ;;  %v80_v9 = vld [vmem:[%s2003_s2 + $0x28] sm:$0xff] }
   0x6   :  { %v75_v5 = vld [vmem:[%s2003_s2] sm:$0xff]  ;;  %v85_v6 = vpack.c.bf16 %v81_v4, %v79_v3  ;;  %v77_v7 = vld [vmem:[%s2003_s2 + $0x10] sm:$0xff]  ;;  %1149 = vset.pattern.permute.xlu0 %v1215_v8  ;;  %1150 = vset.pattern.permute.xlu1 %v1215_v8  ;;  %v82_v10 = vld [vmem:[%s2003_s2 + $0x38] sm:$0xff] }
   0x7   :  { %v83_v11 = vpack.c.bf16 %v77_v7, %v75_v5  ;;  %v1137_v13 = vld [vmem:[%s2001_s0] sm:$0xff]  ;;  %v86_v14 = vpack.c.bf16 %v82_v10, %v80_v9  ;;  %v76_v15 = vld [vmem:[%s2003_s2 + $0x8] sm:$0xff]  ;;  %v78_v16 = vld [vmem:[%s2003_s2 + $0x18] sm:$0xff] }
   0x8   :  { %132 = vmatpush.bf16.msra.mxu0 %v85_v6  ;;  %1145 = vmatpush.bf16.msra.mxu1 %v85_v6  ;;  %v1139_v17 = vld [vmem:[%s2001_s0 + $0x10] sm:$0xff] }
   0x9   :  { %v1151_v12 = vld [vmem:[#allocation2] ss:$0 sm:$0xff] }
   0xa   :  { %204 = vperm.xlu0 %1149, %v1151_v12  }
   0xb   :  { %26 = vsyncpa [#allocation6], 0  ;;  %vm113_vm0 = vcmask 261120   ;;  %v84_v18 = vpack.c.bf16 %v78_v16, %v76_v15  ;;  %v1138_v19 = vld [vmem:[%s2001_s0 + $0x8] sm:$0xff]  ;;  %v1140_v20 = vld [vmem:[%s2001_s0 + $0x18] sm:$0xff]  ;;  %s1216_s30 = smov [#allocation5]  }
   0xc   :  { %133 = vmatpush.bf16.msra.mxu0 %v83_v11  ;;  %1146 = vmatpush.bf16.msra.mxu1 %v83_v11  ;;  %v1152_v21 = vld [vmem:[#allocation4] ss:$0 sm:$0xff]  ;;  %v253_v22 = vld [vmem:[%s2006_s5 + $0x70] sm:$0xff]  ;;  %v254_v23 = vld [vmem:[%s2006_s5 + $0x78] sm:$0xff]  ;;  %s1066_s16 = sshll.u32 %s1216_s30, 4  ;;  %s1067_s16 = int_to_ptr.vmem [resolvable:$true] %s1066_s16 }
   0xd   :  { %v251_v24 = vld [vmem:[%s2006_s5 + $0x60] sm:$0xff]  ;;  %v286_v25 = vpack.c.bf16 %v254_v23, %v253_v22  ;;  %v252_v26 = vld [vmem:[%s2006_s5 + $0x68] sm:$0xff]  ;;  %v249_v28 = vld [vmem:[%s2006_s5 + $0x50] sm:$0xff] }
   0xe   :  { %v285_v27 = vpack.c.bf16 %v252_v26, %v251_v24  ;;  %v250_v29 = vld [vmem:[%s2006_s5 + $0x58] sm:$0xff]  ;;  %v247_v31 = vld [vmem:[%s2006_s5 + $0x40] sm:$0xff]  ;;  %v248_v32 = vld [vmem:[%s2006_s5 + $0x48] sm:$0xff] }
   0xf   :  { %1101 = vmatmul.msk.bf16.vlgmr.msra.gmra.mxu0 %vm113_vm0, %v1137_v13  ;;  %1103 = vmatmul.msk.bf16.vlgmr.msra.gmra.mxu1 %vm113_vm0, %v1139_v17  ;;  %v284_v30 = vpack.c.bf16 %v250_v29, %v249_v28  ;;  %v283_v33 = vpack.c.bf16 %v248_v32, %v247_v31  ;;  %v245_v34 = vld [vmem:[%s2006_s5 + $0x30] sm:$0xff]  ;;  %v246_v35 = vld [vmem:[%s2006_s5 + $0x38] sm:$0xff]  ;;  %v243_v37 = vld [vmem:[%s2006_s5 + $0x20] sm:$0xff] }
  0x10   :  { %161 = vmatpush.bf16.msrb.mxu1 %v86_v14  ;;  %299 = vmatpush.bf16.msra.mxu2 %v286_v25  ;;  %v282_v36 = vpack.c.bf16 %v246_v35, %v245_v34  ;;  %v244_v38 = vld [vmem:[%s2006_s5 + $0x28] sm:$0xff]  ;;  %v241_v40 = vld [vmem:[%s2006_s5 + $0x10] sm:$0xff]  ;;  %v242_v41 = vld [vmem:[%s2006_s5 + $0x18] sm:$0xff] }
  0x11   :  { %v281_v39 = vpack.c.bf16 %v244_v38, %v243_v37  ;;  %v280_v42 = vpack.c.bf16 %v242_v41, %v241_v40  ;;  %v239_v43 = vld [vmem:[%s2006_s5] sm:$0xff]  ;;  %v240_v44 = vld [vmem:[%s2006_s5 + $0x8] sm:$0xff]  ;;  %v269_v46 = vld [vmem:[%s2006_s5 + $0xf0] sm:$0xff] }
  0x12   :  { %369 = vperm.xlu0 %1149, %v1152_v21   ;;  %v279_v45 = vpack.c.bf16 %v240_v44, %v239_v43  ;;  %v270_v47 = vld [vmem:[%s2006_s5 + $0xf8] sm:$0xff]  ;;  %v267_v49 = vld [vmem:[%s2006_s5 + $0xe0] sm:$0xff]  ;;  %v268_v50 = vld [vmem:[%s2006_s5 + $0xe8] sm:$0xff] }
  0x13   :  { %v294_v48 = vpack.c.bf16 %v270_v47, %v269_v46  ;;  %v293_v51 = vpack.c.bf16 %v268_v50, %v267_v49  ;;  %v265_v52 = vld [vmem:[%s2006_s5 + $0xd0] sm:$0xff]  ;;  %v266_v53 = vld [vmem:[%s2006_s5 + $0xd8] sm:$0xff]  ;;  %v263_v55 = vld [vmem:[%s2006_s5 + $0xc0] sm:$0xff] }
  0x14   :  { %162 = vmatpush.bf16.msrb.mxu1 %v84_v18  ;;  %300 = vmatpush.bf16.msra.mxu2 %v285_v27  ;;  %v292_v54 = vpack.c.bf16 %v266_v53, %v265_v52  ;;  %v264_v56 = vld [vmem:[%s2006_s5 + $0xc8] sm:$0xff]  ;;  %v87_v58 = vld [vmem:[%s2004_s3] sm:$0x3]  ;;  %v261_v59 = vld [vmem:[%s2006_s5 + $0xb0] sm:$0xff] }
  0x15   :  { %328 = vmatpush.bf16.msra.mxu3 %v294_v48  ;;  %v291_v57 = vpack.c.bf16 %v264_v56, %v263_v55  ;;  %v262_v60 = vld [vmem:[%s2006_s5 + $0xb8] sm:$0xff]  ;;  %v1431_v0 = vperm.slane %v87_v58, 0  ;;  %v259_v1 = vld [vmem:[%s2006_s5 + $0xa0] sm:$0xff]  ;;  %v260_v2 = vld [vmem:[%s2006_s5 + $0xa8] sm:$0xff] }
  0x16   :  { %v290_v61 = vpack.c.bf16 %v262_v60, %v261_v59  ;;  %v289_v4 = vpack.c.bf16 %v260_v2, %v259_v1  ;;  %v257_v6 = vld [vmem:[%s2006_s5 + $0x90] sm:$0xff]  ;;  %v258_v7 = vld [vmem:[%s2006_s5 + $0x98] sm:$0xff]  ;;  %v256_v14 = vld [vmem:[%s2006_s5 + $0x88] sm:$0xff] }
  0x17   :  { %v288_v9 = vpack.c.bf16 %v258_v7, %v257_v6  ;;  %v447_v18 = vld [vmem:[%s2008_s7 + $0x20] sm:$0xff]  ;;  %v445_v26 = vld [vmem:[%s2008_s7 + $0x10] sm:$0xff]  ;;  %v448_v29 = vld [vmem:[%s2008_s7 + $0x28] sm:$0xff] }
  0x18   :  { %301 = vmatpush.bf16.msra.mxu2 %v284_v30  ;;  %v443_v25 = vld [vmem:[%s2008_s7] sm:$0xff]  ;;  %v450_v30 = vld [vmem:[%s2008_s7 + $0x38] sm:$0xff]  ;;  %v1492_v44 = vld [vmem:[%s2001_s0 + $0x28] sm:$0xff] }
  0x19   :  { %329 = vmatpush.bf16.msra.mxu3 %v293_v51  ;;  %v451_v27 = vpack.c.bf16 %v445_v26, %v443_v25  ;;  %v1479_v31 = vld [vmem:[%s2001_s0 + $0x20] sm:$0xff]  ;;  %v454_v32 = vpack.c.bf16 %v450_v30, %v448_v29  ;;  %v444_v55 = vld [vmem:[%s2008_s7 + $0x8] sm:$0xff]  ;;  %v446_v56 = vld [vmem:[%s2008_s7 + $0x18] sm:$0xff] }
  0x1a   :  { %v1153_v52 = vld [vmem:[#allocation3] ss:$0 sm:$0xff]  ;;  %v1143_v2 = vld [vmem:[%s2001_s0 + $0x30] sm:$0xff] }
  0x1b   :  { %571 = vperm.xlu1 %1150, %v1153_v52  }
  0x1c   :  { %302 = vmatpush.bf16.msra.mxu2 %v283_v33 }
  0x1d   :  { %330 = vmatpush.bf16.msra.mxu3 %v292_v54 }
  0x1f   :  { %1102 = vmatmul.msk.bf16.gmra.mxu0 %vm113_vm0, %v1138_v19  ;;  %1104 = vmatmul.msk.bf16.gmra.mxu1 %vm113_vm0, %v1140_v20 }
  0x20   :  { %303 = vmatpush.bf16.msra.mxu2 %v282_v36 }
  0x21   :  { %331 = vmatpush.bf16.msra.mxu3 %v291_v57  ;;  %v452_v57 = vpack.c.bf16 %v446_v56, %v444_v55  ;;  %v610_v55 = vld [vmem:[%s2010_s10 + $0x20] sm:$0xff]  ;;  %v611_v56 = vld [vmem:[%s2010_s10 + $0x28] sm:$0xff] }
  0x24   :  { %304 = vmatpush.bf16.msra.mxu2 %v281_v39 }
  0x25   :  { %332 = vmatpush.bf16.msra.mxu3 %v290_v61 }
  0x28   :  { %305 = vmatpush.bf16.msra.mxu2 %v280_v42  ;;  %v1486_v42 = vperm.slane %v87_v58, 1 }
  0x29   :  { %333 = vmatpush.bf16.msra.mxu3 %v289_v4 }
  0x2c   :  { %306 = vmatpush.bf16.msra.mxu2 %v279_v45 }
  0x2d   :  { %334 = vmatpush.bf16.msra.mxu3 %v288_v9 }
  0x2f   :  { %1105 = vmatmul.msk.bf16.vlgmr.msrb.gmra.mxu1 %vm113_vm0, %v1137_v13  ;;  %v255_v13 = vld [vmem:[%s2006_s5 + $0x80] sm:$0xff] }
  0x30   :  { %528 = vmatpush.bf16.msrb.mxu2 %v454_v32 }
  0x34   :  { %529 = vmatpush.bf16.msrb.mxu2 %v452_v57  ;;  %v648_v57 = vpack.c.bf16 %v611_v56, %v610_v55  ;;  %v630_v56 = vld [vmem:[%s2010_s10 + $0xc0] sm:$0xff] }
  0x3f   :  { %1106 = vmatmul.msk.bf16.gmra.mxu1 %vm113_vm0, %v1138_v19  ;;  %v449_v19 = vld [vmem:[%s2008_s7 + $0x30] sm:$0xff] }
  0x4f   :  { %1107 = vmatmul.msk.bf16.gmra.mxu1 %vm113_vm0, %v1139_v17  ;;  %v287_v17 = vpack.c.bf16 %v256_v14, %v255_v13 }
  0x51   :  { %335 = vmatpush.bf16.msra.mxu3 %v287_v17 }
  0x5f   :  { %1108 = vmatmul.msk.bf16.gmra.mxu1 %vm113_vm0, %v1140_v20  ;;  %v453_v20 = vpack.c.bf16 %v449_v19, %v447_v18  ;;  %v1144_v18 = vld [vmem:[%s2001_s0 + $0x38] sm:$0xff] }
  0x61   :  { %499 = vmatpush.bf16.msra.mxu1 %v453_v20 }
  0x65   :  { %500 = vmatpush.bf16.msra.mxu1 %v451_v27 }
  0x6f   :  { %1129 = vmatmul.msk.bf16.vlgmr.msra.gmra.mxu1 %vm113_vm0, %v1479_v31 }
  0x7c   :  { %v1440_v5 = vpop.permute.xlu0 %204 }
  0x7f   :  { %1130 = vmatmul.msk.bf16.gmra.mxu1 %vm113_vm0, %v1492_v44 }
  0x8c   :  { %v135_v62 = vpop.f32.mrf.mxu0  ;;  %v145_v63 = vpop.f32.mrf.mxu1 }
  0x8d   :  { %v136_v3 = vadd.f32 %v135_v62, %v1431_v0  ;;  %v146_v45 = vadd.f32 %v145_v63, %v1431_v0 }
  0x8f   :  { %v207_v8 = vmul.f32 %v1440_v5, %v136_v3  ;;  %vm185_vm1 = vcmp.gt.f32.partialorder %v136_v3, 0.0  ;;  %v215_v51 = vmul.f32 %v1440_v5, %v146_v45  ;;  %vm193_vm6 = vcmp.gt.f32.partialorder %v146_v45, 0.0  ;;  %1131 = vmatmul.msk.bf16.gmra.mxu1 %vm113_vm0, %v1143_v2 }
  0x91   :  { %v223_v16 = vsel %vm185_vm1, %v136_v3, %v207_v8  ;;  %v231_v58 = vsel %vm193_vm6, %v146_v45, %v215_v51  ;;  %v617_v45 = vld [vmem:[%s2010_s10 + $0x58] sm:$0xff] }
  0x92   :  { %v613_v51 = vld [vmem:[%s2010_s10 + $0x38] sm:$0xff] }
  0x94   :  { %v137_v10 = vpop.f32.mrf.mxu0  ;;  %v147_v11 = vpop.f32.mrf.mxu1 }
  0x95   :  { %v138_v12 = vadd.f32 %v137_v10, %v1431_v0  ;;  %v148_v43 = vadd.f32 %v147_v11, %v1431_v0 }
  0x97   :  { %v209_v15 = vmul.f32 %v1440_v5, %v138_v12  ;;  %vm187_vm2 = vcmp.gt.f32.partialorder %v138_v12, 0.0  ;;  %v217_v47 = vmul.f32 %v1440_v5, %v148_v43  ;;  %vm195_vm5 = vcmp.gt.f32.partialorder %v148_v43, 0.0 }
  0x99   :  { %v225_v21 = vsel %vm187_vm2, %v138_v12, %v209_v15  ;;  %v233_v54 = vsel %vm195_vm5, %v148_v43, %v217_v47  ;;  %v614_v47 = vld [vmem:[%s2010_s10 + $0x40] sm:$0xff] }
  0x9a   :  { %v271_v22 = vpack.c.bf16 %v225_v21, %v223_v16  ;;  %v275_v61 = vpack.c.bf16 %v233_v54, %v231_v58  ;;  %v388_v58 = vld [vmem:[%s2012_s13] sm:$0xff] }
  0x9c   :  { %v140_v23 = vpop.f32.mrf.mxu0  ;;  %v150_v24 = vpop.f32.mrf.mxu1  ;;  %307 = vmatmul.bf16.vlgmr.msra.gmra.mxu2 %v271_v22 }
  0x9d   :  { %v141_v28 = vadd.f32 %v140_v23, %v1431_v0  ;;  %v151_v3 = vadd.f32 %v150_v24, %v1431_v0 }
  0x9f   :  { %v211_v33 = vmul.f32 %v1440_v5, %v141_v28  ;;  %vm189_vm3 = vcmp.gt.f32.partialorder %v141_v28, 0.0  ;;  %v219_v8 = vmul.f32 %v1440_v5, %v151_v3  ;;  %vm197_vm10 = vcmp.gt.f32.partialorder %v151_v3, 0.0  ;;  %1132 = vmatmul.msk.bf16.gmra.mxu1 %vm113_vm0, %v1144_v18 }
  0xa1   :  { %v227_v38 = vsel %vm189_vm3, %v141_v28, %v211_v33 }
  0xa4   :  { %v142_v34 = vpop.f32.mrf.mxu0  ;;  %v152_v35 = vpop.f32.mrf.mxu1 }
  0xa5   :  { %v143_v36 = vadd.f32 %v142_v34, %v1431_v0  ;;  %v153_v1 = vadd.f32 %v152_v35, %v1431_v0  ;;  %v235_v0 = vsel %vm197_vm10, %v151_v3, %v219_v8  ;;  %v1603_v8 = vpop.permute.xlu1 %571 }
  0xa7   :  { %v213_v37 = vmul.f32 %v1440_v5, %v143_v36  ;;  %vm191_vm4 = vcmp.gt.f32.partialorder %v143_v36, 0.0  ;;  %v221_v6 = vmul.f32 %v1440_v5, %v153_v1  ;;  %vm199_vm9 = vcmp.gt.f32.partialorder %v153_v1, 0.0 }
  0xa9   :  { %v229_v39 = vsel %vm191_vm4, %v143_v36, %v213_v37  ;;  %v237_v12 = vsel %vm199_vm9, %v153_v1, %v221_v6  ;;  %v609_v1 = vld [vmem:[%s2010_s10 + $0x18] sm:$0xff] }
  0xaa   :  { %v273_v40 = vpack.c.bf16 %v229_v39, %v227_v38  ;;  %v277_v15 = vpack.c.bf16 %v237_v12, %v235_v0  ;;  %v390_v38 = vld [vmem:[%s2012_s13 + $0x10] sm:$0xff]  ;;  %v391_v39 = vld [vmem:[%s2012_s13 + $0x18] sm:$0xff] }
  0xac   :  { %v164_v41 = vpop.f32.mrf.mxu1  ;;  %312 = vmatmul.bf16.gmra.mxu2 %v273_v40  ;;  %v618_v40 = vld [vmem:[%s2010_s10 + $0x60] sm:$0xff] }
  0xad   :  { %v165_v46 = vadd.f32 %v164_v41, %v1486_v42  ;;  %v397_v41 = vpack.c.bf16 %v391_v39, %v390_v38  ;;  %v632_v38 = vld [vmem:[%s2010_s10 + $0xd0] sm:$0xff]  ;;  %v633_v39 = vld [vmem:[%s2010_s10 + $0xd8] sm:$0xff] }
  0xaf   :  { %v208_v49 = vmul.f32 %v1440_v5, %v165_v46  ;;  %vm186_vm7 = vcmp.gt.f32.partialorder %v165_v46, 0.0  ;;  %420 = vmatpush.bf16.msrb.mxu0 %v397_v41  ;;  %v659_v41 = vpack.c.bf16 %v633_v39, %v632_v38 }
  0xb1   :  { %v224_v59 = vsel %vm186_vm7, %v165_v46, %v208_v49 }
  0xb4   :  { %v166_v48 = vpop.f32.mrf.mxu1 }
  0xb5   :  { %v167_v50 = vadd.f32 %v166_v48, %v1486_v42  ;;  %v615_v48 = vld [vmem:[%s2010_s10 + $0x48] sm:$0xff] }
  0xb6   :  { %v650_v49 = vpack.c.bf16 %v615_v48, %v614_v47 }
  0xb7   :  { %v210_v53 = vmul.f32 %v1440_v5, %v167_v50  ;;  %vm188_vm8 = vcmp.gt.f32.partialorder %v167_v50, 0.0 }
  0xb9   :  { %v226_v60 = vsel %vm188_vm8, %v167_v50, %v210_v53  ;;  %v612_v50 = vld [vmem:[%s2010_s10 + $0x30] sm:$0xff] }
  0xba   :  { %v272_v62 = vpack.c.bf16 %v226_v60, %v224_v59  ;;  %v649_v53 = vpack.c.bf16 %v613_v51, %v612_v50  ;;  %v389_v59 = vld [vmem:[%s2012_s13 + $0x8] sm:$0xff]  ;;  %v1590_v60 = vld [vmem:[%s2009_s8] sm:$0x3] }
  0xbc   :  { %v169_v63 = vpop.f32.mrf.mxu1  ;;  %317 = vmatmul.bf16.gmra.mxu2 %v275_v61  ;;  %336 = vmatmul.bf16.vlgmr.msra.gmra.mxu3 %v272_v62  ;;  %v396_v61 = vpack.c.bf16 %v389_v59, %v388_v58  ;;  %v1593_v62 = vperm.slane %v1590_v60, 0 }
  0xbd   :  { %v170_v4 = vadd.f32 %v169_v63, %v1486_v42  ;;  %v608_v63 = vld [vmem:[%s2010_s10 + $0x10] sm:$0xff] }
  0xbe   :  { %421 = vmatpush.bf16.msrb.mxu0 %v396_v61 }
  0xbf   :  { %v212_v9 = vmul.f32 %v1440_v5, %v170_v4  ;;  %vm190_vm11 = vcmp.gt.f32.partialorder %v170_v4, 0.0 }
  0xc1   :  { %v228_v13 = vsel %vm190_vm11, %v170_v4, %v212_v9  ;;  %v647_v4 = vpack.c.bf16 %v609_v1, %v608_v63  ;;  %v606_v9 = vld [vmem:[%s2010_s10] sm:$0xff] }
  0xc4   :  { %v171_v7 = vpop.f32.mrf.mxu1 }
  0xc5   :  { %v172_v10 = vadd.f32 %v171_v7, %v1486_v42 }
  0xc7   :  { %v214_v11 = vmul.f32 %v1440_v5, %v172_v10  ;;  %vm192_vm12 = vcmp.gt.f32.partialorder %v172_v10, 0.0 }
  0xc9   :  { %v230_v14 = vsel %vm192_vm12, %v172_v10, %v214_v11  ;;  %v607_v10 = vld [vmem:[%s2010_s10 + $0x8] sm:$0xff] }
  0xca   :  { %v274_v16 = vpack.c.bf16 %v230_v14, %v228_v13  ;;  %v646_v11 = vpack.c.bf16 %v607_v10, %v606_v9 }
  0xcc   :  { %v174_v17 = vpop.f32.mrf.mxu1  ;;  %322 = vmatmul.bf16.gmra.mxu2 %v277_v15  ;;  %341 = vmatmul.bf16.gmra.mxu3 %v274_v16 }
  0xcd   :  { %v175_v19 = vadd.f32 %v174_v17, %v1486_v42 }
  0xcf   :  { %v216_v21 = vmul.f32 %v1440_v5, %v175_v19  ;;  %vm194_vm13 = vcmp.gt.f32.partialorder %v175_v19, 0.0 }
  0xd1   :  { %v232_v24 = vsel %vm194_vm13, %v175_v19, %v216_v21  ;;  %v637_v19 = vld [vmem:[%s2010_s10 + $0xf8] sm:$0xff] }
  0xd4   :  { %v176_v20 = vpop.f32.mrf.mxu1 }
  0xd5   :  { %v177_v22 = vadd.f32 %v176_v20, %v1486_v42 }
  0xd7   :  { %v218_v23 = vmul.f32 %v1440_v5, %v177_v22  ;;  %vm196_vm14 = vcmp.gt.f32.partialorder %v177_v22, 0.0 }
  0xd9   :  { %v234_v25 = vsel %vm196_vm14, %v177_v22, %v218_v23 }
  0xda   :  { %v276_v26 = vpack.c.bf16 %v234_v25, %v232_v24 }
  0xdc   :  { %v179_v27 = vpop.f32.mrf.mxu1  ;;  %346 = vmatmul.bf16.gmra.mxu3 %v276_v26  ;;  %1133 = vmatmul.msk.bf16.vlgmr.msrb.gmra.mxu2 %vm113_vm0, %v1479_v31  ;;  %v620_v31 = vld [vmem:[%s2010_s10 + $0x70] sm:$0xff]  ;;  %v634_v26 = vld [vmem:[%s2010_s10 + $0xe0] sm:$0xff] }
  0xdd   :  { %v180_v28 = vadd.f32 %v179_v27, %v1486_v42  ;;  %v635_v27 = vld [vmem:[%s2010_s10 + $0xe8] sm:$0xff] }
  0xdf   :  { %v220_v30 = vmul.f32 %v1440_v5, %v180_v28  ;;  %vm198_vm15 = vcmp.gt.f32.partialorder %v180_v28, 0.0 }
  0xe1   :  { %v236_v34 = vsel %vm198_vm15, %v180_v28, %v220_v30 }
  0xe4   :  { %v181_v29 = vpop.f32.mrf.mxu1 }
  0xe5   :  { %v182_v32 = vadd.f32 %v181_v29, %v1486_v42  ;;  %v619_v42 = vld [vmem:[%s2010_s10 + $0x68] sm:$0xff]  ;;  %v660_v29 = vpack.c.bf16 %v635_v27, %v634_v26 }
  0xe6   :  { %v652_v43 = vpack.c.bf16 %v619_v42, %v618_v40 }
  0xe7   :  { %v222_v33 = vmul.f32 %v1440_v5, %v182_v32  ;;  %vm200_vm1 = vcmp.gt.f32.partialorder %v182_v32, 0.0  ;;  %v621_v5 = vld [vmem:[%s2010_s10 + $0x78] sm:$0xff] }
  0xe8   :  { %v653_v37 = vpack.c.bf16 %v621_v5, %v620_v31 }
  0xe9   :  { %v238_v35 = vsel %vm200_vm1, %v182_v32, %v222_v33  ;;  %v1636_v33 = vld [vmem:[%s2007_s6] ss:$0 sm:$0xff] }
  0xea   :  { %v278_v36 = vpack.c.bf16 %v238_v35, %v236_v34  ;;  %666 = vmatpush.bf16.msrb.mxu3 %v653_v37 }
  0xec   :  { %351 = vmatmul.bf16.gmra.mxu3 %v278_v36  ;;  %1134 = vmatmul.msk.bf16.gmra.mxu2 %vm113_vm0, %v1492_v44  ;;  %v616_v44 = vld [vmem:[%s2010_s10 + $0x50] sm:$0xff]  ;;  %v502_v54 = vpop.f32.mrf.mxu1 }
  0xed   :  { %v651_v46 = vpack.c.bf16 %v617_v45, %v616_v44  ;;  %v503_v3 = vadd.f32 %v502_v54, %v1593_v62 }
  0xee   :  { %667 = vmatpush.bf16.msrb.mxu3 %v652_v43  ;;  %v1649_v43 = vpop.permute.xlu0 %369 }
  0xef   :  { %vm552_vm2 = vcmp.gt.f32.partialorder %v503_v3, 0.0  ;;  %v574_v12 = vmul.f32 %v1603_v8, %v503_v3 }
  0xf1   :  { %v590_v13 = vsel %vm552_vm2, %v503_v3, %v574_v12 }
  0xf2   :  { %668 = vmatpush.bf16.msrb.mxu3 %v651_v46 }
  0xf4   :  { %v504_v6 = vpop.f32.mrf.mxu1 }
  0xf5   :  { %v505_v7 = vadd.f32 %v504_v6, %v1593_v62  ;;  %v629_v6 = vld [vmem:[%s2010_s10 + $0xb8] sm:$0xff] }
  0xf6   :  { %669 = vmatpush.bf16.msrb.mxu3 %v650_v49 }
  0xf7   :  { %v576_v0 = vmul.f32 %v1603_v8, %v505_v7  ;;  %vm554_vm3 = vcmp.gt.f32.partialorder %v505_v7, 0.0 }
  0xf9   :  { %v592_v14 = vsel %vm554_vm3, %v505_v7, %v576_v0 }
  0xfa   :  { %670 = vmatpush.bf16.msrb.mxu3 %v649_v53  ;;  %v638_v15 = vpack.c.bf16 %v592_v14, %v590_v13 }
  0xfc   :  { %1135 = vmatmul.msk.bf16.gmra.mxu2 %vm113_vm0, %v1143_v2  ;;  %v507_v17 = vpop.f32.mrf.mxu1 }
  0xfd   :  { %v508_v21 = vadd.f32 %v507_v17, %v1593_v62 }
  0xfe   :  { %671 = vmatpush.bf16.msrb.mxu3 %v648_v57  ;;  %v631_v57 = vld [vmem:[%s2010_s10 + $0xc8] sm:$0xff] }
  0xff   :  { %v578_v24 = vmul.f32 %v1603_v8, %v508_v21  ;;  %vm556_vm4 = vcmp.gt.f32.partialorder %v508_v21, 0.0  ;;  %v658_v61 = vpack.c.bf16 %v631_v57, %v630_v56 }
 0x101   :  { %v594_v30 = vsel %vm556_vm4, %v508_v21, %v578_v24 }
 0x102   :  { %672 = vmatpush.bf16.msrb.mxu3 %v647_v4  ;;  %v628_v4 = vld [vmem:[%s2010_s10 + $0xb0] sm:$0xff] }
 0x103   :  { %v657_v7 = vpack.c.bf16 %v629_v6, %v628_v4 }
 0x104   :  { %v509_v23 = vpop.f32.mrf.mxu1 }
 0x105   :  { %v510_v25 = vadd.f32 %v509_v23, %v1593_v62 }
 0x106   :  { %673 = vmatpush.bf16.msrb.mxu3 %v646_v11 }
 0x107   :  { %v580_v28 = vmul.f32 %v1603_v8, %v510_v25  ;;  %vm558_vm5 = vcmp.gt.f32.partialorder %v510_v25, 0.0 }
 0x109   :  { %674 = vmatmul.bf16.vlgmr.msrb.gmra.mxu3 %v638_v15  ;;  %v596_v32 = vsel %vm558_vm5, %v510_v25, %v580_v28 }
 0x10a   :  { %v640_v34 = vpack.c.bf16 %v596_v32, %v594_v30  ;;  %v624_v32 = vld [vmem:[%s2010_s10 + $0x90] sm:$0xff] }
 0x10c   :  { %1136 = vmatmul.msk.bf16.gmra.mxu2 %vm113_vm0, %v1144_v18  ;;  %v636_v18 = vld [vmem:[%s2010_s10 + $0xf0] sm:$0xff]  ;;  %v512_v36 = vpop.f32.mrf.mxu1 }
 0x10d   :  { %v661_v20 = vpack.c.bf16 %v637_v19, %v636_v18  ;;  %v513_v40 = vadd.f32 %v512_v36, %v1593_v62  ;;  %v626_v19 = vld [vmem:[%s2010_s10 + $0xa0] sm:$0xff] }
 0x10f   :  { %695 = vmatpush.bf16.msra.mxu0 %v661_v20  ;;  %v582_v48 = vmul.f32 %v1603_v8, %v513_v40  ;;  %vm560_vm8 = vcmp.gt.f32.partialorder %v513_v40, 0.0  ;;  %v627_v20 = vld [vmem:[%s2010_s10 + $0xa8] sm:$0xff] }
 0x111   :  { %v598_v58 = vsel %vm560_vm8, %v513_v40, %v582_v48 }
 0x113   :  { %696 = vmatpush.bf16.msra.mxu0 %v660_v29 }
 0x114   :  { %v514_v47 = vpop.f32.mrf.mxu1 }
 0x115   :  { %v515_v49 = vadd.f32 %v514_v47, %v1593_v62 }
 0x117   :  { %697 = vmatpush.bf16.msra.mxu0 %v659_v41  ;;  %vm562_vm9 = vcmp.gt.f32.partialorder %v515_v49, 0.0  ;;  %v622_v41 = vld [vmem:[%s2010_s10 + $0x80] sm:$0xff] }
 0x119   :  { %679 = vmatmul.bf16.gmra.mxu3 %v640_v34  ;;  %v625_v34 = vld [vmem:[%s2010_s10 + $0x98] sm:$0xff] }
 0x11b   :  { %698 = vmatpush.bf16.msra.mxu0 %v658_v61 }
 0x11f   :  { %v308_v52 = vpop.f32.mrf.mxu2  ;;  %699 = vmatpush.bf16.msra.mxu0 %v657_v7 }
 0x120   :  { %v309_v5 = vadd.f32 %v1636_v33, %v308_v52  ;;  %v584_v52 = vmul.f32 %v1603_v8, %v515_v49 }
 0x122   :  { %v600_v59 = vsel %vm562_vm9, %v515_v49, %v584_v52 }
 0x123   :  { %v642_v63 = vpack.c.bf16 %v600_v59, %v598_v58 }
 0x127   :  { %v310_v2 = vpop.f32.mrf.mxu2 }
 0x128   :  { %v311_v42 = vadd.f32 %v1636_v33, %v310_v2  ;;  %v517_v2 = vpop.f32.mrf.mxu1 }
 0x129   :  { %684 = vmatmul.bf16.gmra.mxu3 %v642_v63  ;;  %v518_v11 = vadd.f32 %v517_v2, %v1593_v62  ;;  %v458_v63 = vperm.slane %v1590_v60, 1 }
 0x12b   :  { %vm564_vm12 = vcmp.gt.f32.partialorder %v518_v11, 0.0 }
 0x12f   :  { %v1613_v16 = vpop.f32.mrf.mxu2 }
 0x130   :  { %v314_v3 = vadd.f32 %v1636_v33, %v1613_v16  ;;  %v519_v15 = vpop.f32.mrf.mxu1  ;;  %v586_v16 = vmul.f32 %v1603_v8, %v518_v11 }
 0x131   :  { %v520_v17 = vadd.f32 %v519_v15, %v1593_v62 }
 0x132   :  { %v602_v62 = vsel %vm564_vm12, %v518_v11, %v586_v16 }
 0x133   :  { %v588_v21 = vmul.f32 %v1603_v8, %v520_v17  ;;  %vm566_vm13 = vcmp.gt.f32.partialorder %v520_v17, 0.0 }
 0x135   :  { %v604_v26 = vsel %vm566_vm13, %v520_v17, %v588_v21 }
 0x136   :  { %v644_v27 = vpack.c.bf16 %v604_v26, %v602_v62 }
 0x137   :  { %v1622_v22 = vpop.f32.mrf.mxu2 }
 0x138   :  { %v316_v12 = vadd.f32 %v1636_v33, %v1622_v22  ;;  %v656_v22 = vpack.c.bf16 %v627_v20, %v626_v19 }
 0x139   :  { %689 = vmatmul.bf16.gmra.mxu3 %v644_v27 }
 0x13a   :  { %700 = vmatpush.bf16.msra.mxu0 %v656_v22 }
 0x13f   :  { %v337_v35 = vpop.f32.mrf.mxu3  ;;  %v1638_v31 = vpop.f32.mrf.mxu2 }
 0x140   :  { %v338_v37 = vadd.f32 %v337_v35, %v309_v5  ;;  %v319_v30 = vadd.f32 %v1636_v33, %v1638_v31  ;;  %v655_v35 = vpack.c.bf16 %v625_v34, %v624_v32  ;;  %v1721_v32 = vld [vmem:[%s2013_s14] ss:$0 sm:$0xff] }
 0x142   :  { %v372_v45 = vmul.f32 %v1649_v43, %v338_v37  ;;  %vm358_vm6 = vcmp.gt.f32.partialorder %v338_v37, 0.0  ;;  %701 = vmatpush.bf16.msra.mxu0 %v655_v35 }
 0x144   :  { %v380_v53 = vsel %vm358_vm6, %v338_v37, %v372_v45 }
 0x147   :  { %v339_v44 = vpop.f32.mrf.mxu3  ;;  %v320_v51 = vpop.f32.mrf.mxu2 }
 0x148   :  { %v340_v46 = vadd.f32 %v339_v44, %v311_v42  ;;  %v321_v5 = vadd.f32 %v1636_v33, %v320_v51  ;;  %v623_v42 = vld [vmem:[%s2010_s10 + $0x88] sm:$0xff] }
 0x149   :  { %v654_v44 = vpack.c.bf16 %v623_v42, %v622_v41 }
 0x14a   :  { %vm359_vm7 = vcmp.gt.f32.partialorder %v340_v46, 0.0  ;;  %v373_v50 = vmul.f32 %v1649_v43, %v340_v46 }
 0x14b   :  { %702 = vmatpush.bf16.msra.mxu0 %v654_v44 }
 0x14c   :  { %v381_v54 = vsel %vm359_vm7, %v340_v46, %v373_v50 }
 0x14d   :  { %v392_v55 = vpack.c.bf16 %v381_v54, %v380_v53 }
 0x14f   :  { %v342_v1 = vpop.f32.mrf.mxu3  ;;  %1109 = vmatmul.msk.bf16.vlgmr.msrb.gmra.mxu0 %vm113_vm0, %v392_v55  ;;  %v323_v10 = vpop.f32.mrf.mxu2 }
 0x150   :  { %v343_v9 = vadd.f32 %v342_v1, %v314_v3  ;;  %v324_v49 = vadd.f32 %v1636_v33, %v323_v10 }
 0x152   :  { %v374_v13 = vmul.f32 %v1649_v43, %v343_v9  ;;  %vm360_vm10 = vcmp.gt.f32.partialorder %v343_v9, 0.0 }
 0x154   :  { %v382_v23 = vsel %vm360_vm10, %v343_v9, %v374_v13 }
 0x157   :  { %v344_v0 = vpop.f32.mrf.mxu3  ;;  %v325_v28 = vpop.f32.mrf.mxu2 }
 0x158   :  { %v345_v14 = vadd.f32 %v344_v0, %v316_v12  ;;  %v326_v52 = vadd.f32 %v1636_v33, %v325_v28 }
 0x15a   :  { %vm361_vm11 = vcmp.gt.f32.partialorder %v345_v14, 0.0  ;;  %v375_v18 = vmul.f32 %v1649_v43, %v345_v14 }
 0x15c   :  { %v383_v24 = vsel %vm361_vm11, %v345_v14, %v375_v18 }
 0x15d   :  { %v393_v25 = vpack.c.bf16 %v383_v24, %v382_v23 }
 0x15f   :  { %v347_v29 = vpop.f32.mrf.mxu3  ;;  %1110 = vmatmul.msk.bf16.gmra.mxu0 %vm113_vm0, %v393_v25  ;;  %v531_v40 = vpop.f32.mrf.mxu2 }
 0x160   :  { %v348_v36 = vadd.f32 %v347_v29, %v319_v30  ;;  %v532_v1 = vadd.f32 %v531_v40, %v458_v63 }
 0x162   :  { %v376_v38 = vmul.f32 %v1649_v43, %v348_v36  ;;  %vm362_vm14 = vcmp.gt.f32.partialorder %v348_v36, 0.0  ;;  %v575_v33 = vmul.f32 %v1603_v8, %v532_v1  ;;  %vm553_vm3 = vcmp.gt.f32.partialorder %v532_v1, 0.0 }
 0x164   :  { %v384_v45 = vsel %vm362_vm14, %v348_v36, %v376_v38  ;;  %v591_v6 = vsel %vm553_vm3, %v532_v1, %v575_v33 }
 0x167   :  { %v349_v37 = vpop.f32.mrf.mxu3  ;;  %v533_v50 = vpop.f32.mrf.mxu2 }
 0x168   :  { %v350_v39 = vadd.f32 %v349_v37, %v321_v5  ;;  %v534_v2 = vadd.f32 %v533_v50, %v458_v63 }
 0x16a   :  { %vm363_vm15 = vcmp.gt.f32.partialorder %v350_v39, 0.0  ;;  %v377_v31 = vmul.f32 %v1649_v43, %v350_v39  ;;  %v577_v3 = vmul.f32 %v1603_v8, %v534_v2  ;;  %vm555_vm4 = vcmp.gt.f32.partialorder %v534_v2, 0.0 }
 0x16c   :  { %v385_v46 = vsel %vm363_vm15, %v350_v39, %v377_v31  ;;  %v593_v7 = vsel %vm555_vm4, %v534_v2, %v577_v3  ;;  %v1156_v2 = vld [vmem:[%s2011_s11] ss:$0 sm:$0xff] }
 0x16d   :  { %v394_v47 = vpack.c.bf16 %v385_v46, %v384_v45 }
 0x16f   :  { %v352_v48 = vpop.f32.mrf.mxu3  ;;  %1111 = vmatmul.msk.bf16.gmra.mxu0 %vm113_vm0, %v394_v47  ;;  %v536_v59 = vpop.f32.mrf.mxu2 }
 0x170   :  { %v353_v51 = vadd.f32 %v352_v48, %v324_v49  ;;  %v537_v10 = vadd.f32 %v536_v59, %v458_v63 }
 0x172   :  { %v378_v54 = vmul.f32 %v1649_v43, %v353_v51  ;;  %vm364_vm1 = vcmp.gt.f32.partialorder %v353_v51, 0.0  ;;  %v579_v60 = vmul.f32 %v1603_v8, %v537_v10  ;;  %vm557_vm5 = vcmp.gt.f32.partialorder %v537_v10, 0.0 }
 0x174   :  { %v386_v57 = vsel %vm364_vm1, %v353_v51, %v378_v54  ;;  %v595_v0 = vsel %vm557_vm5, %v537_v10, %v579_v60 }
 0x177   :  { %v354_v53 = vpop.f32.mrf.mxu3  ;;  %v538_v4 = vpop.f32.mrf.mxu2 }
 0x178   :  { %v355_v55 = vadd.f32 %v354_v53, %v326_v52  ;;  %v539_v11 = vadd.f32 %v538_v4, %v458_v63 }
 0x17a   :  { %vm365_vm2 = vcmp.gt.f32.partialorder %v355_v55, 0.0  ;;  %v379_v56 = vmul.f32 %v1649_v43, %v355_v55  ;;  %v639_v43 = vpack.c.bf16 %v593_v7, %v591_v6  ;;  %v581_v12 = vmul.f32 %v1603_v8, %v539_v11 }
 0x17b   :  { %vm559_vm6 = vcmp.gt.f32.partialorder %v539_v11, 0.0 }
 0x17c   :  { %v387_v58 = vsel %vm365_vm2, %v355_v55, %v379_v56  ;;  %v597_v13 = vsel %vm559_vm6, %v539_v11, %v581_v12 }
 0x17d   :  { %v395_v61 = vpack.c.bf16 %v387_v58, %v386_v57  ;;  %v641_v15 = vpack.c.bf16 %v597_v13, %v595_v0 }
 0x17f   :  { %1112 = vmatmul.msk.bf16.gmra.mxu0 %vm113_vm0, %v395_v61  ;;  %v541_v9 = vpop.f32.mrf.mxu2 }
 0x180   :  { %v542_v17 = vadd.f32 %v541_v9, %v458_v63 }
 0x182   :  { %v583_v20 = vmul.f32 %v1603_v8, %v542_v17  ;;  %vm561_vm8 = vcmp.gt.f32.partialorder %v542_v17, 0.0 }
 0x184   :  { %v599_v22 = vsel %vm561_vm8, %v542_v17, %v583_v20 }
 0x187   :  { %v543_v14 = vpop.f32.mrf.mxu2 }
 0x188   :  { %v544_v16 = vadd.f32 %v543_v14, %v458_v63 }
 0x18a   :  { %v585_v19 = vmul.f32 %v1603_v8, %v544_v16  ;;  %vm563_vm7 = vcmp.gt.f32.partialorder %v544_v16, 0.0 }
 0x18c   :  { %v601_v21 = vsel %vm563_vm7, %v544_v16, %v585_v19  ;;  %v675_v56 = vpop.f32.mrf.mxu3 }
 0x18d   :  { %v643_v23 = vpack.c.bf16 %v601_v21, %v599_v22  ;;  %v676_v33 = vadd.f32 %v1156_v2, %v675_v56 }
 0x18f   :  { %703 = vmatmul.bf16.vlgmr.msra.gmra.mxu0 %v639_v43  ;;  %v546_v18 = vpop.f32.mrf.mxu2 }
 0x190   :  { %v547_v62 = vadd.f32 %v546_v18, %v458_v63 }
 0x192   :  { %v587_v27 = vmul.f32 %v1603_v8, %v547_v62  ;;  %vm565_vm10 = vcmp.gt.f32.partialorder %v547_v62, 0.0 }
 0x194   :  { %v603_v29 = vsel %vm565_vm10, %v547_v62, %v587_v27 }
 0x197   :  { %v548_v24 = vpop.f32.mrf.mxu2 }
 0x198   :  { %v549_v25 = vadd.f32 %v548_v24, %v458_v63  ;;  %v677_v63 = vpop.f32.mrf.mxu3 }
 0x199   :  { %v678_v9 = vadd.f32 %v1156_v2, %v677_v63 }
 0x19a   :  { %v589_v26 = vmul.f32 %v1603_v8, %v549_v25  ;;  %vm567_vm9 = vcmp.gt.f32.partialorder %v549_v25, 0.0 }
 0x19c   :  { %v605_v28 = vsel %vm567_vm9, %v549_v25, %v589_v26 }
 0x19d   :  { %v645_v30 = vpack.c.bf16 %v605_v28, %v603_v29 }
 0x19f   :  { %708 = vmatmul.bf16.gmra.mxu0 %v641_v15 }
 0x1a0   :  { %v680_v6 = vpop.f32.mrf.mxu3 }
 0x1a1   :  { %v681_v13 = vadd.f32 %v1156_v2, %v680_v6 }
 0x1a8   :  { %v682_v12 = vpop.f32.mrf.mxu3 }
 0x1a9   :  { %v683_v19 = vadd.f32 %v1156_v2, %v682_v12 }
 0x1af   :  { %713 = vmatmul.bf16.gmra.mxu0 %v643_v23 }
 0x1b0   :  { %v685_v18 = vpop.f32.mrf.mxu3 }
 0x1b1   :  { %v686_v24 = vadd.f32 %v1156_v2, %v685_v18 }
 0x1b8   :  { %v687_v25 = vpop.f32.mrf.mxu3 }
 0x1b9   :  { %v688_v29 = vadd.f32 %v1156_v2, %v687_v25 }
 0x1bf   :  { %718 = vmatmul.bf16.gmra.mxu0 %v645_v30 }
 0x1cc   :  { %v423_v34 = vpop.f32.mrf.mxu0 }
 0x1cd   :  { %v1724_v35 = vadd.f32 %v1721_v32, %v423_v34 }
 0x1cf   :  { %v724_v36 = vmul.f32 %v1724_v35, %v1724_v35 }
 0x1d1   :  { %v732_v5 = vsel %vm113_vm0, %v724_v36, 0.0  ;;  %v690_v36 = vpop.f32.mrf.mxu3 }
 0x1d2   :  { %733 = vadd.xlane.f32.xlu1 %v732_v5 }
 0x1d4   :  { %v425_v8 = vpop.f32.mrf.mxu0 }
 0x1d5   :  { %v1730_v37 = vadd.f32 %v1721_v32, %v425_v8 }
 0x1d7   :  { %v725_v38 = vmul.f32 %v1730_v37, %v1730_v37 }
 0x1d9   :  { %v735_v39 = vsel %vm113_vm0, %v725_v38, 0.0 }
 0x1da   :  { %736 = vadd.xlane.f32.xlu2 %v735_v39  ;;  %v691_v39 = vadd.f32 %v1156_v2, %v690_v36 }
 0x1dc   :  { %v428_v40 = vpop.f32.mrf.mxu0 }
 0x1dd   :  { %v1736_v31 = vadd.f32 %v1721_v32, %v428_v40 }
 0x1df   :  { %v726_v41 = vmul.f32 %v1736_v31, %v1736_v31 }
 0x1e1   :  { %v738_v42 = vsel %vm113_vm0, %v726_v41, 0.0 }
 0x1e2   :  { %739 = vadd.xlane.f32.xlu2 %v738_v42 }
 0x1e4   :  { %v430_v44 = vpop.f32.mrf.mxu0 }
 0x1e5   :  { %v1742_v45 = vadd.f32 %v1721_v32, %v430_v44 }
 0x1e7   :  { %v727_v46 = vmul.f32 %v1742_v45, %v1742_v45 }
 0x1e9   :  { %v741_v47 = vsel %vm113_vm0, %v727_v46, 0.0  ;;  %v692_v46 = vpop.f32.mrf.mxu3 }
 0x1ea   :  { %742 = vadd.xlane.f32.xlu2 %v741_v47 }
 0x1ec   :  { %v433_v48 = vpop.f32.mrf.mxu0 }
 0x1ed   :  { %v1748_v49 = vadd.f32 %v1721_v32, %v433_v48 }
 0x1ef   :  { %v728_v50 = vmul.f32 %v1748_v49, %v1748_v49 }
 0x1f1   :  { %v744_v51 = vsel %vm113_vm0, %v728_v50, 0.0 }
 0x1f2   :  { %745 = vadd.xlane.f32.xlu2 %v744_v51 }
 0x1f4   :  { %v435_v52 = vpop.f32.mrf.mxu0 }
 0x1f5   :  { %v1754_v53 = vadd.f32 %v1721_v32, %v435_v52 }
 0x1f7   :  { %v729_v54 = vmul.f32 %v1754_v53, %v1754_v53 }
 0x1f9   :  { %v747_v55 = vsel %vm113_vm0, %v729_v54, 0.0 }
 0x1fa   :  { %748 = vadd.xlane.f32.xlu2 %v747_v55 }
 0x1fc   :  { %v438_v57 = vpop.f32.mrf.mxu0 }
 0x1fd   :  { %v1760_v58 = vadd.f32 %v1721_v32, %v438_v57 }
 0x1ff   :  { %v730_v59 = vmul.f32 %v1760_v58, %v1760_v58 }
 0x201   :  { %v750_v61 = vsel %vm113_vm0, %v730_v59, 0.0 }
 0x202   :  { %751 = vadd.xlane.f32.xlu1 %v750_v61 }
 0x204   :  { %v440_v1 = vpop.f32.mrf.mxu0 }
 0x205   :  { %v1798_v8 = vadd.f32 %v1721_v32, %v440_v1  ;;  %v693_v32 = vadd.f32 %v1156_v2, %v692_v46 }
 0x207   :  { %v731_v42 = vmul.f32 %v1798_v8, %v1798_v8 }
 0x209   :  { %v753_v47 = vsel %vm113_vm0, %v731_v42, 0.0 }
 0x20c   :  { %v704_v3 = vpop.f32.mrf.mxu0 }
 0x20d   :  { %v1768_v4 = vadd.f32 %v704_v3, %v676_v33 }
 0x20f   :  { %v852_v7 = vmul.f32 %v1768_v4, %v1768_v4 }
 0x211   :  { %v860_v43 = vsel %vm113_vm0, %v852_v7, 0.0 }
 0x212   :  { %861 = vadd.xlane.f32.xlu2 %v860_v43 }
 0x214   :  { %v706_v10 = vpop.f32.mrf.mxu0 }
 0x215   :  { %v1773_v11 = vadd.f32 %v706_v10, %v678_v9 }
 0x217   :  { %v853_v60 = vmul.f32 %v1773_v11, %v1773_v11 }
 0x219   :  { %v863_v0 = vsel %vm113_vm0, %v853_v60, 0.0 }
 0x21a   :  { %864 = vadd.xlane.f32.xlu0 %v863_v0 }
 0x21c   :  { %v709_v14 = vpop.f32.mrf.mxu0 }
 0x21d   :  { %v1778_v15 = vadd.f32 %v709_v14, %v681_v13 }
 0x21f   :  { %v854_v16 = vmul.f32 %v1778_v15, %v1778_v15 }
 0x221   :  { %v866_v17 = vsel %vm113_vm0, %v854_v16, 0.0 }
 0x222   :  { %867 = vadd.xlane.f32.xlu2 %v866_v17 }
 0x224   :  { %v711_v20 = vpop.f32.mrf.mxu0 }
 0x225   :  { %v1783_v21 = vadd.f32 %v711_v20, %v683_v19 }
 0x227   :  { %v855_v22 = vmul.f32 %v1783_v21, %v1783_v21 }
 0x229   :  { %v869_v23 = vsel %vm113_vm0, %v855_v22, 0.0 }
 0x22a   :  { %870 = vadd.xlane.f32.xlu2 %v869_v23 }
 0x22c   :  { %v714_v62 = vpop.f32.mrf.mxu0 }
 0x22d   :  { %v1788_v26 = vadd.f32 %v714_v62, %v686_v24 }
 0x22f   :  { %v856_v27 = vmul.f32 %v1788_v26, %v1788_v26 }
 0x231   :  { %v872_v28 = vsel %vm113_vm0, %v856_v27, 0.0 }
 0x232   :  { %873 = vadd.xlane.f32.xlu1 %v872_v28 }
 0x234   :  { %v716_v30 = vpop.f32.mrf.mxu0 }
 0x235   :  { %v1793_v34 = vadd.f32 %v716_v30, %v688_v29 }
 0x237   :  { %v857_v5 = vmul.f32 %v1793_v34, %v1793_v34 }
 0x239   :  { %v875_v38 = vsel %vm113_vm0, %v857_v5, 0.0 }
 0x23a   :  { %876 = vadd.xlane.f32.xlu0 %v875_v38 }
 0x23c   :  { %v719_v40 = vpop.f32.mrf.mxu0 }
 0x23d   :  { %v1801_v41 = vadd.f32 %v719_v40, %v691_v39 }
 0x23f   :  { %v858_v44 = vmul.f32 %v1801_v41, %v1801_v41 }
 0x241   :  { %v878_v48 = vsel %vm113_vm0, %v858_v44, 0.0 }
 0x242   :  { %754 = vadd.xlane.f32.xlu0 %v753_v47  ;;  %879 = vadd.xlane.f32.xlu2 %v878_v48 }
 0x244   :  { %v721_v50 = vpop.f32.mrf.mxu0 }
 0x245   :  { %v1809_v51 = vadd.f32 %v721_v50, %v693_v32  ;;  %v734_v59 = vpop.xlane.xlu1 %733 }
 0x246   :  { %v756_v63 = vmax.f32 %v734_v59, 1e-24 }
 0x247   :  { %v859_v52 = vmul.f32 %v1809_v51, %v1809_v51 }
 0x248   :  { %1157 = vrsqrt.f32 %v756_v63  ;;  %vm770_vm12 = vweird.f32 %v756_v63 }
 0x249   :  { %v881_v54 = vsel %vm113_vm0, %v859_v52, 0.0 }
 0x24a   :  { %882 = vadd.xlane.f32.xlu1 %v881_v54 }
 0x24d   :  { %v737_v55 = vpop.xlane.xlu2 %736 }
 0x24e   :  { %v757_v1 = vmax.f32 %v737_v55, 1e-24  ;;  %v1158_v3 = vpop.eup %1157 }
 0x24f   :  { %v765_v2 = vmul.f32 %v1158_v3, %v756_v63  ;;  %vm771_vm11 = vweird.f32 %v1158_v3 }
 0x250   :  { %1159 = vrsqrt.f32 %v757_v1  ;;  %vm1830_vm13 = vmor %vm770_vm12, %vm771_vm11  ;;  %vm780_vm3 = vweird.f32 %v757_v1 }
 0x251   :  { %v766_v43 = vmul.f32 %v1158_v3, %v765_v2 }
 0x253   :  { %v767_v60 = vmul.f32 0.5, %v766_v43 }
 0x255   :  { %v740_v56 = vpop.xlane.xlu2 %739  ;;  %v768_v14 = vsub.f32 1.5, %v767_v60 }
 0x256   :  { %v1814_v6 = vmax.f32 %v740_v56, 1e-24  ;;  %v1816_v10 = vpop.eup %1159 }
 0x257   :  { %v775_v12 = vmul.f32 %v1816_v10, %v757_v1  ;;  %v769_v25 = vmul.f32 %v1158_v3, %v768_v14  ;;  %vm781_vm2 = vweird.f32 %v1816_v10 }
 0x258   :  { %vm1851_vm4 = vmor %vm780_vm3, %vm781_vm2  ;;  %vm790_vm9 = vweird.f32 %v1814_v6 }
 0x259   :  { %v776_v16 = vmul.f32 %v1816_v10, %v775_v12  ;;  %v773_v40 = vsel %vm1830_vm13, %v1158_v3, %v769_v25 }
 0x25a   :  { %v844_v50 = vmul.f32 %v773_v40, %v1724_v35 }
 0x25b   :  { %v777_v23 = vmul.f32 0.5, %v776_v16 }
 0x25d   :  { %v743_v57 = vpop.xlane.xlu2 %742  ;;  %v778_v5 = vsub.f32 1.5, %v777_v23 }
 0x25e   :  { %v1821_v17 = vmax.f32 %v743_v57, 1e-24 }
 0x25f   :  { %v779_v54 = vmul.f32 %v1816_v10, %v778_v5 }
 0x261   :  { %v783_v1 = vsel %vm1851_vm4, %v1816_v10, %v779_v54 }
 0x262   :  { %v845_v10 = vmul.f32 %v783_v1, %v1730_v37 }
 0x265   :  { %v746_v61 = vpop.xlane.xlu2 %745 }
 0x266   :  { %v1828_v62 = vmax.f32 %v746_v61, 1e-24 }
 0x26d   :  { %v749_v33 = vpop.xlane.xlu2 %748 }
 0x26e   :  { %v1855_v63 = vmax.f32 %v749_v33, 1e-24 }
 0x275   :  { %v752_v3 = vpop.xlane.xlu1 %751 }
 0x276   :  { %v1879_v37 = vmax.f32 %v752_v3, 1e-24 }
 0x285   :  { %v862_v7 = vpop.xlane.xlu2 %861 }
 0x286   :  { %v884_v9 = vmax.f32 %v862_v7, 1e-24 }
 0x288   :  { %1161 = vrsqrt.f32 %v884_v9  ;;  %vm898_vm15 = vweird.f32 %v884_v9 }
 0x289   :  { %1163 = vrsqrt.f32 %v1814_v6 }
 0x28d   :  { %v865_v0 = vpop.xlane.xlu0 %864 }
 0x28e   :  { %v1162_v13 = vpop.eup %1161  ;;  %v885_v18 = vmax.f32 %v865_v0, 1e-24 }
 0x28f   :  { %v1823_v19 = vpop.eup %1163  ;;  %v893_v20 = vmul.f32 %v1162_v13, %v884_v9  ;;  %vm899_vm14 = vweird.f32 %v1162_v13 }
 0x290   :  { %1165 = vrsqrt.f32 %v885_v18  ;;  %v785_v24 = vmul.f32 %v1823_v19, %v1814_v6  ;;  %vm900_vm1 = vmor %vm898_vm15, %vm899_vm14  ;;  %vm908_vm6 = vweird.f32 %v885_v18  ;;  %vm791_vm8 = vweird.f32 %v1823_v19 }
 0x291   :  { %v894_v22 = vmul.f32 %v1162_v13, %v893_v20  ;;  %1167 = vrsqrt.f32 %v1821_v17  ;;  %vm1874_vm10 = vmor %vm790_vm9, %vm791_vm8  ;;  %vm800_vm15 = vweird.f32 %v1821_v17 }
 0x292   :  { %v786_v38 = vmul.f32 %v1823_v19, %v785_v24  ;;  %1169 = vrsqrt.f32 %v1828_v62 }
 0x293   :  { %v895_v27 = vmul.f32 0.5, %v894_v22 }
 0x294   :  { %v787_v32 = vmul.f32 0.5, %v786_v38 }
 0x295   :  { %v896_v29 = vsub.f32 1.5, %v895_v27  ;;  %v868_v30 = vpop.xlane.xlu2 %867 }
 0x296   :  { %v1166_v36 = vpop.eup %1165  ;;  %v1835_v39 = vmax.f32 %v868_v30, 1e-24  ;;  %v788_v7 = vsub.f32 1.5, %v787_v32 }
 0x297   :  { %v903_v42 = vmul.f32 %v1166_v36, %v885_v18  ;;  %v897_v44 = vmul.f32 %v1162_v13, %v896_v29  ;;  %v1840_v46 = vpop.eup %1167  ;;  %vm909_vm5 = vweird.f32 %v1166_v36 }
 0x298   :  { %1171 = vrsqrt.f32 %v1835_v39  ;;  %v795_v55 = vmul.f32 %v1840_v46, %v1821_v17  ;;  %v1849_v59 = vpop.eup %1169  ;;  %vm910_vm7 = vmor %vm908_vm6, %vm909_vm5  ;;  %v789_v18 = vmul.f32 %v1823_v19, %v788_v7  ;;  %vm918_vm12 = vweird.f32 %v1835_v39 }
 0x299   :  { %v904_v47 = vmul.f32 %v1166_v36, %v903_v42  ;;  %v901_v48 = vsel %vm900_vm1, %v1162_v13, %v897_v44  ;;  %v805_v0 = vmul.f32 %v1849_v59, %v1828_v62  ;;  %vm801_vm14 = vweird.f32 %v1840_v46 }
 0x29a   :  { %v972_v52 = vmul.f32 %v901_v48, %v1768_v4  ;;  %v796_v60 = vmul.f32 %v1840_v46, %v795_v55  ;;  %v793_v6 = vsel %vm1874_vm10, %v1823_v19, %v789_v18  ;;  %vm1900_vm2 = vmor %vm800_vm15, %vm801_vm14  ;;  %vm811_vm5 = vweird.f32 %v1849_v59 }
 0x29b   :  { %v905_v56 = vmul.f32 0.5, %v904_v47  ;;  %v806_v25 = vmul.f32 %v1849_v59, %v805_v0  ;;  %v846_v19 = vmul.f32 %v793_v6, %v1736_v31  ;;  %vm810_vm6 = vweird.f32 %v1828_v62 }
 0x29c   :  { %v980_v57 = vmul.f32 %v972_v52, %v844_v50  ;;  %v797_v20 = vmul.f32 0.5, %v796_v60 }
 0x29d   :  { %v906_v35 = vsub.f32 1.5, %v905_v56  ;;  %v871_v4 = vpop.xlane.xlu2 %870  ;;  %v807_v42 = vmul.f32 0.5, %v806_v25 }
 0x29e   :  { %v1172_v2 = vpop.eup %1171  ;;  %v1857_v43 = vmax.f32 %v871_v4, 1e-24  ;;  %v988_v9 = vsel %vm113_vm0, %v980_v57, 0.0  ;;  %v798_v5 = vsub.f32 1.5, %v797_v20 }
 0x29f   :  { %v913_v33 = vmul.f32 %v1172_v2, %v1835_v39  ;;  %989 = vadd.xlane.f32.xlu2 %v988_v9  ;;  %v907_v12 = vmul.f32 %v1166_v36, %v906_v35  ;;  %vm919_vm11 = vweird.f32 %v1172_v2  ;;  %v808_v54 = vsub.f32 1.5, %v807_v42 }
 0x2a0   :  { %1173 = vrsqrt.f32 %v1857_v43  ;;  %vm920_vm13 = vmor %vm918_vm12, %vm919_vm11  ;;  %v799_v50 = vmul.f32 %v1840_v46, %v798_v5  ;;  %vm928_vm3 = vweird.f32 %v1857_v43  ;;  %vm820_vm12 = vweird.f32 %v1855_v63 }
 0x2a1   :  { %1175 = vrsqrt.f32 %v1855_v63  ;;  %v914_v13 = vmul.f32 %v1172_v2, %v913_v33  ;;  %v911_v14 = vsel %vm910_vm7, %v1166_v36, %v907_v12  ;;  %v809_v1 = vmul.f32 %v1849_v59, %v808_v54  ;;  %vm1923_vm7 = vmor %vm810_vm6, %vm811_vm5 }
 0x2a2   :  { %v973_v16 = vmul.f32 %v911_v14, %v1773_v11  ;;  %v803_v17 = vsel %vm1900_vm2, %v1840_v46, %v799_v50 }
 0x2a3   :  { %v915_v22 = vmul.f32 0.5, %v914_v13  ;;  %v847_v60 = vmul.f32 %v803_v17, %v1742_v45  ;;  %v813_v45 = vsel %vm1923_vm7, %v1849_v59, %v809_v1 }
 0x2a4   :  { %v981_v23 = vmul.f32 %v973_v16, %v845_v10 }
 0x2a5   :  { %v916_v27 = vsub.f32 1.5, %v915_v22  ;;  %v874_v28 = vpop.xlane.xlu1 %873 }
 0x2a6   :  { %v1174_v29 = vpop.eup %1173  ;;  %v1881_v11 = vmax.f32 %v874_v28, 1e-24  ;;  %v991_v30 = vsel %vm113_vm0, %v981_v23, 0.0  ;;  %v848_v28 = vmul.f32 %v813_v45, %v1748_v49 }
 0x2a7   :  { %v1887_v36 = vpop.eup %1175  ;;  %v923_v38 = vmul.f32 %v1174_v29, %v1857_v43  ;;  %992 = vadd.xlane.f32.xlu0 %v991_v30  ;;  %v917_v40 = vmul.f32 %v1172_v2, %v916_v27  ;;  %vm929_vm1 = vweird.f32 %v1174_v29 }
 0x2a8   :  { %1177 = vrsqrt.f32 %v1881_v11  ;;  %v815_v48 = vmul.f32 %v1887_v36, %v1855_v63  ;;  %vm930_vm4 = vmor %vm928_vm3, %vm929_vm1  ;;  %vm938_vm9 = vweird.f32 %v1881_v11  ;;  %vm821_vm11 = vweird.f32 %v1887_v36 }
 0x2a9   :  { %v924_v44 = vmul.f32 %v1174_v29, %v923_v38  ;;  %v921_v47 = vsel %vm920_vm13, %v1172_v2, %v917_v40  ;;  %1179 = vrsqrt.f32 %v1879_v37  ;;  %vm1942_vm13 = vmor %vm820_vm12, %vm821_vm11  ;;  %vm830_vm3 = vweird.f32 %v1879_v37 }
 0x2aa   :  { %v974_v32 = vmul.f32 %v921_v47, %v1778_v15  ;;  %v816_v31 = vmul.f32 %v1887_v36, %v815_v48 }
 0x2ab   :  { %v925_v39 = vmul.f32 0.5, %v924_v44 }
 0x2ac   :  { %v982_v52 = vmul.f32 %v974_v32, %v846_v19  ;;  %v817_v43 = vmul.f32 0.5, %v816_v31 }
 0x2ad   :  { %v926_v55 = vsub.f32 1.5, %v925_v39  ;;  %v877_v56 = vpop.xlane.xlu0 %876 }
 0x2ae   :  { %v1178_v57 = vpop.eup %1177  ;;  %v1905_v15 = vmax.f32 %v877_v56, 1e-24  ;;  %v994_v3 = vsel %vm113_vm0, %v982_v52, 0.0  ;;  %v818_v18 = vsub.f32 1.5, %v817_v43 }
 0x2af   :  { %v933_v35 = vmul.f32 %v1178_v57, %v1881_v11  ;;  %995 = vadd.xlane.f32.xlu1 %v994_v3  ;;  %v927_v4 = vmul.f32 %v1174_v29, %v926_v55  ;;  %v1913_v2 = vpop.eup %1179  ;;  %vm939_vm8 = vweird.f32 %v1178_v57 }
 0x2b0   :  { %1181 = vrsqrt.f32 %v1905_v15  ;;  %v825_v46 = vmul.f32 %v1913_v2, %v1879_v37  ;;  %vm940_vm10 = vmor %vm938_vm9, %vm939_vm8  ;;  %v819_v30 = vmul.f32 %v1887_v36, %v818_v18  ;;  %vm948_vm15 = vweird.f32 %v1905_v15 }
 0x2b1   :  { %v934_v7 = vmul.f32 %v1178_v57, %v933_v35  ;;  %v931_v9 = vsel %vm930_vm4, %v1174_v29, %v927_v4  ;;  %vm831_vm2 = vweird.f32 %v1913_v2 }
 0x2b2   :  { %v975_v33 = vmul.f32 %v931_v9, %v1783_v21  ;;  %v826_v23 = vmul.f32 %v1913_v2, %v825_v46  ;;  %vm832_vm4 = vmor %vm830_vm3, %vm831_vm2 }
 0x2b3   :  { %v935_v12 = vmul.f32 0.5, %v934_v7 }
 0x2b4   :  { %v983_v13 = vmul.f32 %v975_v33, %v847_v60  ;;  %v827_v6 = vmul.f32 0.5, %v826_v23 }
 0x2b5   :  { %v936_v14 = vsub.f32 1.5, %v935_v12  ;;  %v755_v10 = vpop.xlane.xlu0 %754  ;;  %v880_v16 = vpop.xlane.xlu2 %879 }
 0x2b6   :  { %v1182_v21 = vpop.eup %1181  ;;  %v1930_v62 = vmax.f32 %v755_v10, 1e-24  ;;  %v890_v20 = vmax.f32 %v880_v16, 1e-24  ;;  %v997_v22 = vsel %vm113_vm0, %v983_v13, 0.0  ;;  %v828_v19 = vsub.f32 1.5, %v827_v6 }
 0x2b7   :  { %v943_v24 = vmul.f32 %v1182_v21, %v1905_v15  ;;  %998 = vadd.xlane.f32.xlu2 %v997_v22  ;;  %v937_v25 = vmul.f32 %v1178_v57, %v936_v14  ;;  %vm949_vm14 = vweird.f32 %v1182_v21 }
 0x2b8   :  { %1183 = vrsqrt.f32 %v1930_v62  ;;  %vm950_vm1 = vmor %vm948_vm15, %vm949_vm14  ;;  %vm958_vm6 = vweird.f32 %v890_v20  ;;  %vm840_vm9 = vweird.f32 %v1930_v62  ;;  %vm1059_vm14 = vcmask 0  }
 0x2b9   :  { %v944_v27 = vmul.f32 %v1182_v21, %v943_v24  ;;  %1185 = vrsqrt.f32 %v890_v20  ;;  %v941_v59 = vsel %vm940_vm10, %v1178_v57, %v937_v25  ;;  %v829_v57 = vmul.f32 %v1913_v2, %v828_v19  ;;  %v1026_v19 = vld [vmem:[%s2002_s1 + $0x30] sm:$0xff] }
 0x2ba   :  { %v976_v29 = vmul.f32 %v941_v59, %v1788_v26  ;;  %v823_v26 = vsel %vm1942_vm13, %v1887_v36, %v819_v30  ;;  %v1023_v59 = vld [vmem:[%s2002_s1 + $0x18] sm:$0xff] }
 0x2bb   :  { %v945_v11 = vmul.f32 0.5, %v944_v27  ;;  %v849_v55 = vmul.f32 %v823_v26, %v1754_v53  ;;  %v833_v53 = vsel %vm832_vm4, %v1913_v2, %v829_v57  ;;  %v1027_v57 = vld [vmem:[%s2002_s1 + $0x38] sm:$0xff] }
 0x2bc   :  { %v984_v5 = vmul.f32 %v976_v29, %v848_v28  ;;  %v850_v9 = vmul.f32 %v833_v53, %v1760_v58 }
 0x2bd   :  { %v946_v40 = vsub.f32 1.5, %v945_v11  ;;  %v883_v42 = vpop.xlane.xlu1 %882  ;;  %v1024_v11 = vld [vmem:[%s2002_s1 + $0x20] sm:$0xff] }
 0x2be   :  { %v1184_v44 = vpop.eup %1183  ;;  %v891_v47 = vmax.f32 %v883_v42, 1e-24  ;;  %v1000_v49 = vsel %vm113_vm0, %v984_v5, 0.0  ;;  %v1025_v42 = vld [vmem:[%s2002_s1 + $0x28] sm:$0xff] }
 0x2bf   :  { %v1186_v48 = vpop.eup %1185  ;;  %v835_v63 = vmul.f32 %v1184_v44, %v1930_v62  ;;  %1001 = vadd.xlane.f32.xlu0 %v1000_v49  ;;  %v947_v32 = vmul.f32 %v1182_v21, %v946_v40  ;;  %vm841_vm8 = vweird.f32 %v1184_v44  ;;  %v1021_v62 = vld [vmem:[%s2002_s1 + $0x8] sm:$0xff] }
 0x2c0   :  { %v953_v39 = vmul.f32 %v1186_v48, %v890_v20  ;;  %1187 = vrsqrt.f32 %v891_v47  ;;  %vm959_vm5 = vweird.f32 %v1186_v48  ;;  %vm842_vm11 = vmor %vm840_vm9, %vm841_vm8  ;;  %vm968_vm12 = vweird.f32 %v891_v47 }
 0x2c1   :  { %v836_v50 = vmul.f32 %v1184_v44, %v835_v63  ;;  %v951_v52 = vsel %vm950_vm1, %v1182_v21, %v947_v32  ;;  %vm960_vm7 = vmor %vm958_vm6, %vm959_vm5 }
 0x2c2   :  { %v954_v54 = vmul.f32 %v1186_v48, %v953_v39  ;;  %v977_v56 = vmul.f32 %v951_v52, %v1793_v34 }
 0x2c3   :  { %v837_v36 = vmul.f32 0.5, %v836_v50 }
 0x2c4   :  { %v955_v61 = vmul.f32 0.5, %v954_v54  ;;  %v985_v31 = vmul.f32 %v977_v56, %v849_v55 }
 0x2c5   :  { %v838_v17 = vsub.f32 1.5, %v837_v36 }
 0x2c6   :  { %v1188_v15 = vpop.eup %1187  ;;  %v956_v3 = vsub.f32 1.5, %v955_v61  ;;  %v1003_v35 = vsel %vm113_vm0, %v985_v31, 0.0 }
 0x2c7   :  { %v963_v4 = vmul.f32 %v1188_v15, %v891_v47  ;;  %1004 = vadd.xlane.f32.xlu1 %v1003_v35  ;;  %v839_v60 = vmul.f32 %v1184_v44, %v838_v17  ;;  %vm969_vm10 = vweird.f32 %v1188_v15 }
 0x2c8   :  { %v957_v34 = vmul.f32 %v1186_v48, %v956_v3  ;;  %vm970_vm13 = vmor %vm968_vm12, %vm969_vm10 }
 0x2c9   :  { %v964_v7 = vmul.f32 %v1188_v15, %v963_v4  ;;  %v843_v12 = vsel %vm842_vm11, %v1184_v44, %v839_v60 }
 0x2ca   :  { %v961_v1 = vsel %vm960_vm7, %v1186_v48, %v957_v34  ;;  %v851_v13 = vmul.f32 %v843_v12, %v1798_v8  ;;  %v1020_v8 = vld [vmem:[%s2002_s1] sm:$0xff] }
 0x2cb   :  { %v965_v37 = vmul.f32 0.5, %v964_v7  ;;  %v978_v43 = vmul.f32 %v961_v1, %v1801_v41 }
 0x2cd   :  { %v966_v33 = vsub.f32 1.5, %v965_v37  ;;  %v986_v46 = vmul.f32 %v978_v43, %v850_v9 }
 0x2cf   :  { %v1006_v2 = vsel %vm113_vm0, %v986_v46, 0.0  ;;  %v967_v0 = vmul.f32 %v1188_v15, %v966_v33 }
 0x2d0   :  { %1007 = vadd.xlane.f32.xlu2 %v1006_v2 }
 0x2d1   :  { %v971_v58 = vsel %vm970_vm13, %v1188_v15, %v967_v0 }
 0x2d2   :  { %v979_v14 = vmul.f32 %v971_v58, %v1809_v51  ;;  %v1022_v51 = vld [vmem:[%s2002_s1 + $0x10] sm:$0xff]  ;;  %s1068_s1 = sshll.u32 %s2014_s15, 4  ;;  %s1069_s1 = int_to_ptr.hbm [resolvable:$true] %s1068_s1 }
 0x2d4   :  { %v987_v41 = vmul.f32 %v979_v14, %v851_v13 }
 0x2d6   :  { %v1009_v10 = vsel %vm113_vm0, %v987_v41, 0.0  ;;  %vm1036_vm0 = vcmask 7168  }
 0x2d7   :  { %1010 = vadd.xlane.f32.xlu0 %v1009_v10 }
 0x312   :  { %v990_v16 = vpop.xlane.xlu2 %989 }
 0x313   :  { %v1012_v22 = vsub.f32 1.0, %v990_v16 }
 0x315   :  { %v1028_v29 = vmul.f32 %v1020_v8, %v1012_v22 }
 0x317   :  { %v1037_v44 = vsel %vm1036_vm0, %v1028_v29, 0.0 }
 0x31a   :  { %v993_v45 = vpop.xlane.xlu0 %992 }
 0x31b   :  { %v1013_v18 = vsub.f32 1.0, %v993_v45 }
 0x31d   :  { %v1029_v25 = vmul.f32 %v1021_v62, %v1013_v18 }
 0x31f   :  { %v1038_v5 = vsel %vm1036_vm0, %v1029_v25, 0.0 }
 0x320   :  { %v1039_v48 = vadd.f32 %v1038_v5, %v1037_v44 }
 0x322   :  { %v996_v21 = vpop.xlane.xlu1 %995 }
 0x323   :  { %v1014_v23 = vsub.f32 1.0, %v996_v21 }
 0x325   :  { %v1030_v30 = vmul.f32 %v1022_v51, %v1014_v23 }
 0x327   :  { %v1040_v47 = vsel %vm1036_vm0, %v1030_v30, 0.0 }
 0x328   :  { %v1041_v50 = vadd.f32 %v1040_v47, %v1039_v48 }
 0x32a   :  { %v999_v20 = vpop.xlane.xlu2 %998 }
 0x32b   :  { %v1015_v27 = vsub.f32 1.0, %v999_v20 }
 0x32d   :  { %v1031_v38 = vmul.f32 %v1023_v59, %v1015_v27 }
 0x32f   :  { %v1042_v32 = vsel %vm1036_vm0, %v1031_v38, 0.0 }
 0x330   :  { %v1043_v55 = vadd.f32 %v1042_v32, %v1041_v50 }
 0x332   :  { %v1002_v24 = vpop.xlane.xlu0 %1001 }
 0x333   :  { %v1016_v6 = vsub.f32 1.0, %v1002_v24 }
 0x335   :  { %v1032_v49 = vmul.f32 %v1024_v11, %v1016_v6 }
 0x337   :  { %v1044_v52 = vsel %vm1036_vm0, %v1032_v49, 0.0 }
 0x338   :  { %v1045_v36 = vadd.f32 %v1044_v52, %v1043_v55 }
 0x33a   :  { %v1005_v28 = vpop.xlane.xlu1 %1004 }
 0x33b   :  { %v1017_v40 = vsub.f32 1.0, %v1005_v28 }
 0x33d   :  { %v1033_v39 = vmul.f32 %v1025_v42, %v1017_v40 }
 0x33f   :  { %v1046_v56 = vsel %vm1036_vm0, %v1033_v39, 0.0 }
 0x340   :  { %v1047_v3 = vadd.f32 %v1046_v56, %v1045_v36 }
 0x343   :  { %v1008_v26 = vpop.xlane.xlu2 %1007 }
 0x344   :  { %v1018_v63 = vsub.f32 1.0, %v1008_v26 }
 0x346   :  { %v1034_v54 = vmul.f32 %v1026_v19, %v1018_v63 }
 0x348   :  { %v1048_v31 = vsel %vm1036_vm0, %v1034_v54, 0.0 }
 0x349   :  { %v1049_v17 = vadd.f32 %v1048_v31, %v1047_v3 }
 0x34a   :  { %v1011_v61 = vpop.xlane.xlu0 %1010 }
 0x34b   :  { %v1019_v15 = vsub.f32 1.0, %v1011_v61 }
 0x34d   :  { %v1035_v35 = vmul.f32 %v1027_v57, %v1019_v15 }
 0x34f   :  { %v1050_v4 = vsel %vm1036_vm0, %v1035_v35, 0.0 }
 0x350   :  { %v1051_v53 = vadd.f32 %v1050_v4, %v1049_v17 }
 0x352   :  { %v1052_v34 = vrot.slane %v1051_v53, 4 }
 0x354   :  { %v1053_v7 = vadd.f32 %v1052_v34, %v1051_v53 }
 0x356   :  { %v1054_v9 = vrot.slane %v1053_v7, 2 }
 0x358   :  { %v1055_v1 = vadd.f32 %v1054_v9, %v1053_v7 }
 0x35a   :  { %v1056_v37 = vrot.slane %v1055_v1, 1 }
 0x35c   :  { %v1057_v43 = vadd.f32 %v1056_v37, %v1055_v1 }
 0x35e   :  { %v1058_v60 = vmul.f32 0.03125, %v1057_v43 }
 0x360   :  { %1060 = vst.msk [vmem:[#allocation5] sm:$0x1] %vm1059_vm14, %v1058_v60 }
 0x361   :  { %1071 = dma.vmem_to_hbm [thread:$0]  %s1067_s16, 16, %s1069_s1, [#allocation6]  }
 0x362   :  { %1213 = dma.done.wait [#allocation6], 16  }
 0x363   :  { %1214 = vsyncadd [#allocation6], 4294967280 }
 0x364   :  { %1076 = vsyncpa [#allocation6], 1 }

// kernel: gmae_forward.8
= control target key start
LH: loop header
LB: loop body
LE: loop exit
PB: predicated region body
PF: predicated region fallthrough
CT: control target
= control target key end

     0   :  { %v2408_v3 = vmov 0   ;;  %s4327_s0 = inlined_call_operand.vmem [shape: bf16[2,64,64], index: 0, kind: input, shape index: {}]   ;;  %s4328_s1 = inlined_call_operand.vmem [shape: f32[64,32], index: 1, kind: input, shape index: {}]   ;;  %s4329_s2 = inlined_call_operand.vmem [shape: f32[1,32], index: 2, kind: input, shape index: {}]   ;;  %s4330_s3 = inlined_call_operand.vmem [shape: f32[64,3], index: 3, kind: input, shape index: {}]   ;;  %s4331_s4 = inlined_call_operand.vmem [shape: f32[32,16], index: 4, kind: input, shape index: {}]   ;;  %s4332_s5 = inlined_call_operand.vmem [shape: f32[1,16], index: 5, kind: input, shape index: {}]   ;;  %s4333_s6 = inlined_call_operand.vmem [shape: f32[1,16], index: 6, kind: input, shape index: {}]   ;;  %s4334_s7 = inlined_call_operand.vmem [shape: f32[1,16], index: 7, kind: input, shape index: {}]   ;;  %s4335_s8 = inlined_call_operand.vmem [shape: bf16[64,64], index: 8, kind: input, shape index: {}]   ;;  %s4336_s9 = inlined_call_operand.vmem [shape: bf16[64,64], index: 9, kind: input, shape index: {}]   ;;  %s4337_s10 = inlined_call_operand.vmem [shape: f32[64,16], index: 10, kind: input, shape index: {}]   ;;  %s4338_s11 = inlined_call_operand.vmem [shape: f32[64,1], index: 11, kind: input, shape index: {}]   ;;  %s4339_s12 = inlined_call_operand.hbm [shape: f32[1,1], index: 12, kind: output, shape index: {}]  }
   0x1   :  { %v152_v0 = vld [vmem:[%s4330_s3 + $0x10] sm:$0xff]  ;;  %v150_v1 = vld [vmem:[%s4330_s3] sm:$0xff]  ;;  %2202 = vset.pattern.permute.xlu1 %v2408_v3  ;;  %2201 = vset.pattern.permute.xlu0 %v2408_v3  ;;  %v82_v4 = vld [vmem:[%s4328_s1 + $0x38] sm:$0xff] }
   0x2   :  { %v81_v2 = vld [vmem:[%s4328_s1 + $0x30] sm:$0xff]  ;;  %vm160_vm0 = vcmp.gt.f32.partialorder %v152_v0, 0.0  ;;  %vm158_vm1 = vcmp.gt.f32.partialorder %v150_v1, 0.0  ;;  %v79_v5 = vld [vmem:[%s4328_s1 + $0x20] sm:$0xff]  ;;  %v80_v6 = vld [vmem:[%s4328_s1 + $0x28] sm:$0xff]  ;;  %2203 = vset.pattern.permute.xlu2 %v2408_v3 }
   0x3   :  { %v2495_v7 = vsel %vm160_vm0, 1, %v2408_v3  ;;  %v2497_v8 = vsel %vm158_vm1, 1, %v2408_v3  ;;  %v86_v9 = vpack.c.bf16 %v82_v4, %v81_v2  ;;  %v154_v10 = vld [vmem:[%s4330_s3 + $0x20] sm:$0xff]  ;;  %v153_v11 = vld [vmem:[%s4330_s3 + $0x18] sm:$0xff]  ;;  %v151_v12 = vld [vmem:[%s4330_s3 + $0x8] sm:$0xff]  ;;  %v85_v13 = vpack.c.bf16 %v80_v6, %v79_v5 }
   0x4   :  { %181 = vperm.xlu1 %2202, %v2495_v7   ;;  %175 = vperm.xlu0 %2201, %v2497_v8   ;;  %vm162_vm2 = vcmp.gt.f32.partialorder %v154_v10, 0.0  ;;  %vm161_vm3 = vcmp.gt.f32.partialorder %v153_v11, 0.0  ;;  %vm159_vm4 = vcmp.gt.f32.partialorder %v151_v12, 0.0  ;;  %v77_v15 = vld [vmem:[%s4328_s1 + $0x10] sm:$0xff]  ;;  %v78_v16 = vld [vmem:[%s4328_s1 + $0x18] sm:$0xff]  ;;  %v155_v17 = vld [vmem:[%s4330_s3 + $0x28] sm:$0xff] }
   0x5   :  { %124 = vmatpush.bf16.msra.mxu0 %v86_v9  ;;  %2190 = vmatpush.bf16.msra.mxu3 %v86_v9  ;;  %v170_v14 = vsel %vm162_vm2, 1, %v2408_v3  ;;  %v169_v18 = vsel %vm161_vm3, 1, %v2408_v3  ;;  %v167_v19 = vsel %vm159_vm4, 1, %v2408_v3  ;;  %vm163_vm5 = vcmp.gt.f32.partialorder %v155_v17, 0.0 }
   0x6   :  { %187 = vperm.xlu2 %2203, %v170_v14   ;;  %v84_v20 = vpack.c.bf16 %v78_v16, %v77_v15 }
   0x9   :  { %125 = vmatpush.bf16.msra.mxu0 %v85_v13  ;;  %2191 = vmatpush.bf16.msra.mxu3 %v85_v13 }
   0xa   :  { %17 = vsyncpa [#allocation3], 0  ;;  %v75_v21 = vld [vmem:[%s4328_s1] sm:$0xff]  ;;  %v76_v22 = vld [vmem:[%s4328_s1 + $0x8] sm:$0xff]  ;;  %v171_v23 = vsel %vm163_vm5, 1, %v2408_v3  ;;  %vm107_vm8 = vcmask 523264  }
   0xb   :  { %v157_v24 = vld [vmem:[%s4330_s3 + $0x38] sm:$0xff]  ;;  %v156_v25 = vld [vmem:[%s4330_s3 + $0x30] sm:$0xff]  ;;  %v83_v26 = vpack.c.bf16 %v76_v22, %v75_v21  ;;  %v2148_v27 = vld [vmem:[%s4327_s0] sm:$0xff]  ;;  %v2409_v31 = vmov 1   ;;  %v2410_v33 = vmov 2   ;;  %vm315_vm14 = vcmask 261120  }
   0xc   :  { %184 = vperm.xlu1 %2202, %v169_v18   ;;  %178 = vperm.xlu0 %2201, %v167_v19   ;;  %vm165_vm6 = vcmp.gt.f32.partialorder %v157_v24, 0.0  ;;  %vm164_vm7 = vcmp.gt.f32.partialorder %v156_v25, 0.0  ;;  %v2149_v28 = vld [vmem:[%s4327_s0 + $0x8] sm:$0xff]  ;;  %v2150_v32 = vld [vmem:[%s4327_s0 + $0x10] sm:$0xff]  ;;  %v2151_v34 = vld [vmem:[%s4327_s0 + $0x18] sm:$0xff]  ;;  %s2095_s0 = sshll.u32 %s4339_s12, 4  ;;  %s2096_s0 = int_to_ptr.hbm [resolvable:$true] %s2095_s0 }
   0xd   :  { %126 = vmatpush.bf16.msra.mxu0 %v84_v20  ;;  %2192 = vmatpush.bf16.msra.mxu3 %v84_v20  ;;  %v173_v29 = vsel %vm165_vm6, 1, %v2408_v3  ;;  %v172_v30 = vsel %vm164_vm7, 1, %v2408_v3  ;;  %v299_v36 = vld [vmem:[%s4331_s4 + $0x10] sm:$0xff]  ;;  %v300_v37 = vld [vmem:[%s4331_s4 + $0x18] sm:$0xff]  ;;  %v297_v42 = vld [vmem:[%s4331_s4] sm:$0xff] }
   0xe   :  { %190 = vperm.xlu2 %2203, %v171_v23   ;;  %v314_v38 = vpack.c.bf16 %v300_v37, %v299_v36  ;;  %v298_v43 = vld [vmem:[%s4331_s4 + $0x8] sm:$0xff]  ;;  %v2574_v51 = vld [vmem:[%s4329_s2] ss:$0 sm:$0xff] }
   0xf   :  { %v313_v44 = vpack.c.bf16 %v298_v43, %v297_v42 }
  0x10   :  { %358 = vmatpush.bf16.msra.mxu1 %v314_v38  ;;  %2194 = vmatpush.bf16.msra.mxu2 %v314_v38 }
  0x11   :  { %127 = vmatpush.bf16.msra.mxu0 %v83_v26  ;;  %2193 = vmatpush.bf16.msra.mxu3 %v83_v26 }
  0x14   :  { %2120 = vmatmul.msk.bf16.vlgmr.msra.gmra.mxu0 %vm107_vm8, %v2148_v27  ;;  %2121 = vmatmul.msk.bf16.vlgmr.msra.gmra.mxu3 %vm107_vm8, %v2149_v28 }
  0x15   :  { %196 = vperm.xlu1 %2202, %v173_v29   ;;  %193 = vperm.xlu0 %2201, %v172_v30  }
  0x16   :  { %2204 = vset.pattern.permute.xlu2 %v2409_v31  ;;  %359 = vmatpush.bf16.msra.mxu1 %v313_v44 }
  0x17   :  { %218 = vperm.xlu2 %2204, %v2497_v8   ;;  %2195 = vmatpush.bf16.msra.mxu2 %v313_v44 }
  0x1d   :  { %2206 = vset.pattern.permute.xlu1 %v2409_v31  ;;  %2205 = vset.pattern.permute.xlu0 %v2409_v31 }
  0x1e   :  { %224 = vperm.xlu1 %2206, %v2495_v7   ;;  %221 = vperm.xlu0 %2205, %v167_v19  }
  0x1f   :  { %227 = vperm.xlu2 %2204, %v169_v18  }
  0x24   :  { %2122 = vmatmul.msk.bf16.gmra.mxu3 %vm107_vm8, %v2150_v32 }
  0x26   :  { %230 = vperm.xlu1 %2206, %v170_v14   ;;  %236 = vperm.xlu0 %2205, %v172_v30  }
  0x27   :  { %233 = vperm.xlu2 %2204, %v171_v23  }
  0x2e   :  { %239 = vperm.xlu1 %2206, %v173_v29   ;;  %2208 = vset.pattern.permute.xlu0 %v2410_v33 }
  0x2f   :  { %261 = vperm.xlu0 %2208, %v167_v19   ;;  %2207 = vset.pattern.permute.xlu2 %v2410_v33 }
  0x30   :  { %258 = vperm.xlu2 %2207, %v2497_v8  }
  0x34   :  { %2123 = vmatmul.msk.bf16.gmra.mxu3 %vm107_vm8, %v2151_v34 }
  0x36   :  { %2209 = vset.pattern.permute.xlu1 %v2410_v33 }
  0x37   :  { %264 = vperm.xlu1 %2209, %v2495_v7   ;;  %276 = vperm.xlu0 %2208, %v172_v30  }
  0x38   :  { %267 = vperm.xlu2 %2207, %v169_v18  }
  0x3f   :  { %270 = vperm.xlu1 %2209, %v170_v14  }
  0x40   :  { %273 = vperm.xlu2 %2207, %v171_v23  }
  0x47   :  { %279 = vperm.xlu1 %2209, %v173_v29  }
  0x60   :  { %v2551_v35 = vpop.permute.xlu2 %187 }
  0x68   :  { %v2559_v41 = vpop.permute.xlu2 %190 }
  0x71   :  { %v219_v47 = vpop.permute.xlu2 %218 }
  0x72   :  { %vm241_vm9 = vcmp.eq.s32.totalorder %v219_v47, 1 }
  0x76   :  { %v182_v39 = vpop.permute.xlu1 %181  ;;  %v176_v40 = vpop.permute.xlu0 %175 }
  0x77   :  { %vm198_vm11 = vcmp.eq.s32.totalorder %v176_v40, 1  ;;  %vm200_vm4 = vcmp.eq.s32.totalorder %v182_v39, 1 }
  0x79   :  { %v228_v50 = vpop.permute.xlu2 %227 }
  0x7a   :  { %vm244_vm15 = vcmp.eq.s32.totalorder %v228_v50, 1  ;;  %v429_v50 = vld [vmem:[%s4337_s10 + $0x28] sm:$0xff] }
  0x7e   :  { %v185_v45 = vpop.permute.xlu1 %184  ;;  %v179_v46 = vpop.permute.xlu0 %178 }
  0x7f   :  { %vm199_vm12 = vcmp.eq.s32.totalorder %v179_v46, 1  ;;  %vm201_vm2 = vcmp.eq.s32.totalorder %v185_v45, 1  ;;  %v425_v46 = vld [vmem:[%s4337_s10 + $0x8] sm:$0xff] }
  0x80   :  { %v433_v47 = vmul.f32 %v425_v46, %v425_v46 }
  0x81   :  { %v234_v56 = vpop.permute.xlu2 %233 }
  0x82   :  { %vm246_vm6 = vcmp.eq.s32.totalorder %v234_v56, 1 }
  0x87   :  { %v2567_v48 = vpop.permute.xlu1 %196  ;;  %v2569_v49 = vpop.permute.xlu0 %193 }
  0x8a   :  { %v259_v3 = vpop.permute.xlu2 %258 }
  0x8b   :  { %vm281_vm0 = vcmp.eq.s32.totalorder %v259_v3, 1  ;;  %v431_v3 = vld [vmem:[%s4337_s10 + $0x38] sm:$0xff] }
  0x90   :  { %v225_v52 = vpop.permute.xlu1 %224  ;;  %v222_v53 = vpop.permute.xlu0 %221 }
  0x91   :  { %v129_v54 = vpop.f32.mrf.mxu0  ;;  %vm243_vm10 = vcmp.eq.s32.totalorder %v225_v52, 1  ;;  %vm242_vm13 = vcmp.eq.s32.totalorder %v222_v53, 1  ;;  %v437_v52 = vmul.f32 %v429_v50, %v429_v50 }
  0x92   :  { %v2577_v55 = vsel %vm241_vm9, %v2574_v51, %v129_v54  ;;  %v209_v62 = vsel %vm198_vm11, %v2574_v51, %v129_v54  ;;  %v289_v9 = vsel %vm281_vm0, %v2574_v51, %v129_v54  ;;  %v268_v18 = vpop.permute.xlu2 %267  ;;  %vm203_vm9 = vcmp.eq.s32.totalorder %v2559_v41, 1 }
  0x93   :  { %vm284_vm7 = vcmp.eq.s32.totalorder %v268_v18, 1  ;;  %vm202_vm11 = vcmp.eq.s32.totalorder %v2551_v35, 1  ;;  %vm205_vm0 = vcmp.eq.s32.totalorder %v2567_v48, 1 }
  0x97   :  { %v134_v57 = vpop.f32.mrf.mxu3 }
  0x98   :  { %v2580_v58 = vsel %vm243_vm10, %v2574_v51, %v134_v57  ;;  %v231_v59 = vpop.permute.xlu1 %230  ;;  %v237_v60 = vpop.permute.xlu0 %236  ;;  %v211_v15 = vsel %vm200_vm4, %v2574_v51, %v134_v57  ;;  %vm440_vm4 = vcmask 130048  }
  0x99   :  { %v131_v61 = vpop.f32.mrf.mxu0  ;;  %vm245_vm3 = vcmp.eq.s32.totalorder %v231_v59, 1  ;;  %vm247_vm10 = vcmp.eq.s32.totalorder %v237_v60, 1  ;;  %v444_v48 = vsel %vm440_vm4, %v433_v47, 0.0  ;;  %v456_v54 = vsel %vm440_vm4, %v437_v52, 0.0 }
  0x9a   :  { %v210_v63 = vsel %vm199_vm12, %v2574_v51, %v131_v61  ;;  %v2585_v0 = vsel %vm242_vm13, %v2574_v51, %v131_v61  ;;  %v274_v31 = vpop.permute.xlu2 %273  ;;  %445 = vadd.xlane.f32.xlu0 %v444_v48 }
  0x9b   :  { %v301_v1 = vpack.c.bf16 %v210_v63, %v209_v62  ;;  %v305_v2 = vpack.c.bf16 %v2585_v0, %v2577_v55  ;;  %v427_v55 = vld [vmem:[%s4337_s10 + $0x18] sm:$0xff]  ;;  %v430_v0 = vld [vmem:[%s4337_s10 + $0x30] sm:$0xff] }
  0x9c   :  { %v435_v56 = vmul.f32 %v427_v55, %v427_v55 }
  0x9d   :  { %2124 = vmatmul.msk.bf16.vlgmr.msra.gmra.mxu1 %vm315_vm14, %v301_v1  ;;  %v438_v1 = vmul.f32 %v430_v0, %v430_v0 }
  0x9f   :  { %v136_v4 = vpop.f32.mrf.mxu3 }
  0xa0   :  { %v2591_v5 = vsel %vm244_vm15, %v2574_v51, %v136_v4  ;;  %v240_v6 = vpop.permute.xlu1 %239  ;;  %v212_v13 = vsel %vm201_vm2, %v2574_v51, %v136_v4  ;;  %v292_v23 = vsel %vm284_vm7, %v2574_v51, %v136_v4  ;;  %vm286_vm15 = vcmp.eq.s32.totalorder %v274_v31, 1 }
  0xa1   :  { %v262_v7 = vpop.permute.xlu0 %261  ;;  %v306_v8 = vpack.c.bf16 %v2591_v5, %v2580_v58  ;;  %v302_v17 = vpack.c.bf16 %v212_v13, %v211_v15  ;;  %vm248_vm13 = vcmp.eq.s32.totalorder %v240_v6, 1  ;;  %v426_v58 = vld [vmem:[%s4337_s10 + $0x10] sm:$0xff]  ;;  %v439_v4 = vmul.f32 %v431_v3, %v431_v3  ;;  %v2681_v6 = vld [vmem:[%s4332_s5] ss:$0 sm:$0xff] }
  0xa2   :  { %vm282_vm1 = vcmp.eq.s32.totalorder %v262_v7, 1  ;;  %457 = vadd.xlane.f32.xlu0 %v456_v54  ;;  %v434_v59 = vmul.f32 %v426_v58, %v426_v58 }
  0xa3   :  { %v290_v10 = vsel %vm282_vm1, %v2574_v51, %v131_v61  ;;  %vm204_vm1 = vcmp.eq.s32.totalorder %v2569_v49, 1  ;;  %v424_v49 = vld [vmem:[%s4337_s10] sm:$0xff]  ;;  %v462_v5 = vsel %vm440_vm4, %v439_v4, 0.0 }
  0xa4   :  { %v309_v11 = vpack.c.bf16 %v290_v10, %v289_v9  ;;  %v447_v60 = vsel %vm440_vm4, %v434_v59, 0.0  ;;  %v428_v61 = vld [vmem:[%s4337_s10 + $0x20] sm:$0xff] }
  0xa5   :  { %448 = vadd.xlane.f32.xlu1 %v447_v60  ;;  %v436_v62 = vmul.f32 %v428_v61, %v428_v61  ;;  %v2691_v10 = vld [vmem:[%s4333_s6] ss:$0 sm:$0xff] }
  0xa6   :  { %2132 = vmatmul.msk.bf16.vlgmr.msra.gmra.mxu2 %vm315_vm14, %v309_v11 }
  0xa7   :  { %v139_v12 = vpop.f32.mrf.mxu3  ;;  %v453_v63 = vsel %vm440_vm4, %v436_v62, 0.0 }
  0xa8   :  { %v2600_v14 = vsel %vm245_vm3, %v2574_v51, %v139_v12  ;;  %v213_v28 = vsel %vm202_vm11, %v2574_v51, %v139_v12 }
  0xa9   :  { %v265_v16 = vpop.permute.xlu1 %264  ;;  %v277_v42 = vpop.permute.xlu0 %276 }
  0xaa   :  { %vm283_vm5 = vcmp.eq.s32.totalorder %v265_v16, 1  ;;  %vm287_vm3 = vcmp.eq.s32.totalorder %v277_v42, 1 }
  0xab   :  { %v291_v21 = vsel %vm283_vm5, %v2574_v51, %v134_v57  ;;  %v450_v57 = vsel %vm440_vm4, %v435_v56, 0.0 }
  0xac   :  { %v310_v24 = vpack.c.bf16 %v292_v23, %v291_v21 }
  0xad   :  { %2125 = vmatmul.msk.bf16.gmra.mxu1 %vm315_vm14, %v302_v17 }
  0xaf   :  { %v141_v19 = vpop.f32.mrf.mxu3 }
  0xb0   :  { %v2605_v20 = vsel %vm246_vm6, %v2574_v51, %v141_v19  ;;  %v214_v26 = vsel %vm203_vm9, %v2574_v51, %v141_v19  ;;  %v294_v37 = vsel %vm286_vm15, %v2574_v51, %v141_v19 }
  0xb1   :  { %v307_v22 = vpack.c.bf16 %v2605_v20, %v2600_v14  ;;  %v271_v29 = vpop.permute.xlu1 %270  ;;  %v303_v30 = vpack.c.bf16 %v214_v26, %v213_v28 }
  0xb2   :  { %vm285_vm12 = vcmp.eq.s32.totalorder %v271_v29, 1 }
  0xb3   :  { %v293_v34 = vsel %vm285_vm12, %v2574_v51, %v139_v12 }
  0xb4   :  { %v311_v35 = vpack.c.bf16 %v294_v37, %v293_v34 }
  0xb6   :  { %2133 = vmatmul.msk.bf16.gmra.mxu2 %vm315_vm14, %v310_v24 }
  0xb7   :  { %v144_v25 = vpop.f32.mrf.mxu3 }
  0xb8   :  { %v2615_v27 = vsel %vm247_vm10, %v2574_v51, %v144_v25  ;;  %v215_v39 = vsel %vm204_vm1, %v2574_v51, %v144_v25  ;;  %v295_v44 = vsel %vm287_vm3, %v2574_v51, %v144_v25 }
  0xb9   :  { %v280_v41 = vpop.permute.xlu1 %279 }
  0xba   :  { %vm288_vm2 = vcmp.eq.s32.totalorder %v280_v41, 1 }
  0xbd   :  { %2126 = vmatmul.msk.bf16.gmra.mxu1 %vm315_vm14, %v303_v30 }
  0xbf   :  { %v146_v32 = vpop.f32.mrf.mxu3 }
  0xc0   :  { %v256_v33 = vsel %vm248_vm13, %v2574_v51, %v146_v32  ;;  %v216_v38 = vsel %vm205_vm0, %v2574_v51, %v146_v32  ;;  %v296_v43 = vsel %vm288_vm2, %v2574_v51, %v146_v32  ;;  %v432_v51 = vmul.f32 %v424_v49, %v424_v49 }
  0xc1   :  { %v308_v36 = vpack.c.bf16 %v256_v33, %v2615_v27  ;;  %v304_v40 = vpack.c.bf16 %v216_v38, %v215_v39  ;;  %v312_v45 = vpack.c.bf16 %v296_v43, %v295_v44 }
  0xc2   :  { %v441_v53 = vsel %vm440_vm4, %v432_v51, 0.0 }
  0xc3   :  { %442 = vadd.xlane.f32.xlu2 %v441_v53 }
  0xc6   :  { %2134 = vmatmul.msk.bf16.gmra.mxu2 %vm315_vm14, %v311_v35 }
  0xcb   :  { %451 = vadd.xlane.f32.xlu2 %v450_v57 }
  0xcd   :  { %2127 = vmatmul.msk.bf16.gmra.mxu1 %vm315_vm14, %v304_v40 }
  0xd3   :  { %454 = vadd.xlane.f32.xlu2 %v453_v63 }
  0xd6   :  { %2135 = vmatmul.msk.bf16.gmra.mxu2 %vm315_vm14, %v312_v45 }
  0xdb   :  { %463 = vadd.xlane.f32.xlu2 %v462_v5 }
  0xdd   :  { %2128 = vmatmul.msk.bf16.gmra.mxu1 %vm315_vm14, %v305_v2  ;;  %v459_v2 = vsel %vm440_vm4, %v438_v1, 0.0 }
  0xde   :  { %460 = vadd.xlane.f32.xlu1 %v459_v2 }
  0xed   :  { %2129 = vmatmul.msk.bf16.gmra.mxu1 %vm315_vm14, %v306_v8 }
  0xfd   :  { %2130 = vmatmul.msk.bf16.gmra.mxu1 %vm315_vm14, %v307_v22 }
 0x10d   :  { %2131 = vmatmul.msk.bf16.gmra.mxu1 %vm315_vm14, %v308_v36 }
 0x11a   :  { %v2683_v7 = vpop.f32.mrf.mxu1 }
 0x11b   :  { %v572_v8 = vmul.f32 %v2681_v6, %v2683_v7  ;;  %v639_v11 = vmul.f32 %v2691_v10, %v2683_v7 }
 0x11d   :  { %v580_v9 = vsel %vm440_vm4, %v572_v8, 0.0  ;;  %v647_v13 = vsel %vm440_vm4, %v639_v11, 0.0 }
 0x11e   :  { %581 = vadd.xlane.f32.xlu0 %v580_v9 }
 0x122   :  { %v2695_v12 = vpop.f32.mrf.mxu1 }
 0x123   :  { %v573_v26 = vmul.f32 %v2681_v6, %v2695_v12  ;;  %v640_v32 = vmul.f32 %v2691_v10, %v2695_v12  ;;  %v836_v1 = vpack.c.bf16 %v2695_v12, %v2683_v7 }
 0x125   :  { %v583_v30 = vsel %vm440_vm4, %v573_v26, 0.0  ;;  %v650_v37 = vsel %vm440_vm4, %v640_v32, 0.0 }
 0x126   :  { %648 = vadd.xlane.f32.xlu0 %v647_v13 }
 0x129   :  { %v2698_v14 = vpop.f32.mrf.mxu2 }
 0x12a   :  { %v2700_v15 = vpop.f32.mrf.mxu1  ;;  %v1589_v16 = vmul.f32 %v2681_v6, %v2698_v14  ;;  %v1653_v20 = vmul.f32 %v2691_v10, %v2698_v14 }
 0x12b   :  { %v574_v17 = vmul.f32 %v2681_v6, %v2700_v15  ;;  %v641_v27 = vmul.f32 %v2691_v10, %v2700_v15 }
 0x12c   :  { %v1597_v18 = vsel %vm440_vm4, %v1589_v16, 0.0  ;;  %v1661_v24 = vsel %vm440_vm4, %v1653_v20, 0.0 }
 0x12d   :  { %1598 = vadd.xlane.f32.xlu1 %v1597_v18  ;;  %v586_v19 = vsel %vm440_vm4, %v574_v17, 0.0  ;;  %v653_v31 = vsel %vm440_vm4, %v641_v27, 0.0 }
 0x12e   :  { %587 = vadd.xlane.f32.xlu2 %v586_v19 }
 0x131   :  { %v2710_v21 = vpop.f32.mrf.mxu2 }
 0x132   :  { %v368_v22 = vpop.f32.mrf.mxu1  ;;  %v1654_v23 = vmul.f32 %v2691_v10, %v2710_v21  ;;  %v1590_v38 = vmul.f32 %v2681_v6, %v2710_v21 }
 0x133   :  { %v575_v40 = vmul.f32 %v2681_v6, %v368_v22  ;;  %v642_v56 = vmul.f32 %v2691_v10, %v368_v22  ;;  %v837_v63 = vpack.c.bf16 %v368_v22, %v2700_v15  ;;  %v1834_v22 = vpack.c.bf16 %v2710_v21, %v2698_v14 }
 0x134   :  { %v1664_v25 = vsel %vm440_vm4, %v1654_v23, 0.0  ;;  %v1600_v43 = vsel %vm440_vm4, %v1590_v38, 0.0 }
 0x135   :  { %1662 = vadd.xlane.f32.xlu1 %v1661_v24  ;;  %1665 = vadd.xlane.f32.xlu0 %v1664_v25  ;;  %v589_v45 = vsel %vm440_vm4, %v575_v40, 0.0  ;;  %v656_v61 = vsel %vm440_vm4, %v642_v56, 0.0 }
 0x139   :  { %v2720_v28 = vpop.f32.mrf.mxu2 }
 0x13a   :  { %v2722_v29 = vpop.f32.mrf.mxu1  ;;  %v1655_v33 = vmul.f32 %v2691_v10, %v2720_v28  ;;  %v1591_v46 = vmul.f32 %v2681_v6, %v2720_v28 }
 0x13b   :  { %v643_v59 = vmul.f32 %v2691_v10, %v2722_v29  ;;  %v576_v15 = vmul.f32 %v2681_v6, %v2722_v29 }
 0x13c   :  { %v1667_v35 = vsel %vm440_vm4, %v1655_v33, 0.0  ;;  %v1603_v52 = vsel %vm440_vm4, %v1591_v46, 0.0 }
 0x13d   :  { %584 = vadd.xlane.f32.xlu1 %v583_v30  ;;  %654 = vadd.xlane.f32.xlu0 %v653_v31  ;;  %v659_v0 = vsel %vm440_vm4, %v643_v59, 0.0  ;;  %v592_v19 = vsel %vm440_vm4, %v576_v15, 0.0 }
 0x141   :  { %v2730_v34 = vpop.f32.mrf.mxu2 }
 0x142   :  { %v2732_v36 = vpop.f32.mrf.mxu1  ;;  %v1656_v49 = vmul.f32 %v2691_v10, %v2730_v34  ;;  %v1592_v2 = vmul.f32 %v2681_v6, %v2730_v34  ;;  %v1835_v18 = vpack.c.bf16 %v2730_v34, %v2720_v28 }
 0x143   :  { %v577_v47 = vmul.f32 %v2681_v6, %v2732_v36  ;;  %v838_v55 = vpack.c.bf16 %v2732_v36, %v2722_v29  ;;  %v644_v28 = vmul.f32 %v2691_v10, %v2732_v36 }
 0x144   :  { %v1670_v54 = vsel %vm440_vm4, %v1656_v49, 0.0  ;;  %v1606_v11 = vsel %vm440_vm4, %v1592_v2, 0.0 }
 0x145   :  { %651 = vadd.xlane.f32.xlu1 %v650_v37  ;;  %1668 = vadd.xlane.f32.xlu0 %v1667_v35  ;;  %v595_v53 = vsel %vm440_vm4, %v577_v47, 0.0  ;;  %v662_v30 = vsel %vm440_vm4, %v644_v28, 0.0  ;;  %v2823_v35 = vpop.xlane.xlu0 %445  ;;  %v2836_v47 = vpop.xlane.xlu1 %448 }
 0x149   :  { %v2738_v39 = vpop.f32.mrf.mxu2 }
 0x14a   :  { %v376_v41 = vpop.f32.mrf.mxu1  ;;  %v1657_v42 = vmul.f32 %v2691_v10, %v2738_v39  ;;  %v1593_v23 = vmul.f32 %v2681_v6, %v2738_v39 }
 0x14b   :  { %v578_v5 = vmul.f32 %v2681_v6, %v376_v41  ;;  %v645_v16 = vmul.f32 %v2691_v10, %v376_v41 }
 0x14c   :  { %v1673_v44 = vsel %vm440_vm4, %v1657_v42, 0.0  ;;  %v1609_v26 = vsel %vm440_vm4, %v1593_v23, 0.0 }
 0x14d   :  { %1601 = vadd.xlane.f32.xlu1 %v1600_v43  ;;  %1674 = vadd.xlane.f32.xlu2 %v1673_v44  ;;  %v598_v12 = vsel %vm440_vm4, %v578_v5, 0.0  ;;  %v665_v20 = vsel %vm440_vm4, %v645_v16, 0.0  ;;  %v2834_v46 = vpop.xlane.xlu0 %457 }
 0x14e   :  { %590 = vadd.xlane.f32.xlu0 %v589_v45 }
 0x151   :  { %v2750_v48 = vpop.f32.mrf.mxu2  ;;  %v2848_v59 = vpop.xlane.xlu1 %460 }
 0x152   :  { %v2754_v50 = vpop.f32.mrf.mxu1  ;;  %v1658_v57 = vmul.f32 %v2691_v10, %v2750_v48  ;;  %v1836_v13 = vpack.c.bf16 %v2750_v48, %v2738_v39  ;;  %v1594_v33 = vmul.f32 %v2681_v6, %v2750_v48 }
 0x153   :  { %v839_v51 = vpack.c.bf16 %v2754_v50, %v376_v41  ;;  %v579_v41 = vmul.f32 %v2681_v6, %v2754_v50  ;;  %v646_v48 = vmul.f32 %v2691_v10, %v2754_v50 }
 0x154   :  { %v1676_v62 = vsel %vm440_vm4, %v1658_v57, 0.0  ;;  %v1612_v38 = vsel %vm440_vm4, %v1594_v33, 0.0 }
 0x155   :  { %1604 = vadd.xlane.f32.xlu1 %v1603_v52  ;;  %596 = vadd.xlane.f32.xlu2 %v595_v53  ;;  %v601_v44 = vsel %vm440_vm4, %v579_v41, 0.0  ;;  %v668_v53 = vsel %vm440_vm4, %v646_v48, 0.0 }
 0x156   :  { %1671 = vadd.xlane.f32.xlu0 %v1670_v54  ;;  %859 = vmatpush.bf16.msrb.mxu2 %v839_v51  ;;  %v2845_v54 = vpop.xlane.xlu2 %442 }
 0x159   :  { %v2765_v58 = vpop.f32.mrf.mxu2 }
 0x15a   :  { %860 = vmatpush.bf16.msrb.mxu2 %v838_v55  ;;  %v2769_v60 = vpop.f32.mrf.mxu1  ;;  %v1595_v24 = vmul.f32 %v2681_v6, %v2765_v58 }
 0x15b   :  { %v1156_v3 = vmul.f32 %v2691_v10, %v2769_v60  ;;  %v1092_v14 = vmul.f32 %v2681_v6, %v2769_v60 }
 0x15c   :  { %v1615_v27 = vsel %vm440_vm4, %v1595_v24, 0.0 }
 0x15d   :  { %657 = vadd.xlane.f32.xlu1 %v656_v61  ;;  %1677 = vadd.xlane.f32.xlu2 %v1676_v62  ;;  %v1164_v7 = vsel %vm440_vm4, %v1156_v3, 0.0  ;;  %v1100_v31 = vsel %vm440_vm4, %v1092_v14, 0.0 }
 0x15e   :  { %660 = vadd.xlane.f32.xlu0 %v659_v0  ;;  %861 = vmatpush.bf16.msrb.mxu2 %v837_v63 }
 0x161   :  { %v2781_v4 = vpop.f32.mrf.mxu2 }
 0x162   :  { %862 = vmatpush.bf16.msrb.mxu2 %v836_v1  ;;  %v2784_v8 = vpop.f32.mrf.mxu1  ;;  %v1837_v9 = vpack.c.bf16 %v2781_v4, %v2765_v58  ;;  %v1596_v50 = vmul.f32 %v2681_v6, %v2781_v4  ;;  %v2856_v1 = vpop.xlane.xlu2 %451 }
 0x163   :  { %v1157_v34 = vmul.f32 %v2691_v10, %v2784_v8  ;;  %v1337_v2 = vpack.c.bf16 %v2784_v8, %v2769_v60 }
 0x164   :  { %1854 = vmatpush.bf16.msrb.mxu0 %v1837_v9  ;;  %v1618_v63 = vsel %vm440_vm4, %v1596_v50, 0.0  ;;  %v1093_v9 = vmul.f32 %v2681_v6, %v2784_v8 }
 0x165   :  { %1607 = vadd.xlane.f32.xlu1 %v1606_v11  ;;  %1165 = vadd.xlane.f32.xlu2 %v1164_v7  ;;  %v1167_v39 = vsel %vm440_vm4, %v1157_v34, 0.0 }
 0x166   :  { %599 = vadd.xlane.f32.xlu0 %v598_v12  ;;  %v1103_v7 = vsel %vm440_vm4, %v1093_v9, 0.0 }
 0x168   :  { %1855 = vmatpush.bf16.msrb.mxu0 %v1836_v13 }
 0x16a   :  { %v2796_v17 = vpop.f32.mrf.mxu1 }
 0x16b   :  { %v1094_v42 = vmul.f32 %v2681_v6, %v2796_v17  ;;  %v1158_v60 = vmul.f32 %v2691_v10, %v2796_v17 }
 0x16c   :  { %1856 = vmatpush.bf16.msrb.mxu0 %v1835_v18  ;;  %v2874_v18 = vpop.xlane.xlu2 %454 }
 0x16d   :  { %593 = vadd.xlane.f32.xlu1 %v592_v19  ;;  %v1106_v45 = vsel %vm440_vm4, %v1094_v42, 0.0  ;;  %4340 = vst [vmem:[#allocation5_spill] sm:$0xff] %v2874_v18  ;;  %v1170_v8 = vsel %vm440_vm4, %v1158_v60, 0.0 }
 0x16e   :  { %666 = vadd.xlane.f32.xlu0 %v665_v20 }
 0x170   :  { %1857 = vmatpush.bf16.msrb.mxu0 %v1834_v22 }
 0x172   :  { %v388_v25 = vpop.f32.mrf.mxu1 }
 0x173   :  { %v1095_v49 = vmul.f32 %v2681_v6, %v388_v25  ;;  %v1159_v61 = vmul.f32 %v2691_v10, %v388_v25  ;;  %v1338_v62 = vpack.c.bf16 %v388_v25, %v2796_v17 }
 0x174   :  { %v2882_v25 = vpop.xlane.xlu2 %463 }
 0x175   :  { %1610 = vadd.xlane.f32.xlu1 %v1609_v26  ;;  %v1109_v55 = vsel %vm440_vm4, %v1095_v49, 0.0  ;;  %v1173_v0 = vsel %vm440_vm4, %v1159_v61, 0.0  ;;  %4341 = vst [vmem:[#allocation6_spill] sm:$0xff] %v2882_v25 }
 0x176   :  { %1616 = vadd.xlane.f32.xlu0 %v1615_v27 }
 0x17a   :  { %v391_v21 = vpop.f32.mrf.mxu1 }
 0x17b   :  { %v1160_v29 = vmul.f32 %v2691_v10, %v391_v21  ;;  %v1096_v11 = vmul.f32 %v2681_v6, %v391_v21 }
 0x17d   :  { %663 = vadd.xlane.f32.xlu1 %v662_v30  ;;  %v1176_v32 = vsel %vm440_vm4, %v1160_v29, 0.0  ;;  %v1112_v12 = vsel %vm440_vm4, %v1096_v11, 0.0  ;;  %v2930_v11 = vld [vmem:[%s4336_s9] sm:$0xff]  }
 0x17e   :  { %1101 = vadd.xlane.f32.xlu0 %v1100_v31  ;;  %1177 = vadd.xlane.f32.xlu2 %v1176_v32 }
 0x182   :  { %v393_v36 = vpop.f32.mrf.mxu1 }
 0x183   :  { %v1161_v37 = vmul.f32 %v2691_v10, %v393_v36  ;;  %v1339_v57 = vpack.c.bf16 %v393_v36, %v391_v21  ;;  %v1097_v16 = vmul.f32 %v2681_v6, %v393_v36 }
 0x185   :  { %1613 = vadd.xlane.f32.xlu1 %v1612_v38  ;;  %v1179_v40 = vsel %vm440_vm4, %v1161_v37, 0.0  ;;  %v1115_v19 = vsel %vm440_vm4, %v1097_v16, 0.0 }
 0x186   :  { %1168 = vadd.xlane.f32.xlu0 %v1167_v39  ;;  %1180 = vadd.xlane.f32.xlu2 %v1179_v40 }
 0x18a   :  { %v396_v43 = vpop.f32.mrf.mxu1 }
 0x18b   :  { %v1162_v22 = vmul.f32 %v2691_v10, %v396_v43  ;;  %v1098_v23 = vmul.f32 %v2681_v6, %v396_v43 }
 0x18d   :  { %602 = vadd.xlane.f32.xlu1 %v601_v44  ;;  %v1182_v17 = vsel %vm440_vm4, %v1162_v22, 0.0  ;;  %v1118_v26 = vsel %vm440_vm4, %v1098_v23, 0.0 }
 0x18e   :  { %1107 = vadd.xlane.f32.xlu0 %v1106_v45 }
 0x191   :  { %v582_v56 = vpop.xlane.xlu0 %581 }
 0x192   :  { %v2841_v51 = vpop.f32.mrf.mxu1 }
 0x193   :  { %v1340_v52 = vpack.c.bf16 %v2841_v51, %v396_v43  ;;  %v1099_v28 = vmul.f32 %v2681_v6, %v2841_v51 }
 0x195   :  { %669 = vadd.xlane.f32.xlu1 %v668_v53  ;;  %1357 = vmatpush.bf16.msrb.mxu3 %v1340_v52  ;;  %v1121_v21 = vsel %vm440_vm4, %v1099_v28, 0.0 }
 0x196   :  { %1110 = vadd.xlane.f32.xlu0 %v1109_v55 }
 0x199   :  { %1358 = vmatpush.bf16.msrb.mxu3 %v1339_v57  ;;  %v2860_v3 = vpop.xlane.xlu0 %648 }
 0x19d   :  { %1619 = vadd.xlane.f32.xlu1 %v1618_v63  ;;  %1359 = vmatpush.bf16.msrb.mxu3 %v1338_v62 }
 0x19e   :  { %1174 = vadd.xlane.f32.xlu0 %v1173_v0 }
 0x1a0   :  { %v1599_v5 = vpop.xlane.xlu1 %1598 }
 0x1a1   :  { %1360 = vmatpush.bf16.msrb.mxu3 %v1337_v2  ;;  %v588_v29 = vpop.xlane.xlu2 %587  ;;  %v2169_v2 = vld [vmem:[%s4335_s8] sm:$0xff]  }
 0x1a5   :  { %1104 = vadd.xlane.f32.xlu1 %v1103_v7 }
 0x1a6   :  { %1113 = vadd.xlane.f32.xlu0 %v1112_v12  ;;  %v2934_v12 = vunpack.c.h.bf16 %v2169_v2 }
 0x1a8   :  { %v2867_v13 = vpop.xlane.xlu1 %1662  ;;  %v2869_v15 = vpop.xlane.xlu0 %1665 }
 0x1ad   :  { %1171 = vadd.xlane.f32.xlu1 %v1170_v8  ;;  %v2155_v8 = vunpack.c.h.bf16 %v2930_v11 }
 0x1ae   :  { %1116 = vadd.xlane.f32.xlu0 %v1115_v19 }
 0x1af   :  { %604 = vxpose.xlu2.b32.start [1/8] (short) (narrow) %v582_v56, 8  ;;  %vm2950_vm5 = vcmp.gt.f32.partialorder %v2155_v8, 0.0 }
 0x1b0   :  { %v585_v20 = vpop.xlane.xlu1 %584  ;;  %v2880_v24 = vpop.xlane.xlu0 %654 }
 0x1b5   :  { %1183 = vadd.xlane.f32.xlu1 %v1182_v17  ;;  %v2948_v17 = vld [vmem:[%s4336_s9 + $0x10] sm:$0xff]  }
 0x1b6   :  { %1119 = vadd.xlane.f32.xlu0 %v1118_v26 }
 0x1b7   :  { %605 = vxpose.xlu2.b32.cont [2/8] (short) (narrow) %v585_v20, 8 }
 0x1b8   :  { %v652_v27 = vpop.xlane.xlu1 %651  ;;  %v2888_v14 = vpop.xlane.xlu0 %1668 }
 0x1be   :  { %1122 = vadd.xlane.f32.xlu0 %v1121_v21 }
 0x1bf   :  { %606 = vxpose.xlu2.b32.cont [3/8] (short) (narrow) %v588_v29, 8 }
 0x1c0   :  { %v1602_v30 = vpop.xlane.xlu1 %1601  ;;  %v2895_v37 = vpop.xlane.xlu2 %1674 }
 0x1c1   :  { %v591_v31 = vpop.xlane.xlu0 %590 }
 0x1c7   :  { %607 = vxpose.xlu2.b32.cont [4/8] (short) (narrow) %v591_v31, 8  ;;  %v2187_v31 = vld [vmem:[%s4335_s8 + $0x8] sm:$0xff]  }
 0x1c8   :  { %v1605_v32 = vpop.xlane.xlu1 %1604  ;;  %v597_v39 = vpop.xlane.xlu2 %596 }
 0x1c9   :  { %v2893_v36 = vpop.xlane.xlu0 %1671 }
 0x1d0   :  { %v2891_v33 = vpop.xlane.xlu1 %657  ;;  %v2907_v56 = vpop.xlane.xlu2 %1677 }
 0x1d1   :  { %v661_v6 = vpop.xlane.xlu0 %660 }
 0x1d8   :  { %v1608_v34 = vpop.xlane.xlu1 %1607  ;;  %v2911_v50 = vpop.xlane.xlu2 %1165 }
 0x1d9   :  { %v600_v41 = vpop.xlane.xlu0 %599 }
 0x1e0   :  { %v594_v38 = vpop.xlane.xlu1 %593 }
 0x1e1   :  { %608 = vxpose.xlu2.b32.cont [5/8] (short) (narrow) %v594_v38, 8  ;;  %v2899_v45 = vpop.xlane.xlu0 %666 }
 0x1e7   :  { %1621 = vxpose.xlu0.b32.start [1/8] (short) (narrow) %v1599_v5, 8  ;;  %v2188_v5 = vld [vmem:[%s4335_s8 + $0x10] sm:$0xff]  }
 0x1e8   :  { %v1611_v40 = vpop.xlane.xlu1 %1610  ;;  %v2936_v60 = vunpack.c.l.bf16 %v2188_v5 }
 0x1e9   :  { %609 = vxpose.xlu2.b32.cont [6/8] (short) (narrow) %v597_v39, 8  ;;  %v1617_v49 = vpop.xlane.xlu0 %1616 }
 0x1ef   :  { %1622 = vxpose.xlu0.b32.cont [2/8] (short) (narrow) %v1602_v30, 8 }
 0x1f0   :  { %v2897_v42 = vpop.xlane.xlu1 %663 }
 0x1f1   :  { %610 = vxpose.xlu2.b32.cont [7/8] (short) (narrow) %v600_v41, 8  ;;  %v2903_v53 = vpop.xlane.xlu0 %1101  ;;  %v2913_v61 = vpop.xlane.xlu2 %1177 }
 0x1f7   :  { %1623 = vxpose.xlu0.b32.cont [3/8] (short) (narrow) %v1605_v32, 8 }
 0x1f8   :  { %v1614_v43 = vpop.xlane.xlu1 %1613 }
 0x1f9   :  { %v2905_v55 = vpop.xlane.xlu0 %1168  ;;  %v2917_v63 = vpop.xlane.xlu2 %1180 }
 0x1ff   :  { %1624 = vxpose.xlu0.b32.cont [4/8] (short) (narrow) %v1608_v34, 8  ;;  %v1659_v34 = vmul.f32 %v2691_v10, %v2765_v58 }
 0x200   :  { %v603_v44 = vpop.xlane.xlu1 %602 }
 0x201   :  { %611 = vxpose.xlu2.b32.end [8/8] (short) (narrow) %v603_v44, 8  ;;  %v2909_v57 = vpop.xlane.xlu0 %1107 }
 0x207   :  { %1625 = vxpose.xlu0.b32.cont [5/8] (short) (narrow) %v1611_v40, 8  ;;  %v2972_v40 = vunpack.c.l.bf16 %v2187_v31 }
 0x208   :  { %v2901_v48 = vpop.xlane.xlu1 %669 }
 0x209   :  { %v2915_v62 = vpop.xlane.xlu0 %1110 }
 0x20f   :  { %1626 = vxpose.xlu0.b32.cont [6/8] (short) (narrow) %v1614_v43, 8  ;;  %v1679_v43 = vsel %vm440_vm4, %v1659_v34, 0.0  ;;  %v3009_v34 = vunpack.c.h.bf16 %v2188_v5 }
 0x210   :  { %v1620_v52 = vpop.xlane.xlu1 %1619 }
 0x211   :  { %v2919_v0 = vpop.xlane.xlu0 %1174 }
 0x217   :  { %1627 = vxpose.xlu0.b32.cont [7/8] (short) (narrow) %v1617_v49, 8  ;;  %v2184_v49 = vld [vmem:[%s4336_s9 + $0x8] sm:$0xff]  }
 0x219   :  { %v2938_v16 = vpop.xlane.xlu0 %1113 }
 0x21f   :  { %1628 = vxpose.xlu0.b32.end [8/8] (short) (narrow) %v1620_v52, 8 }
 0x221   :  { %v2966_v38 = vpop.xlane.xlu0 %1116 }
 0x262   :  { %v620_v9 = vpop.trf.xlu2 }
 0x263   :  { %v2932_v7 = vperm.slane %v620_v9, 0  ;;  %v1660_v9 = vmul.f32 %v2691_v10, %v2781_v4 }
 0x265   :  { %v673_v19 = vadd.f32 %v2932_v7, %v652_v27  ;;  %v676_v20 = vadd.f32 %v2932_v7, %v661_v6  ;;  %v2162_v27 = vunpack.c.l.bf16 %v2948_v17  ;;  %v674_v41 = vadd.f32 %v2932_v7, %v2880_v24 }
 0x266   :  { %v2158_v24 = vunpack.c.l.bf16 %v2184_v49 }
 0x267   :  { %v681_v22 = vadd.f32 %v2934_v12, %v673_v19  ;;  %v684_v23 = vadd.f32 %v2936_v60, %v676_v20  ;;  %vm2968_vm7 = vcmp.gt.f32.partialorder %v2162_v27, 0.0  ;;  %v682_v58 = vadd.f32 %v2972_v40, %v674_v41 }
 0x268   :  { %v2989_v19 = vunpack.c.h.bf16 %v2187_v31  ;;  %v675_v20 = vadd.f32 %v2932_v7, %v2891_v33  ;;  %vm2996_vm10 = vcmp.gt.f32.partialorder %v2158_v24, 0.0  ;;  %v3001_v27 = vunpack.c.l.bf16 %v2169_v2 }
 0x269   :  { %vm689_vm14 = vcmp.gt.f32.partialorder %v681_v22, 0.0  ;;  %v697_v26 = vmul.f32 0.2, %v681_v22  ;;  %v700_v29 = vmul.f32 0.2, %v684_v23  ;;  %vm692_vm6 = vcmp.gt.f32.partialorder %v684_v23, 0.0 }
 0x26a   :  { %v698_v8 = vmul.f32 0.2, %v682_v58  ;;  %vm690_vm9 = vcmp.gt.f32.partialorder %v682_v58, 0.0  ;;  %v683_v4 = vadd.f32 %v2989_v19, %v675_v20  ;;  %v2159_v31 = vunpack.c.h.bf16 %v2184_v49 }
 0x26b   :  { %v705_v21 = vsel %vm689_vm14, %v681_v22, %v697_v26  ;;  %v708_v6 = vsel %vm692_vm6, %v684_v23, %v700_v29  ;;  %v2993_v22 = vpop.xlane.xlu0 %1119  ;;  %v1682_v23 = vsel %vm440_vm4, %v1660_v9, 0.0  ;;  %v672_v29 = vadd.f32 %v2932_v7, %v2860_v3 }
 0x26c   :  { %v2957_v30 = vsel %vm2950_vm5, %v705_v21, -1e+30  ;;  %v2979_v44 = vsel %vm2968_vm7, %v708_v6, -1e+30  ;;  %v706_v26 = vsel %vm690_vm9, %v682_v58, %v698_v8  ;;  %v677_v6 = vadd.f32 %v2932_v7, %v2897_v42 }
 0x26d   :  { %v739_v32 = vsel %vm107_vm8, %v2957_v30, -inf  ;;  %v748_v52 = vsel %vm107_vm8, %v2979_v44, -inf  ;;  %v3007_v33 = vsel %vm2996_vm10, %v706_v26, -1e+30  ;;  %vm691_vm11 = vcmp.gt.f32.partialorder %v683_v4, 0.0 }
 0x26e   :  { %740 = vmax.xlane.f32.xlu1 %v739_v32  ;;  %v699_v32 = vmul.f32 0.2, %v683_v4  ;;  %v742_v41 = vsel %vm107_vm8, %v3007_v33, -inf  ;;  %v680_v2 = vadd.f32 %v3001_v27, %v672_v29  ;;  %vm3018_vm12 = vcmp.gt.f32.partialorder %v2159_v31, 0.0 }
 0x26f   :  { %v685_v5 = vadd.f32 %v3009_v34, %v677_v6  ;;  %v2154_v49 = vunpack.c.l.bf16 %v2930_v11  ;;  %v2163_v9 = vunpack.c.h.bf16 %v2948_v17  ;;  %v3038_v11 = vld [vmem:[%s4335_s8 + $0x18] sm:$0xff]   ;;  %v678_v6 = vadd.f32 %v2932_v7, %v2899_v45 }
 0x270   :  { %v707_v3 = vsel %vm691_vm11, %v683_v4, %v699_v32  ;;  %vm688_vm13 = vcmp.gt.f32.partialorder %v680_v2, 0.0  ;;  %v3051_v32 = vunpack.c.l.bf16 %v3038_v11 }
 0x271   :  { %v3026_v42 = vsel %vm3018_vm12, %v707_v3, -1e+30  ;;  %v701_v24 = vmul.f32 0.2, %v685_v5  ;;  %vm693_vm15 = vcmp.gt.f32.partialorder %v685_v5, 0.0  ;;  %vm3031_vm0 = vcmp.gt.f32.partialorder %v2154_v49, 0.0 }
 0x272   :  { %1680 = vadd.xlane.f32.xlu2 %v1679_v43  ;;  %v745_v8 = vsel %vm107_vm8, %v3026_v42, -inf  ;;  %vm3040_vm1 = vcmp.gt.f32.partialorder %v2163_v9, 0.0 }
 0x273   :  { %v3016_v43 = vpop.xlane.xlu0 %1122  ;;  %v709_v4 = vsel %vm693_vm15, %v685_v5, %v701_v24 }
 0x276   :  { %749 = vmax.xlane.f32.xlu1 %v748_v52  ;;  %v696_v52 = vmul.f32 0.2, %v680_v2 }
 0x278   :  { %v704_v20 = vsel %vm688_vm13, %v680_v2, %v696_v52 }
 0x279   :  { %v3048_v31 = vsel %vm3031_vm0, %v704_v20, -1e+30 }
 0x27a   :  { %1683 = vadd.xlane.f32.xlu2 %v1682_v23  ;;  %v736_v5 = vsel %vm107_vm8, %v3048_v31, -inf }
 0x282   :  { %743 = vmax.xlane.f32.xlu2 %v742_v41  ;;  %v3057_v41 = vsel %vm3040_vm1, %v709_v4, -1e+30 }
 0x283   :  { %v751_v9 = vsel %vm107_vm8, %v3057_v41, -inf }
 0x28a   :  { %746 = vmax.xlane.f32.xlu2 %v745_v8  ;;  %v1163_v8 = vmul.f32 %v2691_v10, %v2841_v51 }
 0x28b   :  { %v1637_v26 = vpop.trf.xlu0 }
 0x28c   :  { %v3044_v29 = vperm.slane %v1637_v26, 0  ;;  %v1185_v10 = vsel %vm440_vm4, %v1163_v8, 0.0 }
 0x28e   :  { %v1690_v2 = vadd.f32 %v3044_v29, %v2895_v37  ;;  %v1686_v3 = vadd.f32 %v3044_v29, %v2867_v13  ;;  %v1687_v49 = vadd.f32 %v3044_v29, %v2869_v15  ;;  %v3074_v37 = vld [vmem:[%s4336_s9 + $0x18] sm:$0xff]   ;;  %v686_v13 = vadd.f32 %v3051_v32, %v678_v6 }
 0x290   :  { %737 = vmax.xlane.f32.xlu0 %v736_v5  ;;  %v1698_v52 = vadd.f32 %v2936_v60, %v1690_v2  ;;  %v1694_v45 = vadd.f32 %v3001_v27, %v1686_v3  ;;  %v1695_v20 = vadd.f32 %v2934_v12, %v1687_v49  ;;  %v2166_v3 = vunpack.c.l.bf16 %v3074_v37 }
 0x291   :  { %v702_v5 = vmul.f32 0.2, %v686_v13  ;;  %vm694_vm14 = vcmp.gt.f32.partialorder %v686_v13, 0.0  ;;  %v1688_v49 = vadd.f32 %v3044_v29, %v2888_v14 }
 0x292   :  { %752 = vmax.xlane.f32.xlu2 %v751_v9  ;;  %vm1706_vm2 = vcmp.gt.f32.partialorder %v1698_v52, 0.0  ;;  %v1714_v24 = vmul.f32 0.2, %v1698_v52  ;;  %vm1702_vm3 = vcmp.gt.f32.partialorder %v1694_v45, 0.0  ;;  %v1710_v15 = vmul.f32 0.2, %v1694_v45 }
 0x293   :  { %v1711_v51 = vmul.f32 0.2, %v1695_v20  ;;  %vm1703_vm6 = vcmp.gt.f32.partialorder %v1695_v20, 0.0  ;;  %vm3096_vm9 = vcmp.gt.f32.partialorder %v2166_v3, 0.0  ;;  %v1689_v3 = vadd.f32 %v3044_v29, %v2893_v36 }
 0x294   :  { %v1722_v26 = vsel %vm1706_vm2, %v1698_v52, %v1714_v24  ;;  %v1718_v4 = vsel %vm1702_vm3, %v1694_v45, %v1710_v15  ;;  %v710_v45 = vsel %vm694_vm14, %v686_v13, %v702_v5 }
 0x295   :  { %v3082_v2 = vsel %vm2968_vm7, %v1722_v26, -1e+30  ;;  %v3089_v9 = vsel %vm3031_vm0, %v1718_v4, -1e+30  ;;  %v1719_v15 = vsel %vm1703_vm6, %v1695_v20, %v1711_v51  ;;  %v1696_v26 = vadd.f32 %v2972_v40, %v1688_v49 }
 0x296   :  { %v1746_v6 = vsel %vm107_vm8, %v3082_v2, -inf  ;;  %v1734_v52 = vsel %vm107_vm8, %v3089_v9, -inf  ;;  %v3103_v8 = vsel %vm3096_vm9, %v710_v45, -1e+30  ;;  %v3107_v14 = vsel %vm2950_vm5, %v1719_v15, -1e+30  ;;  %v1105_v15 = vpop.xlane.xlu1 %1104 }
 0x297   :  { %1747 = vmax.xlane.f32.xlu1 %v1746_v6  ;;  %v754_v4 = vsel %vm107_vm8, %v3103_v8, -inf  ;;  %v1712_v13 = vmul.f32 0.2, %v1696_v26  ;;  %vm1704_vm11 = vcmp.gt.f32.partialorder %v1696_v26, 0.0  ;;  %v1737_v20 = vsel %vm107_vm8, %v3107_v14, -inf }
 0x298   :  { %1186 = vadd.xlane.f32.xlu0 %v1185_v10  ;;  %v1697_v6 = vadd.f32 %v2989_v19, %v1689_v3 }
 0x299   :  { %v1720_v5 = vsel %vm1704_vm11, %v1696_v26, %v1712_v13  ;;  %v2183_v13 = vunpack.c.h.bf16 %v3038_v11 }
 0x29a   :  { %1735 = vmax.xlane.f32.xlu2 %v1734_v52  ;;  %v3118_v10 = vsel %vm2996_vm10, %v1720_v5, -1e+30  ;;  %v1713_v51 = vmul.f32 0.2, %v1697_v6  ;;  %vm1705_vm13 = vcmp.gt.f32.partialorder %v1697_v6, 0.0  ;;  %v2167_v5 = vunpack.c.h.bf16 %v3074_v37 }
 0x29b   :  { %v1740_v49 = vsel %vm107_vm8, %v3118_v10, -inf }
 0x29c   :  { %v1721_v36 = vsel %vm1705_vm13, %v1697_v6, %v1713_v51  ;;  %vm3137_vm2 = vcmp.gt.f32.partialorder %v2167_v5, 0.0 }
 0x29d   :  { %v3124_v52 = vsel %vm3018_vm12, %v1721_v36, -1e+30 }
 0x29e   :  { %v1743_v45 = vsel %vm107_vm8, %v3124_v52, -inf }
 0x2a0   :  { %755 = vmax.xlane.f32.xlu0 %v754_v4 }
 0x2a2   :  { %1738 = vmax.xlane.f32.xlu2 %v1737_v20 }
 0x2aa   :  { %1741 = vmax.xlane.f32.xlu2 %v1740_v49 }
 0x2b2   :  { %1744 = vmax.xlane.f32.xlu2 %v1743_v45 }
 0x2d1   :  { %1124 = vxpose.xlu1.b32.start [1/8] (short) (narrow) %v2903_v53, 8 }
 0x2d9   :  { %1125 = vxpose.xlu1.b32.cont [2/8] (short) (narrow) %v1105_v15, 8  ;;  %v679_v15 = vadd.f32 %v2932_v7, %v2901_v48 }
 0x2e1   :  { %1126 = vxpose.xlu1.b32.cont [3/8] (short) (narrow) %v2909_v57, 8 }
 0x2e5   :  { %v3130_v26 = vpop.xlane.xlu2 %1680 }
 0x2e6   :  { %v1692_v58 = vadd.f32 %v3044_v29, %v3130_v26 }
 0x2e9   :  { %1127 = vxpose.xlu1.b32.cont [4/8] (short) (narrow) %v2915_v62, 8 }
 0x2ed   :  { %v1684_v4 = vpop.xlane.xlu2 %1683 }
 0x2ee   :  { %v1693_v3 = vadd.f32 %v3044_v29, %v1684_v4 }
 0x2f0   :  { %v1701_v20 = vadd.f32 %v2183_v13, %v1693_v3 }
 0x2f1   :  { %1128 = vxpose.xlu1.b32.cont [5/8] (short) (narrow) %v2938_v16, 8  ;;  %v1172_v16 = vpop.xlane.xlu1 %1171 }
 0x2f2   :  { %vm1709_vm15 = vcmp.gt.f32.partialorder %v1701_v20, 0.0  ;;  %v1717_v53 = vmul.f32 0.2, %v1701_v20 }
 0x2f4   :  { %v1725_v57 = vsel %vm1709_vm15, %v1701_v20, %v1717_v53 }
 0x2f5   :  { %v3143_v62 = vsel %vm3137_vm2, %v1725_v57, -1e+30  ;;  %v3209_v28 = vpop.xlane.xlu2 %743 }
 0x2f6   :  { %v1755_v11 = vsel %vm107_vm8, %v3143_v62, -inf }
 0x2f7   :  { %1756 = vmax.xlane.f32.xlu0 %v1755_v11 }
 0x2f9   :  { %1129 = vxpose.xlu1.b32.cont [6/8] (short) (narrow) %v2966_v38, 8  ;;  %v3150_v37 = vpop.xlane.xlu1 %1183 }
 0x301   :  { %1130 = vxpose.xlu1.b32.cont [7/8] (short) (narrow) %v2993_v22, 8  ;;  %v3152_v51 = vpop.xlane.xlu1 %740  ;;  %v687_v22 = vadd.f32 %v2183_v13, %v679_v15 }
 0x303   :  { %v738_v36 = vpop.xlane.xlu0 %737  ;;  %vm695_vm3 = vcmp.gt.f32.partialorder %v687_v22, 0.0 }
 0x309   :  { %1131 = vxpose.xlu1.b32.end [8/8] (short) (narrow) %v3016_v43, 8  ;;  %v3154_v49 = vpop.xlane.xlu1 %749 }
 0x30b   :  { %v1187_v38 = vpop.xlane.xlu0 %1186 }
 0x311   :  { %v3156_v45 = vpop.xlane.xlu1 %1747 }
 0x375   :  { %v1140_v4 = vpop.trf.xlu1 }
 0x376   :  { %v3160_v3 = vperm.slane %v1140_v4, 0  ;;  %v760_v4 = vsub.f32 %v3048_v31, %v738_v36 }
 0x378   :  { %v1193_v43 = vadd.f32 %v3160_v3, %v2913_v61  ;;  %v1189_v20 = vadd.f32 %v3160_v3, %v2911_v50  ;;  %v1196_v5 = vadd.f32 %v3160_v3, %v1187_v38  ;;  %v1190_v53 = vadd.f32 %v3160_v3, %v2905_v55 }
 0x379   :  { %v703_v38 = vmul.f32 0.2, %v687_v22 }
 0x37a   :  { %v1201_v57 = vadd.f32 %v2936_v60, %v1193_v43  ;;  %v1197_v48 = vadd.f32 %v3001_v27, %v1189_v20  ;;  %v1204_v7 = vadd.f32 %v2183_v13, %v1196_v5  ;;  %v1198_v11 = vadd.f32 %v2934_v12, %v1190_v53 }
 0x37b   :  { %v1191_v60 = vadd.f32 %v3160_v3, %v1172_v16  ;;  %v768_v16 = vmul.f32 1.442695, %v760_v4 }
 0x37c   :  { %vm1209_vm14 = vcmp.gt.f32.partialorder %v1201_v57, 0.0  ;;  %v1217_v15 = vmul.f32 0.2, %v1201_v57  ;;  %vm1205_vm6 = vcmp.gt.f32.partialorder %v1197_v48, 0.0  ;;  %v1213_v61 = vmul.f32 0.2, %v1197_v48 }
 0x37d   :  { %vm1212_vm11 = vcmp.gt.f32.partialorder %v1204_v7, 0.0  ;;  %v1220_v50 = vmul.f32 0.2, %v1204_v7  ;;  %v1214_v55 = vmul.f32 0.2, %v1198_v11  ;;  %vm1206_vm13 = vcmp.gt.f32.partialorder %v1198_v11, 0.0 }
 0x37e   :  { %v1225_v25 = vsel %vm1209_vm14, %v1201_v57, %v1217_v15  ;;  %v1221_v18 = vsel %vm1205_vm6, %v1197_v48, %v1213_v61  ;;  %v1199_v23 = vadd.f32 %v2972_v40, %v1191_v60  ;;  %v1192_v57 = vadd.f32 %v3160_v3, %v2919_v0 }
 0x37f   :  { %v3176_v27 = vsel %vm2968_vm7, %v1225_v25, -1e+30  ;;  %v3180_v12 = vsel %vm3031_vm0, %v1221_v18, -1e+30  ;;  %v1228_v13 = vsel %vm1212_vm11, %v1204_v7, %v1220_v50  ;;  %v711_v18 = vsel %vm695_vm3, %v687_v22, %v703_v38  ;;  %v3228_v38 = vpop.xlane.xlu2 %746 }
 0x380   :  { %v1249_v31 = vsel %vm107_vm8, %v3176_v27, -inf  ;;  %v1237_v36 = vsel %vm107_vm8, %v3180_v12, -inf  ;;  %v3188_v43 = vsel %vm3137_vm2, %v1228_v13, -1e+30  ;;  %v1222_v39 = vsel %vm1206_vm13, %v1198_v11, %v1214_v55 }
 0x381   :  { %1250 = vmax.xlane.f32.xlu1 %v1249_v31  ;;  %1238 = vmax.xlane.f32.xlu2 %v1237_v36  ;;  %v1258_v25 = vsel %vm107_vm8, %v3188_v43, -inf  ;;  %v3196_v20 = vsel %vm3137_vm2, %v711_v18, -1e+30  ;;  %v3200_v5 = vsel %vm2950_vm5, %v1222_v39, -1e+30  ;;  %2214 = vpow2.f32 %v768_v16 }
 0x382   :  { %1259 = vmax.xlane.f32.xlu0 %v1258_v25  ;;  %v1215_v53 = vmul.f32 0.2, %v1199_v23  ;;  %vm1207_vm7 = vcmp.gt.f32.partialorder %v1199_v23, 0.0  ;;  %v757_v22 = vsel %vm107_vm8, %v3196_v20, -inf  ;;  %v1240_v40 = vsel %vm107_vm8, %v3200_v5, -inf }
 0x383   :  { %v1200_v48 = vadd.f32 %v2989_v19, %v1192_v57  ;;  %v1691_v15 = vadd.f32 %v3044_v29, %v2907_v56  ;;  %v1194_v56 = vadd.f32 %v3160_v3, %v2917_v63  ;;  %v1700_v39 = vadd.f32 %v3051_v32, %v1692_v58 }
 0x384   :  { %v1223_v6 = vsel %vm1207_vm7, %v1199_v23, %v1215_v53  ;;  %v1195_v53 = vadd.f32 %v3160_v3, %v3150_v37 }
 0x385   :  { %v3215_v0 = vsel %vm2996_vm10, %v1223_v6, -1e+30  ;;  %v1216_v11 = vmul.f32 0.2, %v1200_v48  ;;  %vm1208_vm5 = vcmp.gt.f32.partialorder %v1200_v48, 0.0  ;;  %v1699_v50 = vadd.f32 %v3009_v34, %v1691_v15 }
 0x386   :  { %v1243_v61 = vsel %vm107_vm8, %v3215_v0, -inf  ;;  %v1202_v31 = vadd.f32 %v3009_v34, %v1194_v56  ;;  %v1716_v16 = vmul.f32 0.2, %v1700_v39  ;;  %vm1708_vm0 = vcmp.gt.f32.partialorder %v1700_v39, 0.0 }
 0x387   :  { %v3211_v7 = vpop.eup %2214  ;;  %v1224_v19 = vsel %vm1208_vm5, %v1200_v48, %v1216_v11  ;;  %v1715_v55 = vmul.f32 0.2, %v1699_v50  ;;  %vm1707_vm10 = vcmp.gt.f32.partialorder %v1699_v50, 0.0  ;;  %v3241_v18 = vpop.xlane.xlu2 %752  ;;  %v761_v6 = vsub.f32 %v2957_v30, %v3152_v51 }
 0x388   :  { %v784_v4 = vsel %vm107_vm8, %v3211_v7, 0.0  ;;  %v3226_v21 = vsel %vm3018_vm12, %v1224_v19, -1e+30  ;;  %v1218_v25 = vmul.f32 0.2, %v1202_v31  ;;  %vm1210_vm12 = vcmp.gt.f32.partialorder %v1202_v31, 0.0 }
 0x389   :  { %758 = vmax.xlane.f32.xlu1 %v757_v22  ;;  %1241 = vmax.xlane.f32.xlu2 %v1240_v40  ;;  %v1246_v60 = vsel %vm107_vm8, %v3226_v21, -inf  ;;  %v1723_v13 = vsel %vm1707_vm10, %v1699_v50, %v1715_v55  ;;  %v1724_v57 = vsel %vm1708_vm0, %v1700_v39, %v1716_v16  ;;  %v1203_v22 = vadd.f32 %v3051_v32, %v1195_v53 }
 0x38a   :  { %v3237_v36 = vsel %vm3040_vm1, %v1723_v13, -1e+30  ;;  %v1226_v23 = vsel %vm1210_vm12, %v1202_v31, %v1218_v25  ;;  %v3257_v40 = vsel %vm3096_vm9, %v1724_v57, -1e+30  ;;  %v770_v48 = vmul.f32 1.442695, %v761_v6 }
 0x38b   :  { %v1749_v63 = vsel %vm107_vm8, %v3237_v36, -inf  ;;  %v3248_v34 = vsel %vm3040_vm1, %v1226_v23, -1e+30  ;;  %v1219_v17 = vmul.f32 0.2, %v1203_v22  ;;  %vm1211_vm1 = vcmp.gt.f32.partialorder %v1203_v22, 0.0 }
 0x38c   :  { %v1252_v29 = vsel %vm107_vm8, %v3248_v34, -inf  ;;  %v1752_v37 = vsel %vm107_vm8, %v3257_v40, -inf  ;;  %2216 = vpow2.f32 %v770_v48  ;;  %v762_v13 = vsub.f32 %v3007_v33, %v3209_v28 }
 0x38d   :  { %v1227_v3 = vsel %vm1211_vm1, %v1203_v22, %v1219_v17  ;;  %v763_v22 = vsub.f32 %v3026_v42, %v3228_v38  ;;  %v764_v42 = vsub.f32 %v2979_v44, %v3154_v49  ;;  %v756_v44 = vpop.xlane.xlu0 %755 }
 0x38e   :  { %v3265_v15 = vsel %vm3096_vm9, %v1227_v3, -1e+30  ;;  %v772_v31 = vmul.f32 1.442695, %v762_v13 }
 0x38f   :  { %v1736_v26 = vpop.xlane.xlu2 %1735  ;;  %v774_v17 = vmul.f32 1.442695, %v763_v22 }
 0x390   :  { %v1758_v23 = vsub.f32 %v3089_v9, %v1736_v26 }
 0x391   :  { %1244 = vmax.xlane.f32.xlu2 %v1243_v61  ;;  %785 = vadd.xlane.f32.xlu1 %v784_v4  ;;  %v1255_v61 = vsel %vm107_vm8, %v3265_v15, -inf }
 0x392   :  { %v3270_v51 = vpop.eup %2216 }
 0x393   :  { %v787_v4 = vsel %vm107_vm8, %v3270_v51, 0.0 }
 0x397   :  { %v1739_v11 = vpop.xlane.xlu2 %1738 }
 0x398   :  { %v1759_v32 = vsub.f32 %v3107_v14, %v1739_v11 }
 0x399   :  { %1247 = vmax.xlane.f32.xlu2 %v1246_v60 }
 0x39a   :  { %v1768_v30 = vmul.f32 1.442695, %v1759_v32 }
 0x39c   :  { %2218 = vpow2.f32 %v1768_v30  ;;  %v776_v30 = vmul.f32 1.442695, %v764_v42 }
 0x39f   :  { %v1742_v50 = vpop.xlane.xlu2 %1741 }
 0x3a0   :  { %v1760_v32 = vsub.f32 %v3118_v10, %v1742_v50 }
 0x3a1   :  { %1750 = vmax.xlane.f32.xlu2 %v1749_v63 }
 0x3a2   :  { %v3274_v19 = vpop.eup %2218 }
 0x3a3   :  { %v1785_v24 = vsel %vm107_vm8, %v3274_v19, 0.0 }
 0x3a7   :  { %v1745_v14 = vpop.xlane.xlu2 %1744 }
 0x3a9   :  { %1253 = vmax.xlane.f32.xlu2 %v1252_v29  ;;  %v1761_v29 = vsub.f32 %v3124_v52, %v1745_v14 }
 0x3b1   :  { %1753 = vmax.xlane.f32.xlu2 %v1752_v37 }
 0x3b9   :  { %1256 = vmax.xlane.f32.xlu2 %v1255_v61 }
 0x3c1   :  { %788 = vadd.xlane.f32.xlu2 %v787_v4  ;;  %v1770_v4 = vmul.f32 1.442695, %v1760_v32 }
 0x3c9   :  { %1786 = vadd.xlane.f32.xlu2 %v1785_v24 }
 0x3f4   :  { %v1239_v55 = vpop.xlane.xlu2 %1238  ;;  %v1251_v6 = vpop.xlane.xlu1 %1250 }
 0x3f5   :  { %v1261_v56 = vsub.f32 %v3180_v12, %v1239_v55  ;;  %v1766_v12 = vmul.f32 1.442695, %v1758_v23  ;;  %v1265_v48 = vsub.f32 %v3176_v27, %v1251_v6  ;;  %v765_v55 = vsub.f32 %v3057_v41, %v3241_v18 }
 0x3f7   :  { %v1269_v60 = vmul.f32 1.442695, %v1261_v56  ;;  %v1277_v49 = vmul.f32 1.442695, %v1265_v48 }
 0x3f9   :  { %2220 = vpow2.f32 %v1269_v60 }
 0x3fa   :  { %2222 = vpow2.f32 %v772_v31  ;;  %v1757_v31 = vpop.xlane.xlu0 %1756 }
 0x3fc   :  { %v1242_v58 = vpop.xlane.xlu2 %1241 }
 0x3fd   :  { %v1262_v25 = vsub.f32 %v3200_v5, %v1242_v58 }
 0x3ff   :  { %v1271_v63 = vmul.f32 1.442695, %v1262_v25  ;;  %v3282_v39 = vpop.eup %2220 }
 0x400   :  { %v1285_v16 = vsel %vm107_vm8, %v3282_v39, 0.0  ;;  %v3288_v28 = vpop.eup %2222 }
 0x401   :  { %2224 = vpow2.f32 %v1271_v63  ;;  %1286 = vadd.xlane.f32.xlu0 %v1285_v16  ;;  %v790_v26 = vsel %vm107_vm8, %v3288_v28, 0.0  ;;  %v766_v16 = vsub.f32 %v3103_v8, %v756_v44 }
 0x402   :  { %2226 = vpow2.f32 %v1766_v12 }
 0x403   :  { %v780_v8 = vmul.f32 1.442695, %v766_v16 }
 0x404   :  { %v1245_v53 = vpop.xlane.xlu2 %1244 }
 0x405   :  { %v1263_v33 = vsub.f32 %v3215_v0, %v1245_v53  ;;  %v1772_v0 = vmul.f32 1.442695, %v1761_v29  ;;  %v1762_v53 = vsub.f32 %v3082_v2, %v3156_v45 }
 0x407   :  { %v1273_v5 = vmul.f32 1.442695, %v1263_v33  ;;  %v3291_v57 = vpop.eup %2224  ;;  %v1774_v22 = vmul.f32 1.442695, %v1762_v53 }
 0x408   :  { %v1288_v9 = vsel %vm107_vm8, %v3291_v57, 0.0  ;;  %v3300_v3 = vpop.eup %2226 }
 0x409   :  { %2228 = vpow2.f32 %v1273_v5  ;;  %1289 = vadd.xlane.f32.xlu1 %v1288_v9  ;;  %791 = vadd.xlane.f32.xlu0 %v790_v26  ;;  %v1260_v5 = vpop.xlane.xlu0 %1259  ;;  %v759_v9 = vpop.xlane.xlu1 %758 }
 0x40a   :  { %2230 = vpow2.f32 %v1772_v0  ;;  %v767_v6 = vsub.f32 %v3196_v20, %v759_v9 }
 0x40b   :  { %2232 = vpow2.f32 %v774_v17  ;;  %v1268_v17 = vsub.f32 %v3188_v43, %v1260_v5 }
 0x40c   :  { %v1248_v52 = vpop.xlane.xlu2 %1247 }
 0x40d   :  { %v1264_v37 = vsub.f32 %v3226_v21, %v1248_v52  ;;  %v1782_v21 = vsel %vm107_vm8, %v3300_v3, 0.0  ;;  %v1283_v48 = vmul.f32 1.442695, %v1268_v17 }
 0x40f   :  { %v3304_v38 = vpop.eup %2228  ;;  %v1275_v11 = vmul.f32 1.442695, %v1264_v37 }
 0x410   :  { %v1291_v61 = vsel %vm107_vm8, %v3304_v38, 0.0  ;;  %v3312_v14 = vpop.eup %2230 }
 0x411   :  { %2234 = vpow2.f32 %v1275_v11  ;;  %1292 = vadd.xlane.f32.xlu2 %v1291_v61  ;;  %1783 = vadd.xlane.f32.xlu1 %v1782_v21  ;;  %v3314_v27 = vpop.eup %2232  ;;  %v1791_v56 = vsel %vm107_vm8, %v3312_v14, 0.0  ;;  %v782_v11 = vmul.f32 1.442695, %v767_v6  ;;  %v1765_v21 = vsub.f32 %v3143_v62, %v1757_v31 }
 0x412   :  { %2236 = vpow2.f32 %v776_v30  ;;  %v793_v13 = vsel %vm107_vm8, %v3314_v27, 0.0  ;;  %v786_v30 = vpop.xlane.xlu1 %785 }
 0x413   :  { %2238 = vpow2.f32 %v1277_v49 }
 0x414   :  { %v1751_v24 = vpop.xlane.xlu2 %1750  ;;  %2240 = vpow2.f32 %v1770_v4 }
 0x415   :  { %v1763_v50 = vsub.f32 %v3237_v36, %v1751_v24  ;;  %v778_v36 = vmul.f32 1.442695, %v765_v55  ;;  %v808_v24 = vmax.f32 %v786_v30, 1e-12 }
 0x417   :  { %v3316_v10 = vpop.eup %2234  ;;  %v1776_v58 = vmul.f32 1.442695, %v1763_v50 }
 0x418   :  { %v1294_v60 = vsel %vm107_vm8, %v3316_v10, 0.0  ;;  %v3327_v25 = vpop.eup %2236 }
 0x419   :  { %1792 = vadd.xlane.f32.xlu2 %v1791_v56  ;;  %1295 = vadd.xlane.f32.xlu0 %v1294_v60  ;;  %v3329_v41 = vpop.eup %2238  ;;  %2242 = vpow2.f32 %v1776_v58  ;;  %v796_v29 = vsel %vm107_vm8, %v3327_v25, 0.0 }
 0x41a   :  { %794 = vadd.xlane.f32.xlu1 %v793_v13  ;;  %v3332_v23 = vpop.eup %2240  ;;  %2244 = vpow2.f32 %v778_v36  ;;  %v1297_v33 = vsel %vm107_vm8, %v3329_v41, 0.0 }
 0x41c   :  { %v1254_v63 = vpop.xlane.xlu2 %1253 }
 0x41d   :  { %v1266_v18 = vsub.f32 %v3248_v34, %v1254_v63  ;;  %v1788_v34 = vsel %vm107_vm8, %v3332_v23, 0.0 }
 0x41f   :  { %v1279_v12 = vmul.f32 1.442695, %v1266_v18  ;;  %v3343_v0 = vpop.eup %2242 }
 0x420   :  { %v3345_v2 = vpop.eup %2244  ;;  %v1797_v52 = vsel %vm107_vm8, %v3343_v0, 0.0 }
 0x421   :  { %2246 = vpow2.f32 %v1279_v12  ;;  %1298 = vadd.xlane.f32.xlu2 %v1297_v33  ;;  %797 = vadd.xlane.f32.xlu0 %v796_v29  ;;  %v799_v42 = vsel %vm107_vm8, %v3345_v2, 0.0 }
 0x422   :  { %1789 = vadd.xlane.f32.xlu1 %v1788_v34  ;;  %2248 = vpow2.f32 %v780_v8 }
 0x423   :  { %2250 = vpow2.f32 %v1774_v22 }
 0x424   :  { %v1754_v26 = vpop.xlane.xlu2 %1753  ;;  %2252 = vpow2.f32 %v1283_v48 }
 0x425   :  { %2254 = vpow2.f32 %v782_v11  ;;  %v1764_v49 = vsub.f32 %v3257_v40, %v1754_v26 }
 0x427   :  { %v3347_v45 = vpop.eup %2246  ;;  %v1778_v55 = vmul.f32 1.442695, %v1764_v49 }
 0x428   :  { %v1300_v37 = vsel %vm107_vm8, %v3347_v45, 0.0  ;;  %v3357_v61 = vpop.eup %2248 }
 0x429   :  { %1798 = vadd.xlane.f32.xlu2 %v1797_v52  ;;  %1301 = vadd.xlane.f32.xlu0 %v1300_v37  ;;  %v3360_v20 = vpop.eup %2250  ;;  %v802_v4 = vsel %vm107_vm8, %v3357_v61, 0.0 }
 0x42a   :  { %800 = vadd.xlane.f32.xlu1 %v799_v42  ;;  %v1794_v50 = vsel %vm107_vm8, %v3360_v20, 0.0  ;;  %v3368_v62 = vpop.eup %2252 }
 0x42b   :  { %v3370_v13 = vpop.eup %2254  ;;  %v1306_v58 = vsel %vm107_vm8, %v3368_v62, 0.0 }
 0x42c   :  { %v1257_v32 = vpop.xlane.xlu2 %1256  ;;  %v805_v36 = vsel %vm107_vm8, %v3370_v13, 0.0 }
 0x42d   :  { %v1267_v43 = vsub.f32 %v3265_v15, %v1257_v32  ;;  %v1780_v15 = vmul.f32 1.442695, %v1765_v21 }
 0x42f   :  { %v1281_v44 = vmul.f32 1.442695, %v1267_v43 }
 0x431   :  { %2256 = vpow2.f32 %v1281_v44  ;;  %803 = vadd.xlane.f32.xlu0 %v802_v4 }
 0x432   :  { %1795 = vadd.xlane.f32.xlu1 %v1794_v50  ;;  %2258 = vrcp.f32 %v808_v24 }
 0x433   :  { %2260 = vpow2.f32 %v1780_v15 }
 0x434   :  { %v789_v56 = vpop.xlane.xlu2 %788 }
 0x435   :  { %v809_v60 = vmax.f32 %v789_v56, 1e-12 }
 0x437   :  { %v3372_v40 = vpop.eup %2256  ;;  %2262 = vrcp.f32 %v809_v60 }
 0x438   :  { %2264 = vpow2.f32 %v1778_v55  ;;  %v1303_v31 = vsel %vm107_vm8, %v3372_v40, 0.0  ;;  %v2259_v63 = vpop.eup %2258 }
 0x439   :  { %1304 = vadd.xlane.f32.xlu2 %v1303_v31  ;;  %1307 = vadd.xlane.f32.xlu0 %v1306_v58  ;;  %v3380_v18 = vpop.eup %2260  ;;  %v824_v53 = vmul.f32 %v2259_v63, %v3211_v7 }
 0x43a   :  { %806 = vadd.xlane.f32.xlu1 %v805_v36  ;;  %v1803_v29 = vsel %vm107_vm8, %v3380_v18, 0.0 }
 0x43c   :  { %v1787_v9 = vpop.xlane.xlu2 %1786 }
 0x43d   :  { %v2263_v16 = vpop.eup %2262  ;;  %v1807_v7 = vmax.f32 %v1787_v9, 1e-12 }
 0x43e   :  { %v3382_v12 = vpop.eup %2264  ;;  %v825_v33 = vmul.f32 %v2263_v16, %v3270_v51 }
 0x43f   :  { %v1800_v8 = vsel %vm107_vm8, %v3382_v12, 0.0 }
 0x440   :  { %v832_v34 = vpack.c.bf16 %v825_v33, %v824_v53 }
 0x441   :  { %1804 = vadd.xlane.f32.xlu2 %v1803_v29 }
 0x442   :  { %1801 = vadd.xlane.f32.xlu1 %v1800_v8  ;;  %2136 = vmatmul.msk.bf16.vlgmr.msrb.gmra.mxu2 %vm107_vm8, %v832_v34 }
 0x474   :  { %v1287_v5 = vpop.xlane.xlu0 %1286 }
 0x475   :  { %v1309_v22 = vmax.f32 %v1287_v5, 1e-12 }
 0x477   :  { %2266 = vrcp.f32 %v1309_v22 }
 0x47c   :  { %v1290_v26 = vpop.xlane.xlu1 %1289  ;;  %v792_v6 = vpop.xlane.xlu0 %791 }
 0x47d   :  { %v1310_v17 = vmax.f32 %v1290_v26, 1e-12  ;;  %v2267_v51 = vpop.eup %2266  ;;  %v810_v21 = vmax.f32 %v792_v6, 1e-12 }
 0x47e   :  { %v1325_v11 = vmul.f32 %v2267_v51, %v3282_v39 }
 0x47f   :  { %2268 = vrcp.f32 %v1310_v17 }
 0x480   :  { %2270 = vrcp.f32 %v1807_v7 }
 0x484   :  { %v1293_v52 = vpop.xlane.xlu2 %1292  ;;  %v1784_v37 = vpop.xlane.xlu1 %1783 }
 0x485   :  { %v2269_v42 = vpop.eup %2268  ;;  %v1806_v48 = vmax.f32 %v1784_v37, 1e-12  ;;  %v1311_v30 = vmax.f32 %v1293_v52, 1e-12 }
 0x486   :  { %v1326_v32 = vmul.f32 %v2269_v42, %v3291_v57  ;;  %v2271_v44 = vpop.eup %2270 }
 0x487   :  { %2272 = vrcp.f32 %v1806_v48  ;;  %v1823_v56 = vmul.f32 %v2271_v44, %v3274_v19 }
 0x488   :  { %v1333_v43 = vpack.c.bf16 %v1326_v32, %v1325_v11  ;;  %2274 = vrcp.f32 %v810_v21 }
 0x489   :  { %2276 = vrcp.f32 %v1311_v30 }
 0x48a   :  { %2140 = vmatmul.msk.bf16.vlgmr.msrb.gmra.mxu3 %vm107_vm8, %v1333_v43 }
 0x48c   :  { %v1793_v49 = vpop.xlane.xlu2 %1792  ;;  %v1296_v4 = vpop.xlane.xlu0 %1295 }
 0x48d   :  { %v795_v24 = vpop.xlane.xlu1 %794  ;;  %v1312_v50 = vmax.f32 %v1296_v4, 1e-12  ;;  %v2273_v15 = vpop.eup %2272  ;;  %v1809_v60 = vmax.f32 %v1793_v49, 1e-12 }
 0x48e   :  { %v811_v55 = vmax.f32 %v795_v24, 1e-12  ;;  %v1822_v39 = vmul.f32 %v2273_v15, %v3300_v3  ;;  %v2275_v31 = vpop.eup %2274 }
 0x48f   :  { %v2277_v36 = vpop.eup %2276  ;;  %v826_v19 = vmul.f32 %v2275_v31, %v3288_v28 }
 0x490   :  { %2278 = vrcp.f32 %v811_v55  ;;  %v1830_v57 = vpack.c.bf16 %v1823_v56, %v1822_v39  ;;  %v1327_v3 = vmul.f32 %v2277_v36, %v3304_v38 }
 0x491   :  { %2280 = vrcp.f32 %v1312_v50 }
 0x492   :  { %2144 = vmatmul.msk.bf16.vlgmr.msrb.gmra.mxu0 %vm107_vm8, %v1830_v57  ;;  %2282 = vrcp.f32 %v1809_v60 }
 0x494   :  { %v798_v58 = vpop.xlane.xlu0 %797  ;;  %v1299_v63 = vpop.xlane.xlu2 %1298 }
 0x495   :  { %v1790_v16 = vpop.xlane.xlu1 %1789  ;;  %v812_v22 = vmax.f32 %v798_v58, 1e-12  ;;  %v1313_v26 = vmax.f32 %v1299_v63, 1e-12 }
 0x496   :  { %v2279_v53 = vpop.eup %2278  ;;  %v1808_v33 = vmax.f32 %v1790_v16, 1e-12 }
 0x497   :  { %v2281_v29 = vpop.eup %2280  ;;  %v827_v34 = vmul.f32 %v2279_v53, %v3314_v27 }
 0x498   :  { %2284 = vrcp.f32 %v1808_v33  ;;  %v1328_v8 = vmul.f32 %v2281_v29, %v3316_v10  ;;  %v2283_v17 = vpop.eup %2282 }
 0x499   :  { %v833_v5 = vpack.c.bf16 %v827_v34, %v826_v19  ;;  %2286 = vrcp.f32 %v812_v22  ;;  %v1825_v10 = vmul.f32 %v2283_v17, %v3312_v14 }
 0x49a   :  { %v1334_v9 = vpack.c.bf16 %v1328_v8, %v1327_v3  ;;  %2288 = vrcp.f32 %v1313_v26 }
 0x49b   :  { %2137 = vmatmul.msk.bf16.gmra.mxu2 %vm107_vm8, %v833_v5 }
 0x49c   :  { %2141 = vmatmul.msk.bf16.gmra.mxu3 %vm107_vm8, %v1334_v9  ;;  %v1302_v7 = vpop.xlane.xlu0 %1301  ;;  %v1799_v52 = vpop.xlane.xlu2 %1798 }
 0x49d   :  { %v801_v51 = vpop.xlane.xlu1 %800  ;;  %v1314_v6 = vmax.f32 %v1302_v7, 1e-12  ;;  %v1811_v42 = vmax.f32 %v1799_v52, 1e-12 }
 0x49e   :  { %v2285_v28 = vpop.eup %2284  ;;  %v813_v27 = vmax.f32 %v801_v51, 1e-12 }
 0x49f   :  { %v1824_v38 = vmul.f32 %v2285_v28, %v3332_v23  ;;  %v2287_v48 = vpop.eup %2286 }
 0x4a0   :  { %2290 = vrcp.f32 %v813_v27  ;;  %v2289_v32 = vpop.eup %2288  ;;  %v828_v49 = vmul.f32 %v2287_v48, %v3327_v25 }
 0x4a1   :  { %2292 = vrcp.f32 %v1314_v6  ;;  %v1831_v37 = vpack.c.bf16 %v1825_v10, %v1824_v38  ;;  %v1329_v14 = vmul.f32 %v2289_v32, %v3329_v41 }
 0x4a2   :  { %2294 = vrcp.f32 %v1811_v42 }
 0x4a3   :  { %2145 = vmatmul.msk.bf16.gmra.mxu0 %vm107_vm8, %v1831_v37 }
 0x4a4   :  { %v804_v11 = vpop.xlane.xlu0 %803 }
 0x4a5   :  { %v1796_v43 = vpop.xlane.xlu1 %1795  ;;  %v814_v50 = vmax.f32 %v804_v11, 1e-12 }
 0x4a6   :  { %v2291_v21 = vpop.eup %2290  ;;  %v1810_v30 = vmax.f32 %v1796_v43, 1e-12 }
 0x4a7   :  { %v2293_v44 = vpop.eup %2292  ;;  %v829_v23 = vmul.f32 %v2291_v21, %v3345_v2 }
 0x4a8   :  { %2296 = vrcp.f32 %v1810_v30  ;;  %v1330_v4 = vmul.f32 %v2293_v44, %v3347_v45  ;;  %v2295_v55 = vpop.eup %2294 }
 0x4a9   :  { %v834_v24 = vpack.c.bf16 %v829_v23, %v828_v49  ;;  %2298 = vrcp.f32 %v814_v50  ;;  %v1827_v45 = vmul.f32 %v2295_v55, %v3343_v0 }
 0x4aa   :  { %v1335_v15 = vpack.c.bf16 %v1330_v4, %v1329_v14 }
 0x4ab   :  { %2138 = vmatmul.msk.bf16.gmra.mxu2 %vm107_vm8, %v834_v24 }
 0x4ac   :  { %2142 = vmatmul.msk.bf16.gmra.mxu3 %vm107_vm8, %v1335_v15  ;;  %v1305_v56 = vpop.xlane.xlu2 %1304  ;;  %v1308_v39 = vpop.xlane.xlu0 %1307 }
 0x4ad   :  { %v1315_v57 = vmax.f32 %v1305_v56, 1e-12  ;;  %v807_v60 = vpop.xlane.xlu1 %806  ;;  %v1316_v25 = vmax.f32 %v1308_v39, 1e-12 }
 0x4ae   :  { %v2297_v31 = vpop.eup %2296  ;;  %v815_v2 = vmax.f32 %v807_v60, 1e-12 }
 0x4af   :  { %2300 = vrcp.f32 %v1315_v57  ;;  %v1826_v41 = vmul.f32 %v2297_v31, %v3360_v20  ;;  %v2299_v36 = vpop.eup %2298 }
 0x4b0   :  { %2302 = vrcp.f32 %v815_v2  ;;  %v830_v20 = vmul.f32 %v2299_v36, %v3357_v61  ;;  %v3426_v61 = vld [vmem:[%s4334_s7] ss:$0 sm:$0xff] }
 0x4b1   :  { %2304 = vrcp.f32 %v1316_v25  ;;  %v1832_v58 = vpack.c.bf16 %v1827_v45, %v1826_v41 }
 0x4b3   :  { %2146 = vmatmul.msk.bf16.gmra.mxu0 %vm107_vm8, %v1832_v58 }
 0x4b4   :  { %v1805_v63 = vpop.xlane.xlu2 %1804 }
 0x4b5   :  { %v2301_v16 = vpop.eup %2300  ;;  %v1802_v53 = vpop.xlane.xlu1 %1801  ;;  %v1813_v33 = vmax.f32 %v1805_v63, 1e-12 }
 0x4b6   :  { %v2303_v29 = vpop.eup %2302  ;;  %v1812_v19 = vmax.f32 %v1802_v53, 1e-12  ;;  %v1331_v34 = vmul.f32 %v2301_v16, %v3372_v40  ;;  %v3491_v53 = vmax.f32 %v2845_v54, 1e-24 }
 0x4b7   :  { %v2305_v3 = vpop.eup %2304  ;;  %2306 = vrcp.f32 %v1813_v33  ;;  %v831_v0 = vmul.f32 %v2303_v29, %v3370_v13 }
 0x4b8   :  { %2308 = vrcp.f32 %v1812_v19  ;;  %v1332_v8 = vmul.f32 %v2305_v3, %v3368_v62 }
 0x4b9   :  { %v835_v5 = vpack.c.bf16 %v831_v0, %v830_v20  ;;  %2310 = vrsqrt.f32 %v3491_v53 }
 0x4ba   :  { %v1336_v22 = vpack.c.bf16 %v1332_v8, %v1331_v34 }
 0x4bb   :  { %2139 = vmatmul.msk.bf16.gmra.mxu2 %vm107_vm8, %v835_v5 }
 0x4bc   :  { %2143 = vmatmul.msk.bf16.gmra.mxu3 %vm107_vm8, %v1336_v22 }
 0x4bd   :  { %v2307_v9 = vpop.eup %2306 }
 0x4be   :  { %v2309_v26 = vpop.eup %2308  ;;  %v1829_v17 = vmul.f32 %v2307_v9, %v3380_v18  ;;  %v3513_v9 = vmax.f32 %v2823_v35, 1e-24 }
 0x4bf   :  { %v1828_v40 = vmul.f32 %v2309_v26, %v3382_v12 }
 0x4c0   :  { %2312 = vrsqrt.f32 %v3513_v9  ;;  %vm489_vm6 = vweird.f32 %v3513_v9 }
 0x4c1   :  { %v1833_v7 = vpack.c.bf16 %v1829_v17, %v1828_v40 }
 0x4c3   :  { %2147 = vmatmul.msk.bf16.gmra.mxu0 %vm107_vm8, %v1833_v7  ;;  %vm479_vm8 = vweird.f32 %v3491_v53 }
 0x4c5   :  { %v864_v62 = vpop.f32.mrf.mxu2 }
 0x4c6   :  { %v3430_v13 = vadd.f32 %v3426_v61, %v864_v62 }
 0x4c8   :  { %v884_v51 = vmul.f32 %v3430_v13, %v3430_v13 }
 0x4ca   :  { %v892_v6 = vsel %vm440_vm4, %v884_v51, 0.0  ;;  %v3521_v51 = vpop.eup %2310 }
 0x4cb   :  { %893 = vadd.xlane.f32.xlu0 %v892_v6  ;;  %vm480_vm9 = vweird.f32 %v3521_v51 }
 0x4cc   :  { %vm3584_vm15 = vmor %vm479_vm8, %vm480_vm9 }
 0x4cd   :  { %v866_v18 = vpop.f32.mrf.mxu2 }
 0x4ce   :  { %v3436_v12 = vadd.f32 %v3426_v61, %v866_v18 }
 0x4d0   :  { %v885_v28 = vmul.f32 %v3436_v12, %v3436_v12 }
 0x4d2   :  { %v895_v27 = vsel %vm440_vm4, %v885_v28, 0.0 }
 0x4d3   :  { %896 = vadd.xlane.f32.xlu1 %v895_v27  ;;  %v474_v27 = vmul.f32 %v3521_v51, %v3491_v53 }
 0x50d   :  { %v3441_v52 = vpop.f32.mrf.mxu3 }
 0x50f   :  { %v1859_v38 = vpop.f32.mrf.mxu0 }
 0x510   :  { %v3444_v10 = vadd.f32 %v3426_v61, %v1859_v38 }
 0x512   :  { %v1879_v37 = vmul.f32 %v3444_v10, %v3444_v10 }
 0x514   :  { %v1887_v42 = vsel %vm440_vm4, %v1879_v37, 0.0 }
 0x515   :  { %1888 = vadd.xlane.f32.xlu0 %v1887_v42  ;;  %v1364_v48 = vpop.f32.mrf.mxu3 }
 0x516   :  { %v3450_v11 = vadd.f32 %v3426_v61, %v1364_v48 }
 0x517   :  { %v1861_v32 = vpop.f32.mrf.mxu0 }
 0x518   :  { %v3453_v43 = vadd.f32 %v3426_v61, %v1861_v32  ;;  %v1383_v21 = vmul.f32 %v3450_v11, %v3450_v11 }
 0x51a   :  { %v1880_v30 = vmul.f32 %v3453_v43, %v3453_v43  ;;  %v1393_v49 = vsel %vm440_vm4, %v1383_v21, 0.0 }
 0x51c   :  { %v1890_v44 = vsel %vm440_vm4, %v1880_v30, 0.0 }
 0x51d   :  { %1891 = vadd.xlane.f32.xlu1 %v1890_v44  ;;  %1394 = vadd.xlane.f32.xlu0 %v1393_v49  ;;  %v3541_v49 = vpop.eup %2312 }
 0x51e   :  { %v869_v23 = vpop.f32.mrf.mxu2  ;;  %vm490_vm11 = vweird.f32 %v3541_v49 }
 0x51f   :  { %v3462_v14 = vadd.f32 %v3426_v61, %v869_v23  ;;  %v3464_v4 = vpop.f32.mrf.mxu3  ;;  %v475_v23 = vmul.f32 %v3521_v51, %v474_v27  ;;  %vm3607_vm13 = vmor %vm489_vm6, %vm490_vm11 }
 0x520   :  { %v1864_v24 = vpop.f32.mrf.mxu0 }
 0x521   :  { %v886_v50 = vmul.f32 %v3462_v14, %v3462_v14  ;;  %v3469_v15 = vadd.f32 %v3426_v61, %v1864_v24 }
 0x523   :  { %v898_v55 = vsel %vm440_vm4, %v886_v50, 0.0  ;;  %v1881_v2 = vmul.f32 %v3469_v15, %v3469_v15 }
 0x525   :  { %899 = vadd.xlane.f32.xlu1 %v898_v55  ;;  %v1893_v63 = vsel %vm440_vm4, %v1881_v2, 0.0 }
 0x526   :  { %v871_v56 = vpop.f32.mrf.mxu2 }
 0x527   :  { %v3473_v39 = vadd.f32 %v3426_v61, %v871_v56  ;;  %v1369_v57 = vpop.f32.mrf.mxu3 }
 0x528   :  { %v3476_v60 = vadd.f32 %v3426_v61, %v1369_v57  ;;  %v1866_v25 = vpop.f32.mrf.mxu0 }
 0x529   :  { %v887_v31 = vmul.f32 %v3473_v39, %v3473_v39  ;;  %v3487_v36 = vadd.f32 %v3426_v61, %v1866_v25  ;;  %v484_v25 = vmul.f32 %v3541_v49, %v3513_v9 }
 0x52a   :  { %v1385_v41 = vmul.f32 %v3476_v60, %v3476_v60 }
 0x52b   :  { %v901_v45 = vsel %vm440_vm4, %v887_v31, 0.0  ;;  %v1882_v20 = vmul.f32 %v3487_v36, %v3487_v36  ;;  %v3557_v31 = vadd.f32 %v3426_v61, %v3441_v52 }
 0x52c   :  { %902 = vadd.xlane.f32.xlu2 %v901_v45  ;;  %v1399_v58 = vsel %vm440_vm4, %v1385_v41, 0.0  ;;  %v476_v41 = vmul.f32 0.5, %v475_v23 }
 0x52d   :  { %1400 = vadd.xlane.f32.xlu0 %v1399_v58  ;;  %1894 = vadd.xlane.f32.xlu1 %v1893_v63  ;;  %v1896_v22 = vsel %vm440_vm4, %v1882_v20, 0.0  ;;  %v1382_v52 = vmul.f32 %v3557_v31, %v3557_v31 }
 0x52e   :  { %v874_v16 = vpop.f32.mrf.mxu2 }
 0x52f   :  { %v3494_v33 = vadd.f32 %v3426_v61, %v874_v16  ;;  %v1372_v29 = vpop.f32.mrf.mxu3 }
 0x530   :  { %v3497_v19 = vadd.f32 %v3426_v61, %v1372_v29  ;;  %v1869_v34 = vpop.f32.mrf.mxu0 }
 0x531   :  { %v888_v3 = vmul.f32 %v3494_v33, %v3494_v33  ;;  %v3509_v5 = vadd.f32 %v3426_v61, %v1869_v34  ;;  %v485_v34 = vmul.f32 %v3541_v49, %v484_v25 }
 0x532   :  { %v1386_v0 = vmul.f32 %v3497_v19, %v3497_v19 }
 0x533   :  { %v904_v54 = vsel %vm440_vm4, %v888_v3, 0.0  ;;  %v1883_v6 = vmul.f32 %v3509_v5, %v3509_v5 }
 0x534   :  { %905 = vadd.xlane.f32.xlu2 %v904_v54  ;;  %v1402_v8 = vsel %vm440_vm4, %v1386_v0, 0.0  ;;  %v477_v0 = vsub.f32 1.5, %v476_v41 }
 0x535   :  { %1403 = vadd.xlane.f32.xlu0 %v1402_v8  ;;  %1897 = vadd.xlane.f32.xlu1 %v1896_v22  ;;  %v1899_v42 = vsel %vm440_vm4, %v1883_v6, 0.0  ;;  %v3579_v6 = vadd.f32 %v3426_v61, %v3464_v4 }
 0x536   :  { %v876_v26 = vpop.f32.mrf.mxu2 }
 0x537   :  { %v3516_v17 = vadd.f32 %v3426_v61, %v876_v26  ;;  %v1374_v40 = vpop.f32.mrf.mxu3 }
 0x538   :  { %v3519_v7 = vadd.f32 %v3426_v61, %v1374_v40  ;;  %v1871_v62 = vpop.f32.mrf.mxu0 }
 0x539   :  { %v889_v18 = vmul.f32 %v3516_v17, %v3516_v17  ;;  %v3535_v37 = vadd.f32 %v3426_v61, %v1871_v62  ;;  %v486_v62 = vmul.f32 0.5, %v485_v34 }
 0x53a   :  { %v1387_v35 = vmul.f32 %v3519_v7, %v3519_v7 }
 0x53b   :  { %v907_v28 = vsel %vm440_vm4, %v889_v18, 0.0  ;;  %v1884_v50 = vmul.f32 %v3535_v37, %v3535_v37  ;;  %v1390_v18 = vsel %vm440_vm4, %v1382_v52, 0.0 }
 0x53c   :  { %908 = vadd.xlane.f32.xlu2 %v907_v28  ;;  %v1405_v38 = vsel %vm440_vm4, %v1387_v35, 0.0  ;;  %v478_v35 = vmul.f32 %v3521_v51, %v477_v0 }
 0x53d   :  { %1406 = vadd.xlane.f32.xlu0 %v1405_v38  ;;  %1900 = vadd.xlane.f32.xlu1 %v1899_v42  ;;  %v1902_v63 = vsel %vm440_vm4, %v1884_v50, 0.0 }
 0x53e   :  { %v879_v48 = vpop.f32.mrf.mxu2  ;;  %v894_v32 = vpop.xlane.xlu0 %893 }
 0x53f   :  { %v3539_v21 = vadd.f32 %v3426_v61, %v879_v48  ;;  %v1377_v30 = vpop.f32.mrf.mxu3  ;;  %v916_v44 = vmax.f32 %v894_v32, 1e-24  ;;  %v487_v48 = vsub.f32 1.5, %v486_v62  ;;  %v1384_v32 = vmul.f32 %v3579_v6, %v3579_v6 }
 0x540   :  { %v3545_v24 = vadd.f32 %v3426_v61, %v1377_v30  ;;  %v1874_v56 = vpop.f32.mrf.mxu0 }
 0x541   :  { %2314 = vrsqrt.f32 %v916_v44  ;;  %v890_v55 = vmul.f32 %v3539_v21, %v3539_v21  ;;  %v3562_v58 = vadd.f32 %v3426_v61, %v1874_v56  ;;  %vm930_vm3 = vweird.f32 %v916_v44 }
 0x542   :  { %v1388_v57 = vmul.f32 %v3545_v24, %v3545_v24 }
 0x543   :  { %v910_v2 = vsel %vm440_vm4, %v890_v55, 0.0  ;;  %v1885_v22 = vmul.f32 %v3562_v58, %v3562_v58  ;;  %v482_v55 = vsel %vm3584_vm15, %v3521_v51, %v478_v35 }
 0x544   :  { %911 = vadd.xlane.f32.xlu2 %v910_v2  ;;  %v1408_v45 = vsel %vm440_vm4, %v1388_v57, 0.0  ;;  %v1396_v2 = vsel %vm440_vm4, %v1384_v32, 0.0  ;;  %v4363_v32 = vld [vmem:[#allocation6_spill] sm:$0xff] }
 0x545   :  { %1409 = vadd.xlane.f32.xlu0 %v1408_v45  ;;  %1903 = vadd.xlane.f32.xlu1 %v1902_v63  ;;  %v1905_v38 = vsel %vm440_vm4, %v1885_v22, 0.0  ;;  %v488_v45 = vmul.f32 %v3541_v49, %v487_v48 }
 0x546   :  { %v897_v16 = vpop.xlane.xlu1 %896  ;;  %v881_v23 = vpop.f32.mrf.mxu2 }
 0x547   :  { %v2315_v29 = vpop.eup %2314  ;;  %v1379_v3 = vpop.f32.mrf.mxu3  ;;  %v917_v20 = vmax.f32 %v897_v16, 1e-24  ;;  %v3597_v25 = vadd.f32 %v3426_v61, %v881_v23  ;;  %v492_v0 = vsel %vm3607_vm13, %v3541_v49, %v488_v45 }
 0x548   :  { %v925_v54 = vmul.f32 %v2315_v29, %v916_v44  ;;  %v3569_v8 = vadd.f32 %v3426_v61, %v1379_v3  ;;  %vm931_vm2 = vweird.f32 %v2315_v29  ;;  %v2374_v44 = vld [vmem:[%s4337_s10] sm:$0xff] }
 0x549   :  { %2316 = vrsqrt.f32 %v917_v20  ;;  %vm932_vm14 = vmor %vm930_vm3, %vm931_vm2  ;;  %v3603_v41 = vmul.f32 %v2374_v44, %v482_v55  ;;  %v891_v34 = vmul.f32 %v3597_v25, %v3597_v25  ;;  %vm940_vm5 = vweird.f32 %v917_v20 }
 0x54a   :  { %v926_v26 = vmul.f32 %v2315_v29, %v925_v54  ;;  %v1389_v40 = vmul.f32 %v3569_v8, %v3569_v8 }
 0x54c   :  { %v927_v28 = vmul.f32 0.5, %v926_v26  ;;  %1391 = vadd.xlane.f32.xlu2 %v1390_v18  ;;  %v1411_v27 = vsel %vm440_vm4, %v1389_v40, 0.0  ;;  %v913_v26 = vsel %vm440_vm4, %v891_v34, 0.0  ;;  %v2375_v40 = vld [vmem:[%s4337_s10 + $0x8] sm:$0xff] }
 0x54d   :  { %1412 = vadd.xlane.f32.xlu0 %v1411_v27  ;;  %1906 = vadd.xlane.f32.xlu1 %v1905_v38  ;;  %v3625_v62 = vmul.f32 %v2375_v40, %v492_v0  ;;  %v3638_v27 = vmax.f32 %v2856_v1, 1e-24 }
 0x54e   :  { %v928_v42 = vsub.f32 1.5, %v927_v28  ;;  %v3634_v28 = vmax.f32 %v2834_v46, 1e-24  ;;  %v4362_v46 = vld [vmem:[#allocation5_spill] sm:$0xff] }
 0x54f   :  { %v2317_v4 = vpop.eup %2316  ;;  %v3651_v48 = vmax.f32 %v4362_v46, 1e-24  ;;  %vm509_vm3 = vweird.f32 %v3638_v27 }
 0x550   :  { %v929_v30 = vmul.f32 %v2315_v29, %v928_v42  ;;  %v935_v50 = vmul.f32 %v2317_v4, %v917_v20  ;;  %vm941_vm7 = vweird.f32 %v2317_v4  ;;  %2318 = vrsqrt.f32 %v3634_v28 }
 0x551   :  { %vm942_vm10 = vmor %vm940_vm5, %vm941_vm7  ;;  %2320 = vrsqrt.f32 %v3638_v27  ;;  %vm529_vm8 = vweird.f32 %v3634_v28 }
 0x552   :  { %v936_v56 = vmul.f32 %v2317_v4, %v935_v50  ;;  %v933_v57 = vsel %vm932_vm14, %v2315_v29, %v929_v30  ;;  %v3659_v30 = vmax.f32 %v4363_v32, 1e-24 }
 0x553   :  { %v1004_v51 = vmul.f32 %v933_v57, %v3430_v13  ;;  %v1876_v13 = vpop.f32.mrf.mxu0 }
 0x554   :  { %v937_v9 = vmul.f32 0.5, %v936_v56  ;;  %1397 = vadd.xlane.f32.xlu2 %v1396_v2  ;;  %v3619_v22 = vadd.f32 %v3426_v61, %v1876_v13 }
 0x555   :  { %v1012_v16 = vmul.f32 %v1004_v51, %v3603_v41 }
 0x556   :  { %v938_v29 = vsub.f32 1.5, %v937_v9  ;;  %v1886_v49 = vmul.f32 %v3619_v22, %v3619_v22  ;;  %v3645_v42 = vpop.eup %2318 }
 0x557   :  { %v1020_v52 = vsel %vm440_vm4, %v1012_v16, 0.0  ;;  %v524_v1 = vmul.f32 %v3645_v42, %v3634_v28  ;;  %vm530_vm9 = vweird.f32 %v3645_v42 }
 0x558   :  { %v939_v3 = vmul.f32 %v2317_v4, %v938_v29  ;;  %1021 = vadd.xlane.f32.xlu0 %v1020_v52  ;;  %v1908_v61 = vsel %vm440_vm4, %v1886_v49, 0.0  ;;  %vm3735_vm13 = vmor %vm529_vm8, %vm530_vm9 }
 0x559   :  { %v525_v56 = vmul.f32 %v3645_v42, %v524_v1 }
 0x55a   :  { %v943_v54 = vsel %vm942_vm10, %v2317_v4, %v939_v3  ;;  %v3648_v4 = vmax.f32 %v2848_v59, 1e-24  ;;  %vm519_vm10 = vweird.f32 %v3651_v48 }
 0x55b   :  { %v1005_v20 = vmul.f32 %v943_v54, %v3436_v12  ;;  %v3641_v12 = vmax.f32 %v2836_v47, 1e-24  ;;  %v3655_v47 = vpop.eup %2320  ;;  %v526_v16 = vmul.f32 0.5, %v525_v56 }
 0x55c   :  { %914 = vadd.xlane.f32.xlu2 %v913_v26  ;;  %v504_v57 = vmul.f32 %v3655_v47, %v3638_v27  ;;  %vm510_vm14 = vweird.f32 %v3655_v47  ;;  %vm539_vm7 = vweird.f32 %v3648_v4 }
 0x55d   :  { %v1013_v18 = vmul.f32 %v1005_v20, %v3625_v62  ;;  %2322 = vrsqrt.f32 %v3641_v12  ;;  %v527_v20 = vsub.f32 1.5, %v526_v16  ;;  %vm499_vm15 = vweird.f32 %v3641_v12 }
 0x55e   :  { %v505_v29 = vmul.f32 %v3655_v47, %v504_v57 }
 0x55f   :  { %v1023_v35 = vsel %vm440_vm4, %v1013_v18, 0.0 }
 0x560   :  { %1024 = vadd.xlane.f32.xlu1 %v1023_v35  ;;  %v506_v18 = vmul.f32 0.5, %v505_v29 }
 0x563   :  { %v3661_v23 = vpop.eup %2322 }
 0x564   :  { %1909 = vadd.xlane.f32.xlu2 %v1908_v61  ;;  %v494_v51 = vmul.f32 %v3661_v23, %v3641_v12  ;;  %vm500_vm2 = vweird.f32 %v3661_v23 }
 0x566   :  { %v495_v52 = vmul.f32 %v3661_v23, %v494_v51 }
 0x588   :  { %v1889_v53 = vpop.xlane.xlu0 %1888 }
 0x589   :  { %v1911_v38 = vmax.f32 %v1889_v53, 1e-24  ;;  %v3694_v53 = vmul.f32 0.5, %v495_v52 }
 0x58b   :  { %2324 = vrsqrt.f32 %v1911_v38  ;;  %vm1925_vm0 = vweird.f32 %v1911_v38  ;;  %v497_v16 = vsub.f32 1.5, %v3694_v53 }
 0x58c   :  { %2326 = vrsqrt.f32 %v3648_v4 }
 0x58d   :  { %2328 = vrsqrt.f32 %v3651_v48 }
 0x58e   :  { %2330 = vrsqrt.f32 %v3659_v30 }
 0x590   :  { %v1892_v59 = vpop.xlane.xlu1 %1891  ;;  %v1395_v50 = vpop.xlane.xlu0 %1394 }
 0x591   :  { %v2325_v55 = vpop.eup %2324  ;;  %v3667_v2 = vmax.f32 %v1892_v59, 1e-24  ;;  %v3669_v44 = vmax.f32 %v1395_v50, 1e-24 }
 0x592   :  { %v1920_v45 = vmul.f32 %v2325_v55, %v1911_v38  ;;  %v3675_v9 = vpop.eup %2326  ;;  %vm1926_vm12 = vweird.f32 %v2325_v55  ;;  %v3707_v38 = vmul.f32 %v3645_v42, %v527_v20 }
 0x593   :  { %2332 = vrsqrt.f32 %v3667_v2  ;;  %v3679_v34 = vpop.eup %2328  ;;  %v534_v13 = vmul.f32 %v3675_v9, %v3648_v4  ;;  %vm1927_vm1 = vmor %vm1925_vm0, %vm1926_vm12  ;;  %vm1935_vm5 = vweird.f32 %v3667_v2  ;;  %vm1438_vm0 = vweird.f32 %v3669_v44 }
 0x594   :  { %v1921_v63 = vmul.f32 %v2325_v55, %v1920_v45  ;;  %2334 = vrsqrt.f32 %v3669_v44  ;;  %v3684_v0 = vpop.eup %2330  ;;  %v514_v49 = vmul.f32 %v3679_v34, %v3651_v48  ;;  %vm520_vm8 = vweird.f32 %v3679_v34 }
 0x595   :  { %v535_v32 = vmul.f32 %v3675_v9, %v534_v13  ;;  %v544_v59 = vmul.f32 %v3684_v0, %v3659_v30  ;;  %vm540_vm9 = vweird.f32 %v3675_v9 }
 0x596   :  { %v1922_v3 = vmul.f32 0.5, %v1921_v63  ;;  %v507_v63 = vsub.f32 1.5, %v506_v18  ;;  %v515_v29 = vmul.f32 %v3679_v34, %v514_v49 }
 0x597   :  { %v545_v13 = vmul.f32 %v3684_v0, %v544_v59 }
 0x598   :  { %v1923_v54 = vsub.f32 1.5, %v1922_v3  ;;  %v900_v26 = vpop.xlane.xlu1 %899 }
 0x599   :  { %v3686_v40 = vpop.eup %2332  ;;  %v3690_v35 = vmax.f32 %v900_v26, 1e-24 }
 0x59a   :  { %v3692_v61 = vpop.eup %2334  ;;  %v1924_v46 = vmul.f32 %v2325_v55, %v1923_v54  ;;  %v1930_v1 = vmul.f32 %v3686_v40, %v3667_v2  ;;  %vm1936_vm6 = vweird.f32 %v3686_v40 }
 0x59b   :  { %v1433_v50 = vmul.f32 %v3692_v61, %v3669_v44  ;;  %2336 = vrsqrt.f32 %v3690_v35  ;;  %vm1439_vm11 = vweird.f32 %v3692_v61  ;;  %vm1937_vm12 = vmor %vm1935_vm5, %vm1936_vm6  ;;  %vm549_vm6 = vweird.f32 %v3659_v30  ;;  %v2378_v30 = vld [vmem:[%s4337_s10 + $0x30] sm:$0xff] }
 0x59c   :  { %v1931_v56 = vmul.f32 %v3686_v40, %v1930_v1  ;;  %v1928_v57 = vsel %vm1927_vm1, %v2325_v55, %v1924_v46  ;;  %v536_v55 = vmul.f32 0.5, %v535_v32  ;;  %vm3756_vm1 = vmor %vm1438_vm0, %vm1439_vm11 }
 0x59d   :  { %v1434_v51 = vmul.f32 %v3692_v61, %v1433_v50  ;;  %v1999_v45 = vmul.f32 %v1928_v57, %v3444_v10  ;;  %v516_v57 = vmul.f32 0.5, %v515_v29  ;;  %vm3814_vm5 = vmor %vm509_vm3, %vm510_vm14 }
 0x59e   :  { %v1932_v52 = vmul.f32 0.5, %v1931_v56  ;;  %v537_v44 = vsub.f32 1.5, %v536_v55  ;;  %vm3835_vm3 = vmor %vm539_vm7, %vm540_vm9  ;;  %vm550_vm7 = vweird.f32 %v3684_v0 }
 0x59f   :  { %v903_v3 = vpop.xlane.xlu2 %902  ;;  %v1435_v54 = vmul.f32 0.5, %v1434_v51  ;;  %v2007_v53 = vmul.f32 %v1999_v45, %v3603_v41  ;;  %v3752_v51 = vmul.f32 %v3655_v47, %v507_v63  ;;  %vm3851_vm14 = vmor %vm519_vm10, %vm520_vm8 }
 0x5a0   :  { %v3717_v26 = vmax.f32 %v903_v3, 1e-24  ;;  %v1401_v20 = vpop.xlane.xlu0 %1400  ;;  %v1933_v10 = vsub.f32 1.5, %v1932_v52  ;;  %v1895_v49 = vpop.xlane.xlu1 %1894 }
 0x5a1   :  { %v3722_v18 = vmax.f32 %v1401_v20, 1e-24  ;;  %v3725_v46 = vpop.eup %2336  ;;  %v1436_v1 = vsub.f32 1.5, %v1435_v54  ;;  %v3729_v32 = vmax.f32 %v1895_v49, 1e-24  ;;  %v2015_v29 = vsel %vm440_vm4, %v2007_v53, 0.0 }
 0x5a2   :  { %2338 = vrsqrt.f32 %v3717_v26  ;;  %v1934_v50 = vmul.f32 %v3686_v40, %v1933_v10  ;;  %v945_v56 = vmul.f32 %v3725_v46, %v3690_v35  ;;  %2016 = vadd.xlane.f32.xlu0 %v2015_v29  ;;  %v3769_v54 = vmul.f32 %v3661_v23, %v497_v16 }
 0x5a3   :  { %2340 = vrsqrt.f32 %v3722_v18  ;;  %v1437_v28 = vmul.f32 %v3692_v61, %v1436_v1  ;;  %v546_v20 = vmul.f32 0.5, %v545_v13  ;;  %vm951_vm11 = vweird.f32 %v3725_v46 }
 0x5a4   :  { %2342 = vrsqrt.f32 %v3729_v32  ;;  %v946_v45 = vmul.f32 %v3725_v46, %v945_v56  ;;  %v1938_v52 = vsel %vm1937_vm12, %v3686_v40, %v1934_v50  ;;  %v517_v40 = vsub.f32 1.5, %v516_v57  ;;  %vm3904_vm12 = vmor %vm549_vm6, %vm550_vm7 }
 0x5a5   :  { %v2000_v3 = vmul.f32 %v1938_v52, %v3453_v43  ;;  %v1441_v63 = vsel %vm3756_vm1, %v3692_v61, %v1437_v28  ;;  %v532_v61 = vsel %vm3735_vm13, %v3645_v42, %v3707_v38  ;;  %vm3802_vm13 = vmor %vm499_vm15, %vm500_vm2  ;;  %v547_v59 = vsub.f32 1.5, %v546_v20 }
 0x5a6   :  { %v947_v10 = vmul.f32 0.5, %v946_v45  ;;  %v1503_v43 = vmul.f32 %v1441_v63, %v3450_v11  ;;  %v3792_v11 = vmul.f32 %v3675_v9, %v537_v44  ;;  %vm950_vm15 = vweird.f32 %v3690_v35 }
 0x5a7   :  { %v906_v49 = vpop.xlane.xlu2 %905  ;;  %v2008_v28 = vmul.f32 %v2000_v3, %v3625_v62  ;;  %vm3823_vm2 = vmor %vm950_vm15, %vm951_vm11  ;;  %v3865_v48 = vmul.f32 %v3684_v0, %v547_v59  ;;  %vm960_vm0 = vweird.f32 %v3717_v26  ;;  %vm1458_vm8 = vweird.f32 %v3722_v18 }
 0x5a8   :  { %v3772_v53 = vpop.eup %2338  ;;  %v3774_v1 = vmax.f32 %v906_v49, 1e-24  ;;  %v1404_v55 = vpop.xlane.xlu0 %1403  ;;  %v948_v13 = vsub.f32 1.5, %v947_v10  ;;  %v1511_v49 = vmul.f32 %v1503_v43, %v3625_v62  ;;  %v542_v59 = vsel %vm3835_vm3, %v3675_v9, %v3792_v11 }
 0x5a9   :  { %v3781_v16 = vpop.eup %2340  ;;  %v955_v50 = vmul.f32 %v3772_v53, %v3717_v26  ;;  %v3786_v56 = vmax.f32 %v1404_v55, 1e-24  ;;  %v1898_v57 = vpop.xlane.xlu1 %1897  ;;  %v2018_v27 = vsel %vm440_vm4, %v2008_v28, 0.0  ;;  %v518_v55 = vmul.f32 %v3679_v34, %v517_v40  ;;  %v2379_v26 = vld [vmem:[%s4337_s10 + $0x18] sm:$0xff] }
 0x5aa   :  { %v3789_v2 = vpop.eup %2342  ;;  %v1453_v42 = vmul.f32 %v3781_v16, %v3722_v18  ;;  %2344 = vrsqrt.f32 %v3774_v1  ;;  %v949_v45 = vmul.f32 %v3725_v46, %v948_v13  ;;  %v3821_v3 = vmax.f32 %v1898_v57, 1e-24  ;;  %2019 = vadd.xlane.f32.xlu1 %v2018_v27 }
 0x5ab   :  { %v956_v29 = vmul.f32 %v3772_v53, %v955_v50  ;;  %v1940_v52 = vmul.f32 %v3789_v2, %v3729_v32  ;;  %2346 = vrsqrt.f32 %v3786_v56  ;;  %v502_v13 = vsel %vm3802_vm13, %v3661_v23, %v3769_v54  ;;  %v2376_v23 = vld [vmem:[%s4337_s10 + $0x28] sm:$0xff] }
 0x5ac   :  { %v1454_v12 = vmul.f32 %v3781_v16, %v1453_v42  ;;  %2348 = vrsqrt.f32 %v3821_v3  ;;  %v953_v62 = vsel %vm3823_vm2, %v3725_v46, %v949_v45  ;;  %v1521_v43 = vsel %vm440_vm4, %v1511_v49, 0.0 }
 0x5ad   :  { %v957_v20 = vmul.f32 0.5, %v956_v29  ;;  %v1941_v10 = vmul.f32 %v3789_v2, %v1940_v52  ;;  %v3860_v54 = vmul.f32 %v2376_v23, %v532_v61  ;;  %1522 = vadd.xlane.f32.xlu0 %v1521_v43  ;;  %v1006_v38 = vmul.f32 %v953_v62, %v3462_v14  ;;  %v2377_v61 = vld [vmem:[%s4337_s10 + $0x10] sm:$0xff]  ;;  %v2380_v43 = vld [vmem:[%s4337_s10 + $0x20] sm:$0xff] }
 0x5ae   :  { %v1455_v57 = vmul.f32 0.5, %v1454_v12  ;;  %v3875_v63 = vmul.f32 %v2377_v61, %v502_v13  ;;  %vm961_vm10 = vweird.f32 %v3772_v53  ;;  %v3917_v13 = vmul.f32 %v2378_v30, %v542_v59 }
 0x5af   :  { %v958_v40 = vsub.f32 1.5, %v957_v20  ;;  %v909_v50 = vpop.xlane.xlu2 %908  ;;  %v1942_v45 = vmul.f32 0.5, %v1941_v10  ;;  %v512_v20 = vsel %vm3814_vm5, %v3655_v47, %v3752_v51  ;;  %v522_v10 = vsel %vm3851_vm14, %v3679_v34, %v518_v55  ;;  %vm3919_vm1 = vmor %vm960_vm0, %vm961_vm10 }
 0x5b0   :  { %v3862_v46 = vpop.eup %2344  ;;  %v3867_v28 = vmax.f32 %v909_v50, 1e-24  ;;  %v1407_v42 = vpop.xlane.xlu0 %1406  ;;  %v1456_v34 = vsub.f32 1.5, %v1455_v57  ;;  %v1014_v44 = vmul.f32 %v1006_v38, %v3875_v63  ;;  %v3933_v50 = vmul.f32 %v2380_v43, %v522_v10 }
 0x5b1   :  { %v965_v29 = vmul.f32 %v3862_v46, %v3774_v1  ;;  %v1901_v52 = vpop.xlane.xlu1 %1900  ;;  %v3881_v12 = vpop.eup %2346  ;;  %v3884_v14 = vmax.f32 %v1407_v42, 1e-24  ;;  %v959_v27 = vmul.f32 %v3772_v53, %v958_v40  ;;  %v1943_v55 = vsub.f32 1.5, %v1942_v45 }
 0x5b2   :  { %2350 = vrsqrt.f32 %v3867_v28  ;;  %v1463_v11 = vmul.f32 %v3881_v12, %v3786_v56  ;;  %v3898_v49 = vpop.eup %2348  ;;  %v3909_v51 = vmax.f32 %v1901_v52, 1e-24  ;;  %v1026_v4 = vsel %vm440_vm4, %v1014_v44, 0.0 }
 0x5b3   :  { %v966_v9 = vmul.f32 %v3862_v46, %v965_v29  ;;  %2352 = vrsqrt.f32 %v3884_v14  ;;  %v3928_v40 = vmul.f32 %v2379_v26, %v512_v20  ;;  %v1950_v57 = vmul.f32 %v3898_v49, %v3821_v3  ;;  %1027 = vadd.xlane.f32.xlu1 %v1026_v4 }
 0x5b4   :  { %v1464_v35 = vmul.f32 %v3881_v12, %v1463_v11  ;;  %2354 = vrsqrt.f32 %v3909_v51  ;;  %v963_v38 = vsel %vm3919_vm1, %v3772_v53, %v959_v27  ;;  %v552_v45 = vsel %vm3904_vm12, %v3684_v0, %v3865_v48 }
 0x5b5   :  { %v967_v23 = vmul.f32 0.5, %v966_v9  ;;  %v1457_v52 = vmul.f32 %v3781_v16, %v1456_v34  ;;  %vm1459_vm9 = vweird.f32 %v3781_v16  ;;  %v1944_v20 = vmul.f32 %v3789_v2, %v1943_v55 }
 0x5b6   :  { %vm1946_vm6 = vweird.f32 %v3789_v2  ;;  %v1465_v53 = vmul.f32 0.5, %v1464_v35  ;;  %vm1945_vm11 = vweird.f32 %v3729_v32  ;;  %v1007_v11 = vmul.f32 %v963_v38, %v3473_v39  ;;  %vm3962_vm13 = vmor %vm1458_vm8, %vm1459_vm9 }
 0x5b7   :  { %v912_v42 = vpop.xlane.xlu2 %911  ;;  %v968_v44 = vsub.f32 1.5, %v967_v23  ;;  %vm970_vm5 = vweird.f32 %v3774_v1  ;;  %v1951_v55 = vmul.f32 %v3898_v49, %v1950_v57  ;;  %vm3974_vm15 = vmor %vm1945_vm11, %vm1946_vm6  ;;  %v1461_v4 = vsel %vm3962_vm13, %v3781_v16, %v1457_v52 }
 0x5b8   :  { %v3944_v29 = vpop.eup %2350  ;;  %v3949_v61 = vmax.f32 %v912_v42, 1e-24  ;;  %v1410_v59 = vpop.xlane.xlu0 %1409  ;;  %v1466_v26 = vsub.f32 1.5, %v1465_v53  ;;  %v1948_v57 = vsel %vm3974_vm15, %v3789_v2, %v1944_v20  ;;  %vm971_vm2 = vweird.f32 %v3862_v46 }
 0x5b9   :  { %v975_v10 = vmul.f32 %v3944_v29, %v3867_v28  ;;  %v1904_v27 = vpop.xlane.xlu1 %1903  ;;  %v3955_v9 = vpop.eup %2352  ;;  %v3959_v18 = vmax.f32 %v1410_v59, 1e-24  ;;  %vm1468_vm3 = vweird.f32 %v3786_v56  ;;  %v1015_v42 = vmul.f32 %v1007_v11, %v3928_v40  ;;  %vm4015_vm10 = vmor %vm970_vm5, %vm971_vm2 }
 0x5ba   :  { %2356 = vrsqrt.f32 %v3949_v61  ;;  %v1473_v35 = vmul.f32 %v3955_v9, %v3884_v14  ;;  %v3970_v30 = vpop.eup %2354  ;;  %v3980_v62 = vmax.f32 %v1904_v27, 1e-24  ;;  %v969_v16 = vmul.f32 %v3862_v46, %v968_v44 }
 0x5bb   :  { %v976_v39 = vmul.f32 %v3944_v29, %v975_v10  ;;  %2358 = vrsqrt.f32 %v3959_v18  ;;  %v1960_v23 = vmul.f32 %v3970_v30, %v3909_v51  ;;  %v1952_v38 = vmul.f32 0.5, %v1951_v55 }
 0x5bc   :  { %v1474_v43 = vmul.f32 %v3955_v9, %v1473_v35  ;;  %2360 = vrsqrt.f32 %v3980_v62  ;;  %v1505_v59 = vmul.f32 %v1461_v4, %v3476_v60  ;;  %v1029_v2 = vsel %vm440_vm4, %v1015_v42, 0.0 }
 0x5bd   :  { %v1961_v52 = vmul.f32 %v3970_v30, %v1960_v23  ;;  %v977_v27 = vmul.f32 0.5, %v976_v39  ;;  %v2001_v20 = vmul.f32 %v1948_v57, %v3469_v15  ;;  %v1467_v35 = vmul.f32 %v3881_v12, %v1466_v26  ;;  %1030 = vadd.xlane.f32.xlu2 %v1029_v2 }
 0x5be   :  { %vm1469_vm14 = vweird.f32 %v3881_v12  ;;  %vm1955_vm7 = vweird.f32 %v3821_v3  ;;  %v1475_v11 = vmul.f32 0.5, %v1474_v43  ;;  %vm980_vm0 = vweird.f32 %v3867_v28 }
 0x5bf   :  { %v1392_v53 = vpop.xlane.xlu2 %1391  ;;  %v1962_v55 = vmul.f32 0.5, %v1961_v52  ;;  %v1513_v32 = vmul.f32 %v1505_v59, %v3928_v40  ;;  %v2009_v39 = vmul.f32 %v2001_v20, %v3875_v63  ;;  %v1953_v4 = vsub.f32 1.5, %v1952_v38  ;;  %vm4043_vm6 = vmor %vm1468_vm3, %vm1469_vm14 }
 0x5c0   :  { %v3998_v10 = vpop.eup %2356  ;;  %v4002_v34 = vmax.f32 %v1392_v53, 1e-24  ;;  %vm1478_vm1 = vweird.f32 %v3884_v14  ;;  %v1413_v43 = vpop.xlane.xlu0 %1412  ;;  %v973_v57 = vsel %vm4015_vm10, %v3862_v46, %v969_v16  ;;  %vm1956_vm8 = vweird.f32 %v3898_v49 }
 0x5c1   :  { %v985_v60 = vmul.f32 %v3998_v10, %v3949_v61  ;;  %v4009_v44 = vpop.eup %2358  ;;  %v1907_v23 = vpop.xlane.xlu1 %1906  ;;  %v978_v52 = vsub.f32 1.5, %v977_v27  ;;  %v1527_v38 = vsel %vm440_vm4, %v1513_v32, 0.0  ;;  %v2021_v59 = vsel %vm440_vm4, %v2009_v39, 0.0  ;;  %vm1957_vm2 = vmor %vm1955_vm7, %vm1956_vm8 }
 0x5c2   :  { %2362 = vrsqrt.f32 %v4002_v34  ;;  %v1483_v1 = vmul.f32 %v4009_v44, %v3959_v18  ;;  %v4030_v42 = vpop.eup %2360  ;;  %vm981_vm9 = vweird.f32 %v3944_v29  ;;  %v1476_v53 = vsub.f32 1.5, %v1475_v11  ;;  %1528 = vadd.xlane.f32.xlu0 %v1527_v38  ;;  %2022 = vadd.xlane.f32.xlu1 %v2021_v59 }
 0x5c3   :  { %v986_v26 = vmul.f32 %v3998_v10, %v985_v60  ;;  %v1970_v20 = vmul.f32 %v4030_v42, %v3980_v62  ;;  %v1963_v16 = vsub.f32 1.5, %v1962_v55  ;;  %vm1965_vm11 = vweird.f32 %v3909_v51  ;;  %vm982_vm3 = vmor %vm980_vm0, %vm981_vm9 }
 0x5c4   :  { %v1484_v2 = vmul.f32 %v4009_v44, %v1483_v1  ;;  %v4048_v27 = vmax.f32 %v1413_v43, 1e-24  ;;  %v4050_v11 = vmax.f32 %v1907_v23, 1e-24  ;;  %v1008_v60 = vmul.f32 %v973_v57, %v3494_v33 }
 0x5c5   :  { %v1954_v15 = vmul.f32 %v3898_v49, %v1953_v4  ;;  %v987_v32 = vmul.f32 0.5, %v986_v26  ;;  %v1971_v39 = vmul.f32 %v4030_v42, %v1970_v20  ;;  %v1471_v56 = vsel %vm4043_vm6, %v3881_v12, %v1467_v35 }
 0x5c6   :  { %v979_v55 = vmul.f32 %v3944_v29, %v978_v52  ;;  %vm1479_vm13 = vweird.f32 %v3955_v9  ;;  %2364 = vrsqrt.f32 %v4048_v27  ;;  %v1016_v33 = vmul.f32 %v1008_v60, %v3933_v50 }
 0x5c7   :  { %v1398_v1 = vpop.xlane.xlu2 %1397  ;;  %v1477_v4 = vmul.f32 %v3955_v9, %v1476_v53  ;;  %vm1966_vm5 = vweird.f32 %v3970_v30  ;;  %vm990_vm15 = vweird.f32 %v3949_v61  ;;  %v1485_v26 = vmul.f32 0.5, %v1484_v2  ;;  %vm4087_vm14 = vmor %vm1478_vm1, %vm1479_vm13 }
 0x5c8   :  { %v4058_v38 = vpop.eup %2362  ;;  %v1964_v35 = vmul.f32 %v3970_v30, %v1963_v16  ;;  %2366 = vrsqrt.f32 %v4050_v11  ;;  %v1032_v43 = vsel %vm440_vm4, %v1016_v33, 0.0  ;;  %v1506_v23 = vmul.f32 %v1471_v56, %v3497_v19  ;;  %vm4112_vm1 = vmor %vm1965_vm11, %vm1966_vm5 }
 0x5c9   :  { %v1423_v12 = vmul.f32 %v4058_v38, %v4002_v34  ;;  %v988_v57 = vsub.f32 1.5, %v987_v32  ;;  %v1972_v52 = vmul.f32 0.5, %v1971_v39  ;;  %1033 = vadd.xlane.f32.xlu2 %v1032_v43  ;;  %v1958_v3 = vsel %vm1957_vm2, %v3898_v49, %v1954_v15 }
 0x5ca   :  { %v1514_v19 = vmul.f32 %v1506_v23, %v3933_v50  ;;  %v2002_v28 = vmul.f32 %v1958_v3, %v3487_v36  ;;  %v4093_v2 = vmax.f32 %v1398_v1, 1e-24  ;;  %v983_v20 = vsel %vm982_vm3, %v3944_v29, %v979_v55 }
 0x5cb   :  { %v1424_v59 = vmul.f32 %v4058_v38, %v1423_v12  ;;  %vm991_vm7 = vweird.f32 %v3998_v10  ;;  %v1486_v46 = vsub.f32 1.5, %v1485_v26  ;;  %vm1488_vm10 = vweird.f32 %v3959_v18 }
 0x5cc   :  { %v1009_v49 = vmul.f32 %v983_v20, %v3516_v17  ;;  %v1481_v14 = vsel %vm4087_vm14, %v3955_v9, %v1477_v4  ;;  %v4102_v16 = vpop.eup %2364  ;;  %vm1975_vm0 = vweird.f32 %v3980_v62  ;;  %v1530_v60 = vsel %vm440_vm4, %v1514_v19, 0.0  ;;  %vm992_vm11 = vmor %vm990_vm15, %vm991_vm7 }
 0x5cd   :  { %v1425_v36 = vmul.f32 0.5, %v1424_v59  ;;  %v2010_v29 = vmul.f32 %v2002_v28, %v3928_v40  ;;  %2368 = vrsqrt.f32 %v4093_v2  ;;  %v989_v9 = vmul.f32 %v3998_v10, %v988_v57  ;;  %1531 = vadd.xlane.f32.xlu0 %v1530_v60 }
 0x5ce   :  { %vm1489_vm8 = vweird.f32 %v4009_v44  ;;  %v1493_v15 = vmul.f32 %v4102_v16, %v4048_v27  ;;  %v1017_v40 = vmul.f32 %v1009_v49, %v3860_v54  ;;  %v4121_v39 = vpop.eup %2366  ;;  %v1973_v56 = vsub.f32 1.5, %v1972_v52 }
 0x5cf   :  { %v915_v32 = vpop.xlane.xlu2 %914  ;;  %vm1428_vm9 = vweird.f32 %v4002_v34  ;;  %v2024_v51 = vsel %vm440_vm4, %v2010_v29, 0.0  ;;  %v1507_v1 = vmul.f32 %v1481_v14, %v3519_v7  ;;  %v1968_v55 = vsel %vm4112_vm1, %v3970_v30, %v1964_v35  ;;  %vm4158_vm5 = vmor %vm1488_vm10, %vm1489_vm8 }
 0x5d0   :  { %v1487_v33 = vmul.f32 %v4009_v44, %v1486_v46  ;;  %vm1976_vm6 = vweird.f32 %v4030_v42  ;;  %v1494_v4 = vmul.f32 %v4102_v16, %v1493_v15  ;;  %v1980_v26 = vmul.f32 %v4121_v39, %v4050_v11  ;;  %2025 = vadd.xlane.f32.xlu1 %v2024_v51 }
 0x5d1   :  { %v1426_v7 = vsub.f32 1.5, %v1425_v36  ;;  %v1035_v12 = vsel %vm440_vm4, %v1017_v40, 0.0  ;;  %v1515_v30 = vmul.f32 %v1507_v1, %v3860_v54  ;;  %v2003_v35 = vmul.f32 %v1968_v55, %v3509_v5  ;;  %vm4170_vm2 = vmor %vm1975_vm0, %vm1976_vm6 }
 0x5d2   :  { %v1495_v43 = vmul.f32 0.5, %v1494_v4  ;;  %v1981_v23 = vmul.f32 %v4121_v39, %v1980_v26  ;;  %1036 = vadd.xlane.f32.xlu2 %v1035_v12  ;;  %v4142_v57 = vmax.f32 %v915_v32, 1e-24  ;;  %v993_v52 = vsel %vm992_vm11, %v3998_v10, %v989_v9 }
 0x5d3   :  { %v4145_v59 = vpop.eup %2368  ;;  %v1974_v61 = vmul.f32 %v4030_v42, %v1973_v56  ;;  %v1533_v3 = vsel %vm440_vm4, %v1515_v30, 0.0  ;;  %v2011_v53 = vmul.f32 %v2003_v35, %v3933_v50  ;;  %v1010_v19 = vmul.f32 %v993_v52, %v3539_v21 }
 0x5d4   :  { %vm1429_vm13 = vweird.f32 %v4058_v38  ;;  %v1496_v5 = vsub.f32 1.5, %v1495_v43  ;;  %v1982_v28 = vmul.f32 0.5, %v1981_v23  ;;  %v1443_v20 = vmul.f32 %v4145_v59, %v4093_v2 }
 0x5d5   :  { %v1427_v46 = vmul.f32 %v4058_v38, %v1426_v7  ;;  %vm1499_vm15 = vweird.f32 %v4102_v16  ;;  %v2027_v21 = vsel %vm440_vm4, %v2011_v53, 0.0  ;;  %2370 = vrsqrt.f32 %v4142_v57  ;;  %1534 = vadd.xlane.f32.xlu0 %v1533_v3  ;;  %vm1430_vm7 = vmor %vm1428_vm9, %vm1429_vm13 }
 0x5d6   :  { %v1497_v18 = vmul.f32 %v4102_v16, %v1496_v5  ;;  %v1983_v49 = vsub.f32 1.5, %v1982_v28  ;;  %v1444_v14 = vmul.f32 %v4145_v59, %v1443_v20  ;;  %v1018_v36 = vmul.f32 %v1010_v19, %v3917_v13 }
 0x5d7   :  { %v1910_v60 = vpop.xlane.xlu2 %1909  ;;  %vm1498_vm3 = vweird.f32 %v4048_v27  ;;  %vm1986_vm14 = vweird.f32 %v4121_v39  ;;  %v1491_v62 = vsel %vm4158_vm5, %v4009_v44, %v1487_v33  ;;  %v1978_v29 = vsel %vm4170_vm2, %v4030_v42, %v1974_v61  ;;  %v2381_v33 = vld [vmem:[%s4337_s10 + $0x38] sm:$0xff] }
 0x5d8   :  { %v1445_v17 = vmul.f32 0.5, %v1444_v14  ;;  %vm1449_vm10 = vweird.f32 %v4145_v59  ;;  %2028 = vadd.xlane.f32.xlu1 %v2027_v21  ;;  %v1038_v27 = vsel %vm440_vm4, %v1018_v36, 0.0  ;;  %v1508_v9 = vmul.f32 %v1491_v62, %v3545_v24  ;;  %vm4194_vm0 = vmor %vm1498_vm3, %vm1499_vm15 }
 0x5d9   :  { %v1984_v42 = vmul.f32 %v4121_v39, %v1983_v49  ;;  %v2004_v15 = vmul.f32 %v1978_v29, %v3535_v37  ;;  %v1918_v34 = vmax.f32 %v1910_v60, 1e-24  ;;  %v1431_v40 = vsel %vm1430_vm7, %v4058_v38, %v1427_v46  ;;  %v1022_v46 = vpop.xlane.xlu0 %1021 }
 0x5da   :  { %v1446_v32 = vsub.f32 1.5, %v1445_v17  ;;  %1039 = vadd.xlane.f32.xlu2 %v1038_v27  ;;  %v1516_v56 = vmul.f32 %v1508_v9, %v3917_v13  ;;  %v1502_v51 = vmul.f32 %v1431_v40, %v3557_v31  ;;  %v1501_v24 = vsel %vm4194_vm0, %v4102_v16, %v1497_v18 }
 0x5db   :  { %v2371_v1 = vpop.eup %2370  ;;  %vm1985_vm1 = vweird.f32 %v4050_v11  ;;  %v2012_v55 = vmul.f32 %v2004_v15, %v3860_v54  ;;  %2372 = vrsqrt.f32 %v1918_v34  ;;  %vm1448_vm9 = vweird.f32 %v4093_v2 }
 0x5dc   :  { %vm4210_vm8 = vmor %vm1985_vm1, %vm1986_vm14  ;;  %v1447_v38 = vmul.f32 %v4145_v59, %v1446_v32  ;;  %v995_v31 = vmul.f32 %v2371_v1, %v4142_v57  ;;  %v1536_v16 = vsel %vm440_vm4, %v1516_v56, 0.0  ;;  %v1510_v11 = vmul.f32 %v1502_v51, %v3603_v41  ;;  %v562_v51 = vld [vmem:[%s4338_s11 + $0x8] sm:$0xff] }
 0x5dd   :  { %vm1450_vm6 = vmor %vm1448_vm9, %vm1449_vm10  ;;  %v2030_v54 = vsel %vm440_vm4, %v2012_v55, 0.0  ;;  %v560_v2 = vmul.f32 %v2381_v33, %v552_v45  ;;  %v1509_v4 = vmul.f32 %v1501_v24, %v3569_v8  ;;  %1537 = vadd.xlane.f32.xlu0 %v1536_v16  ;;  %v1988_v7 = vsel %vm4210_vm8, %v4121_v39, %v1984_v42 }
 0x5de   :  { %v996_v26 = vmul.f32 %v2371_v1, %v995_v31  ;;  %v1451_v41 = vsel %vm1450_vm6, %v4145_v59, %v1447_v38  ;;  %v1518_v12 = vsel %vm440_vm4, %v1510_v11, 0.0  ;;  %v2005_v35 = vmul.f32 %v1988_v7, %v3562_v58  ;;  %v4265_v31 = vld [vmem:[%s4338_s11 + $0x10] sm:$0xff] }
 0x5df   :  { %v1517_v30 = vmul.f32 %v1509_v4, %v560_v2  ;;  %v1504_v47 = vmul.f32 %v1451_v41, %v3579_v6  ;;  %vm1001_vm12 = vweird.f32 %v2371_v1  ;;  %vm1000_vm11 = vweird.f32 %v4142_v57  ;;  %v4271_v4 = vld [vmem:[%s4338_s11 + $0x18] sm:$0xff] }
 0x5e0   :  { %v997_v43 = vmul.f32 0.5, %v996_v26  ;;  %2031 = vadd.xlane.f32.xlu1 %v2030_v54  ;;  %v2013_v8 = vmul.f32 %v2005_v35, %v3917_v13  ;;  %vm1002_vm13 = vmor %vm1000_vm11, %vm1001_vm12  ;;  %vm1995_vm15 = vweird.f32 %v1918_v34  ;;  %v1044_v44 = vsub.f32 1.0, %v1022_v46 }
 0x5e1   :  { %v2373_v0 = vpop.eup %2372  ;;  %v1539_v39 = vsel %vm440_vm4, %v1517_v30, 0.0  ;;  %v1512_v23 = vmul.f32 %v1504_v47, %v3875_v63  ;;  %vm2086_vm3 = vcmask 0  }
 0x5e2   :  { %v998_v48 = vsub.f32 1.5, %v997_v43  ;;  %v1990_v45 = vmul.f32 %v2373_v0, %v1918_v34  ;;  %1519 = vadd.xlane.f32.xlu2 %v1518_v12  ;;  %v2033_v58 = vsel %vm440_vm4, %v2013_v8, 0.0  ;;  %vm1996_vm5 = vweird.f32 %v2373_v0 }
 0x5e3   :  { %v1524_v13 = vsel %vm440_vm4, %v1512_v23, 0.0  ;;  %vm1997_vm2 = vmor %vm1995_vm15, %vm1996_vm5  ;;  %v1052_v56 = vmul.f32 %v1044_v44, %v1044_v44 }
 0x5e4   :  { %v999_v52 = vmul.f32 %v2371_v1, %v998_v48  ;;  %v1991_v59 = vmul.f32 %v2373_v0, %v1990_v45 }
 0x5e5   :  { %1540 = vadd.xlane.f32.xlu0 %v1539_v39 }
 0x5e6   :  { %v1992_v6 = vmul.f32 0.5, %v1991_v59  ;;  %v1003_v61 = vsel %vm1002_vm13, %v2371_v1, %v999_v52  ;;  %v561_v1 = vld [vmem:[%s4338_s11] sm:$0xff] }
 0x5e7   :  { %v1011_v3 = vmul.f32 %v1003_v61, %v3597_v25  ;;  %v1025_v25 = vpop.xlane.xlu1 %1024  ;;  %v1060_v11 = vmul.f32 %v1052_v56, %v561_v1 }
 0x5e8   :  { %v1993_v53 = vsub.f32 1.5, %v1992_v6  ;;  %2034 = vadd.xlane.f32.xlu1 %v2033_v58  ;;  %v1045_v27 = vsub.f32 1.0, %v1025_v25 }
 0x5e9   :  { %v1019_v63 = vmul.f32 %v1011_v3, %v560_v2 }
 0x5ea   :  { %v1994_v19 = vmul.f32 %v2373_v0, %v1993_v53  ;;  %1525 = vadd.xlane.f32.xlu2 %v1524_v13  ;;  %v1053_v40 = vmul.f32 %v1045_v27, %v1045_v27 }
 0x5eb   :  { %v1041_v5 = vsel %vm440_vm4, %v1019_v63, 0.0 }
 0x5ec   :  { %v1998_v57 = vsel %vm1997_vm2, %v2373_v0, %v1994_v19  ;;  %v1061_v16 = vmul.f32 %v1053_v40, %v562_v51 }
 0x5ed   :  { %v2006_v28 = vmul.f32 %v1998_v57, %v3619_v22 }
 0x5ef   :  { %v2014_v20 = vmul.f32 %v2006_v28, %v560_v2 }
 0x5f1   :  { %v2036_v10 = vsel %vm440_vm4, %v2014_v20, 0.0  ;;  %vm1068_vm4 = vcmask 7168  }
 0x5f2   :  { %1042 = vadd.xlane.f32.xlu2 %v1041_v5  ;;  %v1070_v47 = vsel %vm1068_vm4, %v1061_v16, 0.0  ;;  %v1069_v48 = vsel %vm1068_vm4, %v1060_v11, 0.0  ;;  %v565_v5 = vld [vmem:[%s4338_s11 + $0x20] sm:$0xff] }
 0x5f3   :  { %v1071_v6 = vadd.f32 %v1070_v47, %v1069_v48 }
 0x5fa   :  { %2037 = vadd.xlane.f32.xlu2 %v2036_v10 }
 0x615   :  { %v2017_v21 = vpop.xlane.xlu0 %2016 }
 0x616   :  { %v2039_v32 = vsub.f32 1.0, %v2017_v21 }
 0x618   :  { %v2047_v54 = vmul.f32 %v2039_v32, %v2039_v32 }
 0x61a   :  { %v2055_v43 = vmul.f32 %v2047_v54, %v561_v1 }
 0x61c   :  { %v4280_v3 = vsel %vm1068_vm4, %v2055_v43, 0.0 }
 0x61d   :  { %v2020_v50 = vpop.xlane.xlu1 %2019 }
 0x61e   :  { %v2040_v37 = vsub.f32 1.0, %v2020_v50 }
 0x620   :  { %v1523_v18 = vpop.xlane.xlu0 %1522  ;;  %v2048_v12 = vmul.f32 %v2040_v37, %v2040_v37 }
 0x621   :  { %v1543_v38 = vsub.f32 1.0, %v1523_v18 }
 0x622   :  { %v2056_v61 = vmul.f32 %v2048_v12, %v562_v51 }
 0x623   :  { %v1551_v30 = vmul.f32 %v1543_v38, %v1543_v38 }
 0x624   :  { %v2064_v18 = vsel %vm1068_vm4, %v2056_v61, 0.0 }
 0x625   :  { %v1559_v13 = vmul.f32 %v1551_v30, %v562_v51 }
 0x626   :  { %v1028_v49 = vpop.xlane.xlu1 %1027 }
 0x627   :  { %v1046_v42 = vsub.f32 1.0, %v1028_v49  ;;  %v1567_v49 = vsel %vm1068_vm4, %v1559_v13, 0.0  ;;  %v2065_v13 = vadd.f32 %v2064_v18, %v4280_v3 }
 0x629   :  { %v1054_v55 = vmul.f32 %v1046_v42, %v1046_v42 }
 0x62b   :  { %v1062_v2 = vmul.f32 %v1054_v55, %v4265_v31 }
 0x62d   :  { %v1072_v23 = vsel %vm1068_vm4, %v1062_v2, 0.0 }
 0x62e   :  { %v1073_v63 = vadd.f32 %v1072_v23, %v1071_v6 }
 0x630   :  { %v1031_v14 = vpop.xlane.xlu2 %1030 }
 0x631   :  { %v1047_v24 = vsub.f32 1.0, %v1031_v14  ;;  %v566_v14 = vld [vmem:[%s4338_s11 + $0x28] sm:$0xff] }
 0x633   :  { %v1055_v33 = vmul.f32 %v1047_v24, %v1047_v24 }
 0x635   :  { %v1529_v36 = vpop.xlane.xlu0 %1528  ;;  %v2023_v60 = vpop.xlane.xlu1 %2022  ;;  %v1063_v45 = vmul.f32 %v1055_v33, %v4271_v4 }
 0x636   :  { %v1545_v26 = vsub.f32 1.0, %v1529_v36  ;;  %v2041_v59 = vsub.f32 1.0, %v2023_v60 }
 0x637   :  { %v1074_v57 = vsel %vm1068_vm4, %v1063_v45, 0.0 }
 0x638   :  { %v1553_v52 = vmul.f32 %v1545_v26, %v1545_v26  ;;  %v2049_v46 = vmul.f32 %v2041_v59, %v2041_v59 }
 0x63a   :  { %v1561_v10 = vmul.f32 %v1553_v52, %v4271_v4  ;;  %v2057_v56 = vmul.f32 %v2049_v46, %v4265_v31  ;;  %v568_v52 = vld [vmem:[%s4338_s11 + $0x38] sm:$0xff] }
 0x63c   :  { %v1034_v62 = vpop.xlane.xlu2 %1033  ;;  %v1571_v32 = vsel %vm1068_vm4, %v1561_v10, 0.0  ;;  %v2066_v12 = vsel %vm1068_vm4, %v2057_v56, 0.0 }
 0x63d   :  { %v1048_v0 = vsub.f32 1.0, %v1034_v62  ;;  %v1075_v62 = vadd.f32 %v1074_v57, %v1073_v63  ;;  %v2067_v10 = vadd.f32 %v2066_v12, %v2065_v13 }
 0x63f   :  { %v1056_v53 = vmul.f32 %v1048_v0, %v1048_v0 }
 0x640   :  { %v4248_v29 = vpop.xlane.xlu0 %1531 }
 0x641   :  { %v1546_v19 = vsub.f32 1.0, %v4248_v29  ;;  %v1064_v29 = vmul.f32 %v1056_v53, %v565_v5 }
 0x643   :  { %v4250_v17 = vpop.xlane.xlu1 %2025  ;;  %v1076_v16 = vsel %vm1068_vm4, %v1064_v29, 0.0 }
 0x644   :  { %v2042_v25 = vsub.f32 1.0, %v4250_v17  ;;  %v1077_v45 = vadd.f32 %v1076_v16, %v1075_v62 }
 0x645   :  { %v1037_v22 = vpop.xlane.xlu2 %1036 }
 0x646   :  { %v1049_v58 = vsub.f32 1.0, %v1037_v22  ;;  %v1554_v22 = vmul.f32 %v1546_v19, %v1546_v19  ;;  %v2050_v51 = vmul.f32 %v2042_v25, %v2042_v25 }
 0x648   :  { %v4252_v9 = vpop.xlane.xlu0 %1534  ;;  %v1057_v21 = vmul.f32 %v1049_v58, %v1049_v58  ;;  %v1562_v54 = vmul.f32 %v1554_v22, %v565_v5  ;;  %v2058_v30 = vmul.f32 %v2050_v51, %v4271_v4 }
 0x649   :  { %v1547_v36 = vsub.f32 1.0, %v4252_v9  ;;  %v567_v9 = vld [vmem:[%s4338_s11 + $0x30] sm:$0xff]  ;;  %s2411_s11 = smov [#allocation2]  }
 0x64a   :  { %v1065_v24 = vmul.f32 %v1057_v21, %v566_v14  ;;  %v2068_v53 = vsel %vm1068_vm4, %v2058_v30, 0.0  ;;  %s2093_s23 = sshll.u32 %s2411_s11, 4  ;;  %s2094_s23 = int_to_ptr.vmem [resolvable:$true] %s2093_s23 }
 0x64b   :  { %v4254_v15 = vpop.xlane.xlu1 %2028  ;;  %v1555_v55 = vmul.f32 %v1547_v36, %v1547_v36  ;;  %v2069_v3 = vadd.f32 %v2068_v53, %v2067_v10 }
 0x64c   :  { %v2043_v27 = vsub.f32 1.0, %v4254_v15 }
 0x64d   :  { %v1040_v34 = vpop.xlane.xlu2 %1039  ;;  %v1563_v0 = vmul.f32 %v1555_v55, %v566_v14 }
 0x64e   :  { %v1050_v28 = vsub.f32 1.0, %v1040_v34  ;;  %v2051_v11 = vmul.f32 %v2043_v27, %v2043_v27 }
 0x64f   :  { %v1575_v57 = vsel %vm1068_vm4, %v1563_v0, 0.0 }
 0x650   :  { %v1538_v7 = vpop.xlane.xlu0 %1537  ;;  %v1058_v17 = vmul.f32 %v1050_v28, %v1050_v28  ;;  %v2059_v23 = vmul.f32 %v2051_v11, %v565_v5 }
 0x651   :  { %v1548_v42 = vsub.f32 1.0, %v1538_v7 }
 0x652   :  { %v1066_v2 = vmul.f32 %v1058_v17, %v567_v9  ;;  %v2070_v21 = vsel %vm1068_vm4, %v2059_v23, 0.0 }
 0x653   :  { %v4274_v8 = vpop.xlane.xlu1 %2031  ;;  %v1556_v26 = vmul.f32 %v1548_v42, %v1548_v42  ;;  %v2071_v27 = vadd.f32 %v2070_v21, %v2069_v3 }
 0x654   :  { %v2044_v15 = vsub.f32 1.0, %v4274_v8  ;;  %v1080_v58 = vsel %vm1068_vm4, %v1066_v2, 0.0 }
 0x655   :  { %v1520_v41 = vpop.xlane.xlu2 %1519  ;;  %v1564_v4 = vmul.f32 %v1556_v26, %v567_v9 }
 0x656   :  { %v1542_v35 = vsub.f32 1.0, %v1520_v41 }
 0x658   :  { %v1550_v39 = vmul.f32 %v1542_v35, %v1542_v35  ;;  %v1541_v44 = vpop.xlane.xlu0 %1540  ;;  %v1078_v35 = vsel %vm1068_vm4, %v1065_v24, 0.0 }
 0x659   :  { %v1549_v37 = vsub.f32 1.0, %v1541_v44  ;;  %v1079_v19 = vadd.f32 %v1078_v35, %v1077_v45 }
 0x65a   :  { %v1558_v20 = vmul.f32 %v1550_v39, %v561_v1  ;;  %v1573_v39 = vsel %vm1068_vm4, %v1562_v54, 0.0 }
 0x65b   :  { %v2035_v1 = vpop.xlane.xlu1 %2034  ;;  %v1557_v8 = vmul.f32 %v1549_v37, %v1549_v37  ;;  %v1081_v46 = vadd.f32 %v1080_v58, %v1079_v19 }
 0x65c   :  { %v1566_v34 = vsel %vm1068_vm4, %v1558_v20, 0.0  ;;  %v2045_v7 = vsub.f32 1.0, %v2035_v1 }
 0x65d   :  { %v1526_v50 = vpop.xlane.xlu2 %1525  ;;  %v1568_v33 = vadd.f32 %v1567_v49, %v1566_v34  ;;  %v1565_v5 = vmul.f32 %v1557_v8, %v568_v52 }
 0x65e   :  { %v1544_v60 = vsub.f32 1.0, %v1526_v50  ;;  %v2053_v6 = vmul.f32 %v2045_v7, %v2045_v7  ;;  %v1577_v50 = vsel %vm1068_vm4, %v1564_v4, 0.0 }
 0x660   :  { %v1552_v40 = vmul.f32 %v1544_v60, %v1544_v60  ;;  %v2061_v49 = vmul.f32 %v2053_v6, %v567_v9 }
 0x662   :  { %v1560_v38 = vmul.f32 %v1552_v40, %v4265_v31  ;;  %v2052_v31 = vmul.f32 %v2044_v15, %v2044_v15  ;;  %v2074_v42 = vsel %vm1068_vm4, %v2061_v49, 0.0 }
 0x664   :  { %v1569_v41 = vsel %vm1068_vm4, %v1560_v38, 0.0  ;;  %v2060_v28 = vmul.f32 %v2052_v31, %v566_v14  ;;  %v1579_v14 = vsel %vm1068_vm4, %v1565_v5, 0.0 }
 0x665   :  { %v1570_v47 = vadd.f32 %v1569_v41, %v1568_v33  ;;  %v1043_v43 = vpop.xlane.xlu2 %1042 }
 0x666   :  { %v1051_v48 = vsub.f32 1.0, %v1043_v43  ;;  %v2072_v29 = vsel %vm1068_vm4, %v2060_v28, 0.0 }
 0x667   :  { %v1572_v59 = vadd.f32 %v1571_v32, %v1570_v47  ;;  %v2073_v40 = vadd.f32 %v2072_v29, %v2071_v27 }
 0x668   :  { %v1059_v61 = vmul.f32 %v1051_v48, %v1051_v48 }
 0x669   :  { %v1574_v63 = vadd.f32 %v1573_v39, %v1572_v59  ;;  %v2075_v24 = vadd.f32 %v2074_v42, %v2073_v40 }
 0x66a   :  { %v1067_v20 = vmul.f32 %v1059_v61, %v568_v52 }
 0x66b   :  { %v1576_v25 = vadd.f32 %v1575_v57, %v1574_v63 }
 0x66c   :  { %v1082_v36 = vsel %vm1068_vm4, %v1067_v20, 0.0 }
 0x66d   :  { %v1578_v18 = vadd.f32 %v1577_v50, %v1576_v25  ;;  %v1083_v60 = vadd.f32 %v1082_v36, %v1081_v46  ;;  %v2038_v62 = vpop.xlane.xlu2 %2037 }
 0x66e   :  { %v2046_v22 = vsub.f32 1.0, %v2038_v62 }
 0x66f   :  { %v1084_v44 = vrot.slane %v1083_v60, 4  ;;  %v1580_v17 = vadd.f32 %v1579_v14, %v1578_v18 }
 0x670   :  { %v2054_v34 = vmul.f32 %v2046_v22, %v2046_v22 }
 0x671   :  { %v1085_v32 = vadd.f32 %v1084_v44, %v1083_v60  ;;  %v1581_v56 = vrot.slane %v1580_v17, 4 }
 0x672   :  { %v2062_v51 = vmul.f32 %v2054_v34, %v568_v52 }
 0x673   :  { %v1086_v9 = vrot.slane %v1085_v32, 2  ;;  %v1582_v1 = vadd.f32 %v1581_v56, %v1580_v17 }
 0x674   :  { %v2076_v55 = vsel %vm1068_vm4, %v2062_v51, 0.0 }
 0x675   :  { %v1087_v15 = vadd.f32 %v1086_v9, %v1085_v32  ;;  %v2077_v37 = vadd.f32 %v2076_v55, %v2075_v24  ;;  %v1583_v38 = vrot.slane %v1582_v1, 2 }
 0x677   :  { %v2078_v16 = vrot.slane %v2077_v37, 4  ;;  %v1584_v54 = vadd.f32 %v1583_v38, %v1582_v1  ;;  %v1088_v33 = vrot.slane %v1087_v15, 1 }
 0x679   :  { %v2079_v11 = vadd.f32 %v2078_v16, %v2077_v37  ;;  %v1585_v2 = vrot.slane %v1584_v54, 1  ;;  %v1089_v12 = vadd.f32 %v1088_v33, %v1087_v15 }
 0x67b   :  { %v2080_v26 = vrot.slane %v2079_v11, 2  ;;  %v1586_v7 = vadd.f32 %v1585_v2, %v1584_v54  ;;  %v1090_v47 = vmul.f32 0.03125, %v1089_v12 }
 0x67d   :  { %v2081_v41 = vadd.f32 %v2080_v26, %v2079_v11  ;;  %v1587_v30 = vmul.f32 0.03125, %v1586_v7 }
 0x67f   :  { %v2082_v35 = vrot.slane %v2081_v41, 1  ;;  %v1588_v0 = vadd.f32 %v1587_v30, %v1090_v47 }
 0x681   :  { %v2083_v43 = vadd.f32 %v2082_v35, %v2081_v41 }
 0x683   :  { %v2084_v31 = vmul.f32 0.03125, %v2083_v43 }
 0x685   :  { %v2085_v8 = vadd.f32 %v2084_v31, %v1588_v0 }
 0x687   :  { %2087 = vst.msk [vmem:[#allocation2] sm:$0x1] %vm2086_vm3, %v2085_v8 }
 0x688   :  { %2098 = dma.vmem_to_hbm [thread:$0]  %s2094_s23, 16, %s2096_s0, [#allocation3]  }
 0x689   :  { %2406 = dma.done.wait [#allocation3], 16  }
 0x68a   :  { %2407 = vsyncadd [#allocation3], 4294967280 }
 0x68b   :  { %2103 = vsyncpa [#allocation3], 1 }

// kernel: gmae_forward.6
= control target key start
LH: loop header
LB: loop body
LE: loop exit
PB: predicated region body
PF: predicated region fallthrough
CT: control target
= control target key end

     0   :  { %s4733_s21 = smov 0   ;;  %s7146_s0 = inlined_call_operand.vmem [shape: f32[64,16], index: 0, kind: input, shape index: {}]   ;;  %s7147_s1 = inlined_call_operand.vmem [shape: bf16[64,64], index: 1, kind: input, shape index: {}]   ;;  %s7148_s2 = inlined_call_operand.vmem [shape: bf16[2,8,64,64], index: 2, kind: input, shape index: {}]   ;;  %s7149_s3 = inlined_call_operand.vmem [shape: f32[2,16,32], index: 3, kind: input, shape index: {}]   ;;  %s7150_s4 = inlined_call_operand.vmem [shape: f32[2,4,8], index: 4, kind: input, shape index: {}]   ;;  %s7151_s5 = inlined_call_operand.vmem [shape: f32[2,4,8], index: 5, kind: input, shape index: {}]   ;;  %s7152_s6 = inlined_call_operand.vmem [shape: f32[2,1,32], index: 6, kind: input, shape index: {}]   ;;  %s7153_s7 = inlined_call_operand.vmem [shape: f32[2,32,32], index: 7, kind: input, shape index: {}]   ;;  %s7154_s8 = inlined_call_operand.vmem [shape: f32[2,4,8], index: 8, kind: input, shape index: {}]   ;;  %s7155_s9 = inlined_call_operand.vmem [shape: f32[2,4,8], index: 9, kind: input, shape index: {}]   ;;  %s7156_s10 = inlined_call_operand.vmem [shape: f32[2,1,32], index: 10, kind: input, shape index: {}]   ;;  %s7157_s11 = inlined_call_operand.vmem [shape: bf16[2,64,64], index: 11, kind: output, shape index: {0}]   ;;  %s7158_s12 = inlined_call_operand.vmem [shape: bf16[2,64,32], index: 12, kind: output, shape index: {1}]  }
   0x1 LB: > { %s4054_s22 = sadd.s32 4294967295, %s4659_s21   ;;  %p4058_p0 = scmp.ge.s32.totalorder %s4659_s21, 1  ;;  %s4659_s21 = sphi %s4733_s21, %s23_s21  }
   0x2   : > { %p437_p1 = scmp.lt.s32.totalorder %s4659_s21, 3 }
   0x4   : > { %p438_p2 = pnand %p4058_p0, %p437_p1 }
   0x6   : > { %441 = sbr.rel (%p438_p2) target bundleno = 4960 (0x1360), region = 64 }
   0xb   : > { %p516_p3 = scmp.lt.s32.totalorder %s4054_s22, 1  ;;  %v572_v0 = vld [vmem:[%s7146_s0] sm:$0xff]  ;;  %v573_v1 = vld [vmem:[%s7146_s0 + $0x8] sm:$0xff]  ;;  %v574_v2 = vld [vmem:[%s7146_s0 + $0x10] sm:$0xff]  ;;  %vm590_vm0 = vcmask 130048   ;;  %s4661_s26 = smov 8  }
   0xc   : > { %v575_v3 = vld [vmem:[%s7146_s0 + $0x18] sm:$0xff]  ;;  %v585_v7 = vpack.c.bf16 %v573_v1, %v572_v0  ;;  %s4662_s27 = smov 16   ;;  %v576_v14 = vld [vmem:[%s7146_s0 + $0x20] sm:$0xff]  ;;  %v577_v15 = vld [vmem:[%s7146_s0 + $0x28] sm:$0xff]  ;;  %vm641_vm1 = vcmask 64512   ;;  %s4663_s19 = smov 112  }
   0xd   : > { %s7320_s22 = smov (!%p516_p3, %s4054_s22), 1  ;;  %v586_v8 = vpack.c.bf16 %v575_v3, %v574_v2  ;;  %v587_v16 = vpack.c.bf16 %v577_v15, %v576_v14  ;;  %v578_v17 = vld [vmem:[%s7146_s0 + $0x30] sm:$0xff]  ;;  %v579_v18 = vld [vmem:[%s7146_s0 + $0x38] sm:$0xff]  ;;  %s4666_s24 = smov 104   ;;  %vm1113_vm2 = vcmask 7168   ;;  %vm7166_vm3 = vcmask 15360  }
   0xe   : > { %s4172_s23 = sshll.u32 %s7320_s22, 4  ;;  %s4760_s17 = sshll.u32 %s7320_s22, 2  ;;  %v588_v19 = vpack.c.bf16 %v579_v18, %v578_v17  ;;  %vm7165_vm4 = vcmask 23552   ;;  %vm1253_vm9 = vcmask 523264  }
   0xf   : > { %s525_s28 = scalar_lea.vmem %s7149_s3, %s4172_s23  ;;  %s533_s20 = scalar_lea.vmem %s7151_s5, %s4760_s17 }
  0x10   : > { %v580_v4 = vld [vmem:[%s525_s28] sm:$0xff]  ;;  %v581_v5 = vld [vmem:[%s525_s28 + $0x8] sm:$0xff]  ;;  %s529_s25 = scalar_lea.vmem %s7150_s4, %s4760_s17  ;;  %s4665_s23 = smov 24  }
  0x11   : > { %v589_v6 = vpack.c.bf16 %v581_v5, %v580_v4  ;;  %v4770_v9 = vld [vmem:[%s533_s20] sm:$0xf]  ;;  %s4664_s20 = smov 120   ;;  %s536_s15 = scalar_lea.vmem %s7152_s6, %s7320_s22 }
  0x12   : > { %v4772_v10 = vld [vmem:[%s529_s25] sm:$0xf]  ;;  %v768_v11 = vperm.slane %v4770_v9, 1  ;;  %v4843_v40 = vperm.slane %v4770_v9, 0  ;;  %s4171_s25 = sshll.u32 %s7320_s22, 8  ;;  %s5825_s16 = sshll.u32 %s7320_s22, 5 }
  0x13   : > { %610 = vmatpush.bf16.msra.mxu0 %v589_v6  ;;  %4354 = vmatpush.bf16.msra.mxu3 %v589_v6  ;;  %v699_v12 = vperm.slane %v4772_v10, 1  ;;  %v837_v13 = vperm.slane %v4772_v10, 2  ;;  %v4799_v21 = vperm.slane %v4772_v10, 0  ;;  %s5225_s30 = scalar_lea.vmem %s7148_s2, %s4171_s25  ;;  %s541_s28 = scalar_lea.vmem %s7153_s7, %s5825_s16 }
  0x14   : > { %770 = vrot.lane.b32.xlu0 %v768_v11, %s4661_s26  ;;  %s549_s14 = scalar_lea.vmem %s7155_s9, %s4760_s17  ;;  %s545_s13 = scalar_lea.vmem %s7154_s8, %s4760_s17 }
  0x15   : > { %701 = vrot.lane.b32.xlu1 %v699_v12, %s4661_s26  ;;  %s7101_s18 = scalar_lea.vmem %s7157_s11, %s5825_s16 }
  0x16   : > { %4073 = vmatmul.msk.bf16.vlgmr.msra.gmra.mxu0 %vm590_vm0, %v585_v7  ;;  %4074 = vmatmul.msk.bf16.vlgmr.msra.gmra.mxu3 %vm590_vm0, %v586_v8 }
  0x1c   : > { %839 = vrot.lane.b32.xlu0 %v837_v13, %s4662_s27 }
  0x26   : > { %4075 = vmatmul.msk.bf16.gmra.mxu3 %vm590_vm0, %v587_v16 }
  0x36   : > { %4076 = vmatmul.msk.bf16.gmra.mxu3 %vm590_vm0, %v588_v19 }
  0x86   : > { %v4796_v20 = vpop.permute.xlu0 %770 }
  0x87   : > { %v4803_v23 = vpop.permute.xlu1 %701 }
  0x8e   : > { %v4801_v22 = vpop.permute.xlu0 %839 }
  0x93   : > { %v4805_v24 = vpop.f32.mrf.mxu0 }
  0x94   : > { %v842_v25 = vmul.f32 %v4801_v22, %v4805_v24  ;;  %v704_v26 = vmul.f32 %v4803_v23, %v4805_v24  ;;  %v633_v27 = vmul.f32 %v4799_v21, %v4805_v24  ;;  %v773_v30 = vmul.f32 %v4796_v20, %v4805_v24 }
  0x95   : > { %v667_v44 = vmul.f32 %v4843_v40, %v4805_v24 }
  0x96   : > { %858 = vrot.lane.b32.xlu1 %v842_v25, %s4663_s19  ;;  %720 = vrot.lane.b32.xlu2 %v704_v26, %s4664_s20  ;;  %v642_v28 = vsel %vm641_vm1, %v633_v27, 0.0 }
  0x97   : > { %643 = vadd.xlane.f32.xlu0 %v642_v28  ;;  %v675_v47 = vsel %vm641_vm1, %v667_v44, 0.0 }
  0x99   : > { %v4816_v29 = vpop.f32.mrf.mxu3 }
  0x9a   : > { %v775_v33 = vmul.f32 %v4796_v20, %v4816_v29  ;;  %v844_v35 = vmul.f32 %v4801_v22, %v4816_v29  ;;  %v635_v39 = vmul.f32 %v4799_v21, %v4816_v29  ;;  %v669_v46 = vmul.f32 %v4843_v40, %v4816_v29 }
  0x9b   : > { %v4833_v36 = vpop.f32.mrf.mxu0  ;;  %v706_v51 = vmul.f32 %v4803_v23, %v4816_v29 }
  0x9c   : > { %v705_v38 = vmul.f32 %v4803_v23, %v4833_v36  ;;  %v648_v41 = vsel %vm641_vm1, %v635_v39, 0.0  ;;  %v681_v48 = vsel %vm641_vm1, %v669_v46, 0.0  ;;  %v4874_v50 = vpack.c.bf16 %v4833_v36, %v4805_v24 }
  0x9d   : > { %v774_v52 = vmul.f32 %v4796_v20, %v4833_v36  ;;  %v634_v53 = vmul.f32 %v4799_v21, %v4833_v36  ;;  %v843_v55 = vmul.f32 %v4801_v22, %v4833_v36  ;;  %v668_v57 = vmul.f32 %v4843_v40, %v4833_v36 }
  0x9e   : > { %789 = vrot.lane.b32.xlu2 %v773_v30, %s4664_s20  ;;  %7199 = vst [vmem:[#allocation4_spill] sm:$0xff] %v4874_v50 }
  0x9f   : > { %v645_v54 = vsel %vm641_vm1, %v634_v53, 0.0  ;;  %v678_v58 = vsel %vm641_vm1, %v668_v57, 0.0 }
  0xa1   : > { %v4821_v31 = vpop.f32.mrf.mxu3 }
  0xa2   : > { %v4868_v49 = vpack.c.bf16 %v4821_v31, %v4816_v29  ;;  %v707_v56 = vmul.f32 %v4803_v23, %v4821_v31  ;;  %v776_v59 = vmul.f32 %v4796_v20, %v4821_v31  ;;  %v845_v60 = vmul.f32 %v4801_v22, %v4821_v31 }
  0xa3   : > { %v670_v0 = vmul.f32 %v4843_v40, %v4821_v31  ;;  %v636_v2 = vmul.f32 %v4799_v21, %v4821_v31 }
  0xa5   : > { %v684_v1 = vsel %vm641_vm1, %v670_v0, 0.0  ;;  %v651_v3 = vsel %vm641_vm1, %v636_v2, 0.0 }
  0xa9   : > { %v4823_v32 = vpop.f32.mrf.mxu3 }
  0xaa   : > { %v708_v61 = vmul.f32 %v4803_v23, %v4823_v32  ;;  %v777_v62 = vmul.f32 %v4796_v20, %v4823_v32  ;;  %v846_v63 = vmul.f32 %v4801_v22, %v4823_v32  ;;  %v637_v4 = vmul.f32 %v4799_v21, %v4823_v32 }
  0xab   : > { %793 = vrot.lane.b32.xlu0 %v775_v33, %s4664_s20  ;;  %v671_v8 = vmul.f32 %v4843_v40, %v4823_v32 }
  0xac   : > { %v654_v5 = vsel %vm641_vm1, %v637_v4, 0.0 }
  0xad   : > { %v687_v11 = vsel %vm641_vm1, %v671_v8, 0.0 }
  0xb1   : > { %v4828_v34 = vpop.f32.mrf.mxu3 }
  0xb2   : > { %v4858_v45 = vpack.c.bf16 %v4828_v34, %v4823_v32  ;;  %v778_v6 = vmul.f32 %v4796_v20, %v4828_v34  ;;  %v709_v7 = vmul.f32 %v4803_v23, %v4828_v34  ;;  %v847_v13 = vmul.f32 %v4801_v22, %v4828_v34 }
  0xb3   : > { %862 = vrot.lane.b32.xlu0 %v844_v35, %s4663_s19  ;;  %v672_v17 = vmul.f32 %v4843_v40, %v4828_v34  ;;  %v638_v26 = vmul.f32 %v4799_v21, %v4828_v34 }
  0xb4   : > { %7198 = vst [vmem:[#allocation3_spill] sm:$0xff] %v4858_v45 }
  0xb5   : > { %v690_v19 = vsel %vm641_vm1, %v672_v17, 0.0  ;;  %v657_v28 = vsel %vm641_vm1, %v638_v26, 0.0 }
  0xb9   : > { %v4835_v37 = vpop.f32.mrf.mxu3 }
  0xba   : > { %v639_v12 = vmul.f32 %v4799_v21, %v4835_v37  ;;  %v779_v46 = vmul.f32 %v4796_v20, %v4835_v37  ;;  %v673_v0 = vmul.f32 %v4843_v40, %v4835_v37 }
  0xbb   : > { %722 = vrot.lane.b32.xlu0 %v705_v38, %s4664_s20  ;;  %v710_v38 = vmul.f32 %v4803_v23, %v4835_v37 }
  0xbc   : > { %v660_v14 = vsel %vm641_vm1, %v639_v12, 0.0  ;;  %v693_v4 = vsel %vm641_vm1, %v673_v0, 0.0 }
  0xc0   : > { %649 = vadd.xlane.f32.xlu1 %v648_v41  ;;  %v848_v41 = vmul.f32 %v4801_v22, %v4835_v37 }
  0xc1   : > { %v4846_v42 = vpop.f32.mrf.mxu3 }
  0xc2   : > { %v4850_v43 = vpack.c.bf16 %v4846_v42, %v4835_v37  ;;  %v711_v15 = vmul.f32 %v4803_v23, %v4846_v42  ;;  %v780_v18 = vmul.f32 %v4796_v20, %v4846_v42  ;;  %v849_v27 = vmul.f32 %v4801_v22, %v4846_v42 }
  0xc3   : > { %v674_v53 = vmul.f32 %v4843_v40, %v4846_v42 }
  0xc4   : > { %7197 = vst [vmem:[#allocation2_spill] sm:$0xff] %v4850_v43  ;;  %1374 = vmatpush.bf16.msra.mxu1 %v4850_v43  ;;  %4355 = vmatpush.bf16.msra.mxu2 %v4850_v43 }
  0xc5   : > { %v696_v22 = vsel %vm641_vm1, %v674_v53, 0.0 }
  0xc7   : > { %676 = vadd.xlane.f32.xlu2 %v675_v47 }
  0xc8   : > { %1375 = vmatpush.bf16.msra.mxu1 %v4858_v45  ;;  %4356 = vmatpush.bf16.msra.mxu2 %v4858_v45 }
  0xc9   : > { %682 = vadd.xlane.f32.xlu1 %v681_v48 }
  0xcc   : > { %1376 = vmatpush.bf16.msra.mxu1 %v4868_v49  ;;  %4357 = vmatpush.bf16.msra.mxu2 %v4868_v49 }
  0xd0   : > { %1377 = vmatpush.bf16.msra.mxu1 %v4874_v50  ;;  %4358 = vmatpush.bf16.msra.mxu2 %v4874_v50 }
  0xdf   : > { %724 = vrot.lane.b32.xlu2 %v706_v51, %s4664_s20 }
  0xe2   : > { %791 = vrot.lane.b32.xlu1 %v774_v52, %s4664_s20 }
  0xe5   : > { %646 = vadd.xlane.f32.xlu0 %v645_v54 }
  0xe7   : > { %860 = vrot.lane.b32.xlu2 %v843_v55, %s4663_s19 }
  0xea   : > { %726 = vrot.lane.b32.xlu1 %v707_v56, %s4664_s20 }
  0xed   : > { %679 = vadd.xlane.f32.xlu0 %v678_v58 }
  0xef   : > { %795 = vrot.lane.b32.xlu2 %v776_v59, %s4664_s20 }
  0xf0   : > { %v721_v16 = vpop.permute.xlu2 %720 }
  0xf1   : > { %v744_v40 = vsel %vm641_vm1, %v721_v16, 0.0 }
  0xf2   : > { %864 = vrot.lane.b32.xlu1 %v845_v60, %s4663_s19 }
  0xf8   : > { %v790_v25 = vpop.permute.xlu2 %789 }
 0x101   : > { %728 = vrot.lane.b32.xlu0 %v708_v61, %s4664_s20 }
 0x108   : > { %v4952_v33 = vpop.permute.xlu1 %858 }
 0x109   : > { %797 = vrot.lane.b32.xlu0 %v777_v62, %s4664_s20 }
 0x10a   : > { %v4969_v48 = vpop.xlane.xlu0 %643 }
 0x111   : > { %866 = vrot.lane.b32.xlu0 %v846_v63, %s4663_s19  ;;  %v640_v63 = vmul.f32 %v4799_v21, %v4846_v42  ;;  %v813_v21 = vsel %vm641_vm1, %v790_v25, 0.0 }
 0x118   : > { %685 = vadd.xlane.f32.xlu2 %v684_v1 }
 0x11c   : > { %652 = vadd.xlane.f32.xlu1 %v651_v3  ;;  %v663_v3 = vsel %vm641_vm1, %v640_v63, 0.0 }
 0x11d   : > { %v794_v52 = vpop.permute.xlu0 %793 }
 0x11e   : > { %v819_v60 = vsel %vm641_vm1, %v794_v52, 0.0 }
 0x120   : > { %655 = vadd.xlane.f32.xlu2 %v654_v5 }
 0x125   : > { %v863_v55 = vpop.permute.xlu0 %862 }
 0x12d   : > { %v723_v59 = vpop.permute.xlu0 %722 }
 0x12e   : > { %v747_v12 = vsel %vm641_vm1, %v723_v59, 0.0 }
 0x133   : > { %v4956_v39 = vpop.xlane.xlu1 %649 }
 0x135   : > { %799 = vrot.lane.b32.xlu1 %v778_v6, %s4664_s20 }
 0x138   : > { %730 = vrot.lane.b32.xlu2 %v709_v7, %s4664_s20 }
 0x13a   : > { %v4950_v30 = vpop.xlane.xlu2 %676 }
 0x13b   : > { %688 = vadd.xlane.f32.xlu0 %v687_v11  ;;  %v888_v11 = vsel %vm641_vm1, %v863_v55, 0.0 }
 0x13c   : > { %v4966_v47 = vpop.xlane.xlu1 %682 }
 0x140   : > { %868 = vrot.lane.b32.xlu2 %v847_v13, %s4663_s19 }
 0x142   : > { %v725_v35 = vpop.permute.xlu2 %724 }
 0x143   : > { %661 = vadd.xlane.f32.xlu0 %v660_v14  ;;  %v750_v56 = vsel %vm641_vm1, %v725_v35, 0.0 }
 0x14a   : > { %v4961_v44 = vpop.permute.xlu2 %860 }
 0x152   : > { %v796_v23 = vpop.permute.xlu2 %795 }
 0x153   : > { %v822_v17 = vsel %vm641_vm1, %v796_v23, 0.0 }
 0x154   : > { %v792_v51 = vpop.permute.xlu1 %791 }
 0x155   : > { %v816_v13 = vsel %vm641_vm1, %v792_v51, 0.0 }
 0x157   : > { %734 = vrot.lane.b32.xlu0 %v711_v15, %s4664_s20 }
 0x158   : > { %v4988_v1 = vpop.xlane.xlu0 %646 }
 0x15c   : > { %v727_v20 = vpop.permute.xlu1 %726 }
 0x15d   : > { %v753_v16 = vsel %vm641_vm1, %v727_v20, 0.0 }
 0x15f   : > { %691 = vadd.xlane.f32.xlu1 %v690_v19  ;;  %803 = vrot.lane.b32.xlu0 %v780_v18, %s4664_s20 }
 0x160   : > { %v4993_v6 = vpop.xlane.xlu0 %679 }
 0x164   : > { %v4979_v58 = vpop.permute.xlu1 %864 }
 0x165   : > { %v891_v59 = vsel %vm641_vm1, %v4979_v58, 0.0 }
 0x167   : > { %872 = vrot.lane.b32.xlu0 %v849_v27, %s4663_s19  ;;  %v882_v27 = vsel %vm641_vm1, %v4952_v33, 0.0 }
 0x169   : > { %658 = vadd.xlane.f32.xlu2 %v657_v28  ;;  %v906_v28 = vperm.slane %v4770_v9, 2 }
 0x173   : > { %v729_v8 = vpop.permute.xlu0 %728 }
 0x174   : > { %v756_v19 = vsel %vm641_vm1, %v729_v8, 0.0 }
 0x178   : > { %732 = vrot.lane.b32.xlu1 %v710_v38, %s4664_s20 }
 0x17b   : > { %v798_v18 = vpop.permute.xlu0 %797 }
 0x17c   : > { %v825_v25 = vsel %vm641_vm1, %v798_v18, 0.0 }
 0x180   : > { %870 = vrot.lane.b32.xlu1 %v848_v41, %s4663_s19 }
 0x181   : > { %801 = vrot.lane.b32.xlu2 %v779_v46, %s4664_s20 }
 0x183   : > { %v867_v26 = vpop.permute.xlu0 %866 }
 0x18b   : > { %v4974_v54 = vpop.xlane.xlu2 %685 }
 0x18f   : > { %v4982_v61 = vpop.xlane.xlu1 %652 }
 0x191   : > { %697 = vadd.xlane.f32.xlu0 %v696_v22 }
 0x193   : > { %v4977_v57 = vpop.xlane.xlu2 %655 }
 0x199   : > { %751 = vadd.xlane.f32.xlu0 %v750_v56  ;;  %v885_v56 = vsel %vm641_vm1, %v4961_v44, 0.0 }
 0x19b   : > { %v731_v62 = vpop.permute.xlu2 %730 }
 0x19c   : > { %v759_v2 = vsel %vm641_vm1, %v731_v62, 0.0  ;;  %v894_v62 = vsel %vm641_vm1, %v867_v26, 0.0 }
 0x1a1   : > { %820 = vadd.xlane.f32.xlu0 %v819_v60 }
 0x1a3   : > { %v869_v14 = vpop.permute.xlu2 %868 }
 0x1a4   : > { %v897_v15 = vsel %vm641_vm1, %v869_v14, 0.0 }
 0x1a7   : > { %v800_v5 = vpop.permute.xlu1 %799 }
 0x1a8   : > { %v828_v7 = vsel %vm641_vm1, %v800_v5, 0.0 }
 0x1a9   : > { %760 = vadd.xlane.f32.xlu0 %v759_v2 }
 0x1aa   : > { %664 = vadd.xlane.f32.xlu1 %v663_v3  ;;  %694 = vadd.xlane.f32.xlu2 %v693_v4 }
 0x1ae   : > { %v5009_v35 = vpop.xlane.xlu0 %688 }
 0x1b1   : > { %829 = vadd.xlane.f32.xlu0 %v828_v7 }
 0x1b2   : > { %814 = vadd.xlane.f32.xlu1 %v813_v21  ;;  %745 = vadd.xlane.f32.xlu2 %v744_v40 }
 0x1b6   : > { %v5014_v41 = vpop.xlane.xlu0 %661 }
 0x1b9   : > { %889 = vadd.xlane.f32.xlu0 %v888_v11 }
 0x1ba   : > { %748 = vadd.xlane.f32.xlu1 %v747_v12  ;;  %817 = vadd.xlane.f32.xlu2 %v816_v13 }
 0x1c1   : > { %898 = vadd.xlane.f32.xlu0 %v897_v15 }
 0x1c2   : > { %823 = vadd.xlane.f32.xlu1 %v822_v17  ;;  %754 = vadd.xlane.f32.xlu2 %v753_v16 }
 0x1c9   : > { %v735_v52 = vpop.permute.xlu0 %734 }
 0x1ca   : > { %757 = vadd.xlane.f32.xlu1 %v756_v19  ;;  %826 = vadd.xlane.f32.xlu2 %v825_v25  ;;  %v765_v22 = vsel %vm641_vm1, %v735_v52, 0.0 }
 0x1d1   : > { %v804_v20 = vpop.permute.xlu0 %803 }
 0x1d2   : > { %883 = vadd.xlane.f32.xlu2 %v882_v27  ;;  %v5016_v46 = vpop.xlane.xlu1 %691  ;;  %v834_v55 = vsel %vm641_vm1, %v804_v20, 0.0 }
 0x1d5   : > { %908 = vrot.lane.b32.xlu0 %v906_v28, %s4662_s27 }
 0x1d9   : > { %v873_v60 = vpop.permute.xlu0 %872 }
 0x1da   : > { %v903_v3 = vsel %vm641_vm1, %v873_v60, 0.0 }
 0x1dc   : > { %v5012_v38 = vpop.xlane.xlu2 %658 }
 0x1e4   : > { %v802_v23 = vpop.permute.xlu2 %801 }
 0x1e5   : > { %v831_v51 = vsel %vm641_vm1, %v802_v23, 0.0 }
 0x1e6   : > { %832 = vadd.xlane.f32.xlu1 %v831_v51 }
 0x1ea   : > { %v733_v53 = vpop.permute.xlu1 %732 }
 0x1eb   : > { %v762_v33 = vsel %vm641_vm1, %v733_v53, 0.0 }
 0x1ec   : > { %763 = vadd.xlane.f32.xlu2 %v762_v33 }
 0x1ee   : > { %766 = vadd.xlane.f32.xlu1 %v765_v22 }
 0x1f2   : > { %v871_v63 = vpop.permute.xlu1 %870 }
 0x1f3   : > { %v900_v0 = vsel %vm641_vm1, %v871_v63, 0.0 }
 0x1f4   : > { %835 = vadd.xlane.f32.xlu2 %v834_v55 }
 0x1f6   : > { %886 = vadd.xlane.f32.xlu1 %v885_v56 }
 0x1fc   : > { %892 = vadd.xlane.f32.xlu2 %v891_v59 }
 0x1fe   : > { %895 = vadd.xlane.f32.xlu1 %v894_v62 }
 0x204   : > { %901 = vadd.xlane.f32.xlu2 %v900_v0  ;;  %v5028_v2 = vpop.xlane.xlu0 %697 }
 0x206   : > { %904 = vadd.xlane.f32.xlu1 %v903_v3 }
 0x20c   : > { %v5031_v4 = vpop.xlane.xlu0 %751 }
 0x214   : > { %v5033_v44 = vpop.xlane.xlu0 %820 }
 0x21c   : > { %v5035_v5 = vpop.xlane.xlu0 %760 }
 0x21d   : > { %v5043_v40 = vpop.xlane.xlu2 %694  ;;  %v5065_v26 = vpop.xlane.xlu1 %664 }
 0x224   : > { %v5037_v58 = vpop.xlane.xlu0 %829 }
 0x225   : > { %v5051_v14 = vpop.xlane.xlu2 %745  ;;  %v5069_v28 = vpop.xlane.xlu1 %814 }
 0x22c   : > { %v5039_v7 = vpop.xlane.xlu0 %889 }
 0x22d   : > { %v5060_v19 = vpop.xlane.xlu2 %817  ;;  %v5073_v51 = vpop.xlane.xlu1 %748 }
 0x234   : > { %v5041_v21 = vpop.xlane.xlu0 %898 }
 0x235   : > { %v5067_v27 = vpop.xlane.xlu2 %754  ;;  %v5077_v53 = vpop.xlane.xlu1 %823 }
 0x23d   : > { %v5071_v23 = vpop.xlane.xlu2 %826  ;;  %v5081_v22 = vpop.xlane.xlu1 %757 }
 0x245   : > { %v5075_v52 = vpop.xlane.xlu2 %883 }
 0x247   : > { %v909_v8 = vpop.permute.xlu0 %908 }
 0x248   : > { %v913_v11 = vmul.f32 %v909_v8, %v4816_v29  ;;  %v912_v12 = vmul.f32 %v909_v8, %v4833_v36  ;;  %v911_v13 = vmul.f32 %v909_v8, %v4805_v24  ;;  %v915_v15 = vmul.f32 %v909_v8, %v4823_v32 }
 0x249   : > { %v916_v17 = vmul.f32 %v909_v8, %v4828_v34  ;;  %v914_v16 = vmul.f32 %v909_v8, %v4821_v31  ;;  %v918_v18 = vmul.f32 %v909_v8, %v4846_v42  ;;  %v917_v25 = vmul.f32 %v909_v8, %v4835_v37 }
 0x24a   : > { %931 = vrot.lane.b32.xlu0 %v913_v11, %s4663_s19  ;;  %929 = vrot.lane.b32.xlu1 %v912_v12, %s4663_s19 }
 0x24b   : > { %927 = vrot.lane.b32.xlu2 %v911_v13, %s4663_s19 }
 0x252   : > { %935 = vrot.lane.b32.xlu0 %v915_v15, %s4663_s19  ;;  %937 = vrot.lane.b32.xlu1 %v916_v17, %s4663_s19 }
 0x253   : > { %933 = vrot.lane.b32.xlu2 %v914_v16, %s4663_s19 }
 0x259   : > { %v5085_v55 = vpop.xlane.xlu1 %832 }
 0x25a   : > { %941 = vrot.lane.b32.xlu0 %v918_v18, %s4663_s19 }
 0x25b   : > { %939 = vrot.lane.b32.xlu2 %v917_v25, %s4663_s19 }
 0x25f   : > { %v5079_v33 = vpop.xlane.xlu2 %763 }
 0x261   : > { %v5089_v59 = vpop.xlane.xlu1 %766 }
 0x267   : > { %v5083_v20 = vpop.xlane.xlu2 %835 }
 0x269   : > { %v5093_v62 = vpop.xlane.xlu1 %886 }
 0x26f   : > { %v5087_v56 = vpop.xlane.xlu2 %892 }
 0x271   : > { %v5096_v3 = vpop.xlane.xlu1 %895 }
 0x277   : > { %v5091_v60 = vpop.xlane.xlu2 %901 }
 0x279   : > { %v5099_v12 = vpop.xlane.xlu1 %904 }
 0x2a5   : > { %v928_v63 = vpop.permute.xlu2 %927 }
 0x2a6   : > { %v951_v0 = vsel %vm641_vm1, %v928_v63, 0.0 }
 0x2a7   : > { %952 = vadd.xlane.f32.xlu1 %v951_v0 }
 0x2ad   : > { %v934_v8 = vpop.permute.xlu2 %933 }
 0x2ae   : > { %v960_v11 = vsel %vm641_vm1, %v934_v8, 0.0 }
 0x2af   : > { %961 = vadd.xlane.f32.xlu1 %v960_v11 }
 0x2b5   : > { %v940_v13 = vpop.permute.xlu2 %939 }
 0x2b6   : > { %v969_v15 = vsel %vm641_vm1, %v940_v13, 0.0 }
 0x2b7   : > { %970 = vadd.xlane.f32.xlu1 %v969_v15  ;;  %v975_v15 = vperm.slane %v4772_v10, 3 }
 0x2bc   : > { %v932_v17 = vpop.permute.xlu0 %931  ;;  %v930_v16 = vpop.permute.xlu1 %929 }
 0x2bd   : > { %v957_v18 = vsel %vm641_vm1, %v932_v17, 0.0  ;;  %v954_v25 = vsel %vm641_vm1, %v930_v16, 0.0 }
 0x2be   : > { %958 = vadd.xlane.f32.xlu0 %v957_v18  ;;  %955 = vadd.xlane.f32.xlu2 %v954_v25 }
 0x2c4   : > { %v936_v63 = vpop.permute.xlu0 %935  ;;  %v938_v0 = vpop.permute.xlu1 %937 }
 0x2c5   : > { %v966_v45 = vsel %vm641_vm1, %v938_v0, 0.0  ;;  %v963_v8 = vsel %vm641_vm1, %v936_v63, 0.0 }
 0x2c6   : > { %967 = vadd.xlane.f32.xlu0 %v966_v45  ;;  %964 = vadd.xlane.f32.xlu2 %v963_v8 }
 0x2cc   : > { %v942_v11 = vpop.permute.xlu0 %941 }
 0x2cd   : > { %v972_v13 = vsel %vm641_vm1, %v942_v11, 0.0 }
 0x2ce   : > { %973 = vadd.xlane.f32.xlu2 %v972_v13 }
 0x2da   : > { %977 = vrot.lane.b32.xlu0 %v975_v15, %s4665_s23 }
 0x331   : > { %v5109_v17 = vpop.xlane.xlu0 %958  ;;  %v5129_v15 = vpop.xlane.xlu2 %955 }
 0x332   : > { %7200 = vst [vmem:[#allocation5_spill] sm:$0xff] %v5109_v17 }
 0x333   : > { %7201 = vst [vmem:[#allocation6_spill] sm:$0xff] %v5129_v15 }
 0x339   : > { %v5111_v16 = vpop.xlane.xlu0 %967 }
 0x34c   : > { %v978_v18 = vpop.permute.xlu0 %977 }
 0x34d   : > { %v982_v25 = vmul.f32 %v978_v18, %v4816_v29  ;;  %v981_v63 = vmul.f32 %v978_v18, %v4833_v36  ;;  %v980_v45 = vmul.f32 %v978_v18, %v4805_v24  ;;  %v983_v10 = vmul.f32 %v978_v18, %v4821_v31 }
 0x34e   : > { %v984_v0 = vmul.f32 %v978_v18, %v4823_v32  ;;  %v985_v8 = vmul.f32 %v978_v18, %v4828_v34  ;;  %v986_v11 = vmul.f32 %v978_v18, %v4835_v37  ;;  %v987_v13 = vmul.f32 %v978_v18, %v4846_v42 }
 0x34f   : > { %1000 = vrot.lane.b32.xlu0 %v982_v25, %s4666_s24  ;;  %998 = vrot.lane.b32.xlu2 %v981_v63, %s4666_s24  ;;  %v5131_v25 = vpop.xlane.xlu2 %964 }
 0x350   : > { %996 = vrot.lane.b32.xlu1 %v980_v45, %s4666_s24  ;;  %v5135_v45 = vpop.xlane.xlu1 %952 }
 0x351   : > { %7203 = vst [vmem:[#allocation8_spill] sm:$0xff] %v5135_v45 }
 0x357   : > { %1002 = vrot.lane.b32.xlu0 %v983_v10, %s4666_s24  ;;  %1004 = vrot.lane.b32.xlu2 %v984_v0, %s4666_s24  ;;  %v5133_v63 = vpop.xlane.xlu2 %973 }
 0x358   : > { %1006 = vrot.lane.b32.xlu1 %v985_v8, %s4666_s24  ;;  %7202 = vst [vmem:[#allocation7_spill] sm:$0xff] %v5133_v63  ;;  %v5138_v8 = vpop.xlane.xlu1 %961 }
 0x359   : > { %7204 = vst [vmem:[#allocation9_spill] sm:$0xff] %v5138_v8 }
 0x35f   : > { %1008 = vrot.lane.b32.xlu0 %v986_v11, %s4666_s24  ;;  %1010 = vrot.lane.b32.xlu2 %v987_v13, %s4666_s24 }
 0x360   : > { %v5140_v17 = vpop.xlane.xlu1 %970 }
 0x361   : > { %7205 = vst [vmem:[#allocation10_spill] sm:$0xff] %v5140_v17 }
 0x3a9   : > { %v999_v10 = vpop.permute.xlu2 %998 }
 0x3aa   : > { %v1023_v0 = vsel %vm641_vm1, %v999_v10, 0.0 }
 0x3ab   : > { %1024 = vadd.xlane.f32.xlu0 %v1023_v0 }
 0x3b1   : > { %v1005_v43 = vpop.permute.xlu2 %1004 }
 0x3b2   : > { %v1032_v10 = vsel %vm641_vm1, %v1005_v43, 0.0 }
 0x3b9   : > { %v1011_v17 = vpop.permute.xlu2 %1010 }
 0x3c1   : > { %v1001_v18 = vpop.permute.xlu0 %1000 }
 0x3c2   : > { %v997_v11 = vpop.permute.xlu1 %996  ;;  %v1026_v13 = vsel %vm641_vm1, %v1001_v18, 0.0 }
 0x3c3   : > { %1027 = vadd.xlane.f32.xlu2 %v1026_v13  ;;  %v1020_v15 = vsel %vm641_vm1, %v997_v11, 0.0  ;;  %v1041_v13 = vsel %vm641_vm1, %v1011_v17, 0.0 }
 0x3c4   : > { %1021 = vadd.xlane.f32.xlu1 %v1020_v15  ;;  %v1044_v15 = vperm.slane %v4770_v9, 3 }
 0x3c9   : > { %v1003_v63 = vpop.permute.xlu0 %1002 }
 0x3ca   : > { %v1007_v50 = vpop.permute.xlu1 %1006  ;;  %v1029_v45 = vsel %vm641_vm1, %v1003_v63, 0.0 }
 0x3cb   : > { %v1035_v0 = vsel %vm641_vm1, %v1007_v50, 0.0  ;;  %1033 = vadd.xlane.f32.xlu2 %v1032_v10 }
 0x3cc   : > { %1030 = vadd.xlane.f32.xlu1 %v1029_v45  ;;  %1036 = vadd.xlane.f32.xlu0 %v1035_v0 }
 0x3d1   : > { %v1009_v8 = vpop.permute.xlu0 %1008 }
 0x3d2   : > { %v1038_v18 = vsel %vm641_vm1, %v1009_v8, 0.0 }
 0x3d3   : > { %1042 = vadd.xlane.f32.xlu2 %v1041_v13 }
 0x3d4   : > { %1039 = vadd.xlane.f32.xlu1 %v1038_v18 }
 0x3e0   : > { %1046 = vrot.lane.b32.xlu0 %v1044_v15, %s4665_s23 }
 0x41e   : > { %v1025_v63 = vpop.xlane.xlu0 %1024 }
 0x436   : > { %v1028_v18 = vpop.xlane.xlu2 %1027 }
 0x43f   : > { %v1037_v11 = vpop.xlane.xlu0 %1036 }
 0x452   : > { %v1047_v43 = vpop.permute.xlu0 %1046 }
 0x453   : > { %v1051_v50 = vmul.f32 %v1047_v43, %v4816_v29  ;;  %v1049_v45 = vmul.f32 %v1047_v43, %v4805_v24  ;;  %v1050_v10 = vmul.f32 %v1047_v43, %v4833_v36  ;;  %v1053_v17 = vmul.f32 %v1047_v43, %v4823_v32  ;;  %v1022_v32 = vpop.xlane.xlu1 %1021 }
 0x454   : > { %v1052_v9 = vmul.f32 %v1047_v43, %v4821_v31  ;;  %v1054_v8 = vmul.f32 %v1047_v43, %v4828_v34  ;;  %v1056_v24 = vmul.f32 %v1047_v43, %v4846_v42  ;;  %v1055_v29 = vmul.f32 %v1047_v43, %v4835_v37 }
 0x455   : > { %1069 = vrot.lane.b32.xlu0 %v1051_v50, %s4666_s24  ;;  %1065 = vrot.lane.b32.xlu1 %v1049_v45, %s4666_s24  ;;  %v1114_v31 = vsel %vm1113_vm2, %v4969_v48, %v5051_v14  ;;  %v1115_v37 = vsel %vm1113_vm2, %v4988_v1, %v5073_v51  ;;  %v1116_v48 = vsel %vm1113_vm2, %v4956_v39, %v5031_v4 }
 0x456   : > { %1067 = vrot.lane.b32.xlu2 %v1050_v10, %s4666_s24  ;;  %v1123_v34 = vsel %vm7166_vm3, %v1114_v31, %v5075_v52  ;;  %v1124_v42 = vsel %vm7166_vm3, %v1115_v37, %v5093_v62  ;;  %v1125_v14 = vsel %vm7166_vm3, %v1116_v48, %v5039_v7  ;;  %v1117_v1 = vsel %vm1113_vm2, %v4982_v61, %v5067_v27  ;;  %v1034_v62 = vpop.xlane.xlu2 %1033 }
 0x457   : > { %v1132_v36 = vsel %vm7165_vm4, %v1123_v34, %v1022_v32  ;;  %v1133_v0 = vsel %vm7165_vm4, %v1124_v42, %v1025_v63  ;;  %v1134_v52 = vsel %vm7165_vm4, %v1125_v14, %v1028_v18  ;;  %v1126_v51 = vsel %vm7166_vm3, %v1117_v1, %v5087_v56  ;;  %v4177_v32 = vld [vmem:[%s7147_s1] sm:$0xff]   ;;  %v4324_v18 = vld [vmem:[%s5225_s30 + $0x10] sm:$0xff]   ;;  %v4320_v1 = vld [vmem:[%s7147_s1 + $0x8] sm:$0xff]  }
 0x458   : > { %v1118_v39 = vsel %vm1113_vm2, %v4977_v57, %v5081_v22  ;;  %v1119_v61 = vsel %vm1113_vm2, %v5012_v38, %v5035_v5  ;;  %v1121_v5 = vsel %vm1113_vm2, %v5065_v26, %v5089_v59  ;;  %v4179_v48 = vunpack.c.h.bf16 %v4177_v32 }
 0x459   : > { %v1127_v4 = vsel %vm7166_vm3, %v1118_v39, %v5096_v3  ;;  %v1128_v27 = vsel %vm7166_vm3, %v1119_v61, %v5041_v21  ;;  %v1120_v3 = vsel %vm1113_vm2, %v5014_v41, %v5079_v33  ;;  %v1130_v21 = vsel %vm7166_vm3, %v1121_v5, %v5099_v12 }
 0x45a   : > { %v1136_v7 = vsel %vm7165_vm4, %v1127_v4, %v1034_v62  ;;  %v1137_v56 = vsel %vm7165_vm4, %v1128_v27, %v1037_v11  ;;  %v1129_v50 = vsel %vm7166_vm3, %v1120_v3, %v5091_v60  ;;  %v4178_v14 = vunpack.c.l.bf16 %v4177_v32 }
 0x45b   : > { %v1031_v13 = vpop.xlane.xlu1 %1030  ;;  %v4203_v39 = vunpack.c.h.bf16 %v4324_v18  ;;  %vm5250_vm5 = vcmp.gt.f32.partialorder %v4179_v48, 0.0  ;;  %v4202_v27 = vunpack.c.l.bf16 %v4324_v18 }
 0x45c   : > { %v1135_v15 = vsel %vm7165_vm4, %v1126_v51, %v1031_v13  ;;  %vm5254_vm6 = vcmp.gt.f32.partialorder %v4178_v14, 0.0 }
 0x45d   : > { %1073 = vrot.lane.b32.xlu0 %v1053_v17, %s4666_s24  ;;  %1071 = vrot.lane.b32.xlu1 %v1052_v9, %s4666_s24 }
 0x45e   : > { %1075 = vrot.lane.b32.xlu2 %v1054_v8, %s4666_s24  ;;  %v1043_v63 = vpop.xlane.xlu2 %1042 }
 0x45f   : > { %v1139_v11 = vsel %vm7165_vm4, %v1130_v21, %v1043_v63 }
 0x463   : > { %v1040_v22 = vpop.xlane.xlu1 %1039 }
 0x464   : > { %v1138_v38 = vsel %vm7165_vm4, %v1129_v50, %v1040_v22 }
 0x465   : > { %1079 = vrot.lane.b32.xlu0 %v1056_v24, %s4666_s24  ;;  %1077 = vrot.lane.b32.xlu1 %v1055_v29, %s4666_s24  ;;  %v4193_v24 = vld [vmem:[%s5225_s30] sm:$0xff]   ;;  %v4323_v29 = vld [vmem:[%s5225_s30 + $0x8] sm:$0xff]  }
 0x466   : > { %v4195_v34 = vunpack.c.h.bf16 %v4193_v24  ;;  %v4194_v37 = vunpack.c.l.bf16 %v4193_v24  ;;  %v4199_v42 = vunpack.c.h.bf16 %v4323_v29 }
 0x487   : > { %1140 = vxpose.xlu0.b32.start [1/8] (short) (narrow) %v1132_v36, 8 }
 0x48f   : > { %1141 = vxpose.xlu0.b32.cont [2/8] (short) (narrow) %v1133_v0, 8  ;;  %v4198_v0 = vunpack.c.l.bf16 %v4323_v29 }
 0x497   : > { %1142 = vxpose.xlu0.b32.cont [3/8] (short) (narrow) %v1134_v52, 8 }
 0x49f   : > { %1143 = vxpose.xlu0.b32.cont [4/8] (short) (narrow) %v1135_v15, 8 }
 0x4a7   : > { %1144 = vxpose.xlu0.b32.cont [5/8] (short) (narrow) %v1136_v7, 8 }
 0x4af   : > { %1145 = vxpose.xlu0.b32.cont [6/8] (short) (narrow) %v1137_v56, 8 }
 0x4b0   : > { %v1068_v43 = vpop.permute.xlu2 %1067 }
 0x4b1   : > { %v1092_v57 = vsel %vm641_vm1, %v1068_v43, 0.0  ;;  %v4182_v43 = vunpack.c.l.bf16 %v4320_v1 }
 0x4b2   : > { %1093 = vadd.xlane.f32.xlu1 %v1092_v57 }
 0x4b3   : > { %vm5279_vm13 = vcmp.gt.f32.partialorder %v4182_v43, 0.0 }
 0x4b7   : > { %1146 = vxpose.xlu0.b32.cont [7/8] (short) (narrow) %v1138_v38, 8 }
 0x4b8   : > { %v1076_v3 = vpop.permute.xlu2 %1075 }
 0x4bf   : > { %1147 = vxpose.xlu0.b32.end [8/8] (short) (narrow) %v1139_v11, 8 }
 0x4c7   : > { %v1070_v45 = vpop.permute.xlu0 %1069  ;;  %v1066_v10 = vpop.permute.xlu1 %1065 }
 0x4c8   : > { %v1089_v41 = vsel %vm641_vm1, %v1066_v10, 0.0  ;;  %v1095_v15 = vsel %vm641_vm1, %v1070_v45, 0.0  ;;  %v1104_v10 = vsel %vm641_vm1, %v1076_v3, 0.0 }
 0x4c9   : > { %1090 = vadd.xlane.f32.xlu2 %v1089_v41 }
 0x4cf   : > { %v1074_v33 = vpop.permute.xlu0 %1073  ;;  %v1072_v60 = vpop.permute.xlu1 %1071 }
 0x4d0   : > { %v1098_v17 = vsel %vm641_vm1, %v1072_v60, 0.0  ;;  %v1101_v9 = vsel %vm641_vm1, %v1074_v33, 0.0  ;;  %v4321_v60 = vld [vmem:[%s7147_s1 + $0x10] sm:$0xff]  }
 0x4d1   : > { %1099 = vadd.xlane.f32.xlu2 %v1098_v17  ;;  %1102 = vadd.xlane.f32.xlu1 %v1101_v9  ;;  %v4325_v17 = vld [vmem:[%s5225_s30 + $0x18] sm:$0xff]  }
 0x4d2   : > { %v4207_v24 = vunpack.c.h.bf16 %v4325_v17 }
 0x4d7   : > { %v1080_v26 = vpop.permute.xlu0 %1079  ;;  %v1078_v59 = vpop.permute.xlu1 %1077 }
 0x4d8   : > { %v1107_v12 = vsel %vm641_vm1, %v1078_v59, 0.0  ;;  %v1110_v8 = vsel %vm641_vm1, %v1080_v26, 0.0 }
 0x4d9   : > { %1108 = vadd.xlane.f32.xlu2 %v1107_v12  ;;  %1111 = vadd.xlane.f32.xlu1 %v1110_v8  ;;  %v4187_v8 = vunpack.c.h.bf16 %v4321_v60 }
 0x52b   : > { %v5232_v31 = vpop.trf.xlu0 }
 0x52c   : > { %v5235_v36 = vperm.slane %v5232_v31, 0 }
 0x52e   : > { %v1190_v52 = vadd.f32 %v5235_v36, %v4993_v6  ;;  %v1189_v13 = vadd.f32 %v5235_v36, %v4950_v30  ;;  %v1192_v51 = vadd.f32 %v5235_v36, %v4974_v54  ;;  %v1191_v62 = vadd.f32 %v5235_v36, %v4966_v47 }
 0x52f   : > { %v4183_v54 = vunpack.c.h.bf16 %v4320_v1  ;;  %v1194_v57 = vadd.f32 %v5235_v36, %v5016_v46  ;;  %v1193_v22 = vadd.f32 %v5235_v36, %v5009_v35  ;;  %v1196_v18 = vadd.f32 %v5235_v36, %v5028_v2 }
 0x530   : > { %1096 = vadd.xlane.f32.xlu0 %v1095_v15  ;;  %v1198_v4 = vadd.f32 %v4195_v34, %v1190_v52  ;;  %v1197_v7 = vadd.f32 %v4194_v37, %v1189_v13  ;;  %v1200_v6 = vadd.f32 %v4199_v42, %v1192_v51  ;;  %v1199_v63 = vadd.f32 %v4198_v0, %v1191_v62  ;;  %v4322_v62 = vld [vmem:[%s7147_s1 + $0x18] sm:$0xff]  }
 0x531   : > { %vm5275_vm12 = vcmp.gt.f32.partialorder %v4183_v54, 0.0  ;;  %v1202_v59 = vadd.f32 %v4203_v39, %v1194_v57  ;;  %v1201_v12 = vadd.f32 %v4202_v27, %v1193_v22  ;;  %v4186_v34 = vunpack.c.l.bf16 %v4321_v60 }
 0x532   : > { %vm1206_vm7 = vcmp.gt.f32.partialorder %v1198_v4, 0.0  ;;  %v1214_v47 = vmul.f32 0.2, %v1198_v4  ;;  %vm1205_vm8 = vcmp.gt.f32.partialorder %v1197_v7, 0.0  ;;  %v1213_v56 = vmul.f32 0.2, %v1197_v7 }
 0x533   : > { %v1216_v5 = vmul.f32 0.2, %v1200_v6  ;;  %v1215_v21 = vmul.f32 0.2, %v1199_v63  ;;  %vm1208_vm10 = vcmp.gt.f32.partialorder %v1200_v6, 0.0  ;;  %vm1207_vm11 = vcmp.gt.f32.partialorder %v1199_v63, 0.0 }
 0x534   : > { %v1222_v50 = vsel %vm1206_vm7, %v1198_v4, %v1214_v47  ;;  %v1221_v38 = vsel %vm1205_vm8, %v1197_v7, %v1213_v56  ;;  %v4206_v37 = vunpack.c.l.bf16 %v4325_v17  ;;  %v1218_v42 = vmul.f32 0.2, %v1202_v59  ;;  %v5347_v17 = vpop.xlane.xlu1 %1093 }
 0x535   : > { %v5264_v11 = vsel %vm5250_vm5, %v1222_v50, -1e+30  ;;  %v5268_v45 = vsel %vm5254_vm6, %v1221_v38, -1e+30  ;;  %v1224_v9 = vsel %vm1208_vm10, %v1200_v6, %v1216_v5  ;;  %v1223_v26 = vsel %vm1207_vm11, %v1199_v63, %v1215_v21  ;;  %v5338_v21 = vld [vmem:[%s5225_s30 + $0x50] sm:$0xff]  }
 0x536   : > { %v1257_v46 = vsel %vm1253_vm9, %v5264_v11, -inf  ;;  %v1254_v35 = vsel %vm1253_vm9, %v5268_v45, -inf  ;;  %v5289_v29 = vsel %vm5275_vm12, %v1224_v9, -1e+30  ;;  %v5293_v32 = vsel %vm5279_vm13, %v1223_v26, -1e+30 }
 0x537   : > { %1258 = vmax.xlane.f32.xlu1 %v1257_v46  ;;  %1255 = vmax.xlane.f32.xlu2 %v1254_v35  ;;  %v1217_v0 = vmul.f32 0.2, %v1201_v12  ;;  %v1195_v48 = vadd.f32 %v5235_v36, %v5043_v40  ;;  %vm1210_vm14 = vcmp.gt.f32.partialorder %v1202_v59, 0.0  ;;  %vm1209_vm15 = vcmp.gt.f32.partialorder %v1201_v12, 0.0 }
 0x538   : > { %1105 = vadd.xlane.f32.xlu0 %v1104_v10  ;;  %v1263_v14 = vsel %vm1253_vm9, %v5289_v29, -inf  ;;  %v1260_v52 = vsel %vm1253_vm9, %v5293_v32, -inf  ;;  %vm5303_vm7 = vcmp.gt.f32.partialorder %v4187_v8, 0.0  ;;  %vm5307_vm8 = vcmp.gt.f32.partialorder %v4186_v34, 0.0 }
 0x539   : > { %v7216_v1 = vmov 0  ;;  %v1226_v2 = vsel %vm1210_vm14, %v1202_v59, %v1218_v42  ;;  %v1225_v40 = vsel %vm1209_vm15, %v1201_v12, %v1217_v0  ;;  %v1204_v36 = vadd.f32 %v4207_v24, %v1196_v18 }
 0x53a   : > { %v7217_v1 = vsel %vm5307_vm8, 4294967295, %v7216_v1  ;;  %v1203_v51 = vadd.f32 %v4206_v37, %v1195_v48  ;;  %v1250_v15 = vsel %vm5303_vm7, %v1226_v2, -1e+30  ;;  %v1249_v39 = vsel %vm5307_vm8, %v1225_v40, -1e+30 }
 0x53b   : > { %7218 = vst [vmem:[#allocation11_spill] sm:$0xff] %v7217_v1  ;;  %v4191_v4 = vunpack.c.h.bf16 %v4322_v62  ;;  %v1220_v7 = vmul.f32 0.2, %v1204_v36  ;;  %v4190_v6 = vunpack.c.l.bf16 %v4322_v62  ;;  %vm1212_vm10 = vcmp.gt.f32.partialorder %v1204_v36, 0.0 }
 0x53c   : > { %v1219_v63 = vmul.f32 0.2, %v1203_v51  ;;  %vm1211_vm11 = vcmp.gt.f32.partialorder %v1203_v51, 0.0  ;;  %v1269_v54 = vsel %vm1253_vm9, %v1250_v15, -inf  ;;  %v1266_v27 = vsel %vm1253_vm9, %v1249_v39, -inf  ;;  %v5345_v60 = vpop.xlane.xlu2 %1090 }
 0x53d   : > { %v1228_v47 = vsel %vm1212_vm10, %v1204_v36, %v1220_v7  ;;  %vm5320_vm14 = vcmp.gt.f32.partialorder %v4191_v4, 0.0  ;;  %v7219_v56 = vmov 0  ;;  %vm5324_vm15 = vcmp.gt.f32.partialorder %v4190_v6, 0.0 }
 0x53e   : > { %v7220_v56 = vsel %vm5320_vm14, 4294967295, %v7219_v56  ;;  %v1227_v43 = vsel %vm1211_vm11, %v1203_v51, %v1219_v63  ;;  %v7222_v57 = vmov 0  ;;  %v1252_v22 = vsel %vm5320_vm14, %v1228_v47, -1e+30 }
 0x53f   : > { %1264 = vmax.xlane.f32.xlu1 %v1263_v14  ;;  %1261 = vmax.xlane.f32.xlu2 %v1260_v52  ;;  %7221 = vst [vmem:[#allocation12_spill] sm:$0xff] %v7220_v56  ;;  %v7223_v57 = vsel %vm5324_vm15, 4294967295, %v7222_v57  ;;  %v1251_v3 = vsel %vm5324_vm15, %v1227_v43, -1e+30  ;;  %v1275_v50 = vsel %vm1253_vm9, %v1252_v22, -inf  ;;  %v5335_v5 = vperm.slane %v5232_v31, 2 }
 0x540   : > { %7224 = vst [vmem:[#allocation13_spill] sm:$0xff] %v7223_v57  ;;  %v1272_v38 = vsel %vm1253_vm9, %v1251_v3, -inf  ;;  %v4234_v46 = vunpack.c.l.bf16 %v5338_v21  ;;  %v5378_v47 = vperm.slane %v5232_v31, 1 }
 0x541   : > { %v1644_v35 = vadd.f32 %v5335_v5, %v5131_v25 }
 0x543   : > { %v5343_v10 = vadd.f32 %v4234_v46, %v1644_v35  ;;  %v1418_v35 = vadd.f32 %v5378_v47, %v5060_v19 }
 0x544   : > { %v5349_v9 = vpop.xlane.xlu1 %1102  ;;  %v5351_v26 = vpop.xlane.xlu2 %1099 }
 0x547   : > { %1270 = vmax.xlane.f32.xlu1 %v1269_v54  ;;  %1267 = vmax.xlane.f32.xlu2 %v1266_v27 }
 0x54c   : > { %v5353_v59 = vpop.xlane.xlu1 %1111  ;;  %v5355_v12 = vpop.xlane.xlu2 %1108 }
 0x54f   : > { %1276 = vmax.xlane.f32.xlu1 %v1275_v50  ;;  %1273 = vmax.xlane.f32.xlu2 %v1272_v38 }
 0x5aa   : > { %v1259_v8 = vpop.xlane.xlu1 %1258  ;;  %v1256_v24 = vpop.xlane.xlu2 %1255 }
 0x5ab   : > { %v1279_v34 = vsub.f32 %v5264_v11, %v1259_v8  ;;  %v1278_v25 = vsub.f32 %v5268_v45, %v1256_v24 }
 0x5ad   : > { %v1288_v37 = vmul.f32 1.442695, %v1279_v34  ;;  %v1286_v42 = vmul.f32 1.442695, %v1278_v25 }
 0x5af   : > { %4397 = vpow2.f32 %v1288_v37  ;;  %v1417_v37 = vadd.f32 %v5378_v47, %v5069_v28  ;;  %v1420_v28 = vadd.f32 %v5378_v47, %v5077_v53 }
 0x5b0   : > { %4399 = vpow2.f32 %v1286_v42 }
 0x5b2   : > { %v1265_v0 = vpop.xlane.xlu1 %1264  ;;  %v1262_v18 = vpop.xlane.xlu2 %1261 }
 0x5b3   : > { %v1281_v48 = vsub.f32 %v5289_v29, %v1265_v0  ;;  %v1280_v14 = vsub.f32 %v5293_v32, %v1262_v18  ;;  %v4327_v18 = vld [vmem:[%s5225_s30 + $0x28] sm:$0xff]  }
 0x5b5   : > { %v5361_v52 = vpop.eup %4397  ;;  %v1292_v2 = vmul.f32 1.442695, %v1281_v48  ;;  %v1290_v40 = vmul.f32 1.442695, %v1280_v14  ;;  %v4215_v14 = vunpack.c.h.bf16 %v4327_v18 }
 0x5b6   : > { %v5363_v36 = vpop.eup %4399  ;;  %v1305_v11 = vsel %vm1253_vm9, %v5361_v52, 0.0 }
 0x5b7   : > { %4401 = vpow2.f32 %v1292_v2  ;;  %1306 = vadd.xlane.f32.xlu1 %v1305_v11  ;;  %v1302_v45 = vsel %vm1253_vm9, %v5363_v36, 0.0  ;;  %v4214_v11 = vunpack.c.l.bf16 %v4327_v18  ;;  %v1424_v18 = vadd.f32 %v5378_v47, %v5083_v20 }
 0x5b8   : > { %4403 = vpow2.f32 %v1290_v40  ;;  %1303 = vadd.xlane.f32.xlu2 %v1302_v45  ;;  %v1419_v45 = vadd.f32 %v5378_v47, %v5033_v44 }
 0x5ba   : > { %v1271_v29 = vpop.xlane.xlu1 %1270  ;;  %v1268_v51 = vpop.xlane.xlu2 %1267 }
 0x5bb   : > { %v1283_v32 = vsub.f32 %v1250_v15, %v1271_v29  ;;  %v1282_v62 = vsub.f32 %v1249_v39, %v1268_v51  ;;  %v4326_v15 = vld [vmem:[%s5225_s30 + $0x20] sm:$0xff]  }
 0x5bc   : > { %v4211_v46 = vunpack.c.h.bf16 %v4326_v15  ;;  %v4210_v25 = vunpack.c.l.bf16 %v4326_v15 }
 0x5bd   : > { %v5369_v4 = vpop.eup %4401  ;;  %v1296_v7 = vmul.f32 1.442695, %v1283_v32  ;;  %v1294_v6 = vmul.f32 1.442695, %v1282_v62  ;;  %v1428_v62 = vadd.f32 %v4215_v14, %v1420_v28  ;;  %v1423_v28 = vadd.f32 %v5378_v47, %v5085_v55 }
 0x5be   : > { %v5371_v63 = vpop.eup %4403  ;;  %v1311_v54 = vsel %vm1253_vm9, %v5369_v4, 0.0  ;;  %v1426_v19 = vadd.f32 %v4211_v46, %v1418_v35  ;;  %v1421_v46 = vadd.f32 %v5378_v47, %v5071_v23 }
 0x5bf   : > { %4405 = vpow2.f32 %v1296_v7  ;;  %1312 = vadd.xlane.f32.xlu1 %v1311_v54  ;;  %v1308_v27 = vsel %vm1253_vm9, %v5371_v63, 0.0  ;;  %v4328_v54 = vld [vmem:[%s5225_s30 + $0x30] sm:$0xff]   ;;  %v1444_v15 = vmul.f32 0.2, %v1428_v62  ;;  %vm1436_vm4 = vcmp.gt.f32.partialorder %v1428_v62, 0.0 }
 0x5c0   : > { %4407 = vpow2.f32 %v1294_v6  ;;  %1309 = vadd.xlane.f32.xlu2 %v1308_v27  ;;  %v1442_v48 = vmul.f32 0.2, %v1426_v19  ;;  %vm1434_vm10 = vcmp.gt.f32.partialorder %v1426_v19, 0.0  ;;  %v1427_v6 = vadd.f32 %v4214_v11, %v1419_v45 }
 0x5c2   : > { %v1277_v39 = vpop.xlane.xlu1 %1276  ;;  %v1274_v43 = vpop.xlane.xlu2 %1273  ;;  %v1450_v53 = vsel %vm1434_vm10, %v1426_v19, %v1442_v48  ;;  %vm1435_vm10 = vcmp.gt.f32.partialorder %v1427_v6, 0.0 }
 0x5c3   : > { %v1285_v50 = vsub.f32 %v1252_v22, %v1277_v39  ;;  %v1284_v38 = vsub.f32 %v1251_v3, %v1274_v43  ;;  %v1425_v3 = vadd.f32 %v4210_v25, %v1417_v37  ;;  %v5409_v27 = vsel %vm5250_vm5, %v1450_v53, -1e+30 }
 0x5c4   : > { %v4219_v39 = vunpack.c.h.bf16 %v4328_v54  ;;  %v1422_v43 = vadd.f32 %v5378_v47, %v5037_v58  ;;  %v1468_v35 = vsel %vm1253_vm9, %v5409_v27, -inf  ;;  %v4329_v58 = vld [vmem:[%s5225_s30 + $0x38] sm:$0xff]  }
 0x5c5   : > { %v5383_v8 = vpop.eup %4405  ;;  %v1300_v24 = vmul.f32 1.442695, %v1285_v50  ;;  %v1298_v34 = vmul.f32 1.442695, %v1284_v38  ;;  %v1441_v40 = vmul.f32 0.2, %v1425_v3  ;;  %v4218_v38 = vunpack.c.l.bf16 %v4328_v54 }
 0x5c6   : > { %v5387_v42 = vpop.eup %4407  ;;  %v1317_v0 = vsel %vm1253_vm9, %v5383_v8, 0.0  ;;  %vm1433_vm11 = vcmp.gt.f32.partialorder %v1425_v3, 0.0  ;;  %v1443_v50 = vmul.f32 0.2, %v1427_v6  ;;  %v1430_v25 = vadd.f32 %v4219_v39, %v1422_v43 }
 0x5c7   : > { %4409 = vpow2.f32 %v1300_v24  ;;  %1318 = vadd.xlane.f32.xlu1 %v1317_v0  ;;  %v1314_v22 = vsel %vm1253_vm9, %v5387_v42, 0.0  ;;  %v1449_v7 = vsel %vm1433_vm11, %v1425_v3, %v1441_v40  ;;  %v1429_v0 = vadd.f32 %v4218_v38, %v1421_v46 }
 0x5c8   : > { %4411 = vpow2.f32 %v1298_v34  ;;  %1315 = vadd.xlane.f32.xlu2 %v1314_v22  ;;  %v5413_v44 = vsel %vm5254_vm6, %v1449_v7, -1e+30  ;;  %v1452_v34 = vsel %vm1436_vm4, %v1428_v62, %v1444_v15  ;;  %v1451_v37 = vsel %vm1435_vm10, %v1427_v6, %v1443_v50 }
 0x5c9   : > { %v1465_v24 = vsel %vm1253_vm9, %v5413_v44, -inf  ;;  %v5426_v22 = vsel %vm5275_vm12, %v1452_v34, -1e+30  ;;  %v5430_v23 = vsel %vm5279_vm13, %v1451_v37, -1e+30  ;;  %v4223_v3 = vunpack.c.h.bf16 %v4329_v58 }
 0x5ca   : > { %v1446_v19 = vmul.f32 0.2, %v1430_v25  ;;  %vm1438_vm11 = vcmp.gt.f32.partialorder %v1430_v25, 0.0  ;;  %v1445_v48 = vmul.f32 0.2, %v1429_v0  ;;  %v4222_v14 = vunpack.c.l.bf16 %v4329_v58 }
 0x5cb   : > { %v1474_v40 = vsel %vm1253_vm9, %v5426_v22, -inf  ;;  %vm1437_vm4 = vcmp.gt.f32.partialorder %v1429_v0, 0.0  ;;  %v1471_v11 = vsel %vm1253_vm9, %v5430_v23, -inf }
 0x5cc   : > { %v1454_v45 = vsel %vm1438_vm11, %v1430_v25, %v1446_v19  ;;  %v1431_v53 = vadd.f32 %v4222_v14, %v1423_v28 }
 0x5cd   : > { %v5396_v2 = vpop.eup %4409  ;;  %v5442_v20 = vsel %vm5303_vm7, %v1454_v45, -1e+30 }
 0x5ce   : > { %v5400_v29 = vpop.eup %4411  ;;  %v1323_v51 = vsel %vm1253_vm9, %v5396_v2, 0.0  ;;  %v1447_v62 = vmul.f32 0.2, %v1431_v53  ;;  %v1480_v7 = vsel %vm1253_vm9, %v5442_v20, -inf  ;;  %vm1439_vm3 = vcmp.gt.f32.partialorder %v1431_v53, 0.0 }
 0x5cf   : > { %1324 = vadd.xlane.f32.xlu1 %v1323_v51  ;;  %v1320_v32 = vsel %vm1253_vm9, %v5400_v29, 0.0  ;;  %v1432_v51 = vadd.f32 %v4223_v3, %v1424_v18 }
 0x5d0   : > { %1321 = vadd.xlane.f32.xlu2 %v1320_v32  ;;  %v1453_v32 = vsel %vm1437_vm4, %v1429_v0, %v1445_v48  ;;  %v1455_v15 = vsel %vm1439_vm3, %v1431_v53, %v1447_v62 }
 0x5d1   : > { %v5446_v55 = vsel %vm5307_vm8, %v1453_v32, -1e+30  ;;  %v1448_v47 = vmul.f32 0.2, %v1432_v51  ;;  %vm1440_vm10 = vcmp.gt.f32.partialorder %v1432_v51, 0.0 }
 0x5d2   : > { %v1477_v6 = vsel %vm1253_vm9, %v5446_v55, -inf  ;;  %v5458_v43 = vsel %vm5324_vm15, %v1455_v15, -1e+30 }
 0x5d3   : > { %v1456_v54 = vsel %vm1440_vm10, %v1432_v51, %v1448_v47  ;;  %v1483_v38 = vsel %vm1253_vm9, %v5458_v43, -inf }
 0x5d4   : > { %v5454_v39 = vsel %vm5320_vm14, %v1456_v54, -1e+30 }
 0x5d5   : > { %v1486_v50 = vsel %vm1253_vm9, %v5454_v39, -inf }
 0x5d7   : > { %1469 = vmax.xlane.f32.xlu1 %v1468_v35 }
 0x5d8   : > { %1466 = vmax.xlane.f32.xlu2 %v1465_v24 }
 0x5df   : > { %1475 = vmax.xlane.f32.xlu1 %v1474_v40 }
 0x5e0   : > { %1472 = vmax.xlane.f32.xlu2 %v1471_v11 }
 0x5e7   : > { %1481 = vmax.xlane.f32.xlu1 %v1480_v7 }
 0x5e8   : > { %1478 = vmax.xlane.f32.xlu2 %v1477_v6 }
 0x5ef   : > { %1487 = vmax.xlane.f32.xlu1 %v1486_v50 }
 0x5f0   : > { %1484 = vmax.xlane.f32.xlu2 %v1483_v38 }
 0x62a   : > { %v1307_v46 = vpop.xlane.xlu1 %1306 }
 0x62b   : > { %v1327_v35 = vmax.f32 %v1307_v46, 1e-12  ;;  %v1304_v24 = vpop.xlane.xlu2 %1303 }
 0x62c   : > { %v1326_v34 = vmax.f32 %v1304_v24, 1e-12 }
 0x62d   : > { %4413 = vrcp.f32 %v1327_v35 }
 0x62e   : > { %4415 = vrcp.f32 %v1326_v34 }
 0x632   : > { %v1313_v25 = vpop.xlane.xlu1 %1312 }
 0x633   : > { %v4414_v37 = vpop.eup %4413  ;;  %v1310_v0 = vpop.xlane.xlu2 %1309  ;;  %v1329_v3 = vmax.f32 %v1313_v25, 1e-12 }
 0x634   : > { %v4416_v58 = vpop.eup %4415  ;;  %v1343_v19 = vmul.f32 %v4414_v37, %v5361_v52  ;;  %v1328_v48 = vmax.f32 %v1310_v0, 1e-12 }
 0x635   : > { %v1342_v18 = vmul.f32 %v4416_v58, %v5363_v36  ;;  %4417 = vrcp.f32 %v1329_v3 }
 0x636   : > { %4419 = vrcp.f32 %v1328_v48 }
 0x637   : > { %v1350_v14 = vpack.c.bf16 %v1343_v19, %v1342_v18 }
 0x639   : > { %4077 = vmatmul.msk.bf16.vlgmr.msra.gmra.mxu1 %vm1253_vm9, %v1350_v14 }
 0x63a   : > { %v1319_v28 = vpop.xlane.xlu1 %1318 }
 0x63b   : > { %v1331_v40 = vmax.f32 %v1319_v28, 1e-12  ;;  %v1316_v11 = vpop.xlane.xlu2 %1315  ;;  %v4418_v51 = vpop.eup %4417 }
 0x63c   : > { %v1330_v45 = vmax.f32 %v1316_v11, 1e-12  ;;  %v4420_v32 = vpop.eup %4419  ;;  %v1345_v36 = vmul.f32 %v4418_v51, %v5369_v4 }
 0x63d   : > { %4421 = vrcp.f32 %v1331_v40  ;;  %v1344_v62 = vmul.f32 %v4420_v32, %v5371_v63 }
 0x63e   : > { %4423 = vrcp.f32 %v1330_v45 }
 0x63f   : > { %v1351_v38 = vpack.c.bf16 %v1345_v36, %v1344_v62 }
 0x642   : > { %v1325_v53 = vpop.xlane.xlu1 %1324 }
 0x643   : > { %v4422_v47 = vpop.eup %4421  ;;  %v1322_v52 = vpop.xlane.xlu2 %1321  ;;  %v1333_v54 = vmax.f32 %v1325_v53, 1e-12 }
 0x644   : > { %v4424_v7 = vpop.eup %4423  ;;  %v1347_v6 = vmul.f32 %v4422_v47, %v5383_v8  ;;  %v1332_v50 = vmax.f32 %v1322_v52, 1e-12  ;;  %v4235_v8 = vunpack.c.h.bf16 %v5338_v21 }
 0x645   : > { %v1346_v15 = vmul.f32 %v4424_v7, %v5387_v42  ;;  %4425 = vrcp.f32 %v1333_v54  ;;  %v1645_v42 = vadd.f32 %v5335_v5, %v5111_v16 }
 0x646   : > { %4427 = vrcp.f32 %v1332_v50 }
 0x647   : > { %v1352_v46 = vpack.c.bf16 %v1347_v6, %v1346_v15  ;;  %v1653_v58 = vadd.f32 %v4235_v8, %v1645_v42  ;;  %v7225_v42 = vld [vmem:[#allocation4_spill] sm:$0xff] }
 0x649   : > { %4078 = vmatmul.msk.bf16.gmra.mxu1 %vm1253_vm9, %v1351_v38  ;;  %4079 = vmatmul.msk.bf16.vlgmr.msra.gmra.mxu2 %vm1253_vm9, %v1352_v46  ;;  %v1669_v16 = vmul.f32 0.2, %v1653_v58  ;;  %vm1661_vm3 = vcmp.gt.f32.partialorder %v1653_v58, 0.0 }
 0x64a   : > { %v1470_v35 = vpop.xlane.xlu1 %1469 }
 0x64b   : > { %v1490_v63 = vsub.f32 %v5409_v27, %v1470_v35  ;;  %v1467_v24 = vpop.xlane.xlu2 %1466  ;;  %v4426_v37 = vpop.eup %4425 }
 0x64c   : > { %v1489_v4 = vsub.f32 %v5413_v44, %v1467_v24  ;;  %v4428_v0 = vpop.eup %4427  ;;  %v1349_v44 = vmul.f32 %v4426_v37, %v5396_v2  ;;  %v1677_v2 = vsel %vm1661_vm3, %v1653_v58, %v1669_v16  ;;  %v7227_v37 = vld [vmem:[#allocation3_spill] sm:$0xff] }
 0x64d   : > { %v1499_v34 = vmul.f32 1.442695, %v1490_v63  ;;  %v1348_v27 = vmul.f32 %v4428_v0, %v5400_v29  ;;  %v5495_v53 = vsel %vm5303_vm7, %v1677_v2, -1e+30  ;;  %v4330_v0 = vld [vmem:[%s5225_s30 + $0x40] sm:$0xff]  }
 0x64e   : > { %v1497_v25 = vmul.f32 1.442695, %v1489_v4  ;;  %v4227_v58 = vunpack.c.h.bf16 %v4330_v0 }
 0x64f   : > { %4429 = vpow2.f32 %v1499_v34 }
 0x650   : > { %4431 = vpow2.f32 %v1497_v25  ;;  %v7226_v25 = vld [vmem:[#allocation2_spill] sm:$0xff] }
 0x652   : > { %v1476_v19 = vpop.xlane.xlu1 %1475 }
 0x653   : > { %v1492_v3 = vsub.f32 %v5426_v22, %v1476_v19  ;;  %v1473_v18 = vpop.xlane.xlu2 %1472  ;;  %v1353_v22 = vpack.c.bf16 %v1349_v44, %v1348_v27  ;;  %v7228_v19 = vld [vmem:[#allocation6_spill] sm:$0xff]  ;;  %v7229_v27 = vld [vmem:[#allocation8_spill] sm:$0xff] }
 0x654   : > { %v1491_v48 = vsub.f32 %v5430_v23, %v1473_v18  ;;  %v4226_v18 = vunpack.c.l.bf16 %v4330_v0  ;;  %v1640_v44 = vadd.f32 %v5335_v5, %v7229_v27  ;;  %v1668_v27 = vmul.f32 0.2, %v5343_v10 }
 0x655   : > { %v5482_v21 = vpop.eup %4429  ;;  %v1503_v14 = vmul.f32 1.442695, %v1492_v3  ;;  %v1641_v3 = vadd.f32 %v5335_v5, %v7228_v19 }
 0x656   : > { %v5484_v28 = vpop.eup %4431  ;;  %v1501_v40 = vmul.f32 1.442695, %v1491_v48  ;;  %v1516_v11 = vsel %vm1253_vm9, %v5482_v21, 0.0  ;;  %v1648_v16 = vadd.f32 %v4226_v18, %v1640_v44 }
 0x657   : > { %4433 = vpow2.f32 %v1503_v14  ;;  %1517 = vadd.xlane.f32.xlu2 %v1516_v11  ;;  %v1513_v29 = vsel %vm1253_vm9, %v5484_v28, 0.0  ;;  %v1649_v48 = vadd.f32 %v4227_v58, %v1641_v3  ;;  %v4331_v14 = vld [vmem:[%s5225_s30 + $0x48] sm:$0xff]  }
 0x658   : > { %4435 = vpow2.f32 %v1501_v40  ;;  %1514 = vadd.xlane.f32.xlu0 %v1513_v29  ;;  %v4231_v11 = vunpack.c.h.bf16 %v4331_v14  ;;  %v7230_v29 = vld [vmem:[#allocation9_spill] sm:$0xff]  ;;  %v1664_v2 = vmul.f32 0.2, %v1648_v16  ;;  %vm1656_vm4 = vcmp.gt.f32.partialorder %v1648_v16, 0.0 }
 0x659   : > { %4080 = vmatmul.msk.bf16.gmra.mxu2 %vm1253_vm9, %v1353_v22  ;;  %v1665_v40 = vmul.f32 0.2, %v1649_v48  ;;  %v1643_v22 = vadd.f32 %v5335_v5, %v7230_v29  ;;  %vm1657_vm11 = vcmp.gt.f32.partialorder %v1649_v48, 0.0 }
 0x65a   : > { %v1482_v23 = vpop.xlane.xlu1 %1481 }
 0x65b   : > { %v1494_v45 = vsub.f32 %v5442_v20, %v1482_v23  ;;  %v1479_v51 = vpop.xlane.xlu2 %1478  ;;  %v1703_v20 = vsel %vm1253_vm9, %v5495_v53, -inf  ;;  %v4230_v23 = vunpack.c.l.bf16 %v4331_v14 }
 0x65c   : > { %v1493_v32 = vsub.f32 %v5446_v55, %v1479_v51 }
 0x65d   : > { %v5497_v47 = vpop.eup %4433  ;;  %v1507_v52 = vmul.f32 1.442695, %v1494_v45  ;;  %v7231_v45 = vld [vmem:[#allocation5_spill] sm:$0xff] }
 0x65e   : > { %v5499_v62 = vpop.eup %4435  ;;  %v1505_v36 = vmul.f32 1.442695, %v1493_v32  ;;  %v1522_v7 = vsel %vm1253_vm9, %v5497_v47, 0.0  ;;  %v1642_v51 = vadd.f32 %v5335_v5, %v7231_v45  ;;  %v1673_v32 = vsel %vm1657_vm11, %v1649_v48, %v1665_v40  ;;  %v7233_v48 = vld [vmem:[#allocation7_spill] sm:$0xff] }
 0x65f   : > { %4437 = vpow2.f32 %v1507_v52  ;;  %1523 = vadd.xlane.f32.xlu2 %v1522_v7  ;;  %v1519_v55 = vsel %vm1253_vm9, %v5499_v62, 0.0  ;;  %v1651_v52 = vadd.f32 %v4231_v11, %v1643_v22  ;;  %v5546_v7 = vsel %vm5250_vm5, %v1673_v32, -1e+30 }
 0x660   : > { %4439 = vpow2.f32 %v1505_v36  ;;  %1704 = vmax.xlane.f32.xlu0 %v1703_v20  ;;  %1520 = vadd.xlane.f32.xlu1 %v1519_v55  ;;  %v4333_v36 = vld [vmem:[%s5225_s30 + $0x58] sm:$0xff]   ;;  %v1672_v20 = vsel %vm1656_vm4, %v1648_v16, %v1664_v2  ;;  %v1650_v55 = vadd.f32 %v4230_v23, %v1642_v51  ;;  %v1647_v14 = vadd.f32 %v5335_v5, %v7233_v48 }
 0x661   : > { %vm1659_vm10 = vcmp.gt.f32.partialorder %v1651_v52, 0.0  ;;  %v4239_v44 = vunpack.c.h.bf16 %v4333_v36  ;;  %vm1660_vm4 = vcmp.gt.f32.partialorder %v5343_v10, 0.0 }
 0x662   : > { %v1488_v6 = vpop.xlane.xlu1 %1487  ;;  %vm1658_vm3 = vcmp.gt.f32.partialorder %v1650_v55, 0.0  ;;  %v1676_v29 = vsel %vm1660_vm4, %v5343_v10, %v1668_v27 }
 0x663   : > { %v1496_v54 = vsub.f32 %v5454_v39, %v1488_v6  ;;  %v1485_v15 = vpop.xlane.xlu2 %1484  ;;  %v1667_v6 = vmul.f32 0.2, %v1651_v52  ;;  %v1655_v22 = vadd.f32 %v4239_v44, %v1647_v14 }
 0x664   : > { %v1495_v50 = vsub.f32 %v5458_v43, %v1485_v15  ;;  %v7232_v15 = vld [vmem:[#allocation10_spill] sm:$0xff] }
 0x665   : > { %v5509_v38 = vpop.eup %4437  ;;  %v1511_v46 = vmul.f32 1.442695, %v1496_v54  ;;  %v4238_v54 = vunpack.c.l.bf16 %v4333_v36  ;;  %v1671_v23 = vmul.f32 0.2, %v1655_v22 }
 0x666   : > { %v5511_v35 = vpop.eup %4439  ;;  %v1509_v63 = vmul.f32 1.442695, %v1495_v50  ;;  %v1528_v24 = vsel %vm1253_vm9, %v5509_v38, 0.0  ;;  %v1646_v50 = vadd.f32 %v5335_v5, %v7232_v15  ;;  %v5583_v5 = vsel %vm5307_vm8, %v1676_v29, -1e+30 }
 0x667   : > { %4441 = vpow2.f32 %v1511_v46  ;;  %1529 = vadd.xlane.f32.xlu2 %v1528_v24  ;;  %v1525_v4 = vsel %vm1253_vm9, %v5511_v35, 0.0  ;;  %v1691_v46 = vsel %vm1253_vm9, %v5546_v7, -inf  ;;  %v1666_v24 = vmul.f32 0.2, %v1650_v55 }
 0x668   : > { %4443 = vpow2.f32 %v1509_v63  ;;  %1526 = vadd.xlane.f32.xlu1 %v1525_v4  ;;  %v5554_v63 = vsel %vm5254_vm6, %v1672_v20, -1e+30  ;;  %v1675_v4 = vsel %vm1659_vm10, %v1651_v52, %v1667_v6  ;;  %vm1663_vm10 = vcmp.gt.f32.partialorder %v1655_v22, 0.0 }
 0x669   : > { %v5560_v0 = vsel %vm5275_vm12, %v1675_v4, -1e+30  ;;  %v1674_v58 = vsel %vm1658_vm3, %v1650_v55, %v1666_v24  ;;  %v1700_v45 = vsel %vm1253_vm9, %v5583_v5, -inf  ;;  %v1679_v32 = vsel %vm1663_vm10, %v1655_v22, %v1671_v23 }
 0x66a   : > { %v1697_v3 = vsel %vm1253_vm9, %v5560_v0, -inf  ;;  %v5566_v18 = vsel %vm5279_vm13, %v1674_v58, -1e+30  ;;  %v5589_v10 = vsel %vm5320_vm14, %v1679_v32, -1e+30 }
 0x66b   : > { %v1694_v40 = vsel %vm1253_vm9, %v5566_v18, -inf  ;;  %v1709_v52 = vsel %vm1253_vm9, %v5589_v10, -inf }
 0x66d   : > { %v5517_v39 = vpop.eup %4441 }
 0x66e   : > { %v5519_v43 = vpop.eup %4443  ;;  %v1534_v34 = vsel %vm1253_vm9, %v5517_v39, 0.0 }
 0x66f   : > { %1535 = vadd.xlane.f32.xlu2 %v1534_v34  ;;  %v1531_v8 = vsel %vm1253_vm9, %v5519_v43, 0.0  ;;  %v1654_v34 = vadd.f32 %v4238_v54, %v1646_v50  ;;  %v5593_v54 = vpop.xlane.xlu0 %1096 }
 0x670   : > { %1532 = vadd.xlane.f32.xlu1 %v1531_v8  ;;  %v1688_v8 = vsel %vm1253_vm9, %v5554_v63, -inf }
 0x671   : > { %v1670_v19 = vmul.f32 0.2, %v1654_v34  ;;  %vm1662_vm11 = vcmp.gt.f32.partialorder %v1654_v34, 0.0 }
 0x673   : > { %v1678_v16 = vsel %vm1662_vm11, %v1654_v34, %v1670_v19 }
 0x674   : > { %v5576_v11 = vsel %vm5324_vm15, %v1678_v16, -1e+30 }
 0x675   : > { %v1706_v2 = vsel %vm1253_vm9, %v5576_v11, -inf }
 0x687   : > { %1571 = vrot.lane.b32.xlu2 %v4868_v49, %s4664_s20 }
 0x689   : > { %1569 = vrot.lane.b32.xlu1 %v7225_v42, %s4664_s20 }
 0x68f   : > { %1575 = vrot.lane.b32.xlu2 %v7226_v25, %s4664_s20 }
 0x691   : > { %1573 = vrot.lane.b32.xlu1 %v7227_v37, %s4664_s20 }
 0x6b8   : > { %1692 = vmax.xlane.f32.xlu2 %v1691_v46  ;;  %v5595_v46 = vpop.xlane.xlu0 %1105 }
 0x6bb   : > { %1689 = vmax.xlane.f32.xlu1 %v1688_v8 }
 0x6c0   : > { %1698 = vmax.xlane.f32.xlu2 %v1697_v3 }
 0x6c3   : > { %1695 = vmax.xlane.f32.xlu1 %v1694_v40 }
 0x6c8   : > { %1707 = vmax.xlane.f32.xlu2 %v1706_v2 }
 0x6ca   : > { %v1518_v51 = vpop.xlane.xlu2 %1517 }
 0x6cb   : > { %1701 = vmax.xlane.f32.xlu1 %v1700_v45  ;;  %v1515_v34 = vpop.xlane.xlu0 %1514  ;;  %v1538_v8 = vmax.f32 %v1518_v51, 1e-12 }
 0x6cc   : > { %v1537_v19 = vmax.f32 %v1515_v34, 1e-12 }
 0x6cd   : > { %4445 = vrcp.f32 %v1538_v8 }
 0x6ce   : > { %4447 = vrcp.f32 %v1537_v19 }
 0x6d2   : > { %v1524_v36 = vpop.xlane.xlu2 %1523 }
 0x6d3   : > { %1710 = vmax.xlane.f32.xlu1 %v1709_v52  ;;  %v1521_v55 = vpop.xlane.xlu1 %1520  ;;  %v4446_v27 = vpop.eup %4445  ;;  %v1540_v16 = vmax.f32 %v1524_v36, 1e-12 }
 0x6d4   : > { %v4448_v44 = vpop.eup %4447  ;;  %v1554_v14 = vmul.f32 %v4446_v27, %v5482_v21  ;;  %v1539_v40 = vmax.f32 %v1521_v55, 1e-12 }
 0x6d5   : > { %v1553_v48 = vmul.f32 %v4448_v44, %v5484_v28  ;;  %4449 = vrcp.f32 %v1540_v16 }
 0x6d6   : > { %4451 = vrcp.f32 %v1539_v40 }
 0x6d7   : > { %v1561_v29 = vpack.c.bf16 %v1554_v14, %v1553_v48 }
 0x6da   : > { %v1530_v20 = vpop.xlane.xlu2 %1529 }
 0x6db   : > { %v1527_v15 = vpop.xlane.xlu1 %1526  ;;  %v4450_v22 = vpop.eup %4449  ;;  %v1542_v51 = vmax.f32 %v1530_v20, 1e-12 }
 0x6dc   : > { %v4452_v2 = vpop.eup %4451  ;;  %v1556_v45 = vmul.f32 %v4450_v22, %v5497_v47  ;;  %v1541_v32 = vmax.f32 %v1527_v15, 1e-12 }
 0x6dd   : > { %v1555_v23 = vmul.f32 %v4452_v2, %v5499_v62  ;;  %4453 = vrcp.f32 %v1542_v51 }
 0x6de   : > { %4455 = vrcp.f32 %v1541_v32 }
 0x6df   : > { %v1562_v52 = vpack.c.bf16 %v1556_v45, %v1555_v23 }
 0x6e2   : > { %v1536_v6 = vpop.xlane.xlu2 %1535 }
 0x6e3   : > { %v1533_v4 = vpop.xlane.xlu1 %1532  ;;  %v4454_v21 = vpop.eup %4453 }
 0x6e4   : > { %v4456_v28 = vpop.eup %4455  ;;  %v1558_v55 = vmul.f32 %v4454_v21, %v5509_v38 }
 0x6e5   : > { %v1557_v36 = vmul.f32 %v4456_v28, %v5511_v35 }
 0x6e7   : > { %v1563_v8 = vpack.c.bf16 %v1558_v55, %v1557_v36 }
 0x6ea   : > { %v1572_v50 = vpop.permute.xlu2 %1571 }
 0x6f2   : > { %v1576_v24 = vpop.permute.xlu2 %1575 }
 0x6f3   : > { %1597 = vmatpush.bf16.msrb.mxu2 %v1576_v24  ;;  %v1543_v24 = vmax.f32 %v1533_v4, 1e-12  ;;  %v1705_v4 = vpop.xlane.xlu0 %1704 }
 0x6f4   : > { %v1717_v48 = vsub.f32 %v5495_v53, %v1705_v4 }
 0x6f6   : > { %v1730_v2 = vmul.f32 1.442695, %v1717_v48 }
 0x6fb   : > { %v1570_v58 = vpop.permute.xlu1 %1569 }
 0x703   : > { %v1574_v3 = vpop.permute.xlu1 %1573 }
 0x704   : > { %1598 = vmatpush.bf16.msrb.mxu2 %v1574_v3 }
 0x708   : > { %1599 = vmatpush.bf16.msrb.mxu2 %v1572_v50  ;;  %v1544_v50 = vmax.f32 %v1536_v6, 1e-12 }
 0x70a   : > { %4457 = vrcp.f32 %v1544_v50 }
 0x70b   : > { %4459 = vrcp.f32 %v1543_v24 }
 0x70c   : > { %1600 = vmatpush.bf16.msrb.mxu2 %v1570_v58 }
 0x70f   : > { %4089 = vmatmul.msk.bf16.vlgmr.msrb.gmra.mxu2 %vm1253_vm9, %v1561_v29 }
 0x710   : > { %v4458_v19 = vpop.eup %4457 }
 0x711   : > { %v4460_v6 = vpop.eup %4459  ;;  %v1560_v40 = vmul.f32 %v4458_v19, %v5517_v39 }
 0x71f   : > { %4090 = vmatmul.msk.bf16.gmra.mxu2 %vm1253_vm9, %v1562_v52 }
 0x72b   : > { %v1693_v34 = vpop.xlane.xlu2 %1692 }
 0x72c   : > { %v1713_v62 = vsub.f32 %v5546_v7, %v1693_v34 }
 0x72e   : > { %v1722_v47 = vmul.f32 1.442695, %v1713_v62  ;;  %v1690_v20 = vpop.xlane.xlu1 %1689 }
 0x72f   : > { %v1712_v15 = vsub.f32 %v5554_v63, %v1690_v20  ;;  %4091 = vmatmul.msk.bf16.gmra.mxu2 %vm1253_vm9, %v1563_v8  ;;  %v4334_v20 = vld [vmem:[%s5225_s30 + $0x60] sm:$0xff]  }
 0x730   : > { %4461 = vpow2.f32 %v1722_v47  ;;  %v1858_v47 = vperm.slane %v5232_v31, 3  ;;  %v4243_v4 = vunpack.c.h.bf16 %v4334_v20 }
 0x731   : > { %v1720_v58 = vmul.f32 1.442695, %v1712_v15  ;;  %v4242_v15 = vunpack.c.l.bf16 %v4334_v20 }
 0x733   : > { %4463 = vpow2.f32 %v1720_v58  ;;  %v1699_v35 = vpop.xlane.xlu2 %1698  ;;  %v1859_v58 = vadd.f32 %v1858_v47, %v5345_v60  ;;  %v1864_v60 = vadd.f32 %v1858_v47, %v5595_v46 }
 0x734   : > { %v1715_v38 = vsub.f32 %v5560_v0, %v1699_v35  ;;  %v1559_v0 = vmul.f32 %v4460_v6, %v5519_v43  ;;  %v4335_v35 = vld [vmem:[%s5225_s30 + $0x68] sm:$0xff]   ;;  %v1861_v6 = vadd.f32 %v1858_v47, %v5593_v54 }
 0x735   : > { %v1867_v19 = vadd.f32 %v4242_v15, %v1859_v58 }
 0x736   : > { %v5609_v3 = vpop.eup %4461  ;;  %v1726_v7 = vmul.f32 1.442695, %v1715_v38  ;;  %v1696_v27 = vpop.xlane.xlu1 %1695  ;;  %v1564_v23 = vpack.c.bf16 %v1560_v40, %v1559_v0  ;;  %v4246_v38 = vunpack.c.l.bf16 %v4335_v35  ;;  %v4337_v40 = vld [vmem:[%s5225_s30 + $0x78] sm:$0xff]  }
 0x737   : > { %v1714_v44 = vsub.f32 %v5566_v18, %v1696_v27  ;;  %v1739_v63 = vsel %vm1253_vm9, %v5609_v3, 0.0  ;;  %v4247_v27 = vunpack.c.h.bf16 %v4335_v35  ;;  %v1883_v48 = vmul.f32 0.2, %v1867_v19 }
 0x738   : > { %1740 = vadd.xlane.f32.xlu2 %v1739_v63  ;;  %4465 = vpow2.f32 %v1726_v7  ;;  %v1860_v7 = vadd.f32 %v1858_v47, %v5347_v17  ;;  %v1869_v63 = vadd.f32 %v4246_v38, %v1861_v6  ;;  %vm1875_vm3 = vcmp.gt.f32.partialorder %v1867_v19, 0.0 }
 0x739   : > { %v5615_v14 = vpop.eup %4463  ;;  %v1724_v16 = vmul.f32 1.442695, %v1714_v44  ;;  %v1862_v44 = vadd.f32 %v1858_v47, %v5351_v26 }
 0x73a   : > { %v1736_v29 = vsel %vm1253_vm9, %v5615_v14, 0.0  ;;  %v1868_v31 = vadd.f32 %v4243_v4, %v1860_v7  ;;  %vm1877_vm11 = vcmp.gt.f32.partialorder %v1869_v63, 0.0 }
 0x73b   : > { %4467 = vpow2.f32 %v1724_v16  ;;  %1737 = vadd.xlane.f32.xlu0 %v1736_v29  ;;  %v1708_v18 = vpop.xlane.xlu2 %1707  ;;  %v4336_v16 = vld [vmem:[%s5225_s30 + $0x70] sm:$0xff]   ;;  %v1870_v0 = vadd.f32 %v4247_v27, %v1862_v44 }
 0x73c   : > { %v1718_v22 = vsub.f32 %v5576_v11, %v1708_v18  ;;  %4469 = vpow2.f32 %v1730_v2  ;;  %v4251_v29 = vunpack.c.h.bf16 %v4336_v16  ;;  %v1891_v18 = vsel %vm1875_vm3, %v1867_v19, %v1883_v48 }
 0x73d   : > { %v4250_v54 = vunpack.c.l.bf16 %v4336_v16  ;;  %v1863_v2 = vadd.f32 %v1858_v47, %v5349_v9  ;;  %v1884_v17 = vmul.f32 0.2, %v1868_v31  ;;  %v5670_v26 = vsel %vm5254_vm6, %v1891_v18, -1e+30 }
 0x73e   : > { %v1732_v53 = vmul.f32 1.442695, %v1718_v22  ;;  %v1702_v45 = vpop.xlane.xlu1 %1701  ;;  %v5622_v51 = vpop.eup %4465  ;;  %v1885_v22 = vmul.f32 0.2, %v1869_v63  ;;  %vm1876_vm4 = vcmp.gt.f32.partialorder %v1868_v31, 0.0  ;;  %vm1878_vm10 = vcmp.gt.f32.partialorder %v1870_v0, 0.0 }
 0x73f   : > { %v1716_v32 = vsub.f32 %v5583_v5, %v1702_v45  ;;  %4092 = vmatmul.msk.bf16.gmra.mxu2 %vm1253_vm9, %v1564_v23  ;;  %v1745_v11 = vsel %vm1253_vm9, %v5622_v51, 0.0  ;;  %v4254_v23 = vunpack.c.l.bf16 %v4337_v40  ;;  %v1872_v45 = vadd.f32 %v4251_v29, %v1864_v60 }
 0x740   : > { %4471 = vpow2.f32 %v1732_v53  ;;  %v1865_v53 = vadd.f32 %v1858_v47, %v5355_v12  ;;  %v1871_v46 = vadd.f32 %v4250_v54, %v1863_v2 }
 0x741   : > { %v5626_v43 = vpop.eup %4467  ;;  %v1728_v39 = vmul.f32 1.442695, %v1716_v32  ;;  %v1893_v32 = vsel %vm1877_vm11, %v1869_v63, %v1885_v22  ;;  %vm1880_vm3 = vcmp.gt.f32.partialorder %v1872_v45, 0.0 }
 0x742   : > { %v1742_v52 = vsel %vm1253_vm9, %v5626_v43, 0.0  ;;  %v5632_v28 = vpop.eup %4469  ;;  %v5677_v9 = vsel %vm5279_vm13, %v1893_v32, -1e+30  ;;  %vm1879_vm11 = vcmp.gt.f32.partialorder %v1871_v46, 0.0 }
 0x743   : > { %4473 = vpow2.f32 %v1728_v39  ;;  %1743 = vadd.xlane.f32.xlu1 %v1742_v52  ;;  %1746 = vadd.xlane.f32.xlu0 %v1745_v11  ;;  %v1751_v24 = vsel %vm1253_vm9, %v5632_v28, 0.0  ;;  %v1886_v39 = vmul.f32 0.2, %v1870_v0  ;;  %v1907_v52 = vsel %vm1253_vm9, %v5670_v26, -inf }
 0x744   : > { %v1892_v11 = vsel %vm1876_vm4, %v1868_v31, %v1884_v17 }
 0x745   : > { %v5681_v12 = vsel %vm5250_vm5, %v1892_v11, -1e+30 }
 0x746   : > { %v1711_v21 = vpop.xlane.xlu1 %1710  ;;  %v5635_v36 = vpop.eup %4471  ;;  %v1910_v15 = vsel %vm1253_vm9, %v5681_v12, -inf }
 0x747   : > { %v1719_v5 = vsub.f32 %v5589_v10, %v1711_v21  ;;  %v1754_v62 = vsel %vm1253_vm9, %v5635_v36, 0.0  ;;  %v1873_v21 = vadd.f32 %v4254_v23, %v1865_v53 }
 0x749   : > { %v5637_v55 = vpop.eup %4473  ;;  %v1734_v50 = vmul.f32 1.442695, %v1719_v5  ;;  %v1894_v5 = vsel %vm1878_vm10, %v1870_v0, %v1886_v39  ;;  %v1889_v35 = vmul.f32 0.2, %v1873_v21  ;;  %vm1881_vm4 = vcmp.gt.f32.partialorder %v1873_v21, 0.0 }
 0x74a   : > { %v1748_v34 = vsel %vm1253_vm9, %v5637_v55, 0.0  ;;  %v5688_v20 = vsel %vm5275_vm12, %v1894_v5, -1e+30 }
 0x74b   : > { %4475 = vpow2.f32 %v1734_v50  ;;  %1752 = vadd.xlane.f32.xlu1 %v1751_v24  ;;  %1749 = vadd.xlane.f32.xlu2 %v1748_v34  ;;  %v1888_v50 = vmul.f32 0.2, %v1872_v45  ;;  %v4255_v24 = vunpack.c.h.bf16 %v4337_v40  ;;  %v1866_v34 = vadd.f32 %v1858_v47, %v5353_v59 }
 0x74c   : > { %1755 = vadd.xlane.f32.xlu0 %v1754_v62  ;;  %v1913_v62 = vsel %vm1253_vm9, %v5677_v9, -inf  ;;  %v1916_v59 = vsel %vm1253_vm9, %v5688_v20, -inf  ;;  %v1897_v6 = vsel %vm1881_vm4, %v1873_v21, %v1889_v35  ;;  %v5721_v21 = vpop.f32.mrf.mxu2  ;;  %vm7256_vm4 = vcmask 15360  }
 0x74d   : > { %v1896_v58 = vsel %vm1880_vm3, %v1872_v45, %v1888_v50  ;;  %v1874_v19 = vadd.f32 %v4255_v24, %v1866_v34  ;;  %v5706_v44 = vsel %vm5324_vm15, %v1897_v6, -1e+30  ;;  %vm7194_vm3 = vcmask 195584  }
 0x74e   : > { %v5696_v38 = vsel %vm5303_vm7, %v1896_v58, -1e+30  ;;  %v1925_v48 = vsel %vm1253_vm9, %v5706_v44, -inf }
 0x74f   : > { %v1922_v7 = vsel %vm1253_vm9, %v5696_v38, -inf  ;;  %v1890_v27 = vmul.f32 0.2, %v1874_v19  ;;  %vm1882_vm10 = vcmp.gt.f32.partialorder %v1874_v19, 0.0 }
 0x751   : > { %v5645_v10 = vpop.eup %4475  ;;  %v1898_v31 = vsel %vm1882_vm10, %v1874_v19, %v1890_v27  ;;  %vm7257_vm10 = vcmask 23552  }
 0x752   : > { %v1757_v8 = vsel %vm1253_vm9, %v5645_v10, 0.0  ;;  %v5714_v16 = vsel %vm5320_vm14, %v1898_v31, -1e+30 }
 0x753   : > { %1758 = vadd.xlane.f32.xlu2 %v1757_v8  ;;  %v1887_v8 = vmul.f32 0.2, %v1871_v46  ;;  %v1928_v0 = vsel %vm1253_vm9, %v5714_v16, -inf }
 0x755   : > { %v1895_v47 = vsel %vm1879_vm11, %v1871_v46, %v1887_v8  ;;  %v5725_v8 = vpop.f32.mrf.mxu2  ;;  %vm7193_vm11 = vcmask 261120  }
 0x756   : > { %v5700_v4 = vsel %vm5307_vm8, %v1895_v47, -1e+30 }
 0x757   : > { %v1919_v63 = vsel %vm1253_vm9, %v5700_v4, -inf }
 0x75d   : > { %v5729_v47 = vpop.f32.mrf.mxu2 }
 0x760   : > { %1790 = vrot.lane.b32.xlu0 %v4868_v49, %s4663_s19 }
 0x764   : > { %1788 = vrot.lane.b32.xlu1 %v7225_v42, %s4663_s19 }
 0x768   : > { %1794 = vrot.lane.b32.xlu0 %v7226_v25, %s4663_s19 }
 0x76b   : > { %1792 = vrot.lane.b32.xlu2 %v7227_v37, %s4663_s19 }
 0x78e   : > { %1908 = vmax.xlane.f32.xlu1 %v1907_v52 }
 0x792   : > { %1914 = vmax.xlane.f32.xlu0 %v1913_v62 }
 0x794   : > { %1911 = vmax.xlane.f32.xlu2 %v1910_v15 }
 0x796   : > { %1917 = vmax.xlane.f32.xlu1 %v1916_v59 }
 0x79a   : > { %1923 = vmax.xlane.f32.xlu0 %v1922_v7 }
 0x79c   : > { %1920 = vmax.xlane.f32.xlu2 %v1919_v63 }
 0x79e   : > { %1926 = vmax.xlane.f32.xlu1 %v1925_v48  ;;  %v5733_v48 = vpop.f32.mrf.mxu2 }
 0x7a4   : > { %1929 = vmax.xlane.f32.xlu2 %v1928_v0 }
 0x7ab   : > { %v1741_v60 = vpop.xlane.xlu2 %1740 }
 0x7ac   : > { %v1761_v53 = vmax.f32 %v1741_v60, 1e-12 }
 0x7ae   : > { %v1738_v40 = vpop.xlane.xlu0 %1737 }
 0x7af   : > { %v1760_v23 = vmax.f32 %v1738_v40, 1e-12 }
 0x7b1   : > { %4477 = vrcp.f32 %v1760_v23 }
 0x7b2   : > { %4479 = vrcp.f32 %v1761_v53 }
 0x7b6   : > { %v1747_v29 = vpop.xlane.xlu0 %1746  ;;  %v1744_v2 = vpop.xlane.xlu1 %1743 }
 0x7b7   : > { %v4478_v46 = vpop.eup %4477  ;;  %v1762_v50 = vmax.f32 %v1744_v2, 1e-12  ;;  %v1763_v34 = vmax.f32 %v1747_v29, 1e-12 }
 0x7b8   : > { %v4480_v52 = vpop.eup %4479  ;;  %v1776_v11 = vmul.f32 %v4478_v46, %v5615_v14 }
 0x7b9   : > { %v1777_v5 = vmul.f32 %v4480_v52, %v5609_v3  ;;  %4481 = vrcp.f32 %v1762_v50 }
 0x7ba   : > { %4483 = vrcp.f32 %v1763_v34 }
 0x7bb   : > { %v1784_v62 = vpack.c.bf16 %v1777_v5, %v1776_v11 }
 0x7be   : > { %v1750_v22 = vpop.xlane.xlu2 %1749  ;;  %v1753_v32 = vpop.xlane.xlu1 %1752 }
 0x7bf   : > { %v5718_v18 = vpop.xlane.xlu0 %1755  ;;  %v4482_v15 = vpop.eup %4481  ;;  %v1765_v19 = vmax.f32 %v1753_v32, 1e-12  ;;  %v1764_v59 = vmax.f32 %v1750_v22, 1e-12 }
 0x7c0   : > { %v4484_v58 = vpop.eup %4483  ;;  %v1778_v35 = vmul.f32 %v4482_v15, %v5626_v43  ;;  %v1766_v23 = vmax.f32 %v5718_v18, 1e-12 }
 0x7c1   : > { %v1779_v14 = vmul.f32 %v4484_v58, %v5622_v51  ;;  %4485 = vrcp.f32 %v1765_v19 }
 0x7c2   : > { %4487 = vrcp.f32 %v1764_v59 }
 0x7c3   : > { %v1785_v3 = vpack.c.bf16 %v1779_v14, %v1778_v35 }
 0x7c6   : > { %v1759_v17 = vpop.xlane.xlu2 %1758 }
 0x7c7   : > { %v4486_v6 = vpop.eup %4485  ;;  %v1767_v29 = vmax.f32 %v1759_v17, 1e-12 }
 0x7c8   : > { %v4488_v7 = vpop.eup %4487  ;;  %v1781_v51 = vmul.f32 %v4486_v6, %v5632_v28  ;;  %v1602_v28 = vpop.f32.mrf.mxu2 }
 0x7c9   : > { %v1780_v43 = vmul.f32 %v4488_v7, %v5637_v55 }
 0x7cb   : > { %v1786_v2 = vpack.c.bf16 %v1781_v51, %v1780_v43 }
 0x7ce   : > { %v1793_v39 = vpop.permute.xlu2 %1792 }
 0x7d0   : > { %v1604_v35 = vpop.f32.mrf.mxu2 }
 0x7d2   : > { %v1791_v54 = vpop.permute.xlu0 %1790 }
 0x7d6   : > { %v1789_v24 = vpop.permute.xlu1 %1788 }
 0x7da   : > { %v1795_v45 = vpop.permute.xlu0 %1794 }
 0x7db   : > { %1816 = vmatpush.bf16.msrb.mxu3 %v1795_v45 }
 0x7df   : > { %1817 = vmatpush.bf16.msrb.mxu3 %v1793_v39 }
 0x7e3   : > { %1818 = vmatpush.bf16.msrb.mxu3 %v1791_v54 }
 0x7e7   : > { %1819 = vmatpush.bf16.msrb.mxu3 %v1789_v24 }
 0x7ea   : > { %4101 = vmatmul.msk.bf16.vlgmr.msrb.gmra.mxu3 %vm1253_vm9, %v1784_v62 }
 0x7fa   : > { %4102 = vmatmul.msk.bf16.gmra.mxu3 %vm1253_vm9, %v1785_v3 }
 0x801   : > { %v1909_v27 = vpop.xlane.xlu1 %1908 }
 0x802   : > { %v1931_v63 = vsub.f32 %v5670_v26, %v1909_v27 }
 0x804   : > { %v1939_v31 = vmul.f32 1.442695, %v1931_v63 }
 0x805   : > { %v1915_v0 = vpop.xlane.xlu0 %1914 }
 0x806   : > { %4489 = vpow2.f32 %v1939_v31  ;;  %v1933_v40 = vsub.f32 %v5677_v9, %v1915_v0 }
 0x807   : > { %v1912_v60 = vpop.xlane.xlu2 %1911 }
 0x808   : > { %v1943_v22 = vmul.f32 1.442695, %v1933_v40  ;;  %v1932_v54 = vsub.f32 %v5681_v12, %v1912_v60 }
 0x809   : > { %v1918_v26 = vpop.xlane.xlu1 %1917 }
 0x80a   : > { %4491 = vpow2.f32 %v1943_v22  ;;  %v1941_v53 = vmul.f32 1.442695, %v1932_v54  ;;  %v1934_v45 = vsub.f32 %v5688_v20, %v1918_v26  ;;  %4103 = vmatmul.msk.bf16.gmra.mxu3 %vm1253_vm9, %v1786_v2 }
 0x80b   : > { %4493 = vrcp.f32 %v1767_v29 }
 0x80c   : > { %v5742_v55 = vpop.eup %4489  ;;  %4495 = vpow2.f32 %v1941_v53  ;;  %v1945_v9 = vmul.f32 1.442695, %v1934_v45 }
 0x80d   : > { %4497 = vrcp.f32 %v1766_v23  ;;  %v1924_v17 = vpop.xlane.xlu0 %1923  ;;  %v1955_v12 = vsel %vm1253_vm9, %v5742_v55, 0.0 }
 0x80e   : > { %4499 = vpow2.f32 %v1945_v9  ;;  %v1936_v18 = vsub.f32 %v5696_v38, %v1924_v17  ;;  %1956 = vadd.xlane.f32.xlu0 %v1955_v12 }
 0x80f   : > { %v1921_v32 = vpop.xlane.xlu2 %1920 }
 0x810   : > { %v5747_v39 = vpop.eup %4491  ;;  %v1949_v20 = vmul.f32 1.442695, %v1936_v18  ;;  %v1935_v46 = vsub.f32 %v5700_v4, %v1921_v32 }
 0x811   : > { %v4494_v52 = vpop.eup %4493  ;;  %v1927_v11 = vpop.xlane.xlu1 %1926  ;;  %v1961_v5 = vsel %vm1253_vm9, %v5747_v39, 0.0 }
 0x812   : > { %v5752_v50 = vpop.eup %4495  ;;  %4501 = vpow2.f32 %v1949_v20  ;;  %v1947_v24 = vmul.f32 1.442695, %v1935_v46  ;;  %v1937_v34 = vsub.f32 %v5706_v44, %v1927_v11  ;;  %1962 = vadd.xlane.f32.xlu2 %v1961_v5  ;;  %v1783_v58 = vmul.f32 %v4494_v52, %v5645_v10 }
 0x813   : > { %v4498_v38 = vpop.eup %4497  ;;  %v1958_v62 = vsel %vm1253_vm9, %v5752_v50, 0.0 }
 0x814   : > { %v5757_v15 = vpop.eup %4499  ;;  %4503 = vpow2.f32 %v1947_v24  ;;  %v1951_v4 = vmul.f32 1.442695, %v1937_v34  ;;  %1959 = vadd.xlane.f32.xlu1 %v1958_v62  ;;  %v1782_v44 = vmul.f32 %v4498_v38, %v5635_v36 }
 0x815   : > { %v1964_v14 = vsel %vm1253_vm9, %v5757_v15, 0.0 }
 0x816   : > { %4505 = vpow2.f32 %v1951_v4  ;;  %1965 = vadd.xlane.f32.xlu0 %v1964_v14  ;;  %v1787_v6 = vpack.c.bf16 %v1783_v58, %v1782_v44 }
 0x817   : > { %v1930_v19 = vpop.xlane.xlu2 %1929 }
 0x818   : > { %v5763_v59 = vpop.eup %4501  ;;  %v1938_v3 = vsub.f32 %v5714_v16, %v1930_v19  ;;  %v1607_v16 = vpop.f32.mrf.mxu2 }
 0x819   : > { %v1970_v7 = vsel %vm1253_vm9, %v5763_v59, 0.0 }
 0x81a   : > { %v5768_v27 = vpop.eup %4503  ;;  %v1953_v10 = vmul.f32 1.442695, %v1938_v3  ;;  %1971 = vadd.xlane.f32.xlu2 %v1970_v7  ;;  %4104 = vmatmul.msk.bf16.gmra.mxu3 %vm1253_vm9, %v1787_v6 }
 0x81b   : > { %v1967_v63 = vsel %vm1253_vm9, %v5768_v27, 0.0 }
 0x81c   : > { %v5773_v31 = vpop.eup %4505  ;;  %4507 = vpow2.f32 %v1953_v10  ;;  %1968 = vadd.xlane.f32.xlu1 %v1967_v63 }
 0x81d   : > { %v1973_v36 = vsel %vm1253_vm9, %v5773_v31, 0.0 }
 0x81e   : > { %1974 = vadd.xlane.f32.xlu0 %v1973_v36 }
 0x820   : > { %v1609_v0 = vpop.f32.mrf.mxu2 }
 0x822   : > { %v5777_v43 = vpop.eup %4507 }
 0x823   : > { %v1976_v51 = vsel %vm1253_vm9, %v5777_v43, 0.0 }
 0x824   : > { %1977 = vadd.xlane.f32.xlu1 %v1976_v51 }
 0x828   : > { %v1612_v40 = vpop.f32.mrf.mxu2 }
 0x830   : > { %v1614_v29 = vpop.f32.mrf.mxu2 }
 0x832   : > { %2007 = vrot.lane.b32.xlu2 %v7225_v42, %s4666_s24  ;;  %2009 = vrot.lane.b32.xlu0 %v4868_v49, %s4666_s24 }
 0x838   : > { %v1617_v42 = vpop.f32.mrf.mxu2 }
 0x83a   : > { %2068 = vrot.lane.b32.xlu2 %v1602_v28, %s4661_s26  ;;  %2013 = vrot.lane.b32.xlu0 %v7226_v25, %s4666_s24 }
 0x83d   : > { %2011 = vrot.lane.b32.xlu1 %v7227_v37, %s4666_s24 }
 0x840   : > { %v1619_v49 = vpop.f32.mrf.mxu2 }
 0x842   : > { %2072 = vrot.lane.b32.xlu2 %v1607_v16, %s4661_s26  ;;  %2070 = vrot.lane.b32.xlu0 %v1604_v35, %s4661_s26 }
 0x845   : > { %2074 = vrot.lane.b32.xlu1 %v1609_v0, %s4661_s26 }
 0x84a   : > { %2078 = vrot.lane.b32.xlu2 %v1614_v29, %s4661_s26  ;;  %2076 = vrot.lane.b32.xlu0 %v1612_v40, %s4661_s26 }
 0x84d   : > { %2080 = vrot.lane.b32.xlu1 %v1617_v42, %s4661_s26 }
 0x852   : > { %2082 = vrot.lane.b32.xlu0 %v1619_v49, %s4661_s26 }
 0x86d   : > { %v1821_v25 = vpop.f32.mrf.mxu3 }
 0x86e   : > { %2100 = vrot.lane.b32.xlu2 %v1821_v25, %s4662_s27 }
 0x875   : > { %v1823_v37 = vpop.f32.mrf.mxu3 }
 0x876   : > { %2102 = vrot.lane.b32.xlu1 %v1823_v37, %s4662_s27  ;;  %v2203_v37 = vld [vmem:[%s541_s28 + $0x18] sm:$0xff] }
 0x87d   : > { %v1826_v60 = vpop.f32.mrf.mxu3 }
 0x87e   : > { %2104 = vrot.lane.b32.xlu0 %v1826_v60, %s4662_s27 }
 0x881   : > { %v1957_v54 = vpop.xlane.xlu0 %1956 }
 0x882   : > { %v1979_v46 = vmax.f32 %v1957_v54, 1e-12 }
 0x885   : > { %v1828_v22 = vpop.f32.mrf.mxu3  ;;  %v1963_v17 = vpop.xlane.xlu2 %1962 }
 0x886   : > { %2106 = vrot.lane.b32.xlu2 %v1828_v22, %s4662_s27  ;;  %v1981_v14 = vmax.f32 %v1963_v17, 1e-12 }
 0x887   : > { %v1960_v26 = vpop.xlane.xlu1 %1959 }
 0x888   : > { %v1980_v20 = vmax.f32 %v1960_v26, 1e-12 }
 0x889   : > { %v1966_v23 = vpop.xlane.xlu0 %1965 }
 0x88a   : > { %4509 = vrcp.f32 %v1980_v20  ;;  %v1982_v58 = vmax.f32 %v1966_v23, 1e-12 }
 0x88b   : > { %4511 = vrcp.f32 %v1979_v46 }
 0x88c   : > { %4513 = vrcp.f32 %v1982_v58 }
 0x88d   : > { %v1831_v2 = vpop.f32.mrf.mxu3  ;;  %v1972_v11 = vpop.xlane.xlu2 %1971  ;;  %4515 = vrcp.f32 %v1981_v14 }
 0x88e   : > { %2108 = vrot.lane.b32.xlu1 %v1831_v2, %s4662_s27 }
 0x88f   : > { %v1969_v28 = vpop.xlane.xlu1 %1968 }
 0x890   : > { %v4510_v24 = vpop.eup %4509  ;;  %v1983_v7 = vmax.f32 %v1969_v28, 1e-12  ;;  %v2200_v28 = vld [vmem:[%s541_s28] sm:$0xff] }
 0x891   : > { %v1975_v45 = vpop.xlane.xlu0 %1974  ;;  %v4512_v34 = vpop.eup %4511  ;;  %v1996_v38 = vmul.f32 %v4510_v24, %v5752_v50  ;;  %v1984_v50 = vmax.f32 %v1972_v11, 1e-12 }
 0x892   : > { %v1995_v62 = vmul.f32 %v4512_v34, %v5742_v55  ;;  %v4514_v44 = vpop.eup %4513  ;;  %4517 = vrcp.f32 %v1983_v7  ;;  %v1985_v40 = vmax.f32 %v1975_v45, 1e-12  ;;  %v1379_v11 = vpop.f32.mrf.mxu1 }
 0x893   : > { %v4516_v19 = vpop.eup %4515  ;;  %v1998_v3 = vmul.f32 %v4514_v44, %v5757_v15  ;;  %4519 = vrcp.f32 %v1984_v50 }
 0x894   : > { %v2003_v35 = vpack.c.bf16 %v1996_v38, %v1995_v62  ;;  %v1997_v6 = vmul.f32 %v4516_v19, %v5747_v39  ;;  %v5848_v38 = vld [vmem:[%s549_s14] sm:$0xf] }
 0x895   : > { %v1833_v53 = vpop.f32.mrf.mxu3  ;;  %v2008_v4 = vpop.permute.xlu2 %2007  ;;  %v2390_v62 = vperm.slane %v5848_v38, 1 }
 0x896   : > { %2110 = vrot.lane.b32.xlu0 %v1833_v53, %s4662_s27  ;;  %v2004_v10 = vpack.c.bf16 %v1998_v3, %v1997_v6  ;;  %v4395_v3 = vld [vmem:[%s536_s15] ss:$0 sm:$0xff] }
 0x897   : > { %v1978_v32 = vpop.xlane.xlu1 %1977 }
 0x898   : > { %v4518_v55 = vpop.eup %4517  ;;  %v1986_v51 = vmax.f32 %v1978_v32, 1e-12 }
 0x899   : > { %v4520_v63 = vpop.eup %4519  ;;  %v1999_v36 = vmul.f32 %v4518_v55, %v5768_v27 }
 0x89a   : > { %v2000_v16 = vmul.f32 %v4520_v63, %v5763_v59  ;;  %4521 = vrcp.f32 %v1986_v51 }
 0x89b   : > { %4523 = vrcp.f32 %v1985_v40  ;;  %v5873_v40 = vld [vmem:[%s545_s13] sm:$0xf] }
 0x89c   : > { %v2005_v0 = vpack.c.bf16 %v2000_v16, %v1999_v36 }
 0x89d   : > { %v1836_v9 = vpop.f32.mrf.mxu3  ;;  %v2069_v26 = vpop.permute.xlu2 %2068 }
 0x89e   : > { %2112 = vrot.lane.b32.xlu2 %v1836_v9, %s4662_s27  ;;  %v2201_v9 = vld [vmem:[%s541_s28 + $0x8] sm:$0xff]  ;;  %v2156_v7 = vsel %vm641_vm1, %v1379_v11, %v2069_v26 }
 0x89f   : > { %v2211_v17 = vpack.c.bf16 %v2201_v9, %v2200_v28 }
 0x8a0   : > { %v4522_v39 = vpop.eup %4521 }
 0x8a1   : > { %v4524_v15 = vpop.eup %4523  ;;  %v2002_v29 = vmul.f32 %v4522_v39, %v5777_v43  ;;  %v2202_v43 = vld [vmem:[%s541_s28 + $0x10] sm:$0xff]  ;;  %v2321_v39 = vperm.slane %v5873_v40, 1 }
 0x8a2   : > { %v2001_v42 = vmul.f32 %v4524_v15, %v5773_v31  ;;  %v2212_v60 = vpack.c.bf16 %v2203_v37, %v2202_v43 }
 0x8a4   : > { %v2010_v12 = vpop.permute.xlu0 %2009  ;;  %v2006_v49 = vpack.c.bf16 %v2002_v29, %v2001_v42  ;;  %2232 = vmatpush.bf16.msrb.mxu1 %v2212_v60 }
 0x8a5   : > { %v1838_v18 = vpop.f32.mrf.mxu3  ;;  %v2073_v53 = vpop.permute.xlu2 %2072 }
 0x8a6   : > { %2114 = vrot.lane.b32.xlu1 %v1838_v18, %s4662_s27 }
 0x8a8   : > { %2233 = vmatpush.bf16.msrb.mxu1 %v2211_v17 }
 0x8ac   : > { %v2014_v52 = vpop.permute.xlu0 %2013 }
 0x8ad   : > { %2035 = vmatpush.bf16.msrb.mxu0 %v2014_v52 }
 0x8af   : > { %v2012_v5 = vpop.permute.xlu1 %2011 }
 0x8b1   : > { %2036 = vmatpush.bf16.msrb.mxu0 %v2012_v5 }
 0x8b4   : > { %v2071_v45 = vpop.permute.xlu0 %2070 }
 0x8b5   : > { %2037 = vmatpush.bf16.msrb.mxu0 %v2010_v12  ;;  %v5836_v12 = vpop.permute.xlu2 %2078 }
 0x8b7   : > { %v2075_v20 = vpop.permute.xlu1 %2074 }
 0x8b9   : > { %2038 = vmatpush.bf16.msrb.mxu0 %v2008_v4 }
 0x8bc   : > { %4113 = vmatmul.msk.bf16.vlgmr.msrb.gmra.mxu0 %vm1253_vm9, %v2003_v35  ;;  %v2077_v18 = vpop.permute.xlu0 %2076  ;;  %v1381_v35 = vpop.f32.mrf.mxu1 }
 0x8bd   : > { %v2157_v44 = vsel %vm641_vm1, %v1381_v35, %v2071_v45  ;;  %v2160_v9 = vsel %vm641_vm1, %v5721_v21, %v2077_v18 }
 0x8bf   : > { %v5840_v24 = vpop.permute.xlu1 %2080 }
 0x8c4   : > { %v5838_v46 = vpop.permute.xlu0 %2082  ;;  %v1384_v42 = vpop.f32.mrf.mxu1 }
 0x8c8   : > { %v2101_v32 = vpop.permute.xlu2 %2100 }
 0x8cc   : > { %4114 = vmatmul.msk.bf16.gmra.mxu0 %vm1253_vm9, %v2004_v10  ;;  %v2164_v10 = vsel %vm590_vm0, %v2156_v7, %v2101_v32  ;;  %v1386_v43 = vpop.f32.mrf.mxu1 }
 0x8cd   : > { %v2159_v37 = vsel %vm641_vm1, %v1386_v43, %v2075_v20  ;;  %v2161_v20 = vsel %vm641_vm1, %v5725_v8, %v5836_v12  ;;  %v2162_v8 = vsel %vm641_vm1, %v5729_v47, %v5840_v24 }
 0x8dc   : > { %4115 = vmatmul.msk.bf16.gmra.mxu0 %vm1253_vm9, %v2005_v0 }
 0x8e0   : > { %v2107_v52 = vpop.permute.xlu2 %2106 }
 0x8e1   : > { %v2167_v60 = vsel %vm590_vm0, %v2159_v37, %v2107_v52 }
 0x8e8   : > { %v2103_v58 = vpop.permute.xlu1 %2102 }
 0x8e9   : > { %v2165_v19 = vsel %vm590_vm0, %v2157_v44, %v2103_v58  ;;  %v2163_v44 = vsel %vm641_vm1, %v5733_v48, %v5838_v46  ;;  %v5944_v48 = vperm.slane %v5873_v40, 0 }
 0x8ec   : > { %4116 = vmatmul.msk.bf16.gmra.mxu0 %vm1253_vm9, %v2006_v49  ;;  %v2459_v49 = vperm.slane %v5873_v40, 2 }
 0x8f0   : > { %v2105_v5 = vpop.permute.xlu0 %2104 }
 0x8f8   : > { %v5846_v34 = vpop.permute.xlu2 %2112 }
 0x8f9   : > { %v2170_v12 = vsel %vm590_vm0, %v2162_v8, %v5846_v34 }
 0x900   : > { %v2109_v36 = vpop.permute.xlu1 %2108 }
 0x901   : > { %v2168_v17 = vsel %vm590_vm0, %v2160_v9, %v2109_v36 }
 0x908   : > { %v2111_v4 = vpop.permute.xlu0 %2110 }
 0x909   : > { %v2169_v52 = vsel %vm590_vm0, %v2161_v20, %v2111_v4 }
 0x918   : > { %v2115_v29 = vpop.permute.xlu1 %2114 }
 0x939   : > { %v2040_v59 = vpop.f32.mrf.mxu0 }
 0x93a   : > { %2132 = vrot.lane.b32.xlu0 %v2040_v59, %s4665_s23 }
 0x941   : > { %v2042_v27 = vpop.f32.mrf.mxu0 }
 0x942   : > { %2134 = vrot.lane.b32.xlu2 %v2042_v27, %s4665_s23  ;;  %v2158_v27 = vsel %vm641_vm1, %v1384_v42, %v2073_v53 }
 0x949   : > { %v2045_v25 = vpop.f32.mrf.mxu0 }
 0x94a   : > { %2136 = vrot.lane.b32.xlu1 %v2045_v25, %s4665_s23  ;;  %v2166_v25 = vsel %vm590_vm0, %v2158_v27, %v2105_v5 }
 0x951   : > { %v2047_v31 = vpop.f32.mrf.mxu0 }
 0x952   : > { %2138 = vrot.lane.b32.xlu0 %v2047_v31, %s4665_s23 }
 0x959   : > { %v2050_v22 = vpop.f32.mrf.mxu0 }
 0x95a   : > { %2140 = vrot.lane.b32.xlu2 %v2050_v22, %s4665_s23 }
 0x961   : > { %v2052_v54 = vpop.f32.mrf.mxu0 }
 0x962   : > { %2142 = vrot.lane.b32.xlu1 %v2052_v54, %s4665_s23 }
 0x969   : > { %v2055_v2 = vpop.f32.mrf.mxu0 }
 0x96a   : > { %2144 = vrot.lane.b32.xlu0 %v2055_v2, %s4665_s23  ;;  %2392 = vrot.lane.b32.xlu1 %v2390_v62, %s4661_s26 }
 0x971   : > { %v2057_v23 = vpop.f32.mrf.mxu0 }
 0x972   : > { %2146 = vrot.lane.b32.xlu2 %v2057_v23, %s4665_s23 }
 0x97a   : > { %2323 = vrot.lane.b32.xlu2 %v2321_v39, %s4661_s26 }
 0x982   : > { %2461 = vrot.lane.b32.xlu2 %v2459_v49, %s4662_s27 }
 0x99c   : > { %v2135_v14 = vpop.permute.xlu2 %2134 }
 0x99d   : > { %v2174_v6 = vsel %vm7194_vm3, %v2165_v19, %v2135_v14 }
 0x99e   : > { %v5862_v50 = vadd.f32 %v4395_v3, %v2174_v6  ;;  %v2171_v6 = vsel %vm590_vm0, %v2163_v44, %v2115_v29 }
 0x9a0   : > { %7234 = vst [vmem:[#allocation4_spill] sm:$0xff] %v5862_v50  ;;  %v7174_v51 = vmax.f32 %v5862_v50, 0.0 }
 0x9ac   : > { %v2133_v55 = vpop.permute.xlu0 %2132 }
 0x9ad   : > { %v2173_v63 = vsel %vm7194_vm3, %v2164_v10, %v2133_v55 }
 0x9ae   : > { %v5869_v16 = vadd.f32 %v4395_v3, %v2173_v63 }
 0x9b0   : > { %7235 = vst [vmem:[#allocation2_spill] sm:$0xff] %v5869_v16  ;;  %v7173_v0 = vmax.f32 %v5869_v16, 0.0 }
 0x9b2   : > { %v2207_v15 = vpack.c.bf16 %v7174_v51, %v7173_v0 }
 0x9b4   : > { %4117 = vmatmul.msk.bf16.vlgmr.msrb.gmra.mxu1 %vm7193_vm11, %v2207_v15  ;;  %v2141_v28 = vpop.permute.xlu2 %2140 }
 0x9b5   : > { %v2177_v32 = vsel %vm7194_vm3, %v2168_v17, %v2141_v28  ;;  %v5989_v28 = vperm.slane %v5848_v38, 0 }
 0x9b6   : > { %v5909_v11 = vadd.f32 %v4395_v3, %v2177_v32 }
 0x9b8   : > { %7238 = vst [vmem:[#allocation8_spill] sm:$0xff] %v5909_v11  ;;  %v7167_v35 = vmax.f32 %v5909_v11, 0.0 }
 0x9bc   : > { %v2137_v59 = vpop.permute.xlu1 %2136 }
 0x9bd   : > { %v2175_v31 = vsel %vm7194_vm3, %v2166_v25, %v2137_v59 }
 0x9be   : > { %v5889_v22 = vadd.f32 %v4395_v3, %v2175_v31 }
 0x9c0   : > { %7236 = vst [vmem:[#allocation3_spill] sm:$0xff] %v5889_v22  ;;  %v7169_v26 = vmax.f32 %v5889_v22, 0.0 }
 0x9c4   : > { %v2139_v54 = vpop.permute.xlu0 %2138 }
 0x9c5   : > { %v2176_v2 = vsel %vm7194_vm3, %v2167_v60, %v2139_v54 }
 0x9c6   : > { %v5892_v23 = vadd.f32 %v4395_v3, %v2176_v2 }
 0x9c8   : > { %7237 = vst [vmem:[#allocation6_spill] sm:$0xff] %v5892_v23  ;;  %v7170_v53 = vmax.f32 %v5892_v23, 0.0 }
 0x9ca   : > { %v2208_v45 = vpack.c.bf16 %v7170_v53, %v7169_v26 }
 0x9cc   : > { %4118 = vmatmul.msk.bf16.gmra.mxu1 %vm7193_vm11, %v2208_v45  ;;  %v2147_v4 = vpop.permute.xlu2 %2146 }
 0x9cd   : > { %v2180_v7 = vsel %vm7194_vm3, %v2171_v6, %v2147_v4 }
 0x9ce   : > { %v5934_v55 = vadd.f32 %v4395_v3, %v2180_v7 }
 0x9d0   : > { %7241 = vst [vmem:[#allocation10_spill] sm:$0xff] %v5934_v55  ;;  %v7172_v24 = vmax.f32 %v5934_v55, 0.0 }
 0x9d4   : > { %v2143_v5 = vpop.permute.xlu1 %2142  ;;  %v5946_v46 = vpop.permute.xlu2 %2323 }
 0x9d5   : > { %v2178_v62 = vsel %vm7194_vm3, %v2169_v52, %v2143_v5 }
 0x9d6   : > { %v5912_v58 = vadd.f32 %v4395_v3, %v2178_v62 }
 0x9d8   : > { %7239 = vst [vmem:[#allocation9_spill] sm:$0xff] %v5912_v58  ;;  %v7168_v21 = vmax.f32 %v5912_v58, 0.0 }
 0x9da   : > { %v2209_v18 = vpack.c.bf16 %v7168_v21, %v7167_v35 }
 0x9dc   : > { %v2145_v14 = vpop.permute.xlu0 %2144  ;;  %4119 = vmatmul.msk.bf16.gmra.mxu1 %vm7193_vm11, %v2209_v18  ;;  %v5956_v15 = vpop.permute.xlu1 %2392 }
 0x9dd   : > { %v2179_v19 = vsel %vm7194_vm3, %v2170_v12, %v2145_v14  ;;  %v5966_v59 = vpop.permute.xlu2 %2461  ;;  %vm7259_vm3 = vmmov %vm7257_vm10 }
 0x9de   : > { %v5932_v10 = vadd.f32 %v4395_v3, %v2179_v19 }
 0x9e0   : > { %7240 = vst [vmem:[#allocation5_spill] sm:$0xff] %v5932_v10  ;;  %v7171_v47 = vmax.f32 %v5932_v10, 0.0 }
 0x9e2   : > { %v2210_v34 = vpack.c.bf16 %v7172_v24, %v7171_v47 }
 0x9ec   : > { %4120 = vmatmul.msk.bf16.gmra.mxu1 %vm7193_vm11, %v2210_v34  ;;  %vm7258_vm11 = vmmov %vm7256_vm4 }
 0xa31   : > { %v5948_v63 = vpop.f32.mrf.mxu1 }
 0xa32   : > { %v2326_v3 = vmul.f32 %v5946_v46, %v5948_v63  ;;  %v2256_v36 = vmul.f32 %v5944_v48, %v5948_v63  ;;  %v2395_v49 = vmul.f32 %v5956_v15, %v5948_v63  ;;  %v2464_v27 = vmul.f32 %v5966_v59, %v5948_v63 }
 0xa33   : > { %v2289_v32 = vmul.f32 %v5989_v28, %v5948_v63 }
 0xa34   : > { %2342 = vrot.lane.b32.xlu0 %v2326_v3, %s4664_s20  ;;  %v2264_v39 = vsel %vm641_vm1, %v2256_v36, 0.0 }
 0xa35   : > { %2265 = vadd.xlane.f32.xlu1 %v2264_v39  ;;  %v2297_v52 = vsel %vm641_vm1, %v2289_v32, 0.0 }
 0xa39   : > { %v5958_v29 = vpop.f32.mrf.mxu1 }
 0xa3a   : > { %v2396_v42 = vmul.f32 %v5956_v15, %v5958_v29  ;;  %v2327_v31 = vmul.f32 %v5946_v46, %v5958_v29  ;;  %v2465_v37 = vmul.f32 %v5966_v59, %v5958_v29  ;;  %v2257_v62 = vmul.f32 %v5944_v48, %v5958_v29 }
 0xa3b   : > { %v2290_v4 = vmul.f32 %v5989_v28, %v5958_v29  ;;  %v6023_v44 = vpack.c.bf16 %v5958_v29, %v5948_v63 }
 0xa3c   : > { %2413 = vrot.lane.b32.xlu2 %v2396_v42, %s4664_s20  ;;  %2411 = vrot.lane.b32.xlu0 %v2395_v49, %s4664_s20  ;;  %v2267_v14 = vsel %vm641_vm1, %v2257_v62, 0.0 }
 0xa3d   : > { %7243 = vst [vmem:[#allocation14_spill] sm:$0xff] %v6023_v44  ;;  %v2300_v19 = vsel %vm641_vm1, %v2290_v4, 0.0 }
 0xa44   : > { %2480 = vrot.lane.b32.xlu0 %v2464_v27, %s4663_s19 }
 0xa49   : > { %v5971_v25 = vpop.f32.mrf.mxu1 }
 0xa4a   : > { %v2258_v54 = vmul.f32 %v5944_v48, %v5971_v25  ;;  %v2291_v9 = vmul.f32 %v5989_v28, %v5971_v25  ;;  %v2328_v7 = vmul.f32 %v5946_v46, %v5971_v25  ;;  %v2397_v3 = vmul.f32 %v5956_v15, %v5971_v25 }
 0xa4c   : > { %v2270_v45 = vsel %vm641_vm1, %v2258_v54, 0.0  ;;  %v2303_v20 = vsel %vm641_vm1, %v2291_v9, 0.0 }
 0xa4e   : > { %2344 = vrot.lane.b32.xlu1 %v2327_v31, %s4664_s20 }
 0xa51   : > { %v5976_v43 = vpop.f32.mrf.mxu1 }
 0xa52   : > { %v6016_v12 = vpack.c.bf16 %v5976_v43, %v5971_v25  ;;  %v2329_v6 = vmul.f32 %v5946_v46, %v5976_v43  ;;  %v2398_v36 = vmul.f32 %v5956_v15, %v5976_v43  ;;  %v2292_v49 = vmul.f32 %v5989_v28, %v5976_v43 }
 0xa53   : > { %v2259_v54 = vmul.f32 %v5944_v48, %v5976_v43 }
 0xa54   : > { %7242 = vst [vmem:[#allocation7_spill] sm:$0xff] %v6016_v12  ;;  %v2306_v31 = vsel %vm641_vm1, %v2292_v49, 0.0 }
 0xa56   : > { %2482 = vrot.lane.b32.xlu1 %v2465_v37, %s4663_s19 }
 0xa59   : > { %v5981_v60 = vpop.f32.mrf.mxu1 }
 0xa5a   : > { %v2399_v34 = vmul.f32 %v5956_v15, %v5981_v60  ;;  %v2260_v39 = vmul.f32 %v5944_v48, %v5981_v60 }
 0xa5c   : > { %v2276_v42 = vsel %vm641_vm1, %v2260_v39, 0.0 }
 0xa61   : > { %v5985_v2 = vpop.f32.mrf.mxu1 }
 0xa62   : > { %v6011_v8 = vpack.c.bf16 %v5985_v2, %v5981_v60  ;;  %v2294_v27 = vmul.f32 %v5989_v28, %v5985_v2  ;;  %v2331_v9 = vmul.f32 %v5946_v46, %v5985_v2 }
 0xa64   : > { %v2312_v37 = vsel %vm641_vm1, %v2294_v27, 0.0 }
 0xa65   : > { %2271 = vadd.xlane.f32.xlu2 %v2270_v45  ;;  %v2273_v45 = vsel %vm641_vm1, %v2259_v54, 0.0 }
 0xa69   : > { %v5993_v17 = vpop.f32.mrf.mxu1 }
 0xa6a   : > { %v2332_v32 = vmul.f32 %v5946_v46, %v5993_v17 }
 0xa6d   : > { %2304 = vadd.xlane.f32.xlu2 %v2303_v20  ;;  %v2400_v20 = vmul.f32 %v5956_v15, %v5985_v2 }
 0xa6e   : > { %2298 = vadd.xlane.f32.xlu0 %v2297_v52  ;;  %v2330_v52 = vmul.f32 %v5946_v46, %v5981_v60 }
 0xa71   : > { %v5999_v5 = vpop.f32.mrf.mxu1 }
 0xa72   : > { %v6005_v18 = vpack.c.bf16 %v5999_v5, %v5993_v17  ;;  %v2402_v62 = vmul.f32 %v5956_v15, %v5999_v5 }
 0xa74   : > { %2977 = vmatpush.bf16.msra.mxu2 %v6005_v18 }
 0xa76   : > { %2268 = vadd.xlane.f32.xlu0 %v2267_v14  ;;  %v2261_v14 = vmul.f32 %v5944_v48, %v5985_v2 }
 0xa78   : > { %2978 = vmatpush.bf16.msra.mxu2 %v6011_v8  ;;  %v2279_v4 = vsel %vm641_vm1, %v2261_v14, 0.0 }
 0xa7c   : > { %2979 = vmatpush.bf16.msra.mxu2 %v6016_v12 }
 0xa80   : > { %2980 = vmatpush.bf16.msra.mxu2 %v6023_v44  ;;  %2301 = vadd.xlane.f32.xlu1 %v2300_v19  ;;  %v2293_v19 = vmul.f32 %v5989_v28, %v5981_v60 }
 0xa85   : > { %2348 = vrot.lane.b32.xlu2 %v2329_v6, %s4664_s20  ;;  %v2263_v6 = vmul.f32 %v5944_v48, %v5999_v5 }
 0xa8a   : > { %2346 = vrot.lane.b32.xlu0 %v2328_v7, %s4664_s20  ;;  %v2309_v7 = vsel %vm641_vm1, %v2293_v19, 0.0 }
 0xa8d   : > { %2419 = vrot.lane.b32.xlu2 %v2399_v34, %s4664_s20  ;;  %v2295_v34 = vmul.f32 %v5989_v28, %v5993_v17 }
 0xa92   : > { %2415 = vrot.lane.b32.xlu0 %v2397_v3, %s4664_s20  ;;  %v2285_v3 = vsel %vm641_vm1, %v2263_v6, 0.0 }
 0xa99   : > { %2417 = vrot.lane.b32.xlu1 %v2398_v36, %s4664_s20  ;;  %v2315_v36 = vsel %vm641_vm1, %v2295_v34, 0.0 }
 0xaa6   : > { %v2343_v39 = vpop.permute.xlu0 %2342 }
 0xaae   : > { %v2412_v49 = vpop.permute.xlu0 %2411 }
 0xaaf   : > { %v2435_v27 = vsel %vm641_vm1, %v2412_v49, 0.0 }
 0xab6   : > { %2277 = vadd.xlane.f32.xlu2 %v2276_v42  ;;  %v2366_v42 = vsel %vm641_vm1, %v2343_v39, 0.0  ;;  %v6089_v54 = vpop.permute.xlu0 %2480 }
 0xabc   : > { %2307 = vadd.xlane.f32.xlu0 %v2306_v31  ;;  %v2467_v31 = vmul.f32 %v5966_v59, %v5976_v43 }
 0xabe   : > { %2313 = vadd.xlane.f32.xlu2 %v2312_v37  ;;  %v2401_v37 = vmul.f32 %v5956_v15, %v5993_v17 }
 0xac3   : > { %2274 = vadd.xlane.f32.xlu1 %v2273_v45  ;;  %v2466_v45 = vmul.f32 %v5966_v59, %v5971_v25 }
 0xad0   : > { %2352 = vrot.lane.b32.xlu0 %v2331_v9, %s4664_s20 }
 0xad6   : > { %2354 = vrot.lane.b32.xlu2 %v2332_v32, %s4664_s20  ;;  %v2414_v32 = vpop.permute.xlu2 %2413 }
 0xad8   : > { %2421 = vrot.lane.b32.xlu0 %v2400_v20, %s4664_s20  ;;  %v6096_v20 = vpop.xlane.xlu1 %2265 }
 0xadc   : > { %2350 = vrot.lane.b32.xlu1 %v2330_v52, %s4664_s20 }
 0xade   : > { %2425 = vrot.lane.b32.xlu2 %v2402_v62, %s4664_s20  ;;  %v6100_v62 = vpop.xlane.xlu2 %2271 }
 0xae0   : > { %v2345_v15 = vpop.permute.xlu1 %2344 }
 0xae1   : > { %v6094_v9 = vpop.xlane.xlu0 %2298  ;;  %v2369_v19 = vsel %vm641_vm1, %v2345_v15, 0.0 }
 0xae2   : > { %7244 = vst [vmem:[#allocation15_spill] sm:$0xff] %v6094_v9 }
 0xae8   : > { %v2483_v34 = vpop.permute.xlu1 %2482 }
 0xae9   : > { %v6098_v52 = vpop.xlane.xlu0 %2268 }
 0xafc   : > { %v2347_v14 = vpop.permute.xlu0 %2346 }
 0xb02   : > { %2280 = vadd.xlane.f32.xlu0 %v2279_v4  ;;  %v2262_v4 = vmul.f32 %v5944_v48, %v5993_v17 }
 0xb04   : > { %v2282_v6 = vsel %vm641_vm1, %v2262_v4, 0.0 }
 0xb06   : > { %2310 = vadd.xlane.f32.xlu1 %v2309_v7  ;;  %v6106_v7 = vpop.xlane.xlu2 %2304 }
 0xb07   : > { %2286 = vadd.xlane.f32.xlu2 %v2285_v3  ;;  %7245 = vst [vmem:[#allocation16_spill] sm:$0xff] %v6106_v7  ;;  %v2416_v3 = vpop.permute.xlu0 %2415 }
 0xb0a   : > { %2316 = vadd.xlane.f32.xlu0 %v2315_v36  ;;  %v2441_v36 = vsel %vm641_vm1, %v2416_v3, 0.0 }
 0xb0e   : > { %v2349_v39 = vpop.permute.xlu2 %2348 }
 0xb0f   : > { %v2375_v49 = vsel %vm641_vm1, %v2349_v39, 0.0 }
 0xb12   : > { %2367 = vadd.xlane.f32.xlu0 %v2366_v42  ;;  %v6109_v42 = vpop.xlane.xlu1 %2301 }
 0xb16   : > { %v2420_v15 = vpop.permute.xlu2 %2419 }
 0xb1a   : > { %2436 = vadd.xlane.f32.xlu0 %v2435_v27  ;;  %v2418_v48 = vpop.permute.xlu1 %2417 }
 0xb1b   : > { %v2444_v27 = vsel %vm641_vm1, %v2418_v48, 0.0 }
 0xb1f   : > { %2486 = vrot.lane.b32.xlu2 %v2467_v31, %s4663_s19  ;;  %2423 = vrot.lane.b32.xlu1 %v2401_v37, %s4664_s20  ;;  %v2333_v31 = vmul.f32 %v5946_v46, %v5999_v5  ;;  %v2470_v37 = vmul.f32 %v5966_v59, %v5993_v17  ;;  %v2296_v46 = vmul.f32 %v5989_v28, %v5999_v5  ;;  %v2372_v28 = vsel %vm641_vm1, %v2347_v14, 0.0 }
 0xb20   : > { %v2471_v14 = vmul.f32 %v5966_v59, %v5999_v5 }
 0xb2e   : > { %2484 = vrot.lane.b32.xlu0 %v2466_v45, %s4663_s19  ;;  %v2468_v45 = vmul.f32 %v5966_v59, %v5981_v60 }
 0xb2f   : > { %v6122_v4 = vpop.xlane.xlu0 %2307 }
 0xb30   : > { %7246 = vst [vmem:[#allocation17_spill] sm:$0xff] %v6122_v4 }
 0xb42   : > { %v2353_v3 = vpop.permute.xlu0 %2352 }
 0xb43   : > { %v2381_v24 = vsel %vm641_vm1, %v2353_v3, 0.0 }
 0xb48   : > { %2370 = vadd.xlane.f32.xlu2 %v2369_v19  ;;  %v6124_v19 = vpop.xlane.xlu1 %2274 }
 0xb49   : > { %2283 = vadd.xlane.f32.xlu1 %v2282_v6  ;;  %v6126_v6 = vpop.xlane.xlu2 %2277 }
 0xb50   : > { %2442 = vadd.xlane.f32.xlu2 %v2441_v36  ;;  %v2318_v36 = vsel %vm641_vm1, %v2296_v46, 0.0  ;;  %v2351_v39 = vpop.permute.xlu1 %2350 }
 0xb51   : > { %v2378_v48 = vsel %vm641_vm1, %v2351_v39, 0.0 }
 0xb58   : > { %2376 = vadd.xlane.f32.xlu0 %v2375_v49  ;;  %v6131_v49 = vpop.xlane.xlu2 %2313 }
 0xb60   : > { %2445 = vadd.xlane.f32.xlu0 %v2444_v27  ;;  %v2438_v27 = vsel %vm641_vm1, %v2414_v32, 0.0 }
 0xb62   : > { %2356 = vrot.lane.b32.xlu1 %v2333_v31, %s4664_s20  ;;  %v2422_v31 = vpop.permute.xlu0 %2421 }
 0xb68   : > { %2492 = vrot.lane.b32.xlu2 %v2470_v37, %s4663_s19  ;;  %v2450_v37 = vsel %vm641_vm1, %v2422_v31, 0.0 }
 0xb74   : > { %2488 = vrot.lane.b32.xlu0 %v2468_v45, %s4663_s19  ;;  %v2355_v45 = vpop.permute.xlu2 %2354 }
 0xb75   : > { %v2384_v46 = vsel %vm641_vm1, %v2355_v45, 0.0 }
 0xb79   : > { %v6136_v35 = vpop.xlane.xlu1 %2310 }
 0xb7a   : > { %7247 = vst [vmem:[#allocation18_spill] sm:$0xff] %v6136_v35 }
 0xb8c   : > { %2319 = vadd.xlane.f32.xlu1 %v2318_v36 }
 0xb91   : > { %2379 = vadd.xlane.f32.xlu2 %v2378_v48  ;;  %v2424_v36 = vpop.permute.xlu1 %2423  ;;  %v6141_v48 = vpop.xlane.xlu0 %2280 }
 0xb92   : > { %v2453_v39 = vsel %vm641_vm1, %v2424_v36, 0.0 }
 0xb94   : > { %2439 = vadd.xlane.f32.xlu1 %v2438_v27  ;;  %v2469_v27 = vmul.f32 %v5966_v59, %v5985_v2  ;;  %v2507_v59 = vsel %vm641_vm1, %v2483_v34, 0.0 }
 0xb99   : > { %2451 = vadd.xlane.f32.xlu2 %v2450_v37  ;;  %v6143_v32 = vpop.xlane.xlu0 %2316 }
 0xb9a   : > { %7248 = vst [vmem:[#allocation19_spill] sm:$0xff] %v6143_v32 }
 0xb9c   : > { %2373 = vadd.xlane.f32.xlu1 %v2372_v28 }
 0xb9e   : > { %2385 = vadd.xlane.f32.xlu0 %v2384_v46 }
 0xba1   : > { %v6150_v31 = vpop.xlane.xlu0 %2367 }
 0xba6   : > { %2454 = vadd.xlane.f32.xlu0 %v2453_v39  ;;  %v2426_v39 = vpop.permute.xlu2 %2425 }
 0xba9   : > { %v6153_v37 = vpop.xlane.xlu0 %2436 }
 0xbb1   : > { %v2485_v45 = vpop.permute.xlu0 %2484 }
 0xbb2   : > { %v2510_v53 = vsel %vm641_vm1, %v2485_v45, 0.0 }
 0xbb5   : > { %2490 = vrot.lane.b32.xlu1 %v2469_v27, %s4663_s19  ;;  %v6160_v27 = vpop.xlane.xlu2 %2286 }
 0xbba   : > { %2494 = vrot.lane.b32.xlu0 %v2471_v14, %s4663_s19  ;;  %v2447_v14 = vsel %vm641_vm1, %v2420_v15, 0.0  ;;  %v2504_v15 = vsel %vm641_vm1, %v6089_v54, 0.0 }
 0xbbc   : > { %v6155_v28 = vpop.xlane.xlu1 %2283 }
 0xbbd   : > { %v2487_v0 = vpop.permute.xlu2 %2486 }
 0xbc5   : > { %v6170_v34 = vpop.xlane.xlu2 %2370 }
 0xbcb   : > { %v6157_v46 = vpop.xlane.xlu0 %2376 }
 0xbd3   : > { %v6163_v26 = vpop.xlane.xlu0 %2445 }
 0xbd4   : > { %v2357_v36 = vpop.permute.xlu1 %2356 }
 0xbd5   : > { %v2387_v21 = vsel %vm641_vm1, %v2357_v36, 0.0  ;;  %v2456_v36 = vsel %vm641_vm1, %v2426_v39, 0.0 }
 0xbd6   : > { %2388 = vadd.xlane.f32.xlu2 %v2387_v21 }
 0xbde   : > { %2508 = vadd.xlane.f32.xlu2 %v2507_v59  ;;  %v6174_v59 = vpop.xlane.xlu2 %2442 }
 0xbdf   : > { %2448 = vadd.xlane.f32.xlu1 %v2447_v14 }
 0xbe4   : > { %2511 = vadd.xlane.f32.xlu0 %v2510_v53  ;;  %v2513_v53 = vsel %vm641_vm1, %v2487_v0, 0.0 }
 0xbe6   : > { %v2489_v47 = vpop.permute.xlu0 %2488  ;;  %v2493_v3 = vpop.permute.xlu2 %2492 }
 0xbe7   : > { %2382 = vadd.xlane.f32.xlu1 %v2381_v24  ;;  %v2516_v21 = vsel %vm641_vm1, %v2489_v47, 0.0  ;;  %v2522_v24 = vsel %vm641_vm1, %v2493_v3, 0.0 }
 0xbe8   : > { %2517 = vadd.xlane.f32.xlu2 %v2516_v21 }
 0xbef   : > { %2457 = vadd.xlane.f32.xlu1 %v2456_v36 }
 0xbf7   : > { %2505 = vadd.xlane.f32.xlu1 %v2504_v15 }
 0xbff   : > { %2514 = vadd.xlane.f32.xlu1 %v2513_v53  ;;  %v6178_v47 = vpop.xlane.xlu1 %2319  ;;  %v2528_v53 = vperm.slane %v5848_v38, 2 }
 0xc07   : > { %2523 = vadd.xlane.f32.xlu1 %v2522_v24  ;;  %v6180_v45 = vpop.xlane.xlu1 %2439 }
 0xc0f   : > { %v6184_v14 = vpop.xlane.xlu1 %2373 }
 0xc11   : > { %v6182_v39 = vpop.xlane.xlu0 %2385 }
 0xc19   : > { %v6186_v21 = vpop.xlane.xlu0 %2454 }
 0xc1a   : > { %7249 = vst [vmem:[#allocation20_spill] sm:$0xff] %v6186_v21 }
 0xc27   : > { %v2491_v54 = vpop.permute.xlu1 %2490 }
 0xc28   : > { %v2519_v36 = vsel %vm641_vm1, %v2491_v54, 0.0 }
 0xc29   : > { %2520 = vadd.xlane.f32.xlu0 %v2519_v36 }
 0xc2c   : > { %v2495_v0 = vpop.permute.xlu0 %2494 }
 0xc2d   : > { %v2525_v15 = vsel %vm641_vm1, %v2495_v0, 0.0 }
 0xc2e   : > { %2526 = vadd.xlane.f32.xlu2 %v2525_v15 }
 0xc3d   : > { %2530 = vrot.lane.b32.xlu0 %v2528_v53, %s4662_s27 }
 0xc52   : > { %v6218_v23 = vpop.xlane.xlu1 %2448 }
 0xc53   : > { %7250 = vst [vmem:[#allocation21_spill] sm:$0xff] %v6218_v23 }
 0xc57   : > { %v6192_v3 = vpop.xlane.xlu0 %2511 }
 0xc9c   : > { %v6194_v24 = vpop.xlane.xlu0 %2520 }
 0xcaf   : > { %v2531_v51 = vpop.permute.xlu0 %2530 }
 0xcb0   : > { %v2535_v11 = vmul.f32 %v2531_v51, %v5971_v25  ;;  %v2534_v58 = vmul.f32 %v2531_v51, %v5958_v29  ;;  %v2533_v54 = vmul.f32 %v2531_v51, %v5948_v63  ;;  %v2538_v36 = vmul.f32 %v2531_v51, %v5985_v2 }
 0xcb1   : > { %v2536_v0 = vmul.f32 %v2531_v51, %v5976_v43  ;;  %v2537_v15 = vmul.f32 %v2531_v51, %v5981_v60  ;;  %v2539_v53 = vmul.f32 %v2531_v51, %v5993_v17 }
 0xcb2   : > { %2553 = vrot.lane.b32.xlu0 %v2535_v11, %s4663_s19  ;;  %2551 = vrot.lane.b32.xlu2 %v2534_v58, %s4663_s19  ;;  %v2540_v11 = vmul.f32 %v2531_v51, %v5999_v5  ;;  %v6212_v58 = vpop.xlane.xlu2 %2379 }
 0xcb3   : > { %2549 = vrot.lane.b32.xlu1 %v2533_v54, %s4663_s19 }
 0xcba   : > { %2559 = vrot.lane.b32.xlu0 %v2538_v36, %s4663_s19  ;;  %2555 = vrot.lane.b32.xlu2 %v2536_v0, %s4663_s19  ;;  %v6214_v54 = vpop.xlane.xlu2 %2451  ;;  %v6222_v0 = vpop.xlane.xlu1 %2382 }
 0xcbb   : > { %2557 = vrot.lane.b32.xlu1 %v2537_v15, %s4663_s19 }
 0xcc2   : > { %2561 = vrot.lane.b32.xlu2 %v2539_v53, %s4663_s19  ;;  %v6216_v22 = vpop.xlane.xlu2 %2388  ;;  %v6226_v10 = vpop.xlane.xlu1 %2457 }
 0xcc3   : > { %2563 = vrot.lane.b32.xlu1 %v2540_v11, %s4663_s19  ;;  %7251 = vst [vmem:[#allocation22_spill] sm:$0xff] %v6226_v10 }
 0xcca   : > { %v6220_v36 = vpop.xlane.xlu2 %2508  ;;  %v6230_v53 = vpop.xlane.xlu1 %2505 }
 0xcd2   : > { %v6224_v15 = vpop.xlane.xlu2 %2517  ;;  %v6233_v16 = vpop.xlane.xlu1 %2514 }
 0xcda   : > { %v6228_v51 = vpop.xlane.xlu2 %2526  ;;  %v6235_v50 = vpop.xlane.xlu1 %2523 }
 0xd0c   : > { %v2552_v11 = vpop.permute.xlu2 %2551 }
 0xd0d   : > { %v2576_v55 = vsel %vm641_vm1, %v2552_v11, 0.0 }
 0xd0e   : > { %2577 = vadd.xlane.f32.xlu2 %v2576_v55 }
 0xd14   : > { %v2556_v44 = vpop.permute.xlu2 %2555 }
 0xd15   : > { %v2582_v55 = vsel %vm641_vm1, %v2556_v44, 0.0 }
 0xd1c   : > { %v2562_v56 = vpop.permute.xlu2 %2561 }
 0xd24   : > { %v2554_v32 = vpop.permute.xlu0 %2553 }
 0xd25   : > { %v2550_v12 = vpop.permute.xlu1 %2549  ;;  %v2579_v35 = vsel %vm641_vm1, %v2554_v32, 0.0 }
 0xd26   : > { %v2573_v4 = vsel %vm641_vm1, %v2550_v12, 0.0  ;;  %2580 = vadd.xlane.f32.xlu1 %v2579_v35  ;;  %v2591_v12 = vsel %vm641_vm1, %v2562_v56, 0.0  ;;  %v2597_v35 = vperm.slane %v5873_v40, 3 }
 0xd27   : > { %2574 = vadd.xlane.f32.xlu0 %v2573_v4 }
 0xd2c   : > { %v2560_v57 = vpop.permute.xlu0 %2559 }
 0xd2d   : > { %v2558_v7 = vpop.permute.xlu1 %2557  ;;  %v2588_v21 = vsel %vm641_vm1, %v2560_v57, 0.0 }
 0xd2e   : > { %v2585_v11 = vsel %vm641_vm1, %v2558_v7, 0.0  ;;  %2589 = vadd.xlane.f32.xlu1 %v2588_v21 }
 0xd2f   : > { %2586 = vadd.xlane.f32.xlu2 %v2585_v11  ;;  %2583 = vadd.xlane.f32.xlu0 %v2582_v55 }
 0xd35   : > { %v2564_v1 = vpop.permute.xlu1 %2563 }
 0xd36   : > { %v2594_v32 = vsel %vm641_vm1, %v2564_v1, 0.0 }
 0xd37   : > { %2595 = vadd.xlane.f32.xlu2 %v2594_v32  ;;  %2592 = vadd.xlane.f32.xlu0 %v2591_v12 }
 0xd47   : > { %2599 = vrot.lane.b32.xlu1 %v2597_v35, %s4665_s23 }
 0xd81   : > { %v6266_v12 = vpop.xlane.xlu2 %2577 }
 0xd99   : > { %v6246_v57 = vpop.xlane.xlu1 %2580 }
 0xda1   : > { %v6248_v7 = vpop.xlane.xlu1 %2589 }
 0xda2   : > { %7252 = vst [vmem:[#allocation23_spill] sm:$0xff] %v6248_v7  ;;  %v6268_v35 = vpop.xlane.xlu2 %2586 }
 0xda3   : > { %7253 = vst [vmem:[#allocation24_spill] sm:$0xff] %v6268_v35 }
 0xdb9   : > { %v2600_v4 = vpop.permute.xlu1 %2599 }
 0xdba   : > { %v2605_v44 = vmul.f32 %v2600_v4, %v5976_v43  ;;  %v2603_v21 = vmul.f32 %v2600_v4, %v5958_v29  ;;  %v2602_v11 = vmul.f32 %v2600_v4, %v5948_v63  ;;  %v2608_v1 = vmul.f32 %v2600_v4, %v5993_v17 }
 0xdbb   : > { %v2606_v56 = vmul.f32 %v2600_v4, %v5981_v60  ;;  %v2604_v40 = vmul.f32 %v2600_v4, %v5971_v25  ;;  %v2609_v55 = vmul.f32 %v2600_v4, %v5999_v5  ;;  %v2607_v32 = vmul.f32 %v2600_v4, %v5985_v2 }
 0xdbc   : > { %2624 = vrot.lane.b32.xlu1 %v2605_v44, %s4666_s24  ;;  %2620 = vrot.lane.b32.xlu2 %v2603_v21, %s4666_s24  ;;  %v6270_v44 = vpop.xlane.xlu2 %2595  ;;  %v6272_v21 = vpop.xlane.xlu0 %2574 }
 0xdbd   : > { %2618 = vrot.lane.b32.xlu0 %v2602_v11, %s4666_s24  ;;  %7254 = vst [vmem:[#allocation25_spill] sm:$0xff] %v6270_v44 }
 0xdc4   : > { %2630 = vrot.lane.b32.xlu1 %v2608_v1, %s4666_s24  ;;  %2626 = vrot.lane.b32.xlu2 %v2606_v56, %s4666_s24  ;;  %v6275_v56 = vpop.xlane.xlu0 %2583 }
 0xdc5   : > { %2622 = vrot.lane.b32.xlu0 %v2604_v40, %s4666_s24 }
 0xdcc   : > { %2632 = vrot.lane.b32.xlu2 %v2609_v55, %s4666_s24  ;;  %v6278_v55 = vpop.xlane.xlu0 %2592 }
 0xdcd   : > { %2628 = vrot.lane.b32.xlu0 %v2607_v32, %s4666_s24  ;;  %7255 = vst [vmem:[#allocation26_spill] sm:$0xff] %v6278_v55 }
 0xe16   : > { %v2621_v11 = vpop.permute.xlu2 %2620 }
 0xe17   : > { %v2645_v1 = vsel %vm641_vm1, %v2621_v11, 0.0 }
 0xe18   : > { %2646 = vadd.xlane.f32.xlu1 %v2645_v1 }
 0xe1e   : > { %v2627_v40 = vpop.permute.xlu2 %2626 }
 0xe1f   : > { %v2654_v4 = vsel %vm641_vm1, %v2627_v40, 0.0 }
 0xe20   : > { %2655 = vadd.xlane.f32.xlu1 %v2654_v4 }
 0xe26   : > { %v2633_v55 = vpop.permute.xlu2 %2632 }
 0xe27   : > { %v2663_v7 = vsel %vm641_vm1, %v2633_v55, 0.0 }
 0xe2e   : > { %v2625_v32 = vpop.permute.xlu1 %2624 }
 0xe2f   : > { %v2619_v10 = vpop.permute.xlu0 %2618  ;;  %v2651_v11 = vsel %vm641_vm1, %v2625_v32, 0.0 }
 0xe30   : > { %v2642_v35 = vsel %vm641_vm1, %v2619_v10, 0.0  ;;  %v2666_v10 = vperm.slane %v5848_v38, 3 }
 0xe31   : > { %2643 = vadd.xlane.f32.xlu0 %v2642_v35 }
 0xe36   : > { %v2631_v44 = vpop.permute.xlu1 %2630 }
 0xe37   : > { %v2660_v9 = vsel %vm641_vm1, %v2631_v44, 0.0  ;;  %v2623_v23 = vpop.permute.xlu0 %2622 }
 0xe38   : > { %v2648_v1 = vsel %vm641_vm1, %v2623_v23, 0.0  ;;  %2661 = vadd.xlane.f32.xlu1 %v2660_v9  ;;  %v2737_v23 = vsel %vm1113_vm2, %v6100_v62, %v6184_v14 }
 0xe39   : > { %2652 = vadd.xlane.f32.xlu0 %v2651_v11  ;;  %2649 = vadd.xlane.f32.xlu2 %v2648_v1  ;;  %v2745_v55 = vsel %vm7256_vm4, %v2737_v23, %v6192_v3 }
 0xe3f   : > { %v2629_v40 = vpop.permute.xlu0 %2628 }
 0xe40   : > { %v2657_v4 = vsel %vm641_vm1, %v2629_v40, 0.0 }
 0xe41   : > { %2658 = vadd.xlane.f32.xlu0 %v2657_v4 }
 0xe49   : > { %2664 = vadd.xlane.f32.xlu0 %v2663_v7 }
 0xe51   : > { %2668 = vrot.lane.b32.xlu2 %v2666_v10, %s4665_s23 }
 0xe8b   : > { %v2647_v3 = vpop.xlane.xlu1 %2646 }
 0xea4   : > { %v2644_v14 = vpop.xlane.xlu0 %2643 }
 0xeac   : > { %v2650_v35 = vpop.xlane.xlu2 %2649  ;;  %v2653_v40 = vpop.xlane.xlu0 %2652 }
 0xead   : > { %v2753_v38 = vsel %vm7257_vm10, %v2745_v55, %v2650_v35 }
 0xeb4   : > { %v2669_v44 = vpop.permute.xlu2 %2668  ;;  %v2659_v4 = vpop.xlane.xlu0 %2658 }
 0xeb5   : > { %v2673_v9 = vmul.f32 %v2669_v44, %v5971_v25  ;;  %v2672_v32 = vmul.f32 %v2669_v44, %v5958_v29  ;;  %v2671_v11 = vmul.f32 %v2669_v44, %v5948_v63  ;;  %v2674_v7 = vmul.f32 %v2669_v44, %v5976_v43 }
 0xeb6   : > { %v2676_v62 = vmul.f32 %v2669_v44, %v5985_v2  ;;  %v2675_v25 = vmul.f32 %v2669_v44, %v5981_v60  ;;  %v2677_v63 = vmul.f32 %v2669_v44, %v5993_v17  ;;  %v2678_v29 = vmul.f32 %v2669_v44, %v5999_v5 }
 0xeb7   : > { %2691 = vrot.lane.b32.xlu2 %v2673_v9, %s4666_s24  ;;  %2689 = vrot.lane.b32.xlu0 %v2672_v32, %s4666_s24  ;;  %v2735_v43 = vsel %vm1113_vm2, %v6096_v20, %v6150_v31  ;;  %v2736_v17 = vsel %vm1113_vm2, %v6098_v52, %v6170_v34  ;;  %v2738_v20 = vsel %vm1113_vm2, %v6124_v19, %v6157_v46  ;;  %v2656_v52 = vpop.xlane.xlu1 %2655 }
 0xeb8   : > { %2687 = vrot.lane.b32.xlu1 %v2671_v11, %s4666_s24  ;;  %v2743_v60 = vsel %vm7256_vm4, %v2735_v43, %v6230_v53  ;;  %v2744_v5 = vsel %vm7258_vm11, %v2736_v17, %v6220_v36  ;;  %v2746_v31 = vsel %vm7256_vm4, %v2738_v20, %v6233_v16  ;;  %v2739_v34 = vsel %vm1113_vm2, %v6126_v6, %v6212_v58 }
 0xeb9   : > { %v2751_v2 = vsel %vm7257_vm10, %v2743_v60, %v2644_v14  ;;  %v2752_v1 = vsel %vm7259_vm3, %v2744_v5, %v2647_v3  ;;  %vm7260_vm10 = vmmov %vm7259_vm3  ;;  %v2740_v16 = vsel %vm1113_vm2, %v6141_v48, %v6222_v0  ;;  %v2741_v58 = vsel %vm1113_vm2, %v6155_v28, %v6182_v39  ;;  %v4346_v14 = vld [vmem:[%s5225_s30 + $0xc0] sm:$0xff]  }
 0xeba   : > { %v2754_v53 = vsel %vm7260_vm10, %v2746_v31, %v2653_v40  ;;  %vm7261_vm3 = vmmov %vm7256_vm4  ;;  %v2742_v11 = vsel %vm1113_vm2, %v6160_v27, %v6216_v22  ;;  %v4291_v5 = vunpack.c.h.bf16 %v4346_v14 }
 0xebb   : > { %v2747_v36 = vsel %vm7261_vm3, %v2739_v34, %v6224_v15  ;;  %vm7262_vm11 = vmmov %vm7260_vm10  ;;  %v2749_v32 = vsel %vm7261_vm3, %v2741_v58, %v6235_v50 }
 0xebc   : > { %v2755_v10 = vsel %vm7262_vm11, %v2747_v36, %v2656_v52  ;;  %v2665_v35 = vpop.xlane.xlu0 %2664  ;;  %vm7263_vm4 = vmmov %vm7261_vm3 }
 0xebd   : > { %v2748_v46 = vsel %vm7263_vm4, %v2740_v16, %v6194_v24  ;;  %vm7264_vm11 = vmmov %vm7260_vm10 }
 0xebe   : > { %v2756_v23 = vsel %vm7260_vm10, %v2748_v46, %v2659_v4  ;;  %vm7265_vm4 = vmmov %vm7261_vm3 }
 0xebf   : > { %2693 = vrot.lane.b32.xlu2 %v2674_v7, %s4666_s24  ;;  %2697 = vrot.lane.b32.xlu0 %v2676_v62, %s4666_s24  ;;  %v2662_v19 = vpop.xlane.xlu1 %2661  ;;  %v2750_v28 = vsel %vm7265_vm4, %v2742_v11, %v6228_v51 }
 0xec0   : > { %2695 = vrot.lane.b32.xlu1 %v2675_v25, %s4666_s24  ;;  %v2757_v24 = vsel %vm7264_vm11, %v2749_v32, %v2662_v19 }
 0xec7   : > { %2699 = vrot.lane.b32.xlu2 %v2677_v63, %s4666_s24 }
 0xec8   : > { %2701 = vrot.lane.b32.xlu1 %v2678_v29, %s4666_s24  ;;  %v4342_v29 = vld [vmem:[%s5225_s30 + $0xa0] sm:$0xff]  }
 0xec9   : > { %v4275_v60 = vunpack.c.h.bf16 %v4342_v29  ;;  %v4274_v17 = vunpack.c.l.bf16 %v4342_v29 }
 0xefd   : > { %2759 = vxpose.xlu1.b32.start [1/8] (short) (narrow) %v2751_v2, 8 }
 0xf05   : > { %2760 = vxpose.xlu1.b32.cont [2/8] (short) (narrow) %v2752_v1, 8  ;;  %v4290_v1 = vunpack.c.l.bf16 %v4346_v14 }
 0xf0d   : > { %2761 = vxpose.xlu1.b32.cont [3/8] (short) (narrow) %v2753_v38, 8  ;;  %v2758_v38 = vsel %vm7260_vm10, %v2750_v28, %v2665_v35 }
 0xf11   : > { %v2692_v44 = vpop.permute.xlu2 %2691 }
 0xf12   : > { %v2717_v27 = vsel %vm641_vm1, %v2692_v44, 0.0 }
 0xf15   : > { %2762 = vxpose.xlu1.b32.cont [4/8] (short) (narrow) %v2754_v53, 8 }
 0xf19   : > { %v2694_v0 = vpop.permute.xlu2 %2693 }
 0xf1a   : > { %v2720_v39 = vsel %vm641_vm1, %v2694_v0, 0.0 }
 0xf1d   : > { %2763 = vxpose.xlu1.b32.cont [5/8] (short) (narrow) %v2755_v10, 8  ;;  %v4350_v10 = vld [vmem:[%s5225_s30 + $0xe0] sm:$0xff]  }
 0xf1e   : > { %v4307_v44 = vunpack.c.h.bf16 %v4350_v10 }
 0xf21   : > { %v2700_v7 = vpop.permute.xlu2 %2699 }
 0xf22   : > { %v2729_v25 = vsel %vm641_vm1, %v2700_v7, 0.0 }
 0xf25   : > { %2764 = vxpose.xlu1.b32.cont [6/8] (short) (narrow) %v2756_v23, 8 }
 0xf29   : > { %v2690_v6 = vpop.permute.xlu0 %2689 }
 0xf2a   : > { %v2714_v15 = vsel %vm641_vm1, %v2690_v6, 0.0  ;;  %v2688_v9 = vpop.permute.xlu1 %2687 }
 0xf2b   : > { %v2711_v48 = vsel %vm641_vm1, %v2688_v9, 0.0  ;;  %2715 = vadd.xlane.f32.xlu2 %v2714_v15  ;;  %v4306_v9 = vunpack.c.l.bf16 %v4350_v10 }
 0xf2c   : > { %2712 = vadd.xlane.f32.xlu0 %v2711_v48 }
 0xf2d   : > { %2765 = vxpose.xlu1.b32.cont [7/8] (short) (narrow) %v2757_v24, 8 }
 0xf31   : > { %v2698_v51 = vpop.permute.xlu0 %2697 }
 0xf32   : > { %v2696_v55 = vpop.permute.xlu1 %2695  ;;  %v2726_v63 = vsel %vm641_vm1, %v2698_v51, 0.0 }
 0xf33   : > { %v2723_v50 = vsel %vm641_vm1, %v2696_v55, 0.0  ;;  %v4343_v55 = vld [vmem:[%s5225_s30 + $0xa8] sm:$0xff]  }
 0xf34   : > { %2721 = vadd.xlane.f32.xlu0 %v2720_v39  ;;  %2724 = vadd.xlane.f32.xlu2 %v2723_v50  ;;  %v4279_v7 = vunpack.c.h.bf16 %v4343_v55  ;;  %v4278_v51 = vunpack.c.l.bf16 %v4343_v55 }
 0xf35   : > { %2766 = vxpose.xlu1.b32.end [8/8] (short) (narrow) %v2758_v38, 8 }
 0xf3a   : > { %v2702_v62 = vpop.permute.xlu1 %2701 }
 0xf3b   : > { %v2732_v22 = vsel %vm641_vm1, %v2702_v62, 0.0 }
 0xf3c   : > { %2730 = vadd.xlane.f32.xlu0 %v2729_v25  ;;  %2733 = vadd.xlane.f32.xlu2 %v2732_v22 }
 0xf95   : > { %2718 = vadd.xlane.f32.xlu1 %v2717_v27 }
 0xf9d   : > { %2727 = vadd.xlane.f32.xlu1 %v2726_v63 }
 0xfa1   : > { %v6362_v43 = vpop.trf.xlu1 }
 0xfa2   : > { %v6365_v2 = vperm.slane %v6362_v43, 1  ;;  %v6368_v3 = vperm.slane %v6362_v43, 2  ;;  %v6379_v4 = vperm.slane %v6362_v43, 3 }
 0xfa4   : > { %v3021_v40 = vadd.f32 %v6365_v2, %v6180_v45  ;;  %v3020_v20 = vadd.f32 %v6365_v2, %v6153_v37  ;;  %v3244_v31 = vadd.f32 %v6368_v3, %v6266_v12  ;;  %v3243_v53 = vadd.f32 %v6368_v3, %v6272_v21  ;;  %v2716_v45 = vpop.xlane.xlu2 %2715  ;;  %v2713_v21 = vpop.xlane.xlu0 %2712 }
 0xfa5   : > { %v3463_v12 = vadd.f32 %v6379_v4, %v2716_v45  ;;  %v3462_v32 = vadd.f32 %v6379_v4, %v2713_v21  ;;  %v3023_v62 = vadd.f32 %v6365_v2, %v6163_v26  ;;  %v3022_v63 = vadd.f32 %v6365_v2, %v6174_v59 }
 0xfa6   : > { %v3029_v52 = vadd.f32 %v4275_v60, %v3021_v40  ;;  %v3028_v34 = vadd.f32 %v4274_v17, %v3020_v20  ;;  %v3252_v36 = vadd.f32 %v4291_v5, %v3244_v31  ;;  %v3251_v16 = vadd.f32 %v4290_v1, %v3243_v53  ;;  %v4347_v60 = vld [vmem:[%s5225_s30 + $0xc8] sm:$0xff]  }
 0xfa7   : > { %v3471_v11 = vadd.f32 %v4307_v44, %v3463_v12  ;;  %v3470_v39 = vadd.f32 %v4306_v9, %v3462_v32  ;;  %v3031_v14 = vadd.f32 %v4279_v7, %v3023_v62  ;;  %v3030_v5 = vadd.f32 %v4278_v51, %v3022_v63 }
 0xfa8   : > { %vm3037_vm2 = vcmp.gt.f32.partialorder %v3029_v52, 0.0  ;;  %v3045_v35 = vmul.f32 0.2, %v3029_v52  ;;  %vm3036_vm3 = vcmp.gt.f32.partialorder %v3028_v34, 0.0  ;;  %v3044_v19 = vmul.f32 0.2, %v3028_v34 }
 0xfa9   : > { %v3268_v46 = vmul.f32 0.2, %v3252_v36  ;;  %vm3260_vm11 = vcmp.gt.f32.partialorder %v3252_v36, 0.0  ;;  %v3267_v15 = vmul.f32 0.2, %v3251_v16  ;;  %vm3259_vm4 = vcmp.gt.f32.partialorder %v3251_v16, 0.0 }
 0xfaa   : > { %v3053_v37 = vsel %vm3037_vm2, %v3029_v52, %v3045_v35  ;;  %v3052_v6 = vsel %vm3036_vm3, %v3028_v34, %v3044_v19  ;;  %v3487_v38 = vmul.f32 0.2, %v3471_v11  ;;  %vm3479_vm10 = vcmp.gt.f32.partialorder %v3471_v11, 0.0 }
 0xfab   : > { %v6385_v23 = vsel %vm5250_vm5, %v3053_v37, -1e+30  ;;  %v6392_v48 = vsel %vm5254_vm6, %v3052_v6, -1e+30  ;;  %v3276_v0 = vsel %vm3260_vm11, %v3252_v36, %v3268_v46  ;;  %v3275_v28 = vsel %vm3259_vm4, %v3251_v16, %v3267_v15  ;;  %v6435_v16 = vld [vmem:[%s5225_s30 + $0xe8] sm:$0xff]  }
 0xfac   : > { %v3071_v58 = vsel %vm1253_vm9, %v6385_v23, -inf  ;;  %v3068_v24 = vsel %vm1253_vm9, %v6392_v48, -inf  ;;  %v6399_v50 = vsel %vm5250_vm5, %v3276_v0, -1e+30  ;;  %v6405_v25 = vsel %vm5254_vm6, %v3275_v28, -1e+30  ;;  %v2722_v45 = vpop.xlane.xlu0 %2721 }
 0xfad   : > { %3072 = vmax.xlane.f32.xlu2 %v3071_v58  ;;  %3069 = vmax.xlane.f32.xlu0 %v3068_v24  ;;  %v3294_v22 = vsel %vm1253_vm9, %v6399_v50, -inf  ;;  %v3486_v27 = vmul.f32 0.2, %v3470_v39  ;;  %vm3478_vm2 = vcmp.gt.f32.partialorder %v3470_v39, 0.0  ;;  %v3291_v29 = vsel %vm1253_vm9, %v6405_v25, -inf  ;;  %v4344_v24 = vld [vmem:[%s5225_s30 + $0xb0] sm:$0xff]  }
 0xfae   : > { %v3495_v26 = vsel %vm3479_vm10, %v3471_v11, %v3487_v38  ;;  %v3047_v59 = vmul.f32 0.2, %v3031_v14  ;;  %v4295_v40 = vunpack.c.h.bf16 %v4347_v60  ;;  %v3246_v20 = vadd.f32 %v6368_v3, %v6275_v56 }
 0xfaf   : > { %v3494_v17 = vsel %vm3478_vm2, %v3470_v39, %v3486_v27  ;;  %v6418_v1 = vsel %vm5250_vm5, %v3495_v26, -1e+30  ;;  %vm3039_vm3 = vcmp.gt.f32.partialorder %v3031_v14, 0.0  ;;  %v3046_v52 = vmul.f32 0.2, %v3030_v5 }
 0xfb0   : > { %v6424_v31 = vsel %vm5254_vm6, %v3494_v17, -1e+30  ;;  %v3513_v53 = vsel %vm1253_vm9, %v6418_v1, -inf  ;;  %v4294_v34 = vunpack.c.l.bf16 %v4347_v60  ;;  %v3245_v36 = vadd.f32 %v6368_v3, %v6246_v57  ;;  %v6483_v60 = vld [vmem:[%s5225_s30 + $0x98] sm:$0xff]  }
 0xfb1   : > { %vm3038_vm11 = vcmp.gt.f32.partialorder %v3030_v5, 0.0  ;;  %v3510_v10 = vsel %vm1253_vm9, %v6424_v31, -inf  ;;  %v3055_v56 = vsel %vm3039_vm3, %v3031_v14, %v3047_v59  ;;  %v3254_v35 = vadd.f32 %v4295_v40, %v3246_v20  ;;  %v6480_v14 = vld [vmem:[%s5225_s30 + $0x90] sm:$0xff]  }
 0xfb2   : > { %v3054_v19 = vsel %vm3038_vm11, %v3030_v5, %v3046_v52  ;;  %v3253_v37 = vadd.f32 %v4294_v34, %v3245_v36  ;;  %v6439_v57 = vsel %vm5275_vm12, %v3055_v56, -1e+30  ;;  %v4311_v46 = vunpack.c.h.bf16 %v6435_v16  ;;  %v6492_v52 = vld [vmem:[%s5225_s30 + $0xd0] sm:$0xff]  }
 0xfb3   : > { %v3465_v44 = vadd.f32 %v6379_v4, %v2722_v45  ;;  %v3270_v12 = vmul.f32 0.2, %v3254_v35  ;;  %v6445_v21 = vsel %vm5279_vm13, %v3054_v19, -1e+30  ;;  %vm3262_vm4 = vcmp.gt.f32.partialorder %v3254_v35, 0.0 }
 0xfb4   : > { %v3077_v6 = vsel %vm1253_vm9, %v6439_v57, -inf  ;;  %v3269_v58 = vmul.f32 0.2, %v3253_v37  ;;  %vm3261_vm10 = vcmp.gt.f32.partialorder %v3253_v37, 0.0  ;;  %v3074_v9 = vsel %vm1253_vm9, %v6445_v21, -inf }
 0xfb5   : > { %3295 = vmax.xlane.f32.xlu2 %v3294_v22  ;;  %3292 = vmax.xlane.f32.xlu0 %v3291_v29  ;;  %v3473_v15 = vadd.f32 %v4311_v46, %v3465_v44  ;;  %v3278_v32 = vsel %vm3262_vm4, %v3254_v35, %v3270_v12  ;;  %v4283_v28 = vunpack.c.h.bf16 %v4344_v24  ;;  %v3025_v39 = vadd.f32 %v6365_v2, %v6214_v54  ;;  %v6470_v54 = vld [vmem:[%s5225_s30 + $0x80] sm:$0xff]   ;;  %v7266_v35 = vld [vmem:[#allocation23_spill] sm:$0xff] }
 0xfb6   : > { %3176 = vrot.lane.b32.xlu1 %v6011_v8, %s4664_s20  ;;  %v3277_v0 = vsel %vm3261_vm10, %v3253_v37, %v3269_v58  ;;  %v6454_v11 = vsel %vm5275_vm12, %v3278_v32, -1e+30  ;;  %v6465_v62 = vperm.slane %v6362_v43, 0  ;;  %v4259_v26 = vunpack.c.h.bf16 %v6470_v54  ;;  %v7267_v32 = vld [vmem:[#allocation21_spill] sm:$0xff] }
 0xfb7   : > { %v3489_v55 = vmul.f32 0.2, %v3473_v15  ;;  %v6460_v38 = vsel %vm5279_vm13, %v3277_v0, -1e+30  ;;  %vm3481_vm2 = vcmp.gt.f32.partialorder %v3473_v15, 0.0  ;;  %v3300_v7 = vsel %vm1253_vm9, %v6454_v11, -inf }
 0xfb8   : > { %v3297_v22 = vsel %vm1253_vm9, %v6460_v38, -inf  ;;  %v3033_v51 = vadd.f32 %v4283_v28, %v3025_v39  ;;  %v2810_v43 = vadd.f32 %v6465_v62, %v6109_v42  ;;  %v4267_v5 = vunpack.c.h.bf16 %v6480_v14 }
 0xfb9   : > { %v3497_v27 = vsel %vm3481_vm2, %v3473_v15, %v3489_v55  ;;  %v2814_v59 = vadd.f32 %v6465_v62, %v6131_v49  ;;  %v2816_v34 = vadd.f32 %v6465_v62, %v6178_v47  ;;  %v4299_v56 = vunpack.c.h.bf16 %v6492_v52 }
 0xfba   : > { %v6474_v63 = vsel %vm5275_vm12, %v3497_v27, -1e+30  ;;  %v3049_v29 = vmul.f32 0.2, %v3033_v51  ;;  %vm3041_vm3 = vcmp.gt.f32.partialorder %v3033_v51, 0.0  ;;  %v2818_v20 = vadd.f32 %v4259_v26, %v2810_v43  ;;  %v7268_v43 = vld [vmem:[#allocation15_spill] sm:$0xff] }
 0xfbb   : > { %v3519_v17 = vsel %vm1253_vm9, %v6474_v63, -inf  ;;  %v6494_v42 = vadd.f32 %v4267_v5, %v2814_v59  ;;  %v3248_v49 = vadd.f32 %v6368_v3, %v7266_v35  ;;  %v4310_v30 = vunpack.c.l.bf16 %v6435_v16 }
 0xfbc   : > { %v3057_v40 = vsel %vm3041_vm3, %v3033_v51, %v3049_v29  ;;  %vm2826_vm11 = vcmp.gt.f32.partialorder %v2818_v20, 0.0  ;;  %v3024_v0 = vadd.f32 %v6365_v2, %v7267_v32  ;;  %v4352_v51 = vld [vmem:[%s5225_s30 + $0xf0] sm:$0xff]   ;;  %v2725_v29 = vpop.xlane.xlu2 %2724  ;;  %v4258_v26 = vunpack.c.l.bf16 %v6470_v54 }
 0xfbd   : > { %3514 = vmax.xlane.f32.xlu2 %v3513_v53  ;;  %3511 = vmax.xlane.f32.xlu0 %v3510_v10  ;;  %v4271_v53 = vunpack.c.h.bf16 %v6483_v60  ;;  %v6500_v36 = vsel %vm5303_vm7, %v3057_v40, -1e+30  ;;  %v2834_v10 = vmul.f32 0.2, %v2818_v20  ;;  %v3256_v46 = vadd.f32 %v4299_v56, %v3248_v49  ;;  %v7269_v40 = vld [vmem:[#allocation22_spill] sm:$0xff] }
 0xfbe   : > { %3616 = vrot.lane.b32.xlu1 %v6005_v18, %s4666_s24  ;;  %v3083_v19 = vsel %vm1253_vm9, %v6500_v36, -inf  ;;  %v2809_v16 = vadd.f32 %v6465_v62, %v7268_v43 }
 0xfbf   : > { %v6505_v45 = vadd.f32 %v4271_v53, %v2816_v34  ;;  %v2842_v37 = vsel %vm2826_vm11, %v2818_v20, %v2834_v10  ;;  %v3272_v44 = vmul.f32 0.2, %v3256_v46  ;;  %vm3264_vm4 = vcmp.gt.f32.partialorder %v3256_v46, 0.0 }
 0xfc0   : > { %v6511_v47 = vsel %vm5250_vm5, %v2842_v37, -1e+30  ;;  %v3027_v20 = vadd.f32 %v6365_v2, %v7269_v40  ;;  %v2817_v49 = vadd.f32 %v4258_v26, %v2809_v16 }
 0xfc1   : > { %v2860_v12 = vsel %vm1253_vm9, %v6511_v47, -inf }
 0xfc2   : > { %vm2825_vm3 = vcmp.gt.f32.partialorder %v2817_v49, 0.0 }
 0xfc5   : > { %3078 = vmax.xlane.f32.xlu2 %v3077_v6  ;;  %3075 = vmax.xlane.f32.xlu0 %v3074_v9  ;;  %v3280_v6 = vsel %vm3264_vm4, %v3256_v46, %v3272_v44  ;;  %v4282_v9 = vunpack.c.l.bf16 %v4344_v24 }
 0xfc6   : > { %v6517_v58 = vsel %vm5303_vm7, %v3280_v6, -1e+30 }
 0xfc7   : > { %v3306_v15 = vsel %vm1253_vm9, %v6517_v58, -inf }
 0xfcd   : > { %3301 = vmax.xlane.f32.xlu2 %v3300_v7  ;;  %3298 = vmax.xlane.f32.xlu0 %v3297_v22  ;;  %v3032_v7 = vadd.f32 %v4282_v9, %v3024_v0  ;;  %v6526_v22 = vld [vmem:[%s5225_s30 + $0xb8] sm:$0xff]   ;;  %v7271_v9 = vld [vmem:[#allocation24_spill] sm:$0xff]  ;;  %v6549_v0 = vpop.xlane.xlu2 %2733 }
 0xfce   : > { %v4287_v24 = vunpack.c.h.bf16 %v6526_v22  ;;  %v3247_v32 = vadd.f32 %v6368_v3, %v7271_v9 }
 0xfcf   : > { %v3048_v59 = vmul.f32 0.2, %v3032_v7  ;;  %vm3040_vm10 = vcmp.gt.f32.partialorder %v3032_v7, 0.0 }
 0xfd1   : > { %v3056_v35 = vsel %vm3040_vm10, %v3032_v7, %v3048_v59 }
 0xfd2   : > { %v6544_v44 = vsel %vm5307_vm8, %v3056_v35, -1e+30 }
 0xfd5   : > { %3520 = vmax.xlane.f32.xlu2 %v3519_v17  ;;  %v4315_v17 = vunpack.c.h.bf16 %v4352_v51 }
 0xfdd   : > { %3084 = vmax.xlane.f32.xlu2 %v3083_v19  ;;  %v3035_v19 = vadd.f32 %v4287_v24, %v3027_v20 }
 0xfdf   : > { %vm3043_vm11 = vcmp.gt.f32.partialorder %v3035_v19, 0.0 }
 0xfe5   : > { %2861 = vmax.xlane.f32.xlu2 %v2860_v12  ;;  %v4298_v12 = vunpack.c.l.bf16 %v6492_v52 }
 0xfe7   : > { %v3255_v26 = vadd.f32 %v4298_v12, %v3247_v32 }
 0xfe9   : > { %v3271_v59 = vmul.f32 0.2, %v3255_v26  ;;  %vm3263_vm4 = vcmp.gt.f32.partialorder %v3255_v26, 0.0 }
 0xfed   : > { %3307 = vmax.xlane.f32.xlu2 %v3306_v15  ;;  %v2833_v15 = vmul.f32 0.2, %v2817_v49 }
 0xfef   : > { %v2841_v7 = vsel %vm2825_vm3, %v2817_v49, %v2833_v15 }
 0xff0   : > { %v6563_v43 = vsel %vm5254_vm6, %v2841_v7, -1e+30 }
 0xff1   : > { %v2857_v20 = vsel %vm1253_vm9, %v6563_v43, -inf }
0x1008   : > { %v2719_v55 = vpop.xlane.xlu1 %2718 }
0x1009   : > { %v3464_v28 = vadd.f32 %v6379_v4, %v2719_v55 }
0x100b   : > { %v3472_v39 = vadd.f32 %v4310_v30, %v3464_v28  ;;  %v3051_v30 = vmul.f32 0.2, %v3035_v19  ;;  %v3080_v28 = vsel %vm1253_vm9, %v6544_v44, -inf }
0x100d   : > { %v3488_v27 = vmul.f32 0.2, %v3472_v39  ;;  %vm3480_vm5 = vcmp.gt.f32.partialorder %v3472_v39, 0.0 }
0x100f   : > { %v3496_v5 = vsel %vm3480_vm5, %v3472_v39, %v3488_v27  ;;  %v6559_v39 = vpop.xlane.xlu0 %2730  ;;  %v3059_v27 = vsel %vm3043_vm11, %v3035_v19, %v3051_v30  ;;  %v4286_v19 = vunpack.c.l.bf16 %v6526_v22  ;;  %v6590_v30 = vld [vmem:[%s5225_s30 + $0x88] sm:$0xff]  }
0x1010   : > { %v2728_v53 = vpop.xlane.xlu1 %2727  ;;  %v6537_v34 = vsel %vm5279_vm13, %v3496_v5, -1e+30  ;;  %v6567_v24 = vsel %vm5320_vm14, %v3059_v27, -1e+30  ;;  %v3466_v5 = vadd.f32 %v6379_v4, %v2725_v29  ;;  %v4262_v22 = vunpack.c.l.bf16 %v6590_v30 }
0x1011   : > { %v3467_v10 = vadd.f32 %v6379_v4, %v2728_v53  ;;  %v3516_v54 = vsel %vm1253_vm9, %v6537_v34, -inf  ;;  %v3089_v53 = vsel %vm1253_vm9, %v6567_v24, -inf }
0x1012   : > { %3517 = vmax.xlane.f32.xlu0 %v3516_v54 }
0x1013   : > { %v3475_v56 = vadd.f32 %v4315_v17, %v3467_v10  ;;  %v4314_v17 = vunpack.c.l.bf16 %v4352_v51 }
0x1015   : > { %v3491_v37 = vmul.f32 0.2, %v3475_v56  ;;  %vm3483_vm2 = vcmp.gt.f32.partialorder %v3475_v56, 0.0  ;;  %v3474_v61 = vadd.f32 %v4314_v17, %v3466_v5 }
0x1017   : > { %v3499_v6 = vsel %vm3483_vm2, %v3475_v56, %v3491_v37  ;;  %v3279_v56 = vsel %vm3263_vm4, %v3255_v26, %v3271_v59  ;;  %v3490_v49 = vmul.f32 0.2, %v3474_v61  ;;  %v7273_v37 = vld [vmem:[#allocation20_spill] sm:$0xff]  ;;  %vm3482_vm6 = vcmp.gt.f32.partialorder %v3474_v61, 0.0 }
0x1018   : > { %v6553_v55 = vsel %vm5303_vm7, %v3499_v6, -1e+30  ;;  %v6578_v35 = vsel %vm5307_vm8, %v3279_v56, -1e+30  ;;  %v3026_v12 = vadd.f32 %v6365_v2, %v7273_v37 }
0x1019   : > { %v3525_v52 = vsel %vm1253_vm9, %v6553_v55, -inf  ;;  %v3498_v9 = vsel %vm3482_vm6, %v3474_v61, %v3490_v49 }
0x101a   : > { %3081 = vmax.xlane.f32.xlu0 %v3080_v28  ;;  %3526 = vmax.xlane.f32.xlu2 %v3525_v52  ;;  %v3034_v32 = vadd.f32 %v4286_v19, %v3026_v12  ;;  %v7274_v28 = vld [vmem:[#allocation16_spill] sm:$0xff]  ;;  %v6601_v27 = vsel %vm5307_vm8, %v3498_v9, -1e+30 }
0x101b   : > { %v2811_v2 = vadd.f32 %v6465_v62, %v7274_v28 }
0x101c   : > { %v3050_v26 = vmul.f32 0.2, %v3034_v32  ;;  %vm3042_vm5 = vcmp.gt.f32.partialorder %v3034_v32, 0.0 }
0x101d   : > { %v2819_v59 = vadd.f32 %v4262_v22, %v2811_v2 }
0x101f   : > { %v2835_v56 = vmul.f32 0.2, %v2819_v59  ;;  %vm2827_vm10 = vcmp.gt.f32.partialorder %v2819_v59, 0.0 }
0x1020   : > { %v3073_v40 = vpop.xlane.xlu2 %3072  ;;  %v3070_v10 = vpop.xlane.xlu0 %3069 }
0x1021   : > { %v3092_v54 = vsub.f32 %v6392_v48, %v3070_v10  ;;  %v3093_v51 = vsub.f32 %v6385_v23, %v3073_v40  ;;  %v3303_v23 = vsel %vm1253_vm9, %v6578_v35, -inf  ;;  %v2843_v12 = vsel %vm2827_vm10, %v2819_v59, %v2835_v56 }
0x1022   : > { %2858 = vmax.xlane.f32.xlu0 %v2857_v20  ;;  %3090 = vmax.xlane.f32.xlu2 %v3089_v53  ;;  %v3522_v20 = vsel %vm1253_vm9, %v6601_v27, -inf  ;;  %v4349_v53 = vld [vmem:[%s5225_s30 + $0xd8] sm:$0xff]  }
0x1023   : > { %v3100_v29 = vmul.f32 1.442695, %v3092_v54  ;;  %v3102_v48 = vmul.f32 1.442695, %v3093_v51  ;;  %v3058_v54 = vsel %vm3042_vm5, %v3034_v32, %v3050_v26  ;;  %v4302_v51 = vunpack.c.l.bf16 %v4349_v53 }
0x1024   : > { %v6615_v37 = vsel %vm5324_vm15, %v3058_v54, -1e+30  ;;  %v6623_v32 = vsel %vm5279_vm13, %v2843_v12, -1e+30  ;;  %v4303_v2 = vunpack.c.h.bf16 %v4349_v53  ;;  %v3468_v53 = vadd.f32 %v6379_v4, %v6559_v39 }
0x1025   : > { %4525 = vpow2.f32 %v3100_v29  ;;  %v7275_v29 = vld [vmem:[#allocation26_spill] sm:$0xff] }
0x1026   : > { %4527 = vpow2.f32 %v3102_v48  ;;  %v3249_v49 = vadd.f32 %v6368_v3, %v7275_v29 }
0x1028   : > { %v6583_v6 = vpop.xlane.xlu2 %3295  ;;  %v6585_v15 = vpop.permute.xlu1 %3176  ;;  %v3257_v48 = vadd.f32 %v4302_v51, %v3249_v49 }
0x102a   : > { %3304 = vmax.xlane.f32.xlu0 %v3303_v23  ;;  %v3086_v23 = vsel %vm1253_vm9, %v6615_v37, -inf  ;;  %v3273_v28 = vmul.f32 0.2, %v3257_v48  ;;  %vm3265_vm2 = vcmp.gt.f32.partialorder %v3257_v48, 0.0 }
0x102b   : > { %v6595_v52 = vpop.eup %4525 }
0x102c   : > { %v3116_v7 = vsel %vm1253_vm9, %v6595_v52, 0.0  ;;  %v6607_v10 = vpop.eup %4527 }
0x102d   : > { %3117 = vadd.xlane.f32.xlu2 %v3116_v7  ;;  %v7277_v7 = vld [vmem:[#allocation25_spill] sm:$0xff] }
0x102e   : > { %v3250_v26 = vadd.f32 %v6368_v3, %v7277_v7 }
0x1030   : > { %v3515_v17 = vpop.xlane.xlu2 %3514  ;;  %v3617_v5 = vpop.permute.xlu1 %3616  ;;  %v3258_v59 = vadd.f32 %v4303_v2, %v3250_v26 }
0x1031   : > { %v3535_v40 = vsub.f32 %v6418_v1, %v3515_v17  ;;  %3638 = vmatpush.bf16.msra.mxu1 %v3617_v5  ;;  %v3119_v1 = vsel %vm1253_vm9, %v6607_v10, 0.0  ;;  %v2863_v17 = vsel %vm1253_vm9, %v6623_v32, -inf  ;;  %v3281_v5 = vsel %vm3265_vm2, %v3257_v48, %v3273_v28 }
0x1032   : > { %3523 = vmax.xlane.f32.xlu0 %v3522_v20  ;;  %v6634_v33 = vsel %vm5324_vm15, %v3281_v5, -1e+30  ;;  %vm3266_vm13 = vcmp.gt.f32.partialorder %v3258_v59, 0.0 }
0x1033   : > { %v3544_v61 = vmul.f32 1.442695, %v3535_v40  ;;  %v4353_v40 = vld [vmem:[%s5225_s30 + $0xf8] sm:$0xff]   ;;  %v3309_v3 = vsel %vm1253_vm9, %v6634_v33, -inf  ;;  %s7045_s30 = scalar_lea.vmem %s7158_s12, %s5825_s16 }
0x1034   : > { %v4318_v20 = vunpack.c.l.bf16 %v4353_v40  ;;  %v4319_v49 = vunpack.c.h.bf16 %v4353_v40  ;;  %v7280_v40 = vld [vmem:[#allocation17_spill] sm:$0xff] }
0x1035   : > { %4529 = vpow2.f32 %v3544_v61  ;;  %3120 = vadd.xlane.f32.xlu2 %v3119_v1  ;;  %v3274_v61 = vmul.f32 0.2, %v3258_v59  ;;  %v3469_v1 = vadd.f32 %v6379_v4, %v6549_v0  ;;  %v7279_v0 = vld [vmem:[#allocation14_spill] sm:$0xff] }
0x1036   : > { %v3476_v54 = vadd.f32 %v4318_v20, %v3468_v53  ;;  %v2812_v20 = vadd.f32 %v6465_v62, %v7280_v40 }
0x1037   : > { %v3282_v56 = vsel %vm3266_vm13, %v3258_v59, %v3274_v61  ;;  %v3477_v12 = vadd.f32 %v4319_v49, %v3469_v1  ;;  %v4263_v59 = vunpack.c.h.bf16 %v6590_v30 }
0x1038   : > { %v6642_v51 = vsel %vm5320_vm14, %v3282_v56, -1e+30  ;;  %v3492_v29 = vmul.f32 0.2, %v3476_v54  ;;  %vm3484_vm3 = vcmp.gt.f32.partialorder %v3476_v54, 0.0  ;;  %v6654_v28 = vpop.xlane.xlu2 %3078  ;;  %v4266_v56 = vunpack.c.l.bf16 %v6480_v14 }
0x1039   : > { %7278 = vst [vmem:[#allocation23_spill] sm:$0xff] %v6642_v51  ;;  %v3312_v39 = vsel %vm1253_vm9, %v6642_v51, -inf  ;;  %vm3485_vm11 = vcmp.gt.f32.partialorder %v3477_v12, 0.0  ;;  %v2820_v61 = vadd.f32 %v4263_v59, %v2812_v20  ;;  %v7283_v20 = vld [vmem:[#allocation7_spill] sm:$0xff] }
0x103a   : > { %3087 = vmax.xlane.f32.xlu0 %v3086_v23  ;;  %v3500_v48 = vsel %vm3484_vm3, %v3476_v54, %v3492_v29  ;;  %v7281_v29 = vld [vmem:[#allocation18_spill] sm:$0xff] }
0x103b   : > { %v6619_v9 = vpop.eup %4529  ;;  %v6652_v23 = vsel %vm5324_vm15, %v3500_v48, -1e+30  ;;  %v2836_v54 = vmul.f32 0.2, %v2820_v61  ;;  %v2813_v49 = vadd.f32 %v6465_v62, %v7281_v29  ;;  %vm2828_vm4 = vcmp.gt.f32.partialorder %v2820_v61, 0.0  ;;  %v7284_v29 = vld [vmem:[#allocation19_spill] sm:$0xff] }
0x103c   : > { %v3561_v22 = vsel %vm1253_vm9, %v6619_v9, 0.0  ;;  %v3528_v4 = vsel %vm1253_vm9, %v6652_v23, -inf }
0x103d   : > { %3562 = vadd.xlane.f32.xlu1 %v3561_v22  ;;  %2864 = vmax.xlane.f32.xlu2 %v2863_v17  ;;  %v3493_v22 = vmul.f32 0.2, %v3477_v12  ;;  %v3293_v17 = vpop.xlane.xlu0 %3292  ;;  %v2844_v1 = vsel %vm2828_vm4, %v2820_v61, %v2836_v54 }
0x103e   : > { %v6682_v30 = vsel %vm5275_vm12, %v2844_v1, -1e+30  ;;  %v3315_v46 = vsub.f32 %v6405_v25, %v3293_v17 }
0x103f   : > { %v3501_v2 = vsel %vm3485_vm11, %v3477_v12, %v3493_v22  ;;  %v2866_v14 = vsel %vm1253_vm9, %v6682_v30, -inf  ;;  %vm7297_vm11 = vcmask 261120  }
0x1040   : > { %v6662_v7 = vsel %vm5320_vm14, %v3501_v2, -1e+30  ;;  %v6666_v5 = vpop.xlane.xlu2 %3301  ;;  %vm7300_vm4 = vmmov %vm7297_vm11 }
0x1041   : > { %v3531_v26 = vsel %vm1253_vm9, %v6662_v7, -inf }
0x1045   : > { %3310 = vmax.xlane.f32.xlu2 %v3309_v3  ;;  %v3512_v53 = vpop.xlane.xlu0 %3511 }
0x1048   : > { %v6671_v3 = vpop.xlane.xlu2 %3520 }
0x104d   : > { %3313 = vmax.xlane.f32.xlu2 %v3312_v39  ;;  %v2821_v39 = vadd.f32 %v4266_v56, %v2813_v49  ;;  %v6676_v12 = vpop.xlane.xlu0 %3075  ;;  %v4270_v56 = vunpack.c.l.bf16 %v6483_v60  ;;  %v2815_v49 = vadd.f32 %v6465_v62, %v7284_v29 }
0x104e   : > { %3178 = vrot.lane.b32.xlu0 %v6005_v18, %s4664_s20 }
0x104f   : > { %v2837_v22 = vmul.f32 0.2, %v2821_v39  ;;  %vm2829_vm6 = vcmp.gt.f32.partialorder %v2821_v39, 0.0 }
0x1050   : > { %v6678_v48 = vpop.xlane.xlu2 %3084 }
0x1055   : > { %3529 = vmax.xlane.f32.xlu2 %v3528_v4  ;;  %v2845_v4 = vsel %vm2829_vm6, %v2821_v39, %v2837_v22  ;;  %v3323_v22 = vmul.f32 1.442695, %v3315_v46  ;;  %vm7303_vm6 = vmmov %vm7300_vm4 }
0x1056   : > { %3391 = vrot.lane.b32.xlu1 %v7279_v0, %s4663_s19  ;;  %v6690_v2 = vsel %vm5307_vm8, %v2845_v4, -1e+30  ;;  %vm2830_vm8 = vcmp.gt.f32.partialorder %v6494_v42, 0.0 }
0x1057   : > { %7282 = vst [vmem:[#allocation21_spill] sm:$0xff] %v6690_v2  ;;  %v2869_v41 = vsel %vm1253_vm9, %v6690_v2, -inf }
0x1058   : > { %v6694_v59 = vpop.xlane.xlu2 %2861 }
0x105d   : > { %3532 = vmax.xlane.f32.xlu2 %v3531_v26  ;;  %v6692_v26 = vpop.xlane.xlu0 %3298 }
0x1075   : > { %3397 = vrot.lane.b32.xlu2 %v6005_v18, %s4663_s19  ;;  %v6700_v18 = vpop.xlane.xlu2 %3307 }
0x1078   : > { %2867 = vmax.xlane.f32.xlu0 %v2866_v14  ;;  %v2823_v14 = vadd.f32 %v4270_v56, %v2815_v49  ;;  %v3316_v49 = vsub.f32 %v6399_v50, %v6583_v6 }
0x107a   : > { %v2839_v2 = vmul.f32 0.2, %v2823_v14  ;;  %vm2831_vm12 = vcmp.gt.f32.partialorder %v2823_v14, 0.0 }
0x107c   : > { %v2847_v17 = vsel %vm2831_vm12, %v2823_v14, %v2839_v2  ;;  %vm7306_vm12 = vmmov %vm7300_vm4 }
0x1080   : > { %2870 = vmax.xlane.f32.xlu1 %v2869_v41  ;;  %v3534_v41 = vsub.f32 %v6424_v31, %v3512_v53  ;;  %v6721_v31 = vsel %vm5324_vm15, %v2847_v17, -1e+30 }
0x1081   : > { %v2875_v56 = vsel %vm1253_vm9, %v6721_v31, -inf }
0x1082   : > { %v3542_v62 = vmul.f32 1.442695, %v3534_v41 }
0x1085   : > { %v6698_v40 = vpop.xlane.xlu0 %3517 }
0x1086   : > { %v3536_v13 = vsub.f32 %v6537_v34, %v6698_v40 }
0x108c   : > { %3174 = vrot.lane.b32.xlu0 %v7283_v20, %s4664_s20 }
0x108d   : > { %v3082_v61 = vpop.xlane.xlu0 %3081  ;;  %v6709_v39 = vpop.xlane.xlu2 %3526 }
0x108e   : > { %v3096_v54 = vsub.f32 %v6544_v44, %v3082_v61 }
0x1090   : > { %v3108_v1 = vmul.f32 1.442695, %v3096_v54 }
0x1092   : > { %4531 = vpow2.f32 %v3108_v1 }
0x1093   : > { %4533 = vpow2.f32 %v3323_v22 }
0x1094   : > { %4535 = vpow2.f32 %v3542_v62 }
0x1095   : > { %v2859_v4 = vpop.xlane.xlu0 %2858  ;;  %v3091_v44 = vpop.xlane.xlu2 %3090 }
0x1096   : > { %v2881_v25 = vsub.f32 %v6563_v43, %v2859_v4  ;;  %v3099_v17 = vsub.f32 %v6567_v24, %v3091_v44 }
0x1098   : > { %v6712_v51 = vpop.eup %4531  ;;  %v2889_v46 = vmul.f32 1.442695, %v2881_v25 }
0x1099   : > { %v3128_v60 = vsel %vm1253_vm9, %v6712_v51, 0.0  ;;  %v6717_v61 = vpop.eup %4533 }
0x109a   : > { %3129 = vadd.xlane.f32.xlu1 %v3128_v60  ;;  %v3339_v43 = vsel %vm1253_vm9, %v6717_v61, 0.0  ;;  %4537 = vpow2.f32 %v2889_v46  ;;  %v6728_v29 = vpop.eup %4535 }
0x109b   : > { %v3558_v4 = vsel %vm1253_vm9, %v6728_v29, 0.0 }
0x109d   : > { %v3305_v54 = vpop.xlane.xlu0 %3304 }
0x109e   : > { %v3319_v53 = vsub.f32 %v6578_v35, %v3305_v54  ;;  %3340 = vadd.xlane.f32.xlu2 %v3339_v43  ;;  %v3325_v35 = vmul.f32 1.442695, %v3316_v49 }
0x10a0   : > { %v3118_v2 = vpop.xlane.xlu2 %3117  ;;  %v3331_v19 = vmul.f32 1.442695, %v3319_v53  ;;  %v6732_v22 = vpop.eup %4537 }
0x10a1   : > { %v3140_v14 = vmax.f32 %v3118_v2, 1e-12  ;;  %v2905_v25 = vsel %vm1253_vm9, %v6732_v22, 0.0 }
0x10a2   : > { %2876 = vmax.xlane.f32.xlu1 %v2875_v56  ;;  %4539 = vpow2.f32 %v3331_v19  ;;  %v3114_v56 = vmul.f32 1.442695, %v3099_v17 }
0x10a3   : > { %4541 = vrcp.f32 %v3140_v14 }
0x10a4   : > { %4543 = vpow2.f32 %v3325_v35 }
0x10a5   : > { %v3524_v1 = vpop.xlane.xlu0 %3523 }
0x10a6   : > { %v3538_v41 = vsub.f32 %v6601_v27, %v3524_v1  ;;  %3559 = vadd.xlane.f32.xlu2 %v3558_v4 }
0x10a8   : > { %v3121_v60 = vpop.xlane.xlu2 %3120  ;;  %v3550_v6 = vmul.f32 1.442695, %v3538_v41  ;;  %v6739_v62 = vpop.eup %4539 }
0x10a9   : > { %v3141_v50 = vmax.f32 %v3121_v60, 1e-12  ;;  %v4542_v46 = vpop.eup %4541  ;;  %v3351_v27 = vsel %vm1253_vm9, %v6739_v62, 0.0 }
0x10aa   : > { %2906 = vadd.xlane.f32.xlu1 %v2905_v25  ;;  %v6744_v54 = vpop.eup %4543  ;;  %v6749_v2 = vmul.f32 %v4542_v46, %v6595_v52 }
0x10ab   : > { %4545 = vrcp.f32 %v3141_v50  ;;  %v3342_v24 = vsel %vm1253_vm9, %v6744_v54, 0.0 }
0x10ac   : > { %4547 = vpow2.f32 %v3550_v6 }
0x10ad   : > { %4549 = vpow2.f32 %v3114_v56  ;;  %v6760_v1 = vpop.xlane.xlu0 %3087 }
0x10b0   : > { %v6746_v43 = vpop.xlane.xlu2 %2864 }
0x10b1   : > { %v4546_v53 = vpop.eup %4545 }
0x10b2   : > { %3352 = vadd.xlane.f32.xlu1 %v3351_v27  ;;  %v6752_v49 = vmul.f32 %v4546_v53, %v6607_v10  ;;  %v6756_v44 = vpop.eup %4547 }
0x10b3   : > { %v3570_v14 = vsel %vm1253_vm9, %v6756_v44, 0.0  ;;  %v6765_v35 = vpop.eup %4549 }
0x10b4   : > { %v3164_v19 = vpack.c.bf16 %v6752_v49, %v6749_v2  ;;  %v3137_v25 = vsel %vm1253_vm9, %v6765_v35, 0.0 }
0x10b6   : > { %3343 = vadd.xlane.f32.xlu0 %v3342_v24  ;;  %v3095_v24 = vsub.f32 %v6439_v57, %v6654_v28 }
0x10b8   : > { %v3311_v52 = vpop.xlane.xlu2 %3310 }
0x10b9   : > { %v3321_v10 = vsub.f32 %v6634_v33, %v3311_v52  ;;  %v3563_v52 = vpop.xlane.xlu1 %3562 }
0x10ba   : > { %3571 = vadd.xlane.f32.xlu1 %v3570_v14  ;;  %v3106_v14 = vmul.f32 1.442695, %v3095_v24 }
0x10bb   : > { %v3335_v4 = vmul.f32 1.442695, %v3321_v10 }
0x10bd   : > { %4551 = vpow2.f32 %v3335_v4 }
0x10be   : > { %3172 = vrot.lane.b32.xlu2 %v7279_v0, %s4664_s20  ;;  %s552_s20 = scalar_lea.vmem %s7156_s10, %s7320_s22  ;;  %s4667_s22 = smov 32  }
0x10c0   : > { %v3179_v41 = vpop.permute.xlu0 %3178  ;;  %v6771_v60 = vpop.xlane.xlu2 %3313 }
0x10c1   : > { %3200 = vmatpush.bf16.msra.mxu3 %v3179_v41 }
0x10c2   : > { %3138 = vadd.xlane.f32.xlu1 %v3137_v25  ;;  %v2838_v25 = vmul.f32 0.2, %v6494_v42 }
0x10c3   : > { %v6774_v50 = vpop.eup %4551 }
0x10c4   : > { %v3357_v33 = vsel %vm1253_vm9, %v6774_v50, 0.0 }
0x10c5   : > { %3201 = vmatpush.bf16.msra.mxu3 %v6585_v15 }
0x10c6   : > { %3612 = vrot.lane.b32.xlu2 %v7283_v20, %s4666_s24 }
0x10c8   : > { %v6780_v6 = vpop.xlane.xlu2 %3529  ;;  %v6803_v41 = vpop.permute.xlu1 %3391 }
0x10ca   : > { %3395 = vrot.lane.b32.xlu0 %v6011_v8, %s4663_s19  ;;  %3358 = vadd.xlane.f32.xlu1 %v3357_v33  ;;  %v3317_v33 = vsub.f32 %v6460_v38, %v6692_v26  ;;  %v3318_v38 = vsub.f32 %v6454_v11, %v6666_v5  ;;  %v3546_v11 = vmul.f32 1.442695, %v3536_v13 }
0x10d0   : > { %v3533_v17 = vpop.xlane.xlu2 %3532 }
0x10d1   : > { %v3541_v15 = vsub.f32 %v6662_v7, %v3533_v17  ;;  %v2846_v17 = vsel %vm2830_vm8, %v6494_v42, %v2838_v25  ;;  %vm7309_vm8 = vmmov %vm7300_vm4 }
0x10d2   : > { %3614 = vrot.lane.b32.xlu0 %v6011_v8, %s4666_s24 }
0x10d3   : > { %v3556_v46 = vmul.f32 1.442695, %v3541_v15  ;;  %v3327_v15 = vmul.f32 1.442695, %v3317_v33 }
0x10d5   : > { %4553 = vpow2.f32 %v3556_v46  ;;  %v6818_v46 = vsel %vm5303_vm7, %v2846_v17, -1e+30  ;;  %vm2832_vm7 = vcmp.gt.f32.partialorder %v6505_v45, 0.0 }
0x10d6   : > { %4555 = vpow2.f32 %v3106_v14  ;;  %v2872_v26 = vsel %vm1253_vm9, %v6818_v46, -inf }
0x10d8   : > { %v3398_v27 = vpop.permute.xlu2 %3397 }
0x10d9   : > { %3419 = vmatpush.bf16.msra.mxu0 %v3398_v27 }
0x10da   : > { %3393 = vrot.lane.b32.xlu0 %v7283_v20, %s4663_s19  ;;  %v3094_v20 = vsub.f32 %v6445_v21, %v6676_v12 }
0x10db   : > { %v6789_v53 = vpop.eup %4553 }
0x10dc   : > { %v3579_v56 = vsel %vm1253_vm9, %v6789_v53, 0.0  ;;  %v6795_v8 = vpop.eup %4555  ;;  %v3104_v10 = vmul.f32 1.442695, %v3094_v20  ;;  %v3583_v20 = vmax.f32 %v3563_v52, 1e-12  ;;  %v3537_v52 = vsub.f32 %v6474_v63, %v6671_v3 }
0x10dd   : > { %3580 = vadd.xlane.f32.xlu1 %v3579_v56  ;;  %v3125_v7 = vsel %vm1253_vm9, %v6795_v8, 0.0  ;;  %v3329_v56 = vmul.f32 1.442695, %v3318_v38 }
0x10de   : > { %4557 = vpow2.f32 %v3104_v10 }
0x10df   : > { %4559 = vpow2.f32 %v3327_v15 }
0x10e0   : > { %4561 = vpow2.f32 %v3329_v56 }
0x10e1   : > { %4563 = vpow2.f32 %v3546_v11 }
0x10e4   : > { %v6805_v28 = vpop.eup %4557 }
0x10e5   : > { %v3122_v21 = vsel %vm1253_vm9, %v6805_v28, 0.0  ;;  %v6828_v42 = vpop.eup %4559 }
0x10eb   : > { %v6801_v4 = vpop.xlane.xlu0 %2867 }
0x10ef   : > { %3126 = vadd.xlane.f32.xlu2 %v3125_v7  ;;  %v6837_v7 = vpop.eup %4561 }
0x10f0   : > { %v3348_v40 = vsel %vm1253_vm9, %v6837_v7, 0.0 }
0x10f3   : > { %v6813_v12 = vpop.xlane.xlu1 %2870 }
0x10fe   : > { %v3175_v57 = vpop.permute.xlu0 %3174 }
0x10ff   : > { %3202 = vmatpush.bf16.msra.mxu3 %v3175_v57  ;;  %v3097_v57 = vsub.f32 %v6500_v36, %v6678_v48 }
0x1101   : > { %v3110_v33 = vmul.f32 1.442695, %v3097_v57 }
0x1104   : > { %3123 = vadd.xlane.f32.xlu0 %v3122_v21  ;;  %v6843_v21 = vpop.eup %4563 }
0x1105   : > { %v3564_v15 = vsel %vm1253_vm9, %v6843_v21, 0.0 }
0x1107   : > { %3610 = vrot.lane.b32.xlu2 %v7279_v0, %s4666_s24  ;;  %v3345_v0 = vsel %vm1253_vm9, %v6828_v42, 0.0 }
0x110c   : > { %2873 = vmax.xlane.f32.xlu0 %v2872_v26  ;;  %v3548_v26 = vmul.f32 1.442695, %v3537_v52 }
0x110d   : > { %v6826_v27 = vpop.xlane.xlu1 %3129 }
0x1111   : > { %v6832_v24 = vpop.xlane.xlu2 %3340 }
0x1114   : > { %3346 = vadd.xlane.f32.xlu0 %v3345_v0  ;;  %v3098_v0 = vsub.f32 %v6615_v37, %v6760_v1  ;;  %v2884_v37 = vsub.f32 %v6682_v30, %v6801_v4  ;;  %v3540_v4 = vsub.f32 %v6652_v23, %v6780_v6 }
0x1115   : > { %v2877_v5 = vpop.xlane.xlu1 %2876 }
0x1116   : > { %v2887_v14 = vsub.f32 %v6721_v31, %v2877_v5  ;;  %v3112_v5 = vmul.f32 1.442695, %v3098_v0 }
0x1118   : > { %v2901_v10 = vmul.f32 1.442695, %v2887_v14  ;;  %v2895_v14 = vmul.f32 1.442695, %v2884_v37 }
0x1119   : > { %v3560_v34 = vpop.xlane.xlu2 %3559 }
0x111a   : > { %4565 = vpow2.f32 %v2901_v10  ;;  %v3582_v25 = vmax.f32 %v3560_v34, 1e-12  ;;  %v3554_v34 = vmul.f32 1.442695, %v3540_v4 }
0x111b   : > { %4567 = vrcp.f32 %v3583_v20 }
0x111c   : > { %3349 = vadd.xlane.f32.xlu0 %v3348_v40  ;;  %4569 = vrcp.f32 %v3582_v25 }
0x111d   : > { %4571 = vpow2.f32 %v3110_v33 }
0x111e   : > { %4573 = vpow2.f32 %v3548_v26 }
0x111f   : > { %4575 = vpow2.f32 %v3112_v5 }
0x1120   : > { %v6845_v31 = vpop.eup %4565 }
0x1121   : > { %v2923_v36 = vsel %vm1253_vm9, %v6845_v31, 0.0  ;;  %v4568_v48 = vpop.eup %4567  ;;  %v3173_v17 = vpop.permute.xlu2 %3172 }
0x1122   : > { %2924 = vadd.xlane.f32.xlu1 %v2923_v36  ;;  %v4570_v38 = vpop.eup %4569  ;;  %3203 = vmatpush.bf16.msra.mxu3 %v3173_v17  ;;  %v6854_v56 = vmul.f32 %v4568_v48, %v6619_v9  ;;  %v2840_v9 = vmul.f32 0.2, %v6505_v45 }
0x1123   : > { %v6857_v13 = vmul.f32 %v4570_v38, %v6728_v29  ;;  %v6865_v3 = vpop.eup %4571  ;;  %v2882_v29 = vsub.f32 %v6511_v47, %v6694_v59  ;;  %v3320_v59 = vsub.f32 %v6517_v58, %v6700_v18  ;;  %v3539_v58 = vsub.f32 %v6553_v55, %v6709_v39 }
0x1124   : > { %3565 = vadd.xlane.f32.xlu0 %v3564_v15  ;;  %v3131_v11 = vsel %vm1253_vm9, %v6865_v3, 0.0  ;;  %v2848_v2 = vsel %vm2832_vm7, %v6505_v45, %v2840_v9  ;;  %v6876_v49 = vpop.eup %4573  ;;  %v2883_v55 = vsub.f32 %v6623_v32, %v6746_v43  ;;  %v3363_v39 = vmax.f32 %v6832_v24, 1e-12  ;;  %v7285_v43 = vld [vmem:[#allocation23_spill] sm:$0xff]  ;;  %vm7312_vm7 = vmmov %vm7300_vm4 }
0x1125   : > { %v3606_v63 = vpack.c.bf16 %v6854_v56, %v6857_v13  ;;  %4141 = vmatmul.msk.bf16.vlgmr.msra.gmra.mxu3 %vm1253_vm9, %v3164_v19  ;;  %v2891_v19 = vmul.f32 1.442695, %v2882_v29  ;;  %v6882_v1 = vsel %vm5320_vm14, %v2848_v2, -1e+30  ;;  %v3567_v47 = vsel %vm1253_vm9, %v6876_v49, 0.0  ;;  %v6890_v10 = vpop.eup %4575 }
0x1126   : > { %v2878_v45 = vsel %vm1253_vm9, %v6882_v1, -inf  ;;  %v3333_v30 = vmul.f32 1.442695, %v3320_v59  ;;  %v3134_v57 = vsel %vm1253_vm9, %v6890_v10, 0.0  ;;  %v3552_v33 = vmul.f32 1.442695, %v3539_v58 }
0x1127   : > { %4577 = vpow2.f32 %v2891_v19  ;;  %v2893_v15 = vmul.f32 1.442695, %v2883_v55  ;;  %v3322_v24 = vsub.f32 %v7285_v43, %v6771_v60  ;;  %v7286_v60 = vld [vmem:[#allocation21_spill] sm:$0xff]  ;;  %vm3867_vm14 = vcmask 257024  }
0x1128   : > { %4579 = vpow2.f32 %v2895_v14 }
0x1129   : > { %v3344_v20 = vpop.xlane.xlu0 %3343  ;;  %4581 = vpow2.f32 %v3333_v30  ;;  %v3613_v26 = vpop.permute.xlu2 %3612  ;;  %v3337_v5 = vmul.f32 1.442695, %v3322_v24 }
0x112a   : > { %4583 = vpow2.f32 %v3554_v34  ;;  %v3364_v6 = vmax.f32 %v3344_v20, 1e-12 }
0x112b   : > { %4585 = vpow2.f32 %v3552_v33 }
0x112c   : > { %3132 = vadd.xlane.f32.xlu0 %v3131_v11  ;;  %4587 = vrcp.f32 %v3364_v6 }
0x112d   : > { %v6892_v16 = vpop.eup %4577  ;;  %4589 = vrcp.f32 %v3363_v39 }
0x112e   : > { %v2908_v18 = vsel %vm1253_vm9, %v6892_v16, 0.0  ;;  %v6902_v25 = vpop.eup %4579  ;;  %4591 = vpow2.f32 %v2893_v15 }
0x112f   : > { %v6904_v23 = vpop.eup %4581  ;;  %v2914_v52 = vsel %vm1253_vm9, %v6902_v25, 0.0  ;;  %4593 = vpow2.f32 %v3337_v5 }
0x1130   : > { %3568 = vadd.xlane.f32.xlu2 %v3567_v47  ;;  %v3354_v36 = vsel %vm1253_vm9, %v6904_v23, 0.0  ;;  %v6913_v17 = vpop.eup %4583  ;;  %v2885_v47 = vsub.f32 %v7286_v60, %v6813_v12 }
0x1131   : > { %v6915_v38 = vpop.eup %4585  ;;  %v3576_v32 = vsel %vm1253_vm9, %v6913_v17, 0.0 }
0x1132   : > { %v4588_v0 = vpop.eup %4587  ;;  %v3573_v9 = vsel %vm1253_vm9, %v6915_v38, 0.0  ;;  %v2897_v14 = vmul.f32 1.442695, %v2885_v47 }
0x1133   : > { %v4590_v11 = vpop.eup %4589  ;;  %v3380_v2 = vmul.f32 %v4588_v0, %v6744_v54 }
0x1134   : > { %2879 = vmax.xlane.f32.xlu0 %v2878_v45  ;;  %v6924_v19 = vpop.eup %4591  ;;  %v3379_v37 = vmul.f32 %v4590_v11, %v6717_v61  ;;  %4595 = vpow2.f32 %v2897_v14 }
0x1135   : > { %v2911_v45 = vsel %vm1253_vm9, %v6924_v19, 0.0  ;;  %v6933_v20 = vpop.eup %4593 }
0x1136   : > { %v3387_v59 = vpack.c.bf16 %v3380_v2, %v3379_v37  ;;  %v3360_v61 = vsel %vm1253_vm9, %v6933_v20, 0.0 }
0x1138   : > { %3135 = vadd.xlane.f32.xlu2 %v3134_v57 }
0x113a   : > { %v6937_v54 = vpop.eup %4595 }
0x113c   : > { %2909 = vadd.xlane.f32.xlu0 %v2908_v18  ;;  %v3396_v40 = vpop.permute.xlu0 %3395 }
0x113d   : > { %3420 = vmatpush.bf16.msra.mxu0 %v3396_v40 }
0x1140   : > { %2915 = vadd.xlane.f32.xlu2 %v2914_v52 }
0x1144   : > { %3355 = vadd.xlane.f32.xlu0 %v3354_v36  ;;  %v3615_v48 = vpop.permute.xlu0 %3614 }
0x1145   : > { %3639 = vmatpush.bf16.msra.mxu1 %v3615_v48 }
0x1148   : > { %3577 = vadd.xlane.f32.xlu2 %v3576_v32 }
0x1149   : > { %3640 = vmatpush.bf16.msra.mxu1 %v3613_v26 }
0x114c   : > { %v3394_v29 = vpop.permute.xlu0 %3393  ;;  %3574 = vadd.xlane.f32.xlu0 %v3573_v9  ;;  %v3144_v9 = vmax.f32 %v6826_v27, 1e-12 }
0x114d   : > { %3421 = vmatpush.bf16.msra.mxu0 %v3394_v29 }
0x1151   : > { %3422 = vmatpush.bf16.msra.mxu0 %v6803_v41  ;;  %v2917_v41 = vsel %vm1253_vm9, %v6937_v54, 0.0 }
0x1154   : > { %2912 = vadd.xlane.f32.xlu0 %v2911_v45  ;;  %4153 = vmatmul.msk.bf16.vlgmr.msra.gmra.mxu0 %vm1253_vm9, %v3387_v59 }
0x115c   : > { %3361 = vadd.xlane.f32.xlu0 %v3360_v61 }
0x1162   : > { %v3127_v12 = vpop.xlane.xlu2 %3126 }
0x1163   : > { %v3143_v4 = vmax.f32 %v3127_v12, 1e-12 }
0x1164   : > { %2918 = vadd.xlane.f32.xlu0 %v2917_v41 }
0x1165   : > { %4597 = vrcp.f32 %v3143_v4 }
0x116a   : > { %v3611_v30 = vpop.permute.xlu2 %3610 }
0x116b   : > { %3641 = vmatpush.bf16.msra.mxu1 %v3611_v30  ;;  %v4598_v18 = vpop.eup %4597 }
0x116c   : > { %v3159_v52 = vmul.f32 %v4598_v18, %v6795_v8 }
0x116e   : > { %4165 = vmatmul.msk.bf16.vlgmr.msra.gmra.mxu1 %vm1253_vm9, %v3606_v63  ;;  %v2907_v63 = vpop.xlane.xlu1 %2906 }
0x116f   : > { %v2929_v61 = vmax.f32 %v2907_v63, 1e-12 }
0x1177   : > { %v3124_v57 = vpop.xlane.xlu0 %3123 }
0x1178   : > { %v3142_v58 = vmax.f32 %v3124_v57, 1e-12 }
0x117a   : > { %4599 = vrcp.f32 %v3142_v58 }
0x117f   : > { %v2874_v34 = vpop.xlane.xlu0 %2873 }
0x1180   : > { %v4600_v40 = vpop.eup %4599  ;;  %v2886_v33 = vsub.f32 %v6818_v46, %v2874_v34 }
0x1181   : > { %v3158_v6 = vmul.f32 %v4600_v40, %v6805_v28  ;;  %v3353_v28 = vpop.xlane.xlu1 %3352 }
0x1182   : > { %v2899_v55 = vmul.f32 1.442695, %v2886_v33 }
0x1183   : > { %v3165_v39 = vpack.c.bf16 %v3159_v52, %v3158_v6 }
0x1184   : > { %4601 = vpow2.f32 %v2899_v55 }
0x1185   : > { %4142 = vmatmul.msk.bf16.gmra.mxu3 %vm1253_vm9, %v3165_v39 }
0x1187   : > { %v3347_v56 = vpop.xlane.xlu0 %3346 }
0x1188   : > { %v3365_v48 = vmax.f32 %v3347_v56, 1e-12  ;;  %v3367_v56 = vmax.f32 %v3353_v28, 1e-12 }
0x1189   : > { %v6957_v29 = vpop.xlane.xlu1 %3571 }
0x118a   : > { %v6949_v13 = vpop.eup %4601  ;;  %4603 = vrcp.f32 %v3365_v48  ;;  %v3586_v28 = vmax.f32 %v6957_v29, 1e-12 }
0x118b   : > { %v2920_v36 = vsel %vm1253_vm9, %v6949_v13, 0.0 }
0x118c   : > { %2921 = vadd.xlane.f32.xlu2 %v2920_v36 }
0x118f   : > { %v3350_v15 = vpop.xlane.xlu0 %3349 }
0x1190   : > { %v3366_v46 = vmax.f32 %v3350_v15, 1e-12  ;;  %v4604_v8 = vpop.eup %4603 }
0x1191   : > { %v3381_v43 = vmul.f32 %v4604_v8, %v6828_v42  ;;  %v3139_v45 = vpop.xlane.xlu1 %3138 }
0x1192   : > { %4605 = vrcp.f32 %v3366_v46  ;;  %v3147_v30 = vmax.f32 %v3139_v45, 1e-12 }
0x1193   : > { %4607 = vrcp.f32 %v3144_v9 }
0x1197   : > { %v3566_v26 = vpop.xlane.xlu0 %3565 }
0x1198   : > { %v4606_v32 = vpop.eup %4605  ;;  %v3584_v2 = vmax.f32 %v3566_v26, 1e-12 }
0x1199   : > { %v3382_v24 = vmul.f32 %v4606_v32, %v6837_v7  ;;  %v4608_v60 = vpop.eup %4607 }
0x119a   : > { %v3160_v27 = vmul.f32 %v4608_v60, %v6712_v51 }
0x119b   : > { %v3388_v0 = vpack.c.bf16 %v3382_v24, %v3381_v43 }
0x119d   : > { %4154 = vmatmul.msk.bf16.gmra.mxu0 %vm1253_vm9, %v3388_v0 }
0x119f   : > { %v3133_v11 = vpop.xlane.xlu0 %3132 }
0x11a0   : > { %v3145_v5 = vmax.f32 %v3133_v11, 1e-12 }
0x11a2   : > { %4609 = vrcp.f32 %v3145_v5 }
0x11a3   : > { %v3569_v37 = vpop.xlane.xlu2 %3568  ;;  %4611 = vrcp.f32 %v3584_v2 }
0x11a4   : > { %v3585_v47 = vmax.f32 %v3569_v37, 1e-12 }
0x11a6   : > { %4613 = vrcp.f32 %v3585_v47 }
0x11a7   : > { %v2880_v59 = vpop.xlane.xlu0 %2879 }
0x11a8   : > { %v4610_v42 = vpop.eup %4609  ;;  %v2888_v7 = vsub.f32 %v6882_v1, %v2880_v59  ;;  %v3205_v12 = vpop.f32.mrf.mxu3 }
0x11a9   : > { %v3161_v14 = vmul.f32 %v4610_v42, %v6865_v3  ;;  %3671 = vrot.lane.b32.xlu2 %v3205_v12, %s4661_s26  ;;  %v4612_v57 = vpop.eup %4611 }
0x11aa   : > { %v2903_v41 = vmul.f32 1.442695, %v2888_v7  ;;  %v3600_v51 = vmul.f32 %v4612_v57, %v6843_v21 }
0x11ab   : > { %v3166_v4 = vpack.c.bf16 %v3161_v14, %v3160_v27  ;;  %v3136_v58 = vpop.xlane.xlu2 %3135 }
0x11ac   : > { %4615 = vpow2.f32 %v2903_v41  ;;  %v4614_v18 = vpop.eup %4613  ;;  %v3146_v34 = vmax.f32 %v3136_v58, 1e-12 }
0x11ad   : > { %4143 = vmatmul.msk.bf16.gmra.mxu3 %vm1253_vm9, %v3166_v4  ;;  %4617 = vrcp.f32 %v2929_v61  ;;  %v3601_v3 = vmul.f32 %v4614_v18, %v6876_v49 }
0x11ae   : > { %4619 = vrcp.f32 %v3147_v30 }
0x11af   : > { %v2910_v1 = vpop.xlane.xlu0 %2909  ;;  %4621 = vrcp.f32 %v3146_v34  ;;  %v3607_v33 = vpack.c.bf16 %v3601_v3, %v3600_v51 }
0x11b0   : > { %v2930_v40 = vmax.f32 %v2910_v1, 1e-12  ;;  %v3207_v52 = vpop.f32.mrf.mxu3 }
0x11b1   : > { %4166 = vmatmul.msk.bf16.gmra.mxu1 %vm1253_vm9, %v3607_v33  ;;  %3673 = vrot.lane.b32.xlu1 %v3207_v52, %s4661_s26 }
0x11b2   : > { %v6966_v6 = vpop.eup %4615  ;;  %4623 = vrcp.f32 %v2930_v40 }
0x11b3   : > { %v2926_v55 = vsel %vm1253_vm9, %v6966_v6, 0.0  ;;  %v4618_v39 = vpop.eup %4617  ;;  %4625 = vrcp.f32 %v3367_v56  ;;  %v2916_v24 = vpop.xlane.xlu2 %2915 }
0x11b4   : > { %2927 = vadd.xlane.f32.xlu0 %v2926_v55  ;;  %v4620_v21 = vpop.eup %4619  ;;  %v2945_v46 = vmul.f32 %v4618_v39, %v6732_v22  ;;  %v3359_v22 = vpop.xlane.xlu1 %3358  ;;  %v2932_v2 = vmax.f32 %v2916_v24, 1e-12 }
0x11b5   : > { %v4622_v63 = vpop.eup %4621  ;;  %v3163_v26 = vmul.f32 %v4620_v21, %v6765_v35 }
0x11b6   : > { %v3162_v36 = vmul.f32 %v4622_v63, %v6890_v10 }
0x11b7   : > { %v3356_v49 = vpop.xlane.xlu0 %3355 }
0x11b8   : > { %v4624_v48 = vpop.eup %4623  ;;  %v3368_v15 = vmax.f32 %v3356_v49, 1e-12  ;;  %v3167_v43 = vpack.c.bf16 %v3163_v26, %v3162_v36 }
0x11b9   : > { %v2946_v8 = vmul.f32 %v4624_v48, %v6892_v16  ;;  %v4626_v10 = vpop.eup %4625 }
0x11ba   : > { %4627 = vrcp.f32 %v3368_v15  ;;  %v3383_v16 = vmul.f32 %v4626_v10, %v6739_v62  ;;  %v3369_v62 = vmax.f32 %v3359_v22, 1e-12 }
0x11bb   : > { %v2953_v32 = vpack.c.bf16 %v2946_v8, %v2945_v46  ;;  %4629 = vrcp.f32 %v3586_v28  ;;  %v3578_v37 = vpop.xlane.xlu2 %3577 }
0x11bc   : > { %v3581_v42 = vpop.xlane.xlu1 %3580  ;;  %v3588_v27 = vmax.f32 %v3578_v37, 1e-12 }
0x11bd   : > { %4129 = vmatmul.msk.bf16.vlgmr.msra.gmra.mxu2 %vm1253_vm9, %v2953_v32  ;;  %4144 = vmatmul.msk.bf16.gmra.mxu3 %vm1253_vm9, %v3167_v43  ;;  %v3589_v14 = vmax.f32 %v3581_v42, 1e-12 }
0x11bf   : > { %v3575_v0 = vpop.xlane.xlu0 %3574 }
0x11c0   : > { %v4628_v9 = vpop.eup %4627  ;;  %v3587_v11 = vmax.f32 %v3575_v0, 1e-12 }
0x11c1   : > { %v3384_v35 = vmul.f32 %v4628_v9, %v6904_v23  ;;  %v4630_v29 = vpop.eup %4629 }
0x11c2   : > { %4631 = vrcp.f32 %v3587_v11  ;;  %v3602_v45 = vmul.f32 %v4630_v29, %v6756_v44 }
0x11c3   : > { %v3389_v5 = vpack.c.bf16 %v3384_v35, %v3383_v16  ;;  %4633 = vrcp.f32 %v2932_v2 }
0x11c4   : > { %v2925_v49 = vpop.xlane.xlu1 %2924 }
0x11c5   : > { %4155 = vmatmul.msk.bf16.gmra.mxu0 %vm1253_vm9, %v3389_v5  ;;  %v2935_v36 = vmax.f32 %v2925_v49, 1e-12 }
0x11c7   : > { %v2913_v60 = vpop.xlane.xlu0 %2912 }
0x11c8   : > { %v4632_v47 = vpop.eup %4631  ;;  %v2931_v59 = vmax.f32 %v2913_v60, 1e-12 }
0x11c9   : > { %v3603_v7 = vmul.f32 %v4632_v47, %v6915_v38  ;;  %v4634_v61 = vpop.eup %4633 }
0x11ca   : > { %4635 = vrcp.f32 %v2931_v59  ;;  %v2948_v44 = vmul.f32 %v4634_v61, %v6902_v25 }
0x11cb   : > { %v3608_v23 = vpack.c.bf16 %v3603_v7, %v3602_v45  ;;  %4637 = vrcp.f32 %v3588_v27 }
0x11cc   : > { %4639 = vrcp.f32 %v3369_v62 }
0x11cd   : > { %4167 = vmatmul.msk.bf16.gmra.mxu1 %vm1253_vm9, %v3608_v23  ;;  %4641 = vrcp.f32 %v3589_v14 }
0x11cf   : > { %v3362_v41 = vpop.xlane.xlu0 %3361 }
0x11d0   : > { %v4636_v12 = vpop.eup %4635  ;;  %v3370_v30 = vmax.f32 %v3362_v41, 1e-12 }
0x11d1   : > { %v2947_v4 = vmul.f32 %v4636_v12, %v6924_v19  ;;  %v4638_v57 = vpop.eup %4637  ;;  %v3424_v48 = vpop.f32.mrf.mxu0 }
0x11d2   : > { %4643 = vrcp.f32 %v3370_v30  ;;  %v4640_v58 = vpop.eup %4639  ;;  %v3604_v34 = vmul.f32 %v4638_v57, %v6913_v17 }
0x11d3   : > { %v2954_v38 = vpack.c.bf16 %v2948_v44, %v2947_v4  ;;  %v4642_v18 = vpop.eup %4641  ;;  %v3385_v51 = vmul.f32 %v4640_v58, %v6774_v50 }
0x11d4   : > { %v3605_v40 = vmul.f32 %v4642_v18, %v6789_v53 }
0x11d5   : > { %4130 = vmatmul.msk.bf16.gmra.mxu2 %vm1253_vm9, %v2954_v38 }
0x11d6   : > { %v3609_v19 = vpack.c.bf16 %v3605_v40, %v3604_v34  ;;  %v7035_v34 = vld [vmem:[%s552_s20] ss:$0 sm:$0xff] }
0x11d7   : > { %v2919_v25 = vpop.xlane.xlu0 %2918 }
0x11d8   : > { %v4644_v1 = vpop.eup %4643  ;;  %v2933_v52 = vmax.f32 %v2919_v25, 1e-12 }
0x11d9   : > { %v3386_v3 = vmul.f32 %v4644_v1, %v6933_v20  ;;  %v3426_v26 = vpop.f32.mrf.mxu0 }
0x11da   : > { %4645 = vrcp.f32 %v2933_v52 }
0x11db   : > { %v3390_v33 = vpack.c.bf16 %v3386_v3, %v3385_v51 }
0x11dd   : > { %4156 = vmatmul.msk.bf16.gmra.mxu0 %vm1253_vm9, %v3390_v33  ;;  %4168 = vmatmul.msk.bf16.gmra.mxu1 %vm1253_vm9, %v3609_v19 }
0x11e0   : > { %v4646_v17 = vpop.eup %4645 }
0x11e1   : > { %v2949_v50 = vmul.f32 %v4646_v17, %v6937_v54 }
0x11eb   : > { %v3643_v43 = vpop.f32.mrf.mxu1 }
0x11f3   : > { %v3645_v9 = vpop.f32.mrf.mxu1 }
0x11ff   : > { %v2922_v55 = vpop.xlane.xlu2 %2921 }
0x1200   : > { %v2934_v39 = vmax.f32 %v2922_v55, 1e-12 }
0x1202   : > { %4647 = vrcp.f32 %v2934_v39 }
0x1203   : > { %4649 = vrcp.f32 %v2935_v36 }
0x1207   : > { %v3672_v42 = vpop.permute.xlu2 %3671 }
0x1208   : > { %v4648_v56 = vpop.eup %4647  ;;  %v3210_v21 = vpop.f32.mrf.mxu3 }
0x1209   : > { %3675 = vrot.lane.b32.xlu0 %v3210_v21, %s4661_s26  ;;  %v2950_v53 = vmul.f32 %v4648_v56, %v6949_v13  ;;  %v4650_v8 = vpop.eup %4649 }
0x120a   : > { %v2951_v13 = vmul.f32 %v4650_v8, %v6845_v31 }
0x120b   : > { %v2955_v20 = vpack.c.bf16 %v2950_v53, %v2949_v50 }
0x120d   : > { %4131 = vmatmul.msk.bf16.gmra.mxu2 %vm1253_vm9, %v2955_v20 }
0x1210   : > { %v3212_v63 = vpop.f32.mrf.mxu3 }
0x1211   : > { %3677 = vrot.lane.b32.xlu2 %v3212_v63, %s4661_s26 }
0x121a   : > { %v3429_v10 = vpop.f32.mrf.mxu0 }
0x1222   : > { %v3431_v11 = vpop.f32.mrf.mxu0 }
0x1223   : > { %v3674_v23 = vpop.permute.xlu1 %3673 }
0x1227   : > { %v2928_v15 = vpop.xlane.xlu0 %2927 }
0x1228   : > { %v2936_v46 = vmax.f32 %v2928_v15, 1e-12 }
0x122a   : > { %4651 = vrcp.f32 %v2936_v46 }
0x122e   : > { %v3648_v16 = vpop.f32.mrf.mxu1 }
0x1230   : > { %v4652_v32 = vpop.eup %4651  ;;  %v3215_v54 = vpop.f32.mrf.mxu3 }
0x1231   : > { %3679 = vrot.lane.b32.xlu0 %v3215_v54, %s4661_s26  ;;  %v2952_v28 = vmul.f32 %v4652_v32, %v6966_v6 }
0x1233   : > { %v2956_v24 = vpack.c.bf16 %v2952_v28, %v2951_v13 }
0x1235   : > { %4132 = vmatmul.msk.bf16.gmra.mxu2 %vm1253_vm9, %v2956_v24  ;;  %vm7287_vm9 = vcmask 195584  }
0x1236   : > { %v3650_v35 = vpop.f32.mrf.mxu1  ;;  %vm7288_vm15 = vmmov %vm7287_vm9 }
0x1237   : > { %vm7289_vm5 = vmmov %vm7287_vm9 }
0x1238   : > { %v3217_v0 = vpop.f32.mrf.mxu3  ;;  %vm7290_vm10 = vmmov %vm7289_vm5 }
0x1239   : > { %3681 = vrot.lane.b32.xlu1 %v3217_v0, %s4661_s26  ;;  %vm7291_vm2 = vmmov %vm7289_vm5 }
0x123a   : > { %vm7292_vm13 = vmmov %vm7291_vm2 }
0x123b   : > { %vm7293_vm3 = vmmov %vm7291_vm2 }
0x1240   : > { %v3220_v22 = vpop.f32.mrf.mxu3  ;;  %v2982_v7 = vpop.f32.mrf.mxu2 }
0x1241   : > { %3703 = vrot.lane.b32.xlu1 %v3424_v48, %s4662_s27  ;;  %3683 = vrot.lane.b32.xlu2 %v3220_v22, %s4661_s26  ;;  %v3759_v36 = vsel %vm641_vm1, %v2982_v7, %v3672_v42 }
0x1242   : > { %v3434_v31 = vpop.f32.mrf.mxu0 }
0x1248   : > { %v3222_v6 = vpop.f32.mrf.mxu3  ;;  %v2984_v62 = vpop.f32.mrf.mxu2 }
0x1249   : > { %3709 = vrot.lane.b32.xlu1 %v3431_v11, %s4662_s27  ;;  %3705 = vrot.lane.b32.xlu2 %v3426_v26, %s4662_s27  ;;  %v3760_v15 = vsel %vm641_vm1, %v2984_v62, %v3674_v23 }
0x124a   : > { %3685 = vrot.lane.b32.xlu0 %v3222_v6, %s4661_s26  ;;  %v3436_v5 = vpop.f32.mrf.mxu0  ;;  %v3653_v2 = vpop.f32.mrf.mxu1 }
0x1251   : > { %3711 = vrot.lane.b32.xlu2 %v3434_v31, %s4662_s27 }
0x1252   : > { %3707 = vrot.lane.b32.xlu0 %v3429_v10, %s4662_s27  ;;  %v3655_v37 = vpop.f32.mrf.mxu1 }
0x1258   : > { %v2987_v41 = vpop.f32.mrf.mxu2 }
0x125a   : > { %3713 = vrot.lane.b32.xlu0 %v3436_v5, %s4662_s27  ;;  %v3439_v29 = vpop.f32.mrf.mxu0  ;;  %v3658_v47 = vpop.f32.mrf.mxu1 }
0x125b   : > { %3715 = vrot.lane.b32.xlu1 %v3439_v29, %s4662_s27 }
0x1260   : > { %v2989_v44 = vpop.f32.mrf.mxu2 }
0x1262   : > { %3735 = vrot.lane.b32.xlu0 %v3643_v43, %s4665_s23  ;;  %v3441_v60 = vpop.f32.mrf.mxu0  ;;  %v3660_v59 = vpop.f32.mrf.mxu1 }
0x1263   : > { %3737 = vrot.lane.b32.xlu1 %v3645_v9, %s4665_s23  ;;  %3717 = vrot.lane.b32.xlu2 %v3441_v60, %s4662_s27 }
0x126a   : > { %3741 = vrot.lane.b32.xlu0 %v3650_v35, %s4665_s23 }
0x126b   : > { %3743 = vrot.lane.b32.xlu1 %v3653_v2, %s4665_s23  ;;  %3739 = vrot.lane.b32.xlu2 %v3648_v16, %s4665_s23  ;;  %v3678_v45 = vpop.permute.xlu2 %3677 }
0x126c   : > { %v3762_v11 = vsel %vm641_vm1, %v2989_v44, %v3678_v45 }
0x1272   : > { %3747 = vrot.lane.b32.xlu0 %v3658_v47, %s4665_s23 }
0x1273   : > { %3745 = vrot.lane.b32.xlu2 %v3655_v37, %s4665_s23  ;;  %3749 = vrot.lane.b32.xlu1 %v3660_v59, %s4665_s23 }
0x127b   : > { %v3676_v61 = vpop.permute.xlu0 %3675 }
0x127c   : > { %v3761_v1 = vsel %vm641_vm1, %v2987_v41, %v3676_v61 }
0x1290   : > { %v2992_v18 = vpop.f32.mrf.mxu2 }
0x1298   : > { %v2994_v55 = vpop.f32.mrf.mxu2 }
0x129b   : > { %v7026_v27 = vpop.permute.xlu2 %3683 }
0x12a3   : > { %v3706_v14 = vpop.permute.xlu2 %3705  ;;  %v3680_v30 = vpop.permute.xlu0 %3679 }
0x12a4   : > { %v3768_v26 = vsel %vm590_vm0, %v3760_v15, %v3706_v14  ;;  %v3763_v31 = vsel %vm641_vm1, %v2992_v18, %v3680_v30  ;;  %v7304_v15 = vld [vmem:[#allocation5_spill] sm:$0xff] }
0x12ab   : > { %v3682_v12 = vpop.permute.xlu1 %3681  ;;  %v3712_v4 = vpop.permute.xlu2 %3711 }
0x12ac   : > { %v3764_v17 = vsel %vm641_vm1, %v2994_v55, %v3682_v12  ;;  %v3771_v5 = vsel %vm590_vm0, %v3763_v31, %v3712_v4 }
0x12b3   : > { %v3704_v38 = vpop.permute.xlu1 %3703 }
0x12b4   : > { %v3767_v46 = vsel %vm590_vm0, %v3759_v36, %v3704_v38 }
0x12b8   : > { %v2997_v32 = vpop.f32.mrf.mxu2 }
0x12b9   : > { %v3765_v14 = vsel %vm641_vm1, %v2997_v32, %v7026_v27 }
0x12bb   : > { %v3710_v3 = vpop.permute.xlu1 %3709 }
0x12bc   : > { %v3686_v57 = vpop.permute.xlu0 %3685  ;;  %v3770_v6 = vsel %vm590_vm0, %v3762_v11, %v3710_v3 }
0x12bd   : > { %v7028_v58 = vpop.permute.xlu2 %3717 }
0x12c0   : > { %v2999_v47 = vpop.f32.mrf.mxu2 }
0x12c1   : > { %v3766_v7 = vsel %vm641_vm1, %v2999_v47, %v3686_v57  ;;  %vm7294_vm1 = vmmov %vm7291_vm2 }
0x12c2   : > { %v3774_v27 = vsel %vm590_vm0, %v3766_v7, %v7028_v58 }
0x12c4   : > { %v3708_v51 = vpop.permute.xlu0 %3707 }
0x12c5   : > { %v3769_v40 = vsel %vm590_vm0, %v3761_v1, %v3708_v51  ;;  %v3740_v33 = vpop.permute.xlu2 %3739 }
0x12c6   : > { %v3777_v19 = vsel %vm7287_vm9, %v3769_v40, %v3740_v33  ;;  %vm7315_vm9 = vmmov %vm7300_vm4 }
0x12c7   : > { %v3788_v25 = vadd.f32 %v7035_v34, %v3777_v19 }
0x12c9   : > { %v3796_v52 = vmax.f32 %v3788_v25, 0.0 }
0x12cb   : > { %v3861_v39 = vpack.c.bf16 %v3796_v52, %v3796_v52 }
0x12cc   : > { %v3714_v56 = vpop.permute.xlu0 %3713 }
0x12cd   : > { %3870 = vst.msk [vmem:[%s7045_s30 + $0x8] sm:$0xf] %vm3867_vm14, %v3861_v39  ;;  %v3772_v21 = vsel %vm590_vm0, %v3764_v17, %v3714_v56  ;;  %v3746_v50 = vpop.permute.xlu2 %3745  ;;  %v3716_v53 = vpop.permute.xlu1 %3715  ;;  %v7298_v39 = vld [vmem:[#allocation2_spill] sm:$0xff] }
0x12ce   : > { %v3780_v20 = vsel %vm7288_vm15, %v3772_v21, %v3746_v50  ;;  %v3773_v12 = vsel %vm590_vm0, %v3765_v14, %v3716_v53  ;;  %vm3850_vm0 = vcmask 519168   ;;  %v7299_v17 = vmax.f32 %v7298_v39, 0.0 }
0x12cf   : > { %v3791_v63 = vadd.f32 %v7035_v34, %v3780_v20 }
0x12d1   : > { %v3799_v49 = vmax.f32 %v3791_v63, 0.0 }
0x12d3   : > { %v3864_v48 = vpack.c.bf16 %v3799_v49, %v3799_v49 }
0x12d4   : > { %v3736_v8 = vpop.permute.xlu0 %3735 }
0x12d5   : > { %3873 = vst.msk [vmem:[%s7045_s30 + $0x14] sm:$0xf] %vm3867_vm14, %v3864_v48  ;;  %v3775_v43 = vsel %vm7289_vm5, %v3767_v46, %v3736_v8  ;;  %v3738_v54 = vpop.permute.xlu1 %3737  ;;  %v7305_v46 = vmax.f32 %v7304_v15, 0.0 }
0x12d6   : > { %v3786_v13 = vadd.f32 %v7035_v34, %v3775_v43  ;;  %v3776_v28 = vsel %vm7290_vm10, %v3768_v26, %v3738_v54 }
0x12d7   : > { %v3787_v24 = vadd.f32 %v7035_v34, %v3776_v28 }
0x12d8   : > { %v3794_v10 = vmax.f32 %v3786_v13, 0.0 }
0x12d9   : > { %v3795_v0 = vmax.f32 %v3787_v24, 0.0 }
0x12da   : > { %v3859_v9 = vpack.c.bf16 %v3794_v10, %v3794_v10 }
0x12db   : > { %v4375_v22 = vpack.i.bf16 %v3795_v0, %v3794_v10  ;;  %v3860_v16 = vpack.c.bf16 %v3795_v0, %v3795_v0  ;;  %v7307_v0 = vld [vmem:[#allocation6_spill] sm:$0xff] }
0x12dc   : > { %3868 = vst.msk [vmem:[%s7045_s30] sm:$0xf] %vm3867_vm14, %v3859_v9  ;;  %v3742_v35 = vpop.permute.xlu0 %3741  ;;  %v7308_v9 = vmax.f32 %v7307_v0, 0.0 }
0x12dd   : > { %3869 = vst.msk [vmem:[%s7045_s30 + $0x4] sm:$0xf] %vm3867_vm14, %v3860_v16  ;;  %v3778_v2 = vsel %vm7291_vm2, %v3770_v6, %v3742_v35  ;;  %4376 = vrot.lane.b32.xlu2 %v4375_v22, %s4667_s22  ;;  %v3744_v29 = vpop.permute.xlu1 %3743  ;;  %v7310_v22 = vld [vmem:[#allocation3_spill] sm:$0xff] }
0x12de   : > { %v3789_v37 = vadd.f32 %v7035_v34, %v3778_v2  ;;  %v3779_v60 = vsel %vm7292_vm13, %v3771_v5, %v3744_v29  ;;  %v7311_v16 = vmax.f32 %v7310_v22, 0.0  ;;  %v7313_v5 = vld [vmem:[#allocation9_spill] sm:$0xff] }
0x12df   : > { %v3790_v59 = vadd.f32 %v7035_v34, %v3779_v60  ;;  %v7314_v2 = vmax.f32 %v7313_v5, 0.0 }
0x12e0   : > { %v3797_v42 = vmax.f32 %v3789_v37, 0.0  ;;  %v7316_v37 = vld [vmem:[#allocation8_spill] sm:$0xff] }
0x12e1   : > { %v3798_v45 = vmax.f32 %v3790_v59, 0.0  ;;  %v7317_v60 = vmax.f32 %v7316_v37, 0.0 }
0x12e2   : > { %v4380_v62 = vpack.i.bf16 %v3797_v42, %v3796_v52  ;;  %v3862_v23 = vpack.c.bf16 %v3797_v42, %v3797_v42 }
0x12e3   : > { %v4385_v61 = vpack.i.bf16 %v3799_v49, %v3798_v45  ;;  %v3863_v41 = vpack.c.bf16 %v3798_v45, %v3798_v45  ;;  %v7301_v49 = vld [vmem:[#allocation10_spill] sm:$0xff] }
0x12e4   : > { %3871 = vst.msk [vmem:[%s7045_s30 + $0xc] sm:$0xf] %vm3867_vm14, %v3862_v23  ;;  %v3748_v30 = vpop.permute.xlu0 %3747  ;;  %4381 = vrot.lane.b32.xlu0 %v4380_v62, %s4667_s22  ;;  %v7302_v36 = vmax.f32 %v7301_v49, 0.0 }
0x12e5   : > { %3872 = vst.msk [vmem:[%s7045_s30 + $0x10] sm:$0xf] %vm3867_vm14, %v3863_v41  ;;  %v3781_v4 = vsel %vm7293_vm3, %v3773_v12, %v3748_v30  ;;  %4386 = vrot.lane.b32.xlu1 %v4385_v61, %s4667_s22  ;;  %v3750_v44 = vpop.permute.xlu1 %3749 }
0x12e6   : > { %v3792_v38 = vadd.f32 %v7035_v34, %v3781_v4  ;;  %v3782_v57 = vsel %vm7294_vm1, %v3774_v27, %v3750_v44 }
0x12e7   : > { %v3793_v18 = vadd.f32 %v7035_v34, %v3782_v57  ;;  %v7295_v34 = vld [vmem:[#allocation4_spill] sm:$0xff] }
0x12e8   : > { %v3800_v1 = vmax.f32 %v3792_v38, 0.0  ;;  %v7296_v52 = vmax.f32 %v7295_v34, 0.0 }
0x12e9   : > { %v3801_v51 = vmax.f32 %v3793_v18, 0.0 }
0x12ea   : > { %v3865_v3 = vpack.c.bf16 %v3800_v1, %v3800_v1 }
0x12eb   : > { %v4390_v40 = vpack.i.bf16 %v3801_v51, %v3800_v1  ;;  %v3866_v33 = vpack.c.bf16 %v3801_v51, %v3801_v51 }
0x12ec   : > { %3874 = vst.msk [vmem:[%s7045_s30 + $0x18] sm:$0xf] %vm3867_vm14, %v3865_v3 }
0x12ed   : > { %3875 = vst.msk [vmem:[%s7045_s30 + $0x1c] sm:$0xf] %vm3867_vm14, %v3866_v33  ;;  %4391 = vrot.lane.b32.xlu2 %v4390_v40, %s4667_s22  ;;  %vm7318_vm14 = vmmov %vm7300_vm4 }
0x1337   : > { %v4377_v58 = vpop.permute.xlu2 %4376 }
0x1338   : > { %v4379_v19 = vunpack.i.h.bf16 %v4377_v58  ;;  %v4378_v25 = vunpack.i.l.bf16 %v4377_v58 }
0x133a   : > { %v3835_v55 = vsel %vm7297_vm11, %v7296_v52, %v4379_v19  ;;  %v3834_v56 = vsel %vm7300_vm4, %v7299_v17, %v4378_v25 }
0x133b   : > { %v3843_v21 = vpack.c.bf16 %v3835_v55, %v3835_v55  ;;  %v3842_v50 = vpack.c.bf16 %v3834_v56, %v3834_v56 }
0x133d   : > { %3852 = vst.msk [vmem:[%s7101_s18 + $0x4] sm:$0xf] %vm3850_vm0, %v3843_v21 }
0x133e   : > { %3851 = vst.msk [vmem:[%s7101_s18] sm:$0xf] %vm3850_vm0, %v3842_v50 }
0x1347   : > { %v4392_v53 = vpop.permute.xlu2 %4391 }
0x1348   : > { %v4394_v20 = vunpack.i.h.bf16 %v4392_v53  ;;  %v4393_v63 = vunpack.i.l.bf16 %v4392_v53 }
0x134a   : > { %v3841_v48 = vsel %vm7303_vm6, %v7302_v36, %v4394_v20  ;;  %v3840_v8 = vsel %vm7306_vm12, %v7305_v46, %v4393_v63 }
0x134b   : > { %v3849_v26 = vpack.c.bf16 %v3841_v48, %v3841_v48  ;;  %v3848_v32 = vpack.c.bf16 %v3840_v8, %v3840_v8 }
0x134d   : > { %3858 = vst.msk [vmem:[%s7101_s18 + $0x1c] sm:$0xf] %vm3850_vm0, %v3849_v26 }
0x134e   : > { %3857 = vst.msk [vmem:[%s7101_s18 + $0x18] sm:$0xf] %vm3850_vm0, %v3848_v32 }
0x1356   : > { %v4382_v43 = vpop.permute.xlu0 %4381 }
0x1357   : > { %v4384_v54 = vunpack.i.h.bf16 %v4382_v43  ;;  %v4383_v13 = vunpack.i.l.bf16 %v4382_v43  ;;  %v4387_v28 = vpop.permute.xlu1 %4386 }
0x1358   : > { %v4389_v24 = vunpack.i.h.bf16 %v4387_v28  ;;  %v4388_v10 = vunpack.i.l.bf16 %v4387_v28 }
0x1359   : > { %v3837_v11 = vsel %vm7309_vm8, %v7308_v9, %v4384_v54  ;;  %v3836_v31 = vsel %vm7312_vm7, %v7311_v16, %v4383_v13 }
0x135a   : > { %v3845_v6 = vpack.c.bf16 %v3837_v11, %v3837_v11  ;;  %v3844_v35 = vpack.c.bf16 %v3836_v31, %v3836_v31  ;;  %v3839_v29 = vsel %vm7315_vm9, %v7314_v2, %v4389_v24  ;;  %v3838_v47 = vsel %vm7318_vm14, %v7317_v60, %v4388_v10 }
0x135b   : > { %v3847_v59 = vpack.c.bf16 %v3839_v29, %v3839_v29  ;;  %v3846_v42 = vpack.c.bf16 %v3838_v47, %v3838_v47 }
0x135c   : > { %3854 = vst.msk [vmem:[%s7101_s18 + $0xc] sm:$0xf] %vm3850_vm0, %v3845_v6 }
0x135d   : > { %3853 = vst.msk [vmem:[%s7101_s18 + $0x8] sm:$0xf] %vm3850_vm0, %v3844_v35 }
0x135e   : > { %3856 = vst.msk [vmem:[%s7101_s18 + $0x14] sm:$0xf] %vm3850_vm0, %v3847_v59 }
0x135f   : > { %3855 = vst.msk [vmem:[%s7101_s18 + $0x10] sm:$0xf] %vm3850_vm0, %v3846_v42 }
0x1360 PF: > { %s23_s21 = sadd.s32 1, %s4659_s21  }
0x1361   : > { %p20_p4 = scmp.ge.s32.totalorder %s23_s21, 4  }
0x1363   :  { %22 = sbr.rel (!%p20_p4) target bundleno = 1 (0x1), region = 137 }

// kernel: gmae_forward.9
= control target key start
LH: loop header
LB: loop body
LE: loop exit
PB: predicated region body
PF: predicated region fallthrough
CT: control target
= control target key end

     0   :  { %s1432_s0 = inlined_call_operand.vmem [shape: bf16[128,128], index: 0, kind: input, shape index: {}]   ;;  %s1433_s1 = inlined_call_operand.vmem [shape: f32[128,1], index: 1, kind: input, shape index: {}]   ;;  %s1434_s2 = inlined_call_operand.vmem [shape: f32[128,1], index: 2, kind: input, shape index: {}]   ;;  %s1435_s3 = inlined_call_operand.vmem [shape: f32[128,32], index: 3, kind: input, shape index: {}]   ;;  %s1436_s4 = inlined_call_operand.vmem [shape: f32[1,32], index: 4, kind: input, shape index: {}]   ;;  %s1437_s5 = inlined_call_operand.vmem [shape: f32[1,32], index: 5, kind: input, shape index: {}]   ;;  %s1438_s6 = inlined_call_operand.<no memory space> [shape: f32[1,1], index: 6, kind: input, shape index: {}]   ;;  %s1439_s7 = inlined_call_operand.hbm [shape: f32[1,1], index: 7, kind: output, shape index: {}]  }
   0x1   :  { %v12_v0 = vstv %s1438_s6 }
   0x2   :  { %13 = vst [vmem:[#allocation2] sm:$0x1] %v12_v0 }
   0x3   :  { %v65_v1 = vld [vmem:[%s1435_s3 + $0x70] sm:$0xff]  ;;  %v66_v2 = vld [vmem:[%s1435_s3 + $0x78] sm:$0xff]  ;;  %v63_v3 = vld [vmem:[%s1435_s3 + $0x60] sm:$0xff] }
   0x4   :  { %v74_v4 = vpack.c.bf16 %v66_v2, %v65_v1  ;;  %v64_v5 = vld [vmem:[%s1435_s3 + $0x68] sm:$0xff]  ;;  %v61_v7 = vld [vmem:[%s1435_s3 + $0x50] sm:$0xff]  ;;  %v62_v8 = vld [vmem:[%s1435_s3 + $0x58] sm:$0xff] }
   0x5   :  { %v73_v6 = vpack.c.bf16 %v64_v5, %v63_v3  ;;  %v72_v9 = vpack.c.bf16 %v62_v8, %v61_v7  ;;  %v59_v10 = vld [vmem:[%s1435_s3 + $0x40] sm:$0xff]  ;;  %v60_v11 = vld [vmem:[%s1435_s3 + $0x48] sm:$0xff] }
   0x6   :  { %127 = vmatpush.bf16.msra.mxu0 %v74_v4  ;;  %731 = vmatpush.bf16.msra.mxu1 %v74_v4 }
   0x7   :  { %732 = vmatpush.bf16.msra.mxu2 %v74_v4  ;;  %733 = vmatpush.bf16.msra.mxu3 %v74_v4 }
   0xa   :  { %128 = vmatpush.bf16.msra.mxu0 %v73_v6  ;;  %734 = vmatpush.bf16.msra.mxu1 %v73_v6 }
   0xb   :  { %735 = vmatpush.bf16.msra.mxu2 %v73_v6  ;;  %736 = vmatpush.bf16.msra.mxu3 %v73_v6 }
   0xc   :  { %14 = vsyncpa [#allocation4], 0  ;;  %v71_v12 = vpack.c.bf16 %v60_v11, %v59_v10  ;;  %v57_v13 = vld [vmem:[%s1435_s3 + $0x30] sm:$0xff]  ;;  %v58_v14 = vld [vmem:[%s1435_s3 + $0x38] sm:$0xff]  ;;  %vm244_vm2 = vcmask 261120   ;;  %s682_s12 = sshll.u32 %s1439_s7, 4  ;;  %s683_s12 = int_to_ptr.hbm [resolvable:$true] %s682_s12 }
   0xd   :  { %v70_v15 = vpack.c.bf16 %v58_v14, %v57_v13  ;;  %v55_v16 = vld [vmem:[%s1435_s3 + $0x20] sm:$0xff]  ;;  %v56_v17 = vld [vmem:[%s1435_s3 + $0x28] sm:$0xff]  ;;  %v53_v19 = vld [vmem:[%s1435_s3 + $0x10] sm:$0xff] }
   0xe   :  { %129 = vmatpush.bf16.msra.mxu0 %v72_v9  ;;  %737 = vmatpush.bf16.msra.mxu1 %v72_v9  ;;  %v69_v18 = vpack.c.bf16 %v56_v17, %v55_v16  ;;  %v54_v20 = vld [vmem:[%s1435_s3 + $0x18] sm:$0xff]  ;;  %v51_v22 = vld [vmem:[%s1435_s3] sm:$0xff]  ;;  %v52_v23 = vld [vmem:[%s1435_s3 + $0x8] sm:$0xff] }
   0xf   :  { %738 = vmatpush.bf16.msra.mxu2 %v72_v9  ;;  %739 = vmatpush.bf16.msra.mxu3 %v72_v9  ;;  %v68_v21 = vpack.c.bf16 %v54_v20, %v53_v19  ;;  %v67_v24 = vpack.c.bf16 %v52_v23, %v51_v22  ;;  %v723_v25 = vld [vmem:[%s1432_s0] sm:$0xff]  ;;  %v725_v26 = vld [vmem:[%s1432_s0 + $0x10] sm:$0xff]  ;;  %v724_v29 = vld [vmem:[%s1432_s0 + $0x8] sm:$0xff] }
  0x10   :  { %v727_v27 = vld [vmem:[%s1432_s0 + $0x20] sm:$0xff]  ;;  %v729_v28 = vld [vmem:[%s1432_s0 + $0x30] sm:$0xff]  ;;  %v726_v30 = vld [vmem:[%s1432_s0 + $0x18] sm:$0xff] }
  0x11   :  { %v728_v31 = vld [vmem:[%s1432_s0 + $0x28] sm:$0xff]  ;;  %v730_v32 = vld [vmem:[%s1432_s0 + $0x38] sm:$0xff]  ;;  %v970_v33 = vld [vmem:[%s1436_s4] ss:$0 sm:$0xff] }
  0x12   :  { %130 = vmatpush.bf16.msra.mxu0 %v71_v12  ;;  %740 = vmatpush.bf16.msra.mxu1 %v71_v12  ;;  %v977_v38 = vld [vmem:[%s1437_s5] ss:$0 sm:$0xff] }
  0x13   :  { %741 = vmatpush.bf16.msra.mxu2 %v71_v12  ;;  %742 = vmatpush.bf16.msra.mxu3 %v71_v12 }
  0x16   :  { %131 = vmatpush.bf16.msra.mxu0 %v70_v15  ;;  %743 = vmatpush.bf16.msra.mxu1 %v70_v15 }
  0x17   :  { %744 = vmatpush.bf16.msra.mxu2 %v70_v15  ;;  %745 = vmatpush.bf16.msra.mxu3 %v70_v15 }
  0x1a   :  { %132 = vmatpush.bf16.msra.mxu0 %v69_v18  ;;  %746 = vmatpush.bf16.msra.mxu1 %v69_v18 }
  0x1b   :  { %747 = vmatpush.bf16.msra.mxu2 %v69_v18  ;;  %748 = vmatpush.bf16.msra.mxu3 %v69_v18 }
  0x1e   :  { %133 = vmatpush.bf16.msra.mxu0 %v68_v21  ;;  %749 = vmatpush.bf16.msra.mxu1 %v68_v21 }
  0x1f   :  { %750 = vmatpush.bf16.msra.mxu2 %v68_v21  ;;  %751 = vmatpush.bf16.msra.mxu3 %v68_v21 }
  0x22   :  { %134 = vmatpush.bf16.msra.mxu0 %v67_v24  ;;  %752 = vmatpush.bf16.msra.mxu1 %v67_v24 }
  0x23   :  { %753 = vmatpush.bf16.msra.mxu2 %v67_v24  ;;  %754 = vmatpush.bf16.msra.mxu3 %v67_v24 }
  0x25   :  { %135 = vmatmul.bf16.vlgmr.msra.gmra.mxu0 %v723_v25  ;;  %145 = vmatmul.bf16.vlgmr.msra.gmra.mxu1 %v725_v26 }
  0x26   :  { %155 = vmatmul.bf16.vlgmr.msra.gmra.mxu2 %v727_v27  ;;  %165 = vmatmul.bf16.vlgmr.msra.gmra.mxu3 %v729_v28 }
  0x35   :  { %140 = vmatmul.bf16.gmra.mxu0 %v724_v29  ;;  %150 = vmatmul.bf16.gmra.mxu1 %v726_v30 }
  0x36   :  { %160 = vmatmul.bf16.gmra.mxu2 %v728_v31  ;;  %170 = vmatmul.bf16.gmra.mxu3 %v730_v32 }
  0xa2   :  { %v136_v34 = vpop.f32.mrf.mxu0  ;;  %v146_v35 = vpop.f32.mrf.mxu1 }
  0xa3   :  { %v137_v36 = vadd.f32 %v970_v33, %v136_v34  ;;  %v147_v37 = vadd.f32 %v970_v33, %v146_v35 }
  0xa5   :  { %v192_v39 = vmul.f32 0.2, %v137_v36  ;;  %v196_v40 = vmul.f32 0.2, %v147_v37  ;;  %vm180_vm0 = vcmp.gt.f32.partialorder %v147_v37, 0.0  ;;  %vm176_vm1 = vcmp.gt.f32.partialorder %v137_v36, 0.0 }
  0xa7   :  { %v212_v41 = vsel %vm180_vm0, %v147_v37, %v196_v40  ;;  %v208_v42 = vsel %vm176_vm1, %v137_v36, %v192_v39 }
  0xa8   :  { %v232_v43 = vmul.f32 %v977_v38, %v212_v41  ;;  %v228_v44 = vmul.f32 %v977_v38, %v208_v42 }
  0xa9   :  { %v156_v45 = vpop.f32.mrf.mxu2  ;;  %v166_v46 = vpop.f32.mrf.mxu3 }
  0xaa   :  { %v157_v47 = vadd.f32 %v970_v33, %v156_v45  ;;  %v138_v48 = vpop.f32.mrf.mxu0  ;;  %v148_v49 = vpop.f32.mrf.mxu1  ;;  %v257_v50 = vsel %vm244_vm2, %v232_v43, 0.0  ;;  %v245_v51 = vsel %vm244_vm2, %v228_v44, 0.0  ;;  %v167_v24 = vadd.f32 %v970_v33, %v166_v46 }
  0xab   :  { %v139_v52 = vadd.f32 %v970_v33, %v138_v48  ;;  %v149_v53 = vadd.f32 %v970_v33, %v148_v49  ;;  %258 = vadd.xlane.f32.xlu2 %v257_v50  ;;  %246 = vadd.xlane.f32.xlu0 %v245_v51 }
  0xac   :  { %v200_v54 = vmul.f32 0.2, %v157_v47  ;;  %vm184_vm5 = vcmp.gt.f32.partialorder %v157_v47, 0.0  ;;  %v204_v30 = vmul.f32 0.2, %v167_v24  ;;  %vm188_vm11 = vcmp.gt.f32.partialorder %v167_v24, 0.0 }
  0xad   :  { %vm177_vm3 = vcmp.gt.f32.partialorder %v139_v52, 0.0  ;;  %v193_v55 = vmul.f32 0.2, %v139_v52  ;;  %vm181_vm4 = vcmp.gt.f32.partialorder %v149_v53, 0.0  ;;  %v197_v56 = vmul.f32 0.2, %v149_v53 }
  0xae   :  { %v216_v63 = vsel %vm184_vm5, %v157_v47, %v200_v54  ;;  %v220_v45 = vsel %vm188_vm11, %v167_v24, %v204_v30 }
  0xaf   :  { %v213_v57 = vsel %vm181_vm4, %v149_v53, %v197_v56  ;;  %v209_v58 = vsel %vm177_vm3, %v139_v52, %v193_v55  ;;  %v236_v7 = vmul.f32 %v977_v38, %v216_v63  ;;  %v240_v51 = vmul.f32 %v977_v38, %v220_v45 }
  0xb0   :  { %v233_v59 = vmul.f32 %v977_v38, %v213_v57  ;;  %v229_v60 = vmul.f32 %v977_v38, %v209_v58 }
  0xb1   :  { %v158_v61 = vpop.f32.mrf.mxu2  ;;  %v988_v62 = vpop.f32.mrf.mxu3  ;;  %v269_v13 = vsel %vm244_vm2, %v236_v7, 0.0  ;;  %v281_v57 = vsel %vm244_vm2, %v240_v51, 0.0 }
  0xb2   :  { %v141_v0 = vpop.f32.mrf.mxu0  ;;  %v151_v1 = vpop.f32.mrf.mxu1  ;;  %v260_v2 = vsel %vm244_vm2, %v233_v59, 0.0  ;;  %v248_v3 = vsel %vm244_vm2, %v229_v60, 0.0  ;;  %v159_v6 = vadd.f32 %v970_v33, %v158_v61  ;;  %v169_v56 = vadd.f32 %v970_v33, %v988_v62 }
  0xb3   :  { %v142_v4 = vadd.f32 %v970_v33, %v141_v0  ;;  %v152_v5 = vadd.f32 %v970_v33, %v151_v1  ;;  %261 = vadd.xlane.f32.xlu2 %v260_v2  ;;  %249 = vadd.xlane.f32.xlu0 %v248_v3 }
  0xb4   :  { %v201_v12 = vmul.f32 0.2, %v159_v6  ;;  %vm185_vm8 = vcmp.gt.f32.partialorder %v159_v6, 0.0  ;;  %v205_v63 = vmul.f32 0.2, %v169_v56  ;;  %vm189_vm0 = vcmp.gt.f32.partialorder %v169_v56, 0.0 }
  0xb5   :  { %v194_v8 = vmul.f32 0.2, %v142_v4  ;;  %vm182_vm6 = vcmp.gt.f32.partialorder %v152_v5, 0.0  ;;  %v198_v9 = vmul.f32 0.2, %v152_v5  ;;  %vm178_vm7 = vcmp.gt.f32.partialorder %v142_v4, 0.0 }
  0xb6   :  { %v217_v25 = vsel %vm185_vm8, %v159_v6, %v201_v12  ;;  %v221_v62 = vsel %vm189_vm0, %v169_v56, %v205_v63 }
  0xb7   :  { %v210_v10 = vsel %vm178_vm7, %v142_v4, %v194_v8  ;;  %v214_v11 = vsel %vm182_vm6, %v152_v5, %v198_v9  ;;  %v237_v29 = vmul.f32 %v977_v38, %v217_v25  ;;  %v241_v2 = vmul.f32 %v977_v38, %v221_v62  ;;  %v1028_v4 = vld [vmem:[#allocation2] ss:$0 sm:$0xff]  ;;  %v314_v62 = vld [vmem:[%s1433_s1 + $0x8] sm:$0xff] }
  0xb8   :  { %v230_v14 = vmul.f32 %v977_v38, %v210_v10  ;;  %v234_v15 = vmul.f32 %v977_v38, %v214_v11  ;;  %vm634_vm7 = vcmask 7168  }
  0xb9   :  { %v161_v16 = vpop.f32.mrf.mxu2  ;;  %v171_v17 = vpop.f32.mrf.mxu3  ;;  %v272_v41 = vsel %vm244_vm2, %v237_v29, 0.0  ;;  %v284_v3 = vsel %vm244_vm2, %v241_v2, 0.0 }
  0xba   :  { %v143_v18 = vpop.f32.mrf.mxu0  ;;  %v153_v19 = vpop.f32.mrf.mxu1  ;;  %v251_v20 = vsel %vm244_vm2, %v230_v14, 0.0  ;;  %v263_v21 = vsel %vm244_vm2, %v234_v15, 0.0  ;;  %v172_v31 = vadd.f32 %v970_v33, %v171_v17  ;;  %v162_v40 = vadd.f32 %v970_v33, %v161_v16 }
  0xbb   :  { %v144_v22 = vadd.f32 %v970_v33, %v143_v18  ;;  %v154_v23 = vadd.f32 %v970_v33, %v153_v19  ;;  %270 = vadd.xlane.f32.xlu2 %v269_v13  ;;  %252 = vadd.xlane.f32.xlu1 %v251_v20 }
  0xbc   :  { %264 = vadd.xlane.f32.xlu0 %v263_v21  ;;  %v206_v44 = vmul.f32 0.2, %v172_v31  ;;  %vm190_vm13 = vcmp.gt.f32.partialorder %v172_v31, 0.0  ;;  %v202_v49 = vmul.f32 0.2, %v162_v40  ;;  %vm186_vm15 = vcmp.gt.f32.partialorder %v162_v40, 0.0 }
  0xbd   :  { %vm179_vm9 = vcmp.gt.f32.partialorder %v144_v22, 0.0  ;;  %v195_v26 = vmul.f32 0.2, %v144_v22  ;;  %v199_v27 = vmul.f32 0.2, %v154_v23  ;;  %vm183_vm10 = vcmp.gt.f32.partialorder %v154_v23, 0.0 }
  0xbe   :  { %v222_v52 = vsel %vm190_vm13, %v172_v31, %v206_v44  ;;  %v218_v59 = vsel %vm186_vm15, %v162_v40, %v202_v49 }
  0xbf   :  { %v211_v28 = vsel %vm179_vm9, %v144_v22, %v195_v26  ;;  %v215_v42 = vsel %vm183_vm10, %v154_v23, %v199_v27  ;;  %v242_v58 = vmul.f32 %v977_v38, %v222_v52  ;;  %v238_v61 = vmul.f32 %v977_v38, %v218_v59 }
  0xc0   :  { %v231_v32 = vmul.f32 %v977_v38, %v211_v28  ;;  %v235_v48 = vmul.f32 %v977_v38, %v215_v42 }
  0xc1   :  { %v163_v34 = vpop.f32.mrf.mxu2  ;;  %v173_v35 = vpop.f32.mrf.mxu3  ;;  %v287_v0 = vsel %vm244_vm2, %v242_v58, 0.0 }
  0xc2   :  { %v164_v36 = vadd.f32 %v970_v33, %v163_v34  ;;  %v254_v37 = vsel %vm244_vm2, %v231_v32, 0.0  ;;  %v174_v39 = vadd.f32 %v970_v33, %v173_v35  ;;  %v266_v54 = vsel %vm244_vm2, %v235_v48, 0.0  ;;  %v317_v48 = vld [vmem:[%s1433_s1 + $0x20] sm:$0xff] }
  0xc3   :  { %255 = vadd.xlane.f32.xlu1 %v254_v37  ;;  %v275_v33 = vsel %vm244_vm2, %v238_v61, 0.0 }
  0xc4   :  { %vm187_vm12 = vcmp.gt.f32.partialorder %v164_v36, 0.0  ;;  %v203_v43 = vmul.f32 0.2, %v164_v36  ;;  %273 = vadd.xlane.f32.xlu0 %v272_v41  ;;  %v207_v47 = vmul.f32 0.2, %v174_v39  ;;  %vm191_vm14 = vcmp.gt.f32.partialorder %v174_v39, 0.0 }
  0xc6   :  { %v219_v46 = vsel %vm187_vm12, %v164_v36, %v203_v43  ;;  %v223_v55 = vsel %vm191_vm14, %v174_v39, %v207_v47  ;;  %vm33_vm12 = vcmask 0  }
  0xc7   :  { %v239_v50 = vmul.f32 %v977_v38, %v219_v46  ;;  %v243_v60 = vmul.f32 %v977_v38, %v223_v55 }
  0xc9   :  { %v278_v53 = vsel %vm244_vm2, %v239_v50, 0.0  ;;  %v290_v1 = vsel %vm244_vm2, %v243_v60, 0.0  ;;  %v313_v50 = vld [vmem:[%s1433_s1] sm:$0xff] }
  0xca   :  { %279 = vadd.xlane.f32.xlu2 %v278_v53  ;;  %v318_v53 = vld [vmem:[%s1433_s1 + $0x28] sm:$0xff] }
  0xcb   :  { %267 = vadd.xlane.f32.xlu1 %v266_v54 }
  0xcc   :  { %282 = vadd.xlane.f32.xlu0 %v281_v57 }
  0xd2   :  { %288 = vadd.xlane.f32.xlu2 %v287_v0 }
  0xd3   :  { %276 = vadd.xlane.f32.xlu1 %v275_v33 }
  0xd4   :  { %291 = vadd.xlane.f32.xlu0 %v290_v1 }
  0xdb   :  { %285 = vadd.xlane.f32.xlu1 %v284_v3 }
 0x11e   :  { %v259_v5 = vpop.xlane.xlu2 %258  ;;  %v247_v6 = vpop.xlane.xlu0 %246 }
 0x11f   :  { %v1031_v7 = vadd.f32 %v1028_v4, %v259_v5  ;;  %v1034_v8 = vadd.f32 %v1028_v4, %v247_v6 }
 0x121   :  { %v349_v9 = vand.u32 2147483647, %v1031_v7  ;;  %v345_v10 = vand.u32 2147483647, %v1034_v8  ;;  %v333_v52 = vmax.f32 %v1031_v7, 0.0  ;;  %v1078_v57 = vmul.f32 %v317_v48, %v1031_v7 }
 0x122   :  { %v329_v58 = vmax.f32 %v1034_v8, 0.0  ;;  %v1082_v1 = vmul.f32 %v313_v50, %v1034_v8 }
 0x123   :  { %v365_v12 = vsub.f32 0.0, %v349_v9  ;;  %v361_v14 = vsub.f32 0.0, %v345_v10 }
 0x125   :  { %v385_v16 = vmul.f32 1.442695, %v365_v12  ;;  %v377_v17 = vmul.f32 1.442695, %v361_v14 }
 0x126   :  { %v250_v11 = vpop.xlane.xlu0 %249  ;;  %v262_v13 = vpop.xlane.xlu2 %261 }
 0x127   :  { %v1039_v38 = vadd.f32 %v1028_v4, %v250_v11  ;;  %v1043_v20 = vadd.f32 %v1028_v4, %v262_v13  ;;  %760 = vpow2.f32 %v385_v16 }
 0x128   :  { %762 = vpow2.f32 %v377_v17 }
 0x129   :  { %v346_v15 = vand.u32 2147483647, %v1039_v38  ;;  %v350_v25 = vand.u32 2147483647, %v1043_v20  ;;  %v334_v33 = vmax.f32 %v1043_v20, 0.0  ;;  %v1089_v6 = vmul.f32 %v318_v53, %v1043_v20 }
 0x12a   :  { %v330_v13 = vmax.f32 %v1039_v38, 0.0  ;;  %v1100_v14 = vmul.f32 %v314_v62, %v1039_v38 }
 0x12b   :  { %v362_v18 = vsub.f32 0.0, %v346_v15  ;;  %v366_v31 = vsub.f32 0.0, %v350_v25  ;;  %v321_v15 = vld [vmem:[%s1433_s1 + $0x40] sm:$0xff] }
 0x12d   :  { %v379_v22 = vmul.f32 1.442695, %v362_v18  ;;  %v761_v29 = vpop.eup %760  ;;  %v387_v41 = vmul.f32 1.442695, %v366_v31 }
 0x12e   :  { %v253_v19 = vpop.xlane.xlu1 %252  ;;  %v271_v23 = vpop.xlane.xlu2 %270  ;;  %v445_v36 = vadd.f32 1.0, %v761_v29  ;;  %v448_v49 = vmul.f32 -0.5, %v761_v29  ;;  %v451_v63 = vand.u32 2147483647, %v761_v29 }
 0x12f   :  { %v1046_v21 = vadd.f32 %v1028_v4, %v253_v19  ;;  %v265_v27 = vpop.xlane.xlu0 %264  ;;  %764 = vpow2.f32 %v379_v22  ;;  %v1051_v28 = vadd.f32 %v1028_v4, %v271_v23  ;;  %v763_v30 = vpop.eup %762  ;;  %v606_v19 = vld [vmem:[%s1434_s2 + $0x20] sm:$0xff] }
 0x130   :  { %v1054_v32 = vadd.f32 %v1028_v4, %v265_v27  ;;  %v409_v39 = vadd.f32 1.0, %v763_v30  ;;  %v412_v51 = vmul.f32 -0.5, %v763_v30  ;;  %v415_v0 = vand.u32 2147483647, %v763_v30  ;;  %v315_v27 = vld [vmem:[%s1433_s1 + $0x10] sm:$0xff] }
 0x131   :  { %v347_v24 = vand.u32 2147483647, %v1046_v21  ;;  %v353_v37 = vand.u32 2147483647, %v1051_v28  ;;  %v449_v3 = vadd.f32 1.0, %v448_v49 }
 0x132   :  { %v351_v42 = vand.u32 2147483647, %v1054_v32  ;;  %v413_v5 = vadd.f32 1.0, %v412_v51  ;;  %vm1105_vm1 = vcmp.lt.f32.partialorder %v451_v63, 0.0004427343  ;;  %v319_v63 = vld [vmem:[%s1433_s1 + $0x30] sm:$0xff] }
 0x133   :  { %v363_v26 = vsub.f32 0.0, %v347_v24  ;;  %v369_v44 = vsub.f32 0.0, %v353_v37  ;;  %vm1109_vm2 = vcmp.lt.f32.partialorder %v415_v0, 0.0004427343  ;;  %v450_v23 = vmul.f32 %v761_v29, %v449_v3 }
 0x134   :  { %v367_v47 = vsub.f32 0.0, %v351_v42  ;;  %v414_v24 = vmul.f32 %v763_v30, %v413_v5  ;;  %v337_v30 = vmax.f32 %v1051_v28, 0.0  ;;  %v1127_v37 = vmul.f32 %v321_v15, %v1051_v28 }
 0x135   :  { %v381_v34 = vmul.f32 1.442695, %v363_v26  ;;  %v1057_v40 = vpop.eup %764  ;;  %v393_v54 = vmul.f32 1.442695, %v369_v44 }
 0x136   :  { %v256_v35 = vpop.xlane.xlu1 %255  ;;  %v418_v46 = vadd.f32 1.0, %v1057_v40  ;;  %v389_v59 = vmul.f32 1.442695, %v367_v47  ;;  %v421_v7 = vmul.f32 -0.5, %v1057_v40  ;;  %v424_v29 = vand.u32 2147483647, %v1057_v40 }
 0x137   :  { %v1061_v43 = vadd.f32 %v1028_v4, %v256_v35  ;;  %766 = vpow2.f32 %v381_v34  ;;  %v274_v60 = vpop.xlane.xlu0 %273 }
 0x138   :  { %768 = vlog2.f32 %v445_v36  ;;  %v1096_v11 = vadd.f32 %v1028_v4, %v274_v60  ;;  %v422_v31 = vadd.f32 1.0, %v421_v7  ;;  %vm1145_vm3 = vcmp.lt.f32.partialorder %v424_v29, 0.0004427343 }
 0x139   :  { %v348_v45 = vand.u32 2147483647, %v1061_v43  ;;  %770 = vlog2.f32 %v409_v39 }
 0x13a   :  { %772 = vpow2.f32 %v387_v41  ;;  %v354_v34 = vand.u32 2147483647, %v1096_v11 }
 0x13b   :  { %v364_v55 = vsub.f32 0.0, %v348_v45  ;;  %774 = vlog2.f32 %v418_v46  ;;  %v331_v45 = vmax.f32 %v1046_v21, 0.0  ;;  %v1135_v46 = vmul.f32 %v315_v27, %v1046_v21 }
 0x13c   :  { %776 = vpow2.f32 %v393_v54  ;;  %v423_v54 = vmul.f32 %v1057_v40, %v422_v31 }
 0x13d   :  { %v1075_v56 = vpop.eup %766  ;;  %v383_v10 = vmul.f32 1.442695, %v364_v55  ;;  %778 = vpow2.f32 %v389_v59  ;;  %v280_v39 = vpop.xlane.xlu2 %279  ;;  %v370_v55 = vsub.f32 0.0, %v354_v34 }
 0x13e   :  { %v769_v61 = vpop.eup %768  ;;  %v427_v8 = vadd.f32 1.0, %v1075_v56  ;;  %v268_v16 = vpop.xlane.xlu1 %267  ;;  %v430_v50 = vmul.f32 -0.5, %v1075_v56  ;;  %v1153_v62 = vadd.f32 %v1028_v4, %v280_v39  ;;  %v433_v15 = vand.u32 2147483647, %v1075_v56 }
 0x13f   :  { %v771_v2 = vpop.eup %770  ;;  %v447_v12 = vmul.f32 0.6931472, %v769_v61  ;;  %780 = vpow2.f32 %v383_v10  ;;  %v1120_v35 = vadd.f32 %v1028_v4, %v268_v16  ;;  %v283_v10 = vpop.xlane.xlu0 %282  ;;  %v1163_v16 = vmul.f32 %v319_v63, %v1054_v32 }
 0x140   :  { %v1092_v9 = vpop.eup %772  ;;  %v411_v18 = vmul.f32 0.6931472, %v771_v2  ;;  %782 = vlog2.f32 %v427_v8  ;;  %v431_v5 = vadd.f32 1.0, %v430_v50  ;;  %v395_v17 = vmul.f32 1.442695, %v370_v55  ;;  %v316_v50 = vld [vmem:[%s1433_s1 + $0x18] sm:$0xff] }
 0x141   :  { %v775_v22 = vpop.eup %774  ;;  %v454_v25 = vadd.f32 1.0, %v1092_v9  ;;  %v457_v26 = vmul.f32 -0.5, %v1092_v9  ;;  %v453_v36 = vsel %vm1105_vm1, %v450_v23, %v447_v12  ;;  %v460_v49 = vand.u32 2147483647, %v1092_v9 }
 0x142   :  { %v1129_v41 = vpop.eup %776  ;;  %v417_v42 = vsel %vm1109_vm2, %v414_v24, %v411_v18  ;;  %v420_v44 = vmul.f32 0.6931472, %v775_v22  ;;  %v557_v53 = vadd.f32 %v453_v36, %v333_v52  ;;  %v352_v59 = vand.u32 2147483647, %v1120_v35 }
 0x143   :  { %v1137_v47 = vpop.eup %778  ;;  %784 = vlog2.f32 %v454_v25  ;;  %v458_v48 = vadd.f32 1.0, %v457_v26  ;;  %v1143_v60 = vadd.f32 %v417_v42, %v329_v58  ;;  %v481_v2 = vadd.f32 1.0, %v1129_v41 }
 0x144   :  { %v426_v40 = vsel %vm1145_vm3, %v423_v54, %v420_v44  ;;  %v335_v58 = vmax.f32 %v1054_v32, 0.0  ;;  %v463_v7 = vadd.f32 1.0, %v1137_v47  ;;  %v368_v8 = vsub.f32 0.0, %v352_v59 }
 0x145   :  { %v781_v51 = vpop.eup %780  ;;  %v590_v12 = vsub.f32 %v557_v53, %v1078_v57  ;;  %v586_v22 = vsub.f32 %v1143_v60, %v1082_v1  ;;  %v1171_v23 = vmul.f32 %v1092_v9, %v458_v48  ;;  %vm1173_vm4 = vcmp.lt.f32.partialorder %v460_v49, 0.0004427343  ;;  %v289_v29 = vpop.xlane.xlu2 %288  ;;  %v602_v49 = vld [vmem:[%s1434_s2] sm:$0xff] }
 0x146   :  { %v436_v0 = vadd.f32 1.0, %v781_v51  ;;  %v783_v52 = vpop.eup %782  ;;  %v439_v3 = vmul.f32 -0.5, %v781_v51  ;;  %v356_v25 = vand.u32 2147483647, %v1153_v62  ;;  %v554_v26 = vadd.f32 %v426_v40, %v330_v13  ;;  %v277_v34 = vpop.xlane.xlu1 %276 }
 0x147   :  { %v429_v57 = vmul.f32 0.6931472, %v783_v52  ;;  %v1181_v31 = vadd.f32 %v1028_v4, %v283_v10  ;;  %v432_v1 = vmul.f32 %v1075_v56, %v431_v5  ;;  %v442_v9 = vand.u32 2147483647, %v781_v51 }
 0x148   :  { %786 = vlog2.f32 %v436_v0  ;;  %v440_v27 = vadd.f32 1.0, %v439_v3  ;;  %v391_v36 = vmul.f32 1.442695, %v368_v8  ;;  %v1184_v39 = vmul.f32 %v606_v19, %v590_v12  ;;  %v292_v19 = vpop.xlane.xlu0 %291 }
 0x149   :  { %v785_v18 = vpop.eup %784  ;;  %788 = vlog2.f32 %v481_v2  ;;  %vm1186_vm5 = vcmp.lt.f32.partialorder %v433_v15, 0.0004427343  ;;  %v372_v48 = vsub.f32 0.0, %v356_v25  ;;  %v1193_v56 = vadd.f32 %v1028_v4, %v277_v34 }
 0x14a   :  { %790 = vlog2.f32 %v463_v7  ;;  %v456_v42 = vmul.f32 0.6931472, %v785_v18  ;;  %v435_v13 = vsel %vm1186_vm5, %v432_v1, %v429_v57  ;;  %v441_v54 = vmul.f32 %v781_v51, %v440_v27  ;;  %v603_v51 = vld [vmem:[%s1434_s2 + $0x8] sm:$0xff] }
 0x14b   :  { %792 = vpow2.f32 %v395_v17  ;;  %v357_v55 = vand.u32 2147483647, %v1181_v31  ;;  %v1203_v59 = vadd.f32 %v1028_v4, %v289_v29  ;;  %v587_v60 = vsub.f32 %v554_v26, %v1100_v14 }
 0x14c   :  { %794 = vpow2.f32 %v391_v36  ;;  %v484_v61 = vmul.f32 -0.5, %v1129_v41  ;;  %v466_v63 = vmul.f32 -0.5, %v1137_v47  ;;  %vm1208_vm6 = vcmp.lt.f32.partialorder %v442_v9, 0.0004427343 }
 0x14d   :  { %v555_v40 = vadd.f32 %v435_v13, %v331_v45  ;;  %v332_v2 = vmax.f32 %v1061_v43, 0.0  ;;  %v355_v3 = vand.u32 2147483647, %v1193_v56  ;;  %v618_v7 = vmul.f32 %v602_v49, %v586_v22 }
 0x14e   :  { %v787_v38 = vpop.eup %786  ;;  %v573_v8 = vmul.f32 %v316_v50, %v1061_v43  ;;  %v338_v10 = vmax.f32 %v1096_v11, 0.0  ;;  %v399_v12 = vmul.f32 1.442695, %v372_v48  ;;  %v462_v21 = vsel %vm1173_vm4, %v1171_v23, %v456_v42  ;;  %v604_v23 = vld [vmem:[%s1434_s2 + $0x10] sm:$0xff] }
 0x14f   :  { %v438_v53 = vmul.f32 0.6931472, %v787_v38  ;;  %v789_v52 = vpop.eup %788  ;;  %v487_v45 = vand.u32 2147483647, %v1129_v41  ;;  %v373_v17 = vsub.f32 0.0, %v357_v55  ;;  %v619_v25 = vmul.f32 %v603_v51, %v587_v60  ;;  %v605_v55 = vld [vmem:[%s1434_s2 + $0x18] sm:$0xff] }
 0x150   :  { %v791_v5 = vpop.eup %790  ;;  %v359_v18 = vand.u32 2147483647, %v1203_v59  ;;  %v485_v22 = vadd.f32 1.0, %v484_v61  ;;  %v467_v26 = vadd.f32 1.0, %v466_v63  ;;  %v588_v27 = vsub.f32 %v555_v40, %v1135_v46 }
 0x151   :  { %v444_v14 = vsel %vm1208_vm6, %v441_v54, %v438_v53  ;;  %v1223_v15 = vpop.eup %792  ;;  %v469_v34 = vand.u32 2147483647, %v1137_v47  ;;  %v371_v9 = vsub.f32 0.0, %v355_v3  ;;  %v483_v36 = vmul.f32 0.6931472, %v789_v52 }
 0x152   :  { %v795_v57 = vpop.eup %794  ;;  %v556_v43 = vadd.f32 %v444_v14, %v332_v2  ;;  %v465_v24 = vmul.f32 0.6931472, %v791_v5  ;;  %796 = vpow2.f32 %v399_v12  ;;  %v1236_v29 = vadd.f32 %v1028_v4, %v292_v19  ;;  %v607_v19 = vld [vmem:[%s1434_s2 + $0x28] sm:$0xff] }
 0x153   :  { %v472_v1 = vadd.f32 1.0, %v795_v57  ;;  %v475_v42 = vmul.f32 -0.5, %v795_v57  ;;  %v401_v44 = vmul.f32 1.442695, %v373_v17  ;;  %v375_v38 = vsub.f32 0.0, %v359_v18  ;;  %v286_v18 = vpop.xlane.xlu1 %285 }
 0x154   :  { %v558_v46 = vadd.f32 %v462_v21, %v334_v33  ;;  %v468_v13 = vmul.f32 %v1137_v47, %v467_v26  ;;  %v589_v48 = vsub.f32 %v556_v43, %v573_v8  ;;  %v490_v49 = vadd.f32 1.0, %v1223_v15 }
 0x155   :  { %798 = vlog2.f32 %v472_v1  ;;  %v486_v50 = vmul.f32 %v1129_v41, %v485_v22  ;;  %v620_v53 = vmul.f32 %v604_v23, %v588_v27  ;;  %vm1243_vm8 = vcmp.lt.f32.partialorder %v469_v34, 0.0004427343 }
 0x156   :  { %v397_v60 = vmul.f32 1.442695, %v371_v9  ;;  %v636_v20 = vsel %vm634_vm7, %v619_v25, 0.0  ;;  %vm1251_vm9 = vcmp.lt.f32.partialorder %v487_v45, 0.0004427343  ;;  %v471_v47 = vsel %vm1243_vm8, %v468_v13, %v465_v24 }
 0x157   :  { %v360_v41 = vand.u32 2147483647, %v1236_v29  ;;  %v489_v61 = vsel %vm1251_vm9, %v486_v50, %v483_v36  ;;  %v476_v63 = vadd.f32 1.0, %v475_v42  ;;  %800 = vpow2.f32 %v401_v44  ;;  %v608_v36 = vld [vmem:[%s1434_s2 + $0x30] sm:$0xff] }
 0x158   :  { %v405_v0 = vmul.f32 1.442695, %v375_v38  ;;  %v1260_v52 = vpop.eup %796  ;;  %v621_v51 = vmul.f32 %v605_v55, %v589_v48  ;;  %802 = vlog2.f32 %v490_v49  ;;  %v478_v40 = vand.u32 2147483647, %v795_v57 }
 0x159   :  { %v376_v2 = vsub.f32 0.0, %v360_v41  ;;  %v635_v3 = vsel %vm634_vm7, %v618_v7, 0.0  ;;  %v638_v5 = vsel %vm634_vm7, %v620_v53, 0.0  ;;  %v559_v8 = vadd.f32 %v471_v47, %v335_v58  ;;  %v322_v7 = vld [vmem:[%s1433_s1 + $0x48] sm:$0xff] }
 0x15a   :  { %804 = vpow2.f32 %v397_v60  ;;  %v591_v12 = vsub.f32 %v558_v46, %v1089_v6  ;;  %v637_v21 = vadd.f32 %v636_v20, %v635_v3  ;;  %v561_v25 = vadd.f32 %v489_v61, %v337_v30  ;;  %v610_v46 = vld [vmem:[%s1434_s2 + $0x40] sm:$0xff]  ;;  %v609_v3 = vld [vmem:[%s1434_s2 + $0x38] sm:$0xff] }
 0x15b   :  { %v799_v14 = vpop.eup %798  ;;  %v407_v17 = vmul.f32 1.442695, %v376_v2  ;;  %v493_v32 = vmul.f32 -0.5, %v1223_v15  ;;  %v477_v58 = vmul.f32 %v795_v57, %v476_v63  ;;  %806 = vpow2.f32 %v405_v0 }
 0x15c   :  { %v474_v45 = vmul.f32 0.6931472, %v799_v14  ;;  %v639_v6 = vadd.f32 %v638_v5, %v637_v21  ;;  %v640_v22 = vsel %vm634_vm7, %v621_v51, 0.0  ;;  %v508_v26 = vadd.f32 1.0, %v1260_v52 }
 0x15d   :  { %vm1278_vm10 = vcmp.lt.f32.partialorder %v478_v40, 0.0004427343  ;;  %v1282_v27 = vpop.eup %800  ;;  %v592_v28 = vsub.f32 %v559_v8, %v1163_v16  ;;  %808 = vpow2.f32 %v407_v17  ;;  %v1288_v57 = vadd.f32 %v1028_v4, %v286_v18 }
 0x15e   :  { %v480_v30 = vsel %vm1278_vm10, %v477_v58, %v474_v45  ;;  %v803_v34 = vpop.eup %802  ;;  %v642_v1 = vsel %vm634_vm7, %v1184_v39, 0.0  ;;  %v623_v9 = vmul.f32 %v607_v19, %v591_v12  ;;  %v1296_v23 = vmul.f32 %v322_v7, %v1096_v11  ;;  %v320_v39 = vld [vmem:[%s1433_s1 + $0x38] sm:$0xff] }
 0x15f   :  { %v336_v16 = vmax.f32 %v1120_v35, 0.0  ;;  %v594_v42 = vsub.f32 %v561_v25, %v1127_v37  ;;  %v641_v44 = vadd.f32 %v640_v22, %v639_v6  ;;  %v494_v4 = vadd.f32 1.0, %v493_v32 }
 0x160   :  { %v805_v24 = vpop.eup %804  ;;  %v496_v38 = vand.u32 2147483647, %v1223_v15  ;;  %810 = vlog2.f32 %v508_v26  ;;  %v517_v48 = vadd.f32 1.0, %v1282_v27  ;;  %v624_v37 = vmul.f32 %v608_v36, %v592_v28 }
 0x161   :  { %v560_v13 = vadd.f32 %v480_v30, %v336_v16  ;;  %v499_v49 = vadd.f32 1.0, %v805_v24  ;;  %v1308_v50 = vpop.eup %806  ;;  %v511_v53 = vmul.f32 -0.5, %v1260_v52  ;;  %v502_v54 = vmul.f32 -0.5, %v805_v24 }
 0x162   :  { %v358_v55 = vand.u32 2147483647, %v1288_v57  ;;  %v644_v60 = vsel %vm634_vm7, %v623_v9, 0.0  ;;  %v492_v20 = vmul.f32 0.6931472, %v803_v34  ;;  %v577_v33 = vmul.f32 %v320_v39, %v1120_v35  ;;  %v324_v9 = vld [vmem:[%s1433_s1 + $0x58] sm:$0xff] }
 0x163   :  { %812 = vlog2.f32 %v499_v49  ;;  %v1314_v47 = vpop.eup %808  ;;  %v626_v41 = vmul.f32 %v610_v46, %v594_v42  ;;  %v643_v61 = vadd.f32 %v642_v1, %v641_v44  ;;  %v495_v63 = vmul.f32 %v1223_v15, %v494_v4  ;;  %v323_v15 = vld [vmem:[%s1433_s1 + $0x50] sm:$0xff] }
 0x164   :  { %vm1317_vm11 = vcmp.lt.f32.partialorder %v496_v38, 0.0004427343  ;;  %v593_v51 = vsub.f32 %v560_v13, %v577_v33  ;;  %814 = vlog2.f32 %v517_v48  ;;  %v535_v40 = vadd.f32 1.0, %v1308_v50 }
 0x165   :  { %v339_v2 = vmax.f32 %v1193_v56, 0.0  ;;  %v646_v14 = vsel %vm634_vm7, %v624_v37, 0.0  ;;  %v512_v35 = vadd.f32 1.0, %v511_v53  ;;  %v503_v5 = vadd.f32 1.0, %v502_v54 }
 0x166   :  { %v374_v8 = vsub.f32 0.0, %v358_v55  ;;  %v811_v12 = vpop.eup %810  ;;  %v498_v21 = vsel %vm1317_vm11, %v495_v63, %v492_v20  ;;  %v520_v45 = vmul.f32 -0.5, %v1282_v27  ;;  %v505_v17 = vand.u32 2147483647, %v805_v24  ;;  %v611_v55 = vld [vmem:[%s1434_s2 + $0x48] sm:$0xff] }
 0x167   :  { %v544_v18 = vadd.f32 1.0, %v1314_v47  ;;  %v645_v19 = vadd.f32 %v644_v60, %v643_v61  ;;  %v514_v32 = vand.u32 2147483647, %v1260_v52  ;;  %v625_v58 = vmul.f32 %v609_v3, %v593_v51  ;;  %v325_v51 = vld [vmem:[%s1433_s1 + $0x60] sm:$0xff] }
 0x168   :  { %v403_v25 = vmul.f32 1.442695, %v374_v8  ;;  %816 = vlog2.f32 %v535_v40  ;;  %v580_v6 = vmul.f32 %v323_v15, %v1193_v56  ;;  %v850_v22 = vmov 0.0  }
 0x169   :  { %v813_v7 = vpop.eup %812  ;;  %34 = vst.msk [vmem:[#allocation3] sm:$0x1] %vm33_vm12, %v850_v22  ;;  %v510_v26 = vmul.f32 0.6931472, %v811_v12  ;;  %v504_v28 = vmul.f32 %v805_v24, %v503_v5  ;;  %v562_v34 = vadd.f32 %v498_v21, %v338_v10  ;;  %v513_v1 = vmul.f32 %v1260_v52, %v512_v35 }
 0x16a   :  { %v501_v43 = vmul.f32 0.6931472, %v813_v7  ;;  %818 = vpow2.f32 %v403_v25  ;;  %v815_v30 = vpop.eup %814  ;;  %vm506_vm13 = vcmp.lt.f32.partialorder %v505_v17, 0.0004427343  ;;  %v647_v56 = vadd.f32 %v646_v14, %v645_v19  ;;  %v613_v19 = vld [vmem:[%s1434_s2 + $0x58] sm:$0xff] }
 0x16b   :  { %820 = vlog2.f32 %v544_v18  ;;  %v521_v36 = vadd.f32 1.0, %v520_v45  ;;  %v538_v16 = vmul.f32 -0.5, %v1308_v50  ;;  %vm1344_vm14 = vcmp.lt.f32.partialorder %v514_v32, 0.0004427343 }
 0x16c   :  { %v507_v42 = vsel %vm506_vm13, %v504_v28, %v501_v43  ;;  %v648_v11 = vsel %vm634_vm7, %v625_v58, 0.0  ;;  %v523_v10 = vand.u32 2147483647, %v1282_v27  ;;  %v340_v44 = vmax.f32 %v1153_v62, 0.0 }
 0x16d   :  { %v563_v52 = vadd.f32 %v507_v42, %v339_v2  ;;  %v516_v4 = vsel %vm1344_vm14, %v513_v1, %v510_v26  ;;  %v519_v38 = vmul.f32 0.6931472, %v815_v30  ;;  %v547_v39 = vmul.f32 -0.5, %v1314_v47  ;;  %v327_v26 = vld [vmem:[%s1433_s1 + $0x70] sm:$0xff] }
 0x16e   :  { %v817_v46 = vpop.eup %816  ;;  %v595_v13 = vsub.f32 %v562_v34, %v1296_v23  ;;  %v581_v48 = vmul.f32 %v324_v9, %v1153_v62  ;;  %v341_v49 = vmax.f32 %v1181_v31, 0.0  ;;  %v650_v54 = vsel %vm634_vm7, %v626_v41, 0.0  ;;  %v612_v23 = vld [vmem:[%s1434_s2 + $0x50] sm:$0xff]  ;;  %v328_v9 = vld [vmem:[%s1433_s1 + $0x78] sm:$0xff] }
 0x16f   :  { %v596_v37 = vsub.f32 %v563_v52, %v580_v6  ;;  %v649_v60 = vadd.f32 %v648_v11, %v647_v56  ;;  %v522_v20 = vmul.f32 %v1282_v27, %v521_v36  ;;  %v539_v33 = vadd.f32 1.0, %v538_v16  ;;  %v326_v36 = vld [vmem:[%s1433_s1 + $0x68] sm:$0xff]  ;;  %v614_v16 = vld [vmem:[%s1434_s2 + $0x60] sm:$0xff] }
 0x170   :  { %v819_v53 = vpop.eup %818  ;;  %v564_v62 = vadd.f32 %v516_v4, %v340_v44  ;;  %vm1365_vm15 = vcmp.lt.f32.partialorder %v523_v10, 0.0004427343  ;;  %v541_v41 = vand.u32 2147483647, %v1308_v50  ;;  %v537_v40 = vmul.f32 0.6931472, %v817_v46 }
 0x171   :  { %v821_v61 = vpop.eup %820  ;;  %v526_v0 = vadd.f32 1.0, %v819_v53  ;;  %v525_v27 = vsel %vm1365_vm15, %v522_v20, %v519_v38  ;;  %v548_v2 = vadd.f32 1.0, %v547_v39  ;;  %v529_v14 = vmul.f32 -0.5, %v819_v53 }
 0x172   :  { %v627_v35 = vmul.f32 %v611_v55, %v595_v13  ;;  %v628_v3 = vmul.f32 %v612_v23, %v596_v37  ;;  %v550_v15 = vand.u32 2147483647, %v1314_v47  ;;  %v651_v5 = vadd.f32 %v650_v54, %v649_v60  ;;  %v616_v37 = vld [vmem:[%s1434_s2 + $0x70] sm:$0xff] }
 0x173   :  { %822 = vlog2.f32 %v526_v0  ;;  %v540_v8 = vmul.f32 %v1308_v50, %v539_v33  ;;  %v546_v12 = vmul.f32 0.6931472, %v821_v61  ;;  %v597_v21 = vsub.f32 %v564_v62, %v581_v48 }
 0x174   :  { %v565_v45 = vadd.f32 %v525_v27, %v341_v49  ;;  %v582_v17 = vmul.f32 %v325_v51, %v1181_v31  ;;  %vm1378_vm0 = vcmp.lt.f32.partialorder %v541_v41, 0.0004427343  ;;  %v343_v25 = vmax.f32 %v1203_v59, 0.0 }
 0x175   :  { %v543_v7 = vsel %vm1378_vm0, %v540_v8, %v537_v40  ;;  %v549_v50 = vmul.f32 %v1314_v47, %v548_v2  ;;  %v530_v32 = vadd.f32 1.0, %v529_v14  ;;  %v652_v58 = vsel %vm634_vm7, %v627_v35, 0.0 }
 0x176   :  { %v654_v31 = vsel %vm634_vm7, %v628_v3, 0.0  ;;  %vm1391_vm1 = vcmp.lt.f32.partialorder %v550_v15, 0.0004427343  ;;  %v532_v22 = vand.u32 2147483647, %v819_v53  ;;  %v653_v43 = vadd.f32 %v652_v58, %v651_v5 }
 0x177   :  { %v552_v28 = vsel %vm1391_vm1, %v549_v50, %v546_v12  ;;  %v629_v47 = vmul.f32 %v613_v19, %v597_v21  ;;  %v598_v34 = vsub.f32 %v565_v45, %v582_v17  ;;  %v567_v1 = vadd.f32 %v543_v7, %v343_v25  ;;  %v569_v3 = vld [vmem:[#allocation3] sm:$0x1] }
 0x178   :  { %v344_v56 = vmax.f32 %v1236_v29, 0.0  ;;  %v655_v42 = vadd.f32 %v654_v31, %v653_v43  ;;  %v531_v11 = vmul.f32 %v819_v53, %v530_v32  ;;  %v584_v10 = vmul.f32 %v327_v26, %v1203_v59  ;;  %v615_v59 = vld [vmem:[%s1434_s2 + $0x68] sm:$0xff] }
 0x179   :  { %v823_v30 = vpop.eup %822  ;;  %v342_v44 = vmax.f32 %v1288_v57, 0.0  ;;  %vm533_vm2 = vcmp.lt.f32.partialorder %v532_v22, 0.0004427343  ;;  %v585_v4 = vmul.f32 %v328_v9, %v1236_v29  ;;  %v583_v39 = vmul.f32 %v326_v36, %v1288_v57  ;;  %v617_v29 = vld [vmem:[%s1434_s2 + $0x78] sm:$0xff]  ;;  %s851_s2 = smov [#allocation3]  }
 0x17a   :  { %v528_v24 = vmul.f32 0.6931472, %v823_v30  ;;  %v568_v52 = vadd.f32 %v552_v28, %v344_v56  ;;  %v656_v46 = vsel %vm634_vm7, %v629_v47, 0.0  ;;  %v630_v13 = vmul.f32 %v614_v16, %v598_v34  ;;  %s680_s10 = sshll.u32 %s851_s2, 4  ;;  %s681_s10 = int_to_ptr.vmem [resolvable:$true] %s680_s10 }
 0x17b   :  { %v600_v48 = vsub.f32 %v567_v1, %v584_v10  ;;  %v657_v53 = vadd.f32 %v656_v46, %v655_v42 }
 0x17c   :  { %v534_v38 = vsel %vm533_vm2, %v531_v11, %v528_v24  ;;  %v601_v54 = vsub.f32 %v568_v52, %v585_v4  ;;  %v658_v57 = vsel %vm634_vm7, %v630_v13, 0.0 }
 0x17d   :  { %v566_v49 = vadd.f32 %v534_v38, %v342_v44  ;;  %v632_v60 = vmul.f32 %v616_v37, %v600_v48  ;;  %v659_v33 = vadd.f32 %v658_v57, %v657_v53 }
 0x17e   :  { %v633_v23 = vmul.f32 %v617_v29, %v601_v54 }
 0x17f   :  { %v599_v55 = vsub.f32 %v566_v49, %v583_v39  ;;  %v662_v63 = vsel %vm634_vm7, %v632_v60, 0.0 }
 0x180   :  { %v664_v0 = vsel %vm634_vm7, %v633_v23, 0.0 }
 0x181   :  { %v631_v20 = vmul.f32 %v615_v59, %v599_v55 }
 0x183   :  { %v660_v61 = vsel %vm634_vm7, %v631_v20, 0.0 }
 0x184   :  { %v661_v62 = vadd.f32 %v660_v61, %v659_v33 }
 0x186   :  { %v663_v41 = vadd.f32 %v662_v63, %v661_v62 }
 0x188   :  { %v665_v51 = vadd.f32 %v664_v0, %v663_v41 }
 0x18a   :  { %v666_v27 = vrot.slane %v665_v51, 4 }
 0x18c   :  { %v667_v40 = vadd.f32 %v666_v27, %v665_v51 }
 0x18e   :  { %v668_v2 = vrot.slane %v667_v40, 2 }
 0x190   :  { %v669_v14 = vadd.f32 %v668_v2, %v667_v40 }
 0x192   :  { %v670_v35 = vrot.slane %v669_v14, 1 }
 0x194   :  { %v671_v15 = vadd.f32 %v670_v35, %v669_v14 }
 0x196   :  { %v672_v5 = vadd.f32 %v671_v15, %v569_v3 }
 0x198   :  { %674 = vst.msk [vmem:[#allocation3] sm:$0x1] %vm33_vm12, %v672_v5 }
 0x199   :  { %685 = dma.vmem_to_hbm [thread:$0]  %s681_s10, 16, %s683_s12, [#allocation4]  }
 0x19a   :  { %848 = dma.done.wait [#allocation4], 16  }
 0x19b   :  { %849 = vsyncadd [#allocation4], 4294967280 }
 0x19c   :  { %690 = vsyncpa [#allocation4], 1 }

</bundles_post_ra>
